<compile_context>
chip_gen: v7x
topology: tpu7x:2x2x1
jax: 0.10.0
libtpu: 0.0.40
codegen_flags: <defaults>
</compile_context>

<pallas_src>
import functools

import jax
import jax.numpy as jnp
from jax.experimental import pallas as pl
from jax.experimental.pallas import tpu as pltpu


TILE_N = 128   # output tile on both axes: multiple of 128 -> lane-dense stores, MXU friendly


def _round_up(a, b):
    return (a + b - 1) // b * b


def _pick_tile_m(m):
    for cand in (512, 256, 128):
        if m % cand == 0:
            return cand
    raise ValueError("num_features must be a multiple of 128")


# ----------------------- stage 1: RFF embedding (y side) ----------------------- #

def _rff_embed_kernel(p_ref, w_ref, f_ref):
    """One (i, k) step: f[:, i-tile, k-slice] = [cos(pW), sin(pW)] in bf16."""
    ph = jnp.dot(p_ref[...], w_ref[...], preferred_element_type=jnp.float32)  # [tn, tm]
    f_ref[0, :, :] = jnp.cos(ph).astype(f_ref.dtype)
    f_ref[1, :, :] = jnp.sin(ph).astype(f_ref.dtype)


def _rff_embed(p_pad, w, tile_m):
    """[cos(pW); sin(pW)] as bf16, shape (2, N_pad, M). Computed once, streamed by the gram kernel."""
    n_p, d = p_pad.shape
    _, m = w.shape
    gi, gk = n_p // TILE_N, m // tile_m

    cost = pl.CostEstimate(
        flops=gi * gk * 2 * TILE_N * d * tile_m,
        transcendentals=gi * gk * 2 * TILE_N * tile_m,
        bytes_accessed=gi * gk * (4 * TILE_N * d + 4 * d * tile_m + 2 * 2 * TILE_N * tile_m),
    )

    return pl.pallas_call(
        _rff_embed_kernel,
        out_shape=jax.ShapeDtypeStruct((2, n_p, m), jnp.bfloat16),
        grid_spec=pltpu.PrefetchScalarGridSpec(
            num_scalar_prefetch=0,
            grid=(gi, gk),
            in_specs=[
                pl.BlockSpec((TILE_N, d), lambda i, k: (i, 0)),
                pl.BlockSpec((d, tile_m), lambda i, k: (0, k)),
            ],
            out_specs=pl.BlockSpec((2, TILE_N, tile_m), lambda i, k: (0, i, k)),
        ),
        compiler_params=pltpu.CompilerParams(
            dimension_semantics=("parallel", "parallel"),
            vmem_limit_bytes=32 * 1024 * 1024,
        ),
        cost_estimate=cost,
    )(p_pad, w)


# ------------------ stage 2: gram kernel with cached x embedding ------------------ #

def _rff_gram_kernel(scale2_ref, x_ref, w_ref, yf_ref, out_ref, xr_cache, xi_cache, *, tile_m):
    """One (i, j, k) grid step of K = scale2 * (Re Re^T + Im Im^T).

    x_ref:    [TILE_N, D]           x rows of tile i (raw points)
    w_ref:    [D, tile_m]           frequency slice k
    yf_ref:   [2, TILE_N, tile_m]   precomputed bf16 cos/sin of y tile j, slice k
    out_ref:  [TILE_N, TILE_N]      f32 output tile (i, j); VMEM-resident across k (accumulator)
    xr/xi_cache: [TILE_N, M] bf16   cos/sin of x tile i over ALL k slices; filled only at j == 0
    """
    j = pl.program_id(1)
    k = pl.program_id(2)
    off = pl.multiple_of(k * tile_m, tile_m)

    # Fill the x-embedding cache once per x row tile (first y tile only).
    @pl.when(j == 0)
    def _():
        px = jnp.dot(x_ref[...], w_ref[...], preferred_element_type=jnp.float32)  # [tn, tm]
        xr_cache[:, pl.ds(off, tile_m)] = jnp.cos(px).astype(xr_cache.dtype)
        xi_cache[:, pl.ds(off, tile_m)] = jnp.sin(px).astype(xi_cache.dtype)

    @pl.when(k == 0)
    def _():
        out_ref[...] = jnp.zeros_like(out_ref)

    xr = xr_cache[:, pl.ds(off, tile_m)]          # bf16
    xi = xi_cache[:, pl.ds(off, tile_m)]          # bf16
    yr = yf_ref[0, :, :]                          # bf16
    yi = yf_ref[1, :, :]                          # bf16

    # X Y^T contraction over the feature slice; bf16 operands, f32 accumulation on the MXU.
    dn = (((1,), (1,)), ((), ()))
    out_ref[...] += (
        jax.lax.dot_general(xr, yr, dn, preferred_element_type=jnp.float32)
        + jax.lax.dot_general(xi, yi, dn, preferred_element_type=jnp.float32)
    )

    @pl.when(k == pl.num_programs(2) - 1)
    def _():
        out_ref[...] *= scale2_ref[0]


def rff_gram(x, y, w, scale2):
    """K = scale2 * (cos(xW) cos(yW)^T + sin(xW) sin(yW)^T)."""
    nx, d = x.shape
    ny, dy = y.shape
    dw, m = w.shape
    assert d == dy == dw
    assert m % 128 == 0, "num_features must be a multiple of 128"
    tile_m = _pick_tile_m(m)

    nx_p = _round_up(nx, TILE_N)
    ny_p = _round_up(ny, TILE_N)
    x_p = jnp.pad(x.astype(jnp.float32), ((0, nx_p - nx), (0, 0)))
    y_p = jnp.pad(y.astype(jnp.float32), ((0, ny_p - ny), (0, 0)))
    w_f = w.astype(jnp.float32)
    scale2_arr = jnp.reshape(jnp.asarray(scale2, jnp.float32), (1,))

    # y embedding computed once (EUP-bound), streamed as bf16 into the gram kernel.
    yf = _rff_embed(y_p, w_f, tile_m)

    gi, gj, gk = nx_p // TILE_N, ny_p // TILE_N, m // tile_m

    # bf16 x-embedding cache sized against v7x's 64 MiB VMEM.
    cache_bytes = 2 * TILE_N * m * 2
    assert cache_bytes <= 24 * 1024 * 1024, "x-embedding cache too large for VMEM (reduce num_features)"
    vmem_limit = min(48 * 1024 * 1024, max(32 * 1024 * 1024, cache_bytes + 16 * 1024 * 1024))

    cost = pl.CostEstimate(
        flops=(gi * gk * 2 * TILE_N * d * tile_m                    # x phase matmul (j == 0 only)
               + gi * gj * gk * 4 * TILE_N * TILE_N * tile_m),      # gram contraction
        transcendentals=gi * gk * 2 * TILE_N * tile_m,              # x cos/sin (j == 0 only)
        bytes_accessed=(gi * gj * gk * (4 * TILE_N * d + 4 * d * tile_m + 2 * 2 * TILE_N * tile_m)
                        + gi * gj * 4 * TILE_N * TILE_N),
    )

    out = pl.pallas_call(
        functools.partial(_rff_gram_kernel, tile_m=tile_m),
        out_shape=jax.ShapeDtypeStruct((nx_p, ny_p), jnp.float32),
        grid_spec=pltpu.PrefetchScalarGridSpec(
            num_scalar_prefetch=0,
            grid=(gi, gj, gk),
            in_specs=[
                pl.BlockSpec(memory_space=pltpu.MemorySpace.SMEM),       # scale^2 scalar
                pl.BlockSpec((TILE_N, d), lambda i, j, k: (i, 0)),       # x tile (raw points)
                pl.BlockSpec((d, tile_m), lambda i, j, k: (0, k)),       # W feature slice
                pl.BlockSpec((2, TILE_N, tile_m), lambda i, j, k: (0, j, k)),  # precomputed y features
            ],
            out_specs=pl.BlockSpec((TILE_N, TILE_N), lambda i, j, k: (i, j)),
            scratch_shapes=[
                pltpu.VMEM((TILE_N, m), jnp.bfloat16),   # cos(xW) cache, current x tile
                pltpu.VMEM((TILE_N, m), jnp.bfloat16),   # sin(xW) cache, current x tile
            ],
        ),
        compiler_params=pltpu.CompilerParams(
            # j must stay "arbitrary": the x-cache is filled at j == 0; k is the reduction axis.
            dimension_semantics=("parallel", "arbitrary", "arbitrary"),
            vmem_limit_bytes=vmem_limit,
        ),
        cost_estimate=cost,
    )(scale2_arr, x_p, w_f, yf)

    return out[:nx, :ny]


_rff_gram_jit = jax.jit(rff_gram)


# -------------------- RandomFourierFeatureKernel module -------------------- #

class RandomFourierFeatureKernel:
    """Synthetic Euclidean-like manifold: to_group = identity,
    lb_eigenspaces(x) = exp(i * x @ W) with W sampled from the spectral measure."""

    def __init__(self, dim, num_features, variance=1.5, lengthscale=0.7, seed=0):
        self.dim = dim
        self.num_features = num_features
        self.variance = jnp.asarray(variance, jnp.float32)
        # "generate_lb_eigenspaces(measure)": sample frequencies deterministically.
        key = jax.random.PRNGKey(seed)
        self.W = (jax.random.normal(key, (dim, num_features), dtype=jnp.float32)
                  / lengthscale)
        # normalizer = forward(id, id, normalize=False)[0, 0] with id = zeros point.
        # exp(i * 0 @ W) = 1 for every feature, so the bootstrap value is exactly num_features.
        self.normalizer = jnp.asarray(float(num_features), jnp.float32)

    def forward(self, x, y=None, normalize=True):
        if y is None:
            y = x
        if normalize:
            # (sqrt(|variance|) / sqrt(normalizer))^2, applied once to each gram output tile.
            scale2 = jnp.abs(self.variance) / self.normalizer
        else:
            scale2 = jnp.asarray(1.0, jnp.float32)
        return _rff_gram_jit(x, y, self.W, scale2)


# ---------------------------------- main ----------------------------------- #

if __name__ == "__main__":
    DIM = 4          # manifold/group dimension
    M = 256          # number of random Fourier features (complex)
    NX, NY = 8, 8    # number of input points

    kern = RandomFourierFeatureKernel(DIM, M, variance=1.5, lengthscale=0.7, seed=0)

    key = jax.random.PRNGKey(0)
    kx, ky = jax.random.split(key)
    x = jax.random.normal(kx, (NX, DIM), dtype=jnp.float32)
    y = jax.random.normal(ky, (NY, DIM), dtype=jnp.float32)

    K = jax.block_until_ready(kern.forward(x, y))

    # Pure-JAX reference of the same math (f32 throughout).
    def ref_forward(x, y, W, variance, normalizer):
        s = jnp.sqrt(jnp.abs(variance)) / jnp.sqrt(normalizer)
        px, py = x @ W, y @ W
        xf = jnp.concatenate([s * jnp.cos(px), s * jnp.sin(px)], axis=-1)
        yf = jnp.concatenate([s * jnp.cos(py), s * jnp.sin(py)], axis=-1)
        return xf @ yf.T

    K_ref = ref_forward(x, y, kern.W, kern.variance, kern.normalizer)
    assert K.shape == (NX, NY)
    # bf16 gram operands (f32 accumulation) -> ~1e-3 relative error bound; documented, tolerated here.
    assert jnp.allclose(K, K_ref, atol=5e-3, rtol=5e-3), "mismatch vs reference"

    # sanity: normalized kernel at identical points ~= variance
    Kxx = jax.block_until_ready(kern.forward(x))
    assert jnp.allclose(jnp.diag(Kxx), kern.variance, atol=5e-3)

    # unnormalized path still supported (scale^2 == 1)
    Kun = jax.block_until_ready(kern.forward(x, y, normalize=False))
    assert jnp.allclose(Kun, K * kern.normalizer / jnp.abs(kern.variance),
                        atol=0.1, rtol=1e-2)

    print("KERNEL_OK")
</pallas_src>

<mosaic_0001>
module attributes {stable_mosaic.version = 11 : i64} {
  func.func @_rff_embed_kernel(%arg0: i32, %arg1: i32, %arg2: memref<128x4xf32, #tpu.memory_space<vmem>>, %arg3: memref<4x256xf32, #tpu.memory_space<vmem>>, %arg4: memref<2x128x256xbf16, #tpu.memory_space<vmem>>) attributes {dimension_semantics = [#tpu.dimension_semantics<parallel>, #tpu.dimension_semantics<parallel>], iteration_bounds = array<i64: 1, 1>, scalar_prefetch = 0 : i64, scratch_operands = 0 : i64, tpu.core_type = #tpu.core_type<tc>, window_params = [{transform_indices = @transform_0, window_bounds = array<i64: 128, 4>}, {transform_indices = @transform_1, window_bounds = array<i64: 4, 256>}, {transform_indices = @transform_2, window_bounds = array<i64: 2, 128, 256>}]} {
    %c0 = arith.constant 0 : index
    %c0_0 = arith.constant 0 : index
    %0 = vector.load %arg2[%c0, %c0_0] : memref<128x4xf32, #tpu.memory_space<vmem>>, vector<128x4xf32>
    %c0_1 = arith.constant 0 : index
    %c0_2 = arith.constant 0 : index
    %1 = vector.load %arg3[%c0_1, %c0_2] : memref<4x256xf32, #tpu.memory_space<vmem>>, vector<4x256xf32>
    %cst = arith.constant dense<0.000000e+00> : vector<128x256xf32>
    %2 = tpu.matmul %0, %1, %cst {dimension_numbers = #tpu.dot_dimension_numbers<[1], [0], [0], [1], [0, 0, 1, 1], [], []>} : vector<128x4xf32>, vector<4x256xf32>, vector<128x256xf32> -> vector<128x256xf32>
    %3 = math.cos %2 : vector<128x256xf32>
    %4 = arith.truncf %3 : vector<128x256xf32> to vector<128x256xbf16>
    %c0_3 = arith.constant 0 : index
    %c0_4 = arith.constant 0 : index
    %c0_5 = arith.constant 0 : index
    %5 = vector.load %arg4[%c0_3, %c0_4, %c0_5] : memref<2x128x256xbf16, #tpu.memory_space<vmem>>, vector<1x128x256xbf16>
    %6 = vector.shape_cast %5 : vector<1x128x256xbf16> to vector<128x256xbf16>
    %7 = vector.shape_cast %4 : vector<128x256xbf16> to vector<1x128x256xbf16>
    tpu.vector_store %arg4[%c0_3, %c0_4, %c0_5], %7 {strides = array<i32>} : memref<2x128x256xbf16, #tpu.memory_space<vmem>>, vector<1x128x256xbf16>,
    %8 = math.sin %2 : vector<128x256xf32>
    %9 = arith.truncf %8 : vector<128x256xf32> to vector<128x256xbf16>
    %c1 = arith.constant 1 : index
    %c0_6 = arith.constant 0 : index
    %c0_7 = arith.constant 0 : index
    %10 = vector.load %arg4[%c1, %c0_6, %c0_7] : memref<2x128x256xbf16, #tpu.memory_space<vmem>>, vector<1x128x256xbf16>
    %11 = vector.shape_cast %10 : vector<1x128x256xbf16> to vector<128x256xbf16>
    %12 = vector.shape_cast %9 : vector<128x256xbf16> to vector<1x128x256xbf16>
    tpu.vector_store %arg4[%c1, %c0_6, %c0_7], %12 {strides = array<i32>} : memref<2x128x256xbf16, #tpu.memory_space<vmem>>, vector<1x128x256xbf16>,
    return
  }
  func.func @transform_0(%arg0: i32, %arg1: i32) -> (i32, i32) {
    %c0_i32 = arith.constant 0 : i32
    %c0_i32_0 = arith.constant 0 : i32
    return %arg0, %c0_i32 : i32, i32
  }
  func.func @transform_1(%arg0: i32, %arg1: i32) -> (i32, i32) {
    %c0_i32 = arith.constant 0 : i32
    %c0_i32_0 = arith.constant 0 : i32
    return %c0_i32, %arg1 : i32, i32
  }
  func.func @transform_2(%arg0: i32, %arg1: i32) -> (i32, i32, i32) {
    %c0_i32 = arith.constant 0 : i32
    %c0_i32_0 = arith.constant 0 : i32
    return %c0_i32, %arg0, %arg1 : i32, i32, i32
  }
}

module attributes {stable_mosaic.version = 11 : i64} {
  func.func @_rff_gram_kernel(%arg0: i32, %arg1: i32, %arg2: i32, %arg3: memref<1xf32, #tpu.memory_space<smem>>, %arg4: memref<128x4xf32, #tpu.memory_space<vmem>>, %arg5: memref<4x256xf32, #tpu.memory_space<vmem>>, %arg6: memref<2x128x256xbf16, #tpu.memory_space<vmem>>, %arg7: memref<128x128xf32, #tpu.memory_space<vmem>>, %arg8: memref<128x256xbf16, #tpu.memory_space<vmem>>, %arg9: memref<128x256xbf16, #tpu.memory_space<vmem>>) attributes {dimension_semantics = [#tpu.dimension_semantics<parallel>, #tpu.dimension_semantics<arbitrary>, #tpu.dimension_semantics<arbitrary>], iteration_bounds = array<i64: 1, 1, 1>, scalar_prefetch = 0 : i64, scratch_operands = 2 : i64, tpu.core_type = #tpu.core_type<tc>, window_params = [{transform_indices = @transform_0, window_bounds = array<i64: 1>}, {transform_indices = @transform_1, window_bounds = array<i64: 128, 4>}, {transform_indices = @transform_2, window_bounds = array<i64: 4, 256>}, {transform_indices = @transform_3, window_bounds = array<i64: 2, 128, 256>}, {transform_indices = @transform_4, window_bounds = array<i64: 128, 128>}]} {
    %c256_i32 = arith.constant 256 : i32
    %0 = arith.muli %arg2, %c256_i32 : i32
    %1 = tpu.assume_multiple %0, 256 : i32
    %c0_i32 = arith.constant 0 : i32
    %2 = arith.cmpi eq, %arg1, %c0_i32 : i32
    %3 = arith.extui %2 : i1 to i32
    %c0_i32_0 = arith.constant 0 : i32
    %4 = arith.cmpi ne, %3, %c0_i32_0 : i32
    scf.if %4 {
      %c0_16 = arith.constant 0 : index
      %c0_17 = arith.constant 0 : index
      %25 = vector.load %arg4[%c0_16, %c0_17] : memref<128x4xf32, #tpu.memory_space<vmem>>, vector<128x4xf32>
      %c0_18 = arith.constant 0 : index
      %c0_19 = arith.constant 0 : index
      %26 = vector.load %arg5[%c0_18, %c0_19] : memref<4x256xf32, #tpu.memory_space<vmem>>, vector<4x256xf32>
      %cst_20 = arith.constant dense<0.000000e+00> : vector<128x256xf32>
      %27 = tpu.matmul %25, %26, %cst_20 {dimension_numbers = #tpu.dot_dimension_numbers<[1], [0], [0], [1], [0, 0, 1, 1], [], []>} : vector<128x4xf32>, vector<4x256xf32>, vector<128x256xf32> -> vector<128x256xf32>
      %28 = math.cos %27 : vector<128x256xf32>
      %29 = arith.truncf %28 : vector<128x256xf32> to vector<128x256xbf16>
      %c0_21 = arith.constant 0 : index
      %30 = arith.index_cast %1 : i32 to index
      %31 = vector.load %arg8[%c0_21, %30] : memref<128x256xbf16, #tpu.memory_space<vmem>>, vector<128x256xbf16>
      tpu.vector_store %arg8[%c0_21, %30], %29 {strides = array<i32>} : memref<128x256xbf16, #tpu.memory_space<vmem>>, vector<128x256xbf16>,
      %32 = math.sin %27 : vector<128x256xf32>
      %33 = arith.truncf %32 : vector<128x256xf32> to vector<128x256xbf16>
      %c0_22 = arith.constant 0 : index
      %34 = arith.index_cast %1 : i32 to index
      %35 = vector.load %arg9[%c0_22, %34] : memref<128x256xbf16, #tpu.memory_space<vmem>>, vector<128x256xbf16>
      tpu.vector_store %arg9[%c0_22, %34], %33 {strides = array<i32>} : memref<128x256xbf16, #tpu.memory_space<vmem>>, vector<128x256xbf16>,
    } else {
    }
    %c0_i32_1 = arith.constant 0 : i32
    %5 = arith.cmpi eq, %arg2, %c0_i32_1 : i32
    %6 = arith.extui %5 : i1 to i32
    %c0_i32_2 = arith.constant 0 : i32
    %7 = arith.cmpi ne, %6, %c0_i32_2 : i32
    scf.if %7 {
      %cst_16 = arith.constant 0.000000e+00 : f32
      %25 = vector.broadcast %cst_16 : f32 to vector<128x128xf32>
      %c0_17 = arith.constant 0 : index
      %c0_18 = arith.constant 0 : index
      %26 = vector.load %arg7[%c0_17, %c0_18] : memref<128x128xf32, #tpu.memory_space<vmem>>, vector<128x128xf32>
      tpu.vector_store %arg7[%c0_17, %c0_18], %25 {strides = array<i32>} : memref<128x128xf32, #tpu.memory_space<vmem>>, vector<128x128xf32>,
    } else {
    }
    %c0 = arith.constant 0 : index
    %8 = arith.index_cast %1 : i32 to index
    %9 = vector.load %arg8[%c0, %8] : memref<128x256xbf16, #tpu.memory_space<vmem>>, vector<128x256xbf16>
    %c0_3 = arith.constant 0 : index
    %10 = arith.index_cast %1 : i32 to index
    %11 = vector.load %arg9[%c0_3, %10] : memref<128x256xbf16, #tpu.memory_space<vmem>>, vector<128x256xbf16>
    %c0_4 = arith.constant 0 : index
    %c0_5 = arith.constant 0 : index
    %c0_6 = arith.constant 0 : index
    %12 = vector.load %arg6[%c0_4, %c0_5, %c0_6] : memref<2x128x256xbf16, #tpu.memory_space<vmem>>, vector<1x128x256xbf16>
    %13 = vector.shape_cast %12 : vector<1x128x256xbf16> to vector<128x256xbf16>
    %c1 = arith.constant 1 : index
    %c0_7 = arith.constant 0 : index
    %c0_8 = arith.constant 0 : index
    %14 = vector.load %arg6[%c1, %c0_7, %c0_8] : memref<2x128x256xbf16, #tpu.memory_space<vmem>>, vector<1x128x256xbf16>
    %15 = vector.shape_cast %14 : vector<1x128x256xbf16> to vector<128x256xbf16>
    %c0_9 = arith.constant 0 : index
    %c0_10 = arith.constant 0 : index
    %16 = vector.load %arg7[%c0_9, %c0_10] : memref<128x128xf32, #tpu.memory_space<vmem>>, vector<128x128xf32>
    %cst = arith.constant dense<0.000000e+00> : vector<128x128xf32>
    %17 = tpu.matmul %9, %13, %cst {dimension_numbers = #tpu.dot_dimension_numbers<[1], [1], [0], [0], [0, 0, 1, 0], [], []>} : vector<128x256xbf16>, vector<128x256xbf16>, vector<128x128xf32> -> vector<128x128xf32>
    %cst_11 = arith.constant dense<0.000000e+00> : vector<128x128xf32>
    %18 = tpu.matmul %11, %15, %cst_11 {dimension_numbers = #tpu.dot_dimension_numbers<[1], [1], [0], [0], [0, 0, 1, 0], [], []>} : vector<128x256xbf16>, vector<128x256xbf16>, vector<128x128xf32> -> vector<128x128xf32>
    %19 = arith.addf %17, %18 : vector<128x128xf32>
    %20 = arith.addf %16, %19 : vector<128x128xf32>
    %c0_12 = arith.constant 0 : index
    %c0_13 = arith.constant 0 : index
    %21 = vector.load %arg7[%c0_12, %c0_13] : memref<128x128xf32, #tpu.memory_space<vmem>>, vector<128x128xf32>
    tpu.vector_store %arg7[%c0_12, %c0_13], %20 {strides = array<i32>} : memref<128x128xf32, #tpu.memory_space<vmem>>, vector<128x128xf32>,
    %c0_i32_14 = arith.constant 0 : i32
    %22 = arith.cmpi eq, %arg2, %c0_i32_14 : i32
    %23 = arith.extui %22 : i1 to i32
    %c0_i32_15 = arith.constant 0 : i32
    %24 = arith.cmpi ne, %23, %c0_i32_15 : i32
    scf.if %24 {
      %c0_16 = arith.constant 0 : index
      %c0_17 = arith.constant 0 : index
      %25 = vector.load %arg7[%c0_16, %c0_17] : memref<128x128xf32, #tpu.memory_space<vmem>>, vector<128x128xf32>
      %c0_18 = arith.constant 0 : index
      %26 = memref.load %arg3[%c0_18] : memref<1xf32, #tpu.memory_space<smem>>
      %27 = vector.broadcast %26 : f32 to vector<128x128xf32>
      %28 = arith.mulf %25, %27 : vector<128x128xf32>
      %c0_19 = arith.constant 0 : index
      %c0_20 = arith.constant 0 : index
      %29 = vector.load %arg7[%c0_19, %c0_20] : memref<128x128xf32, #tpu.memory_space<vmem>>, vector<128x128xf32>
      tpu.vector_store %arg7[%c0_19, %c0_20], %28 {strides = array<i32>} : memref<128x128xf32, #tpu.memory_space<vmem>>, vector<128x128xf32>,
    } else {
    }
    return
  }
  func.func @transform_0(%arg0: i32, %arg1: i32, %arg2: i32) -> i32 {
    %c0_i32 = arith.constant 0 : i32
    %c0_i32_0 = arith.constant 0 : i32
    return %c0_i32 : i32
  }
  func.func @transform_1(%arg0: i32, %arg1: i32, %arg2: i32) -> (i32, i32) {
    %c0_i32 = arith.constant 0 : i32
    %c0_i32_0 = arith.constant 0 : i32
    return %arg0, %c0_i32 : i32, i32
  }
  func.func @transform_2(%arg0: i32, %arg1: i32, %arg2: i32) -> (i32, i32) {
    %c0_i32 = arith.constant 0 : i32
    %c0_i32_0 = arith.constant 0 : i32
    return %c0_i32, %arg2 : i32, i32
  }
  func.func @transform_3(%arg0: i32, %arg1: i32, %arg2: i32) -> (i32, i32, i32) {
    %c0_i32 = arith.constant 0 : i32
    %c0_i32_0 = arith.constant 0 : i32
    return %c0_i32, %arg1, %arg2 : i32, i32, i32
  }
  func.func @transform_4(%arg0: i32, %arg1: i32, %arg2: i32) -> (i32, i32) {
    %c0_i32 = arith.constant 0 : i32
    return %arg0, %arg1 : i32, i32
  }
}

</mosaic_0001>

<bundles_post_ra>
// kernel: rff_gram.2
= control target key start
LH: loop header
LB: loop body
LE: loop exit
PB: predicated region body
PF: predicated region fallthrough
CT: control target
= control target key end

     0   :  { %vm79_vm0 = vcmask 1043456   ;;  %v7718_v1 = vmov 0.0   ;;  %vm30_vm1 = vcmask 31744   ;;  %v7719_v51 = vmov 683565275   ;;  %s11182_s1 = inlined_call_operand.vmem [shape: f32[4,256], index: 1, kind: input, shape index: {}]   ;;  %s11183_s0 = inlined_call_operand.vmem [shape: f32[128,4], index: 0, kind: input, shape index: {}]   ;;  %s11184_s2 = inlined_call_operand.vmem [shape: bf16[2,128,256], index: 2, kind: output, shape index: {}]  }
   0x1   :  { %v27_v0 = vld [vmem:[%s11182_s1] sm:$0xff]  ;;  %148 = vmatprep.mubr.f32.mxu0 %v7718_v1  ;;  %196 = vmatprep.mubr.f32.mxu1 %v7718_v1  ;;  %v12_v5 = vld [vmem:[%s11183_s0 + $0x8] sm:$0xff]  ;;  %v13_v7 = vld [vmem:[%s11183_s0 + $0x10] sm:$0xff]  ;;  %v7720_v55 = vmov 2475754826  }
   0x2   :  { %v29_v2 = vcombine.high %v27_v0, %v27_v0  ;;  %v11_v3 = vld [vmem:[%s11183_s0] sm:$0xff]  ;;  %v20_v6 = vld [vmem:[%s11183_s0 + $0x48] sm:$0xff]  ;;  %v21_v8 = vld [vmem:[%s11183_s0 + $0x50] sm:$0xff]  ;;  %v7721_v57 = vmov 2131351028  }
   0x3   :  { %v19_v4 = vld [vmem:[%s11183_s0 + $0x40] sm:$0xff]  ;;  %v14_v9 = vld [vmem:[%s11183_s0 + $0x18] sm:$0xff]  ;;  %v16_v13 = vld [vmem:[%s11183_s0 + $0x28] sm:$0xff]  ;;  %v7722_v59 = vmov 2102212464  }
   0x4   :  { %7098 = vmatprep.subr.msk.mxu0 %vm79_vm0, %v29_v2  ;;  %7452 = vmatprep.subr.msk.mxu1 %vm79_vm0, %v29_v2  ;;  %v22_v10 = vld [vmem:[%s11183_s0 + $0x58] sm:$0xff]  ;;  %v15_v11 = vld [vmem:[%s11183_s0 + $0x20] sm:$0xff]  ;;  %v24_v14 = vld [vmem:[%s11183_s0 + $0x68] sm:$0xff]  ;;  %v7723_v61 = vmov 920167782  }
   0x5   :  { %7099 = vmatpush1.msk.msra.mxu0 %vm79_vm0, %v27_v0  ;;  %7453 = vmatpush1.msk.msra.mxu1 %vm79_vm0, %v27_v0  ;;  %v23_v12 = vld [vmem:[%s11183_s0 + $0x60] sm:$0xff]  ;;  %v17_v15 = vld [vmem:[%s11183_s0 + $0x30] sm:$0xff]  ;;  %v18_v17 = vld [vmem:[%s11183_s0 + $0x38] sm:$0xff] }
   0x6   :  { %7100 = vmatmul.mubr.msk.f32.vlgmr.msra.gmra.mrb[0].mxu0 %vm30_vm1, %v11_v3  ;;  %7108 = vmatmul.mubr.msk.f32.vlgmr.msra.gmra.mrb[0].mxu1 %vm30_vm1, %v19_v4  ;;  %v25_v16 = vld [vmem:[%s11183_s0 + $0x70] sm:$0xff]  ;;  %v26_v18 = vld [vmem:[%s11183_s0 + $0x78] sm:$0xff]  ;;  %v7724_v4 = vmov 1326507024  }
   0x7   :  { %154 = vmatprep.mubr.f32.mxu0 %v7718_v1  ;;  %202 = vmatprep.mubr.f32.mxu1 %v7718_v1 }
   0xa   :  { %7101 = vmatmul.mubr.msk.f32.gmra.mrb[2].mxu0 %vm30_vm1, %v12_v5  ;;  %7109 = vmatmul.mubr.msk.f32.gmra.mrb[2].mxu1 %vm30_vm1, %v20_v6 }
   0xb   :  { %160 = vmatprep.mubr.f32.mxu0 %v7718_v1  ;;  %208 = vmatprep.mubr.f32.mxu1 %v7718_v1 }
   0xe   :  { %7102 = vmatmul.mubr.msk.f32.gmra.mrb[4].mxu0 %vm30_vm1, %v13_v7  ;;  %7110 = vmatmul.mubr.msk.f32.gmra.mrb[4].mxu1 %vm30_vm1, %v21_v8 }
   0xf   :  { %166 = vmatprep.mubr.f32.mxu0 %v7718_v1  ;;  %214 = vmatprep.mubr.f32.mxu1 %v7718_v1 }
  0x12   :  { %7103 = vmatmul.mubr.msk.f32.gmra.mrb[6].mxu0 %vm30_vm1, %v14_v9  ;;  %7111 = vmatmul.mubr.msk.f32.gmra.mrb[6].mxu1 %vm30_vm1, %v22_v10 }
  0x13   :  { %172 = vmatprep.mubr.f32.mxu0 %v7718_v1  ;;  %220 = vmatprep.mubr.f32.mxu1 %v7718_v1 }
  0x16   :  { %7104 = vmatmul.mubr.msk.f32.gmra.mrb[8].mxu0 %vm30_vm1, %v15_v11  ;;  %7112 = vmatmul.mubr.msk.f32.gmra.mrb[8].mxu1 %vm30_vm1, %v23_v12 }
  0x17   :  { %178 = vmatprep.mubr.f32.mxu0 %v7718_v1  ;;  %226 = vmatprep.mubr.f32.mxu1 %v7718_v1 }
  0x1a   :  { %7105 = vmatmul.mubr.msk.f32.gmra.mrb[10].mxu0 %vm30_vm1, %v16_v13  ;;  %7113 = vmatmul.mubr.msk.f32.gmra.mrb[10].mxu1 %vm30_vm1, %v24_v14 }
  0x1b   :  { %184 = vmatprep.mubr.f32.mxu0 %v7718_v1  ;;  %232 = vmatprep.mubr.f32.mxu1 %v7718_v1 }
  0x1e   :  { %7106 = vmatmul.mubr.msk.f32.gmra.mrb[12].mxu0 %vm30_vm1, %v17_v15  ;;  %7114 = vmatmul.mubr.msk.f32.gmra.mrb[12].mxu1 %vm30_vm1, %v25_v16 }
  0x1f   :  { %190 = vmatprep.mubr.f32.mxu0 %v7718_v1  ;;  %238 = vmatprep.mubr.f32.mxu1 %v7718_v1 }
  0x22   :  { %7107 = vmatmul.mubr.msk.f32.gmra.mrb[14].mxu0 %vm30_vm1, %v18_v17  ;;  %7115 = vmatmul.mubr.msk.f32.gmra.mrb[14].mxu1 %vm30_vm1, %v26_v18 }
  0xd9   :  { %v7807_v19 = vpop.f32.mrb[0].mxu0  ;;  %v7809_v20 = vpop.f32.mrb[0].mxu1 }
  0xda   :  { %v245_v21 = vand.u32 2147483647, %v7807_v19  ;;  %v248_v22 = vand.u32 2139095040, %v7807_v19  ;;  %v7813_v23 = vpop.f32.mrb[1].mxu0  ;;  %v7815_v24 = vpop.f32.mrb[1].mxu1  ;;  %v1896_v26 = vand.u32 2139095040, %v7809_v20 }
  0xdb   :  { %v1893_v25 = vand.u32 2147483647, %v7809_v20  ;;  %v351_v31 = vand.u32 2139095040, %v7813_v23 }
  0xdc   :  { %v249_v27 = vshrl.u32 %v248_v22, 23  ;;  %v252_v28 = vand.u32 8388607, %v245_v21  ;;  %v1897_v29 = vshrl.u32 %v1896_v26, 23 }
  0xdd   :  { %v1900_v30 = vand.u32 8388607, %v1893_v25  ;;  %v7824_v33 = vpop.f32.mrb[2].mxu0  ;;  %v7826_v34 = vpop.f32.mrb[2].mxu1  ;;  %v352_v36 = vshrl.u32 %v351_v31, 23 }
  0xde   :  { %v7116_v32 = vadd.s32 4294967169, %v249_v27  ;;  %v7180_v35 = vadd.s32 4294967169, %v1897_v29  ;;  %v7828_v37 = vpop.f32.mrb[3].mxu0  ;;  %v253_v39 = vor.u32 8388608, %v252_v28  ;;  %v7849_v10 = vpop.f32.mrb[3].mxu1 }
  0xdf   :  { %v1901_v40 = vor.u32 8388608, %v1900_v30  ;;  %v7120_v42 = vadd.s32 4294967169, %v352_v36 }
  0xe0   :  { %v255_v38 = vadd.s32 1, %v7116_v32  ;;  %v1903_v41 = vadd.s32 1, %v7180_v35  ;;  %v7830_v47 = vshll.u32 %v253_v39, 8 }
  0xe1   :  { %v7832_v48 = vshll.u32 %v1901_v40, 8  ;;  %v7834_v49 = vadd.s32 1, %v7120_v42 }
  0xe2   :  { %vm256_vm2 = vcmp.gt.s32.totalorder %v255_v38, 0  ;;  %vm1904_vm3 = vcmp.gt.s32.totalorder %v1903_v41, 0 }
  0xe3   :  { %v257_v43 = vsel %vm256_vm2, %v255_v38, 0  ;;  %v1905_v46 = vsel %vm1904_vm3, %v1903_v41, 0  ;;  %vm359_vm8 = vcmp.gt.s32.totalorder %v7834_v49, 0 }
  0xe4   :  { %v258_v44 = vshrl.u32 %v257_v43, 5  ;;  %v259_v45 = vand.u32 31, %v257_v43  ;;  %v7837_v53 = vshrl.u32 %v1905_v46, 5  ;;  %v1907_v54 = vand.u32 31, %v1905_v46 }
  0xe6   :  { %v260_v50 = vsub.s32 32, %v259_v45  ;;  %v262_v52 = vshll.u32 %v7719_v51, %v259_v45  ;;  %v265_v56 = vshll.u32 %v7720_v55, %v259_v45  ;;  %v268_v58 = vshll.u32 %v7721_v57, %v259_v45 }
  0xe7   :  { %v271_v60 = vshll.u32 %v7722_v59, %v259_v45  ;;  %v274_v62 = vshll.u32 %v7723_v61, %v259_v45  ;;  %vm277_vm4 = vcmp.lt.s32.totalorder %v258_v44, 1  ;;  %vm278_vm5 = vcmp.lt.s32.totalorder %v258_v44, 2 }
  0xe8   :  { %v263_v63 = vshrl.u32 %v7720_v55, %v260_v50  ;;  %v266_v0 = vshrl.u32 %v7721_v57, %v260_v50  ;;  %v269_v1 = vshrl.u32 %v7722_v59, %v260_v50  ;;  %v261_v2 = vshrl.u32 %v7719_v51, %v260_v50 }
  0xe9   :  { %v272_v3 = vshrl.u32 %v7723_v61, %v260_v50  ;;  %v275_v5 = vshrl.u32 %v7724_v4, %v260_v50  ;;  %v1908_v9 = vsub.s32 32, %v1907_v54  ;;  %vm279_vm6 = vcmp.lt.s32.totalorder %v258_v44, 3 }
  0xea   :  { %v264_v6 = vor.u32 %v263_v63, %v262_v52  ;;  %v267_v7 = vor.u32 %v266_v0, %v265_v56  ;;  %v270_v8 = vor.u32 %v269_v1, %v268_v58  ;;  %vm280_vm7 = vcmp.lt.s32.totalorder %v258_v44, 4 }
  0xeb   :  { %v273_v11 = vor.u32 %v272_v3, %v271_v60  ;;  %v276_v12 = vor.u32 %v275_v5, %v274_v62  ;;  %v1910_v26 = vshll.u32 %v7719_v51, %v1907_v54  ;;  %v1911_v29 = vshrl.u32 %v7720_v55, %v1908_v9 }
  0xec   :  { %v281_v13 = vsel %vm277_vm4, %v261_v2, %v264_v6  ;;  %v282_v14 = vsel %vm280_vm7, %v270_v8, 2102212464  ;;  %v285_v15 = vsel %vm277_vm4, %v264_v6, %v267_v7  ;;  %v289_v16 = vsel %vm277_vm4, %v267_v7, %v270_v8 }
  0xed   :  { %v283_v17 = vsel %vm279_vm6, %v267_v7, %v282_v14  ;;  %v286_v18 = vsel %vm280_vm7, %v273_v11, 920167782  ;;  %v290_v22 = vsel %vm280_vm7, %v276_v12, 1326507024  ;;  %v1913_v30 = vshll.u32 %v7720_v55, %v1907_v54 }
  0xee   :  { %v287_v27 = vsel %vm279_vm6, %v270_v8, %v286_v18  ;;  %v291_v28 = vsel %vm279_vm6, %v273_v11, %v290_v22  ;;  %v284_v31 = vsel %vm278_vm5, %v281_v13, %v283_v17  ;;  %v1914_v36 = vshrl.u32 %v7721_v57, %v1908_v9 }
  0xef   :  { %v288_v32 = vsel %vm278_vm5, %v285_v15, %v287_v27  ;;  %v292_v35 = vsel %vm278_vm5, %v289_v16, %v291_v28  ;;  %v1912_v42 = vor.u32 %v1911_v29, %v1910_v26  ;;  %v1916_v45 = vshll.u32 %v7721_v57, %v1907_v54 }
  0xf0   :  { %v7863_v38 = vmul.u32.u64.low %v7830_v47, %v292_v35  ;;  %v7864_v39 = vmul.u32.u64.high %v7830_v47, %v292_v35, %v7863_v38  ;;  %v7867_v40 = vmul.u32.u64.low %v7830_v47, %v288_v32  ;;  %v7868_v41 = vmul.u32.u64.high %v7830_v47, %v288_v32, %v7867_v40 }
  0xf1   :  { %v1915_v43 = vor.u32 %v1914_v36, %v1913_v30  ;;  %v1917_v46 = vshrl.u32 %v7722_v59, %v1908_v9  ;;  %v1909_v44 = vshrl.u32 %v7719_v51, %v1908_v9  ;;  %v1919_v50 = vshll.u32 %v7722_v59, %v1907_v54 }
  0xf2   :  { %v1920_v52 = vshrl.u32 %v7723_v61, %v1908_v9  ;;  %v1923_v56 = vshrl.u32 %v7724_v4, %v1908_v9  ;;  %v300_v58 = vmul.u32 %v7830_v47, %v284_v31  ;;  %v1922_v62 = vshll.u32 %v7723_v61, %v1907_v54 }
  0xf3   :  { %v1918_v60 = vor.u32 %v1917_v46, %v1916_v45  ;;  %vm1925_vm9 = vcmp.lt.s32.totalorder %v7837_v53, 1  ;;  %vm302_vm10 = vc.u32 %v7864_v39, %v7867_v40  ;;  %v303_v63 = vadd.s32 1, %v7868_v41 }
  0xf4   :  { %v1921_v0 = vor.u32 %v1920_v52, %v1919_v50  ;;  %vm1926_vm11 = vcmp.lt.s32.totalorder %v7837_v53, 2  ;;  %v1924_v1 = vor.u32 %v1923_v56, %v1922_v62  ;;  %vm1927_vm12 = vcmp.lt.s32.totalorder %v7837_v53, 3 }
  0xf5   :  { %vm1928_vm13 = vcmp.lt.s32.totalorder %v7837_v53, 4  ;;  %v1933_v2 = vsel %vm1925_vm9, %v1912_v42, %v1915_v43  ;;  %v304_v47 = vsel %vm302_vm10, %v303_v63, %v7868_v41  ;;  %v1937_v5 = vsel %vm1925_vm9, %v1915_v43, %v1918_v60 }
  0xf6   :  { %v1930_v3 = vsel %vm1928_vm13, %v1918_v60, 2102212464  ;;  %v1934_v54 = vsel %vm1928_vm13, %v1921_v0, 920167782  ;;  %v305_v6 = vadd.s32 %v304_v47, %v300_v58  ;;  %v1929_v7 = vsel %vm1925_vm9, %v1909_v44, %v1912_v42 }
  0xf7   :  { %v1935_v8 = vsel %vm1927_vm12, %v1918_v60, %v1934_v54  ;;  %v1938_v9 = vsel %vm1928_vm13, %v1924_v1, 1326507024  ;;  %v1931_v11 = vsel %vm1927_vm12, %v1915_v43, %v1930_v3  ;;  %v360_v14 = vsel %vm359_vm8, %v7834_v49, 0 }
  0xf8   :  { %v1936_v12 = vsel %vm1926_vm11, %v1933_v2, %v1935_v8  ;;  %v1939_v13 = vsel %vm1927_vm12, %v1921_v0, %v1938_v9  ;;  %v306_v15 = vadd.s32 536870912, %v305_v6  ;;  %v1932_v28 = vsel %vm1926_vm11, %v1929_v7, %v1931_v11 }
  0xf9   :  { %v1940_v16 = vsel %vm1926_vm11, %v1937_v5, %v1939_v13  ;;  %v7895_v17 = vmul.u32.u64.low %v7832_v48, %v1936_v12  ;;  %v7896_v18 = vmul.u32.u64.high %v7832_v48, %v1936_v12, %v7895_v17  ;;  %v348_v49 = vand.u32 2147483647, %v7813_v23 }
  0xfa   :  { %v7900_v22 = vmul.u32.u64.low %v7832_v48, %v1940_v16  ;;  %v7901_v26 = vmul.u32.u64.high %v7832_v48, %v1940_v16, %v7900_v22  ;;  %v7903_v27 = vshrl.u32 %v306_v15, 30  ;;  %v362_v29 = vand.u32 31, %v360_v14 }
  0xfb   :  { %v1951_v31 = vadd.s32 1, %v7896_v18  ;;  %v1948_v32 = vmul.u32 %v7832_v48, %v1932_v28  ;;  %v355_v38 = vand.u32 8388607, %v348_v49  ;;  %v1999_v43 = vand.u32 2139095040, %v7815_v24 }
  0xfc   :  { %v308_v30 = vshll.u32 %v7903_v27, 30  ;;  %vm1950_vm14 = vc.u32 %v7901_v26, %v7895_v17  ;;  %v363_v41 = vsub.s32 32, %v362_v29  ;;  %v7917_v50 = vshrl.u32 %v360_v14, 5 }
  0xfd   :  { %v1952_v36 = vsel %vm1950_vm14, %v1951_v31, %v7896_v18  ;;  %v356_v44 = vor.u32 8388608, %v355_v38  ;;  %v374_v62 = vshll.u32 %v7722_v59, %v362_v29  ;;  %v2000_v0 = vshrl.u32 %v1999_v43, 23 }
  0xfe   :  { %v309_v35 = vsub.s32 %v305_v6, %v308_v30  ;;  %v1953_v53 = vadd.s32 %v1952_v36, %v1948_v32  ;;  %v366_v52 = vshrl.u32 %v7720_v55, %v363_v41  ;;  %v369_v56 = vshrl.u32 %v7721_v57, %v363_v41 }
  0xff   :  { %v372_v58 = vshrl.u32 %v7722_v59, %v363_v41  ;;  %v375_v63 = vshrl.u32 %v7723_v61, %v363_v41  ;;  %v365_v2 = vshll.u32 %v7719_v51, %v362_v29  ;;  %v368_v47 = vshll.u32 %v7720_v55, %v362_v29 }
 0x100   :  { %v311_v42 = vsub.s32 0, %v309_v35  ;;  %v1954_v45 = vadd.s32 536870912, %v1953_v53  ;;  %v371_v3 = vshll.u32 %v7721_v57, %v362_v29  ;;  %v378_v6 = vshrl.u32 %v7724_v4, %v363_v41 }
 0x101   :  { %v376_v5 = vor.u32 %v375_v63, %v374_v62  ;;  %vm383_vm15 = vcmp.lt.s32.totalorder %v7917_v50, 4  ;;  %v367_v8 = vor.u32 %v366_v52, %v365_v2  ;;  %v370_v9 = vor.u32 %v369_v56, %v368_v47 }
 0x102   :  { %v7117_v46 = vmin.u32 %v311_v42, %v309_v35  ;;  %v7919_v48 = vshrl.u32 %v1954_v45, 30  ;;  %v373_v11 = vor.u32 %v372_v58, %v371_v3  ;;  %v377_v12 = vshll.u32 %v7723_v61, %v362_v29 }
 0x103   :  { %v389_v13 = vsel %vm383_vm15, %v376_v5, 920167782  ;;  %v7937_v14 = vshll.u32 %v356_v44, 8  ;;  %v301_v15 = vadd.s32 %v7867_v40, %v7864_v39  ;;  %vm380_vm1 = vcmp.lt.s32.totalorder %v7917_v50, 1 }
 0x104   :  { %v313_v60 = vclz %v7117_v46  ;;  %v1956_v1 = vshll.u32 %v7919_v48, 30  ;;  %v379_v30 = vor.u32 %v378_v6, %v377_v12  ;;  %vm382_vm2 = vcmp.lt.s32.totalorder %v7917_v50, 3  ;;  %v7955_v46 = vpop.f32.mrb[4].mxu0 }
 0x105   :  { %v388_v31 = vsel %vm380_vm1, %v367_v8, %v370_v9  ;;  %v390_v32 = vsel %vm382_vm2, %v373_v11, %v389_v13  ;;  %v7184_v36 = vadd.s32 4294967169, %v2000_v0  ;;  %v364_v43 = vshrl.u32 %v7719_v51, %v363_v41 }
 0x106   :  { %v7118_v54 = vadd.s32 4294967294, %v313_v60  ;;  %v7932_v7 = vsub.s32 %v1953_v53, %v1956_v1  ;;  %v385_v53 = vsel %vm383_vm15, %v373_v11, 2102212464  ;;  %vm381_vm3 = vcmp.lt.s32.totalorder %v7917_v50, 2 }
 0x107   :  { %v392_v45 = vsel %vm380_vm1, %v370_v9, %v373_v11  ;;  %v393_v56 = vsel %vm383_vm15, %v379_v30, 1326507024  ;;  %v1949_v58 = vadd.s32 %v7895_v17, %v7901_v26  ;;  %v384_v41 = vsel %vm380_vm1, %v364_v43, %v367_v8 }
 0x108   :  { %vm7119_vm0 = vcmp.lt.s32.totalorder %v7118_v54, 0  ;;  %v1959_v18 = vsub.s32 0, %v7932_v7  ;;  %v386_v62 = vsel %vm382_vm2, %v370_v9, %v385_v53  ;;  %v394_v1 = vsel %vm382_vm2, %v376_v5, %v393_v56 }
 0x109   :  { %v316_v16 = vsel %vm7119_vm0, 0, %v7118_v54  ;;  %v2006_v2 = vadd.s32 1, %v7184_v36  ;;  %v395_v47 = vsel %vm381_vm3, %v392_v45, %v394_v1  ;;  %v387_v5 = vsel %vm381_vm3, %v384_v41, %v386_v62 }
 0x10a   :  { %v317_v22 = vsub.s32 32, %v316_v16  ;;  %v321_v28 = vsub.s32 4294967266, %v316_v16  ;;  %v7181_v29 = vmin.u32 %v1959_v18, %v7932_v7  ;;  %v318_v39 = vshll.u32 %v309_v35, %v316_v16 }
 0x10b   :  { %v391_v35 = vsel %vm381_vm3, %v388_v31, %v390_v32  ;;  %v7977_v6 = vmul.u32.u64.low %v7937_v14, %v395_v47  ;;  %v7978_v8 = vmul.u32.u64.high %v7937_v14, %v395_v47, %v7977_v6  ;;  %vm2007_vm5 = vcmp.gt.s32.totalorder %v2006_v2, 0 }
 0x10c   :  { %v319_v40 = vshrl.u32 %v301_v15, %v317_v22  ;;  %v322_v38 = vadd.s32 127, %v321_v28  ;;  %v1961_v42 = vclz %v7181_v29  ;;  %v331_v13 = vsub.s32 4, %v7903_v27 }
 0x10d   :  { %v7972_v3 = vmul.u32.u64.low %v7937_v14, %v391_v35  ;;  %v7973_v17 = vmul.u32.u64.high %v7937_v14, %v391_v35, %v7972_v3  ;;  %v2008_v15 = vsel %vm2007_vm5, %v2006_v2, 0  ;;  %v403_v29 = vmul.u32 %v7937_v14, %v387_v5 }
 0x10e   :  { %v320_v44 = vor.u32 %v319_v40, %v318_v39  ;;  %v323_v52 = vshll.u32 %v322_v38, 23  ;;  %v7182_v60 = vadd.s32 4294967294, %v1961_v42  ;;  %v2010_v31 = vand.u32 31, %v2008_v15 }
 0x10f   :  { %v406_v28 = vadd.s32 1, %v7973_v17  ;;  %vm405_vm6 = vc.u32 %v7978_v8, %v7972_v3  ;;  %v1996_v39 = vand.u32 2147483647, %v7815_v24  ;;  %vm247_vm7 = vcmp.lt.s32.totalorder %v7807_v19, 0 }
 0x110   :  { %v324_v63 = vor.u32 4788187, %v323_v52  ;;  %v327_v0 = vcvt.s32.f32 %v320_v44  ;;  %vm7183_vm4 = vcmp.lt.s32.totalorder %v7182_v60, 0  ;;  %v332_v38 = vsel %vm247_vm7, %v331_v13, %v7903_v27 }
 0x111   :  { %v1964_v54 = vsel %vm7183_vm4, 0, %v7182_v60  ;;  %v407_v36 = vsel %vm405_vm6, %v406_v28, %v7973_v17  ;;  %v2011_v42 = vsub.s32 32, %v2010_v31  ;;  %vm1895_vm8 = vcmp.lt.s32.totalorder %v7809_v20, 0 }
 0x112   :  { %v325_v26 = vand.u32 2147483647, %v324_v63  ;;  %v1965_v9 = vsub.s32 32, %v1964_v54  ;;  %v1969_v11 = vsub.s32 4294967266, %v1964_v54  ;;  %v1966_v16 = vshll.u32 %v7932_v7, %v1964_v54 }
 0x113   :  { %v408_v7 = vadd.s32 %v407_v36, %v403_v29  ;;  %vm246_vm9 = vcmp.le.f32.partialorder %v245_v21, 0.7853982  ;;  %v2003_v44 = vand.u32 8388607, %v1996_v39  ;;  %v1979_v56 = vsub.s32 4, %v7919_v48 }
 0x114   :  { %v328_v12 = vmul.f32 %v327_v0, %v325_v26  ;;  %v1967_v18 = vshrl.u32 %v1949_v58, %v1965_v9  ;;  %v1970_v22 = vadd.s32 127, %v1969_v11  ;;  %v334_v35 = vsel %vm246_vm9, 0, %v332_v38  ;;  %v8014_v11 = vpop.f32.mrb[4].mxu1 }
 0x115   :  { %v409_v14 = vadd.s32 536870912, %v408_v7  ;;  %v2014_v60 = vshrl.u32 %v7720_v55, %v2011_v42  ;;  %v2022_v41 = vshll.u32 %v7722_v59, %v2010_v31  ;;  %v2023_v62 = vshrl.u32 %v7723_v61, %v2011_v42 }
 0x116   :  { %v329_v30 = vxor.u32 2147483648, %v328_v12  ;;  %v1968_v50 = vor.u32 %v1967_v18, %v1966_v16  ;;  %v1971_v32 = vshll.u32 %v1970_v22, 23  ;;  %v8005_v63 = vshrl.u32 %v2008_v15, 5 }
 0x117   :  { %v7999_v58 = vshrl.u32 %v409_v14, 30  ;;  %v2017_v0 = vshrl.u32 %v7721_v57, %v2011_v42  ;;  %v2020_v1 = vshrl.u32 %v7722_v59, %v2011_v42  ;;  %v3746_v2 = vadd.s32 3, %v334_v35 }
 0x118   :  { %v330_v40 = vsel %vm247_vm7, %v329_v30, %v328_v12  ;;  %v1972_v53 = vor.u32 4788187, %v1971_v32  ;;  %v1975_v45 = vcvt.s32.f32 %v1968_v50  ;;  %v2013_v47 = vshll.u32 %v7719_v51, %v2010_v31 }
 0x119   :  { %v333_v52 = vsel %vm246_vm9, %v7807_v19, %v330_v40  ;;  %v411_v21 = vshll.u32 %v7999_v58, 30  ;;  %v2016_v17 = vshll.u32 %v7720_v55, %v2010_v31  ;;  %v2024_v26 = vor.u32 %v2023_v62, %v2022_v41 }
 0x11a   :  { %v1973_v43 = vand.u32 2147483647, %v1972_v53  ;;  %7590 = vcosq.f32 %v333_v52  ;;  %v2019_v9 = vshll.u32 %v7721_v57, %v2010_v31  ;;  %v1980_v5 = vsel %vm1895_vm8, %v1979_v56, %v7919_v48 }
 0x11b   :  { %v8011_v6 = vsub.s32 %v408_v7, %v411_v21  ;;  %7592 = vsinq.f32 %v333_v52  ;;  %v2015_v12 = vor.u32 %v2014_v60, %v2013_v47  ;;  %v2026_v13 = vshrl.u32 %v7724_v4, %v2011_v42 }
 0x11c   :  { %v1976_v27 = vmul.f32 %v1975_v45, %v1973_v43  ;;  %v2018_v16 = vor.u32 %v2017_v0, %v2016_v17  ;;  %v2021_v18 = vor.u32 %v2020_v1, %v2019_v9  ;;  %vm2031_vm10 = vcmp.lt.s32.totalorder %v8005_v63, 4 }
 0x11d   :  { %v414_v15 = vsub.s32 0, %v8011_v6  ;;  %vm8024_vm11 = vcmp.le.f32.partialorder %v1893_v25, 0.7853982  ;;  %v2004_v28 = vor.u32 8388608, %v2003_v44  ;;  %v2025_v30 = vshll.u32 %v7723_v61, %v2010_v31 }
 0x11e   :  { %v1977_v54 = vxor.u32 2147483648, %v1976_v27  ;;  %v2037_v48 = vsel %vm2031_vm10, %v2024_v26, 920167782  ;;  %v1982_v50 = vsel %vm8024_vm11, 0, %v1980_v5  ;;  %vm350_vm12 = vcmp.lt.s32.totalorder %v7813_v23, 0 }
 0x11f   :  { %v7121_v32 = vmin.u32 %v414_v15, %v8011_v6  ;;  %v8037_v25 = vand.u32 3, %v334_v35  ;;  %v2027_v36 = vor.u32 %v2026_v13, %v2025_v30  ;;  %vm2028_vm13 = vcmp.lt.s32.totalorder %v8005_v63, 1 }
 0x120   :  { %v1978_v29 = vsel %vm1895_vm8, %v1977_v54, %v1976_v27  ;;  %vm2030_vm14 = vcmp.lt.s32.totalorder %v8005_v63, 3  ;;  %v8041_v31 = vand.u32 3, %v3746_v2  ;;  %v2036_v40 = vsel %vm2028_vm13, %v2015_v12, %v2018_v16 }
 0x121   :  { %v416_v7 = vclz %v7121_v32  ;;  %v2038_v38 = vsel %vm2030_vm14, %v2021_v18, %v2037_v48  ;;  %v1981_v53 = vsel %vm8024_vm11, %v7809_v20, %v1978_v29  ;;  %v8050_v14 = vand.u32 3, %v1982_v50 }
 0x122   :  { %v404_v43 = vadd.s32 %v7972_v3, %v7978_v8  ;;  %v2044_v45 = vshll.u32 %v2004_v28, 8  ;;  %vm8056_vm15 = vcmp.le.f32.partialorder %v348_v49, 0.7853982  ;;  %v2012_v35 = vshrl.u32 %v7719_v51, %v2011_v42 }
 0x123   :  { %v7122_v52 = vadd.s32 4294967294, %v416_v7  ;;  %vm2029_vm0 = vcmp.lt.s32.totalorder %v8005_v63, 2  ;;  %v2040_v56 = vsel %vm2028_vm13, %v2018_v16, %v2021_v18  ;;  %v434_v27 = vsub.s32 4, %v7999_v58 }
 0x124   :  { %v2033_v3 = vsel %vm2031_vm10, %v2021_v18, 2102212464  ;;  %v2039_v8 = vsel %vm2029_vm0, %v2036_v40, %v2038_v38  ;;  %v2041_v49 = vsel %vm2031_vm10, %v2027_v36, 1326507024  ;;  %v7591_v60 = vpop.eup %7590  ;;  %vm340_vm1 = vcmp.eq.s32.totalorder %v8037_v25, 0 }
 0x125   :  { %7594 = vcosq.f32 %v1981_v53  ;;  %vm7123_vm2 = vcmp.lt.s32.totalorder %v7122_v52, 0  ;;  %v2032_v42 = vsel %vm2028_vm13, %v2012_v35, %v2015_v12  ;;  %v2042_v41 = vsel %vm2030_vm14, %v2024_v26, %v2041_v49  ;;  %v7593_v62 = vpop.eup %7592 }
 0x126   :  { %v419_v21 = vsel %vm7123_vm2, 0, %v7122_v52  ;;  %v2043_v0 = vsel %vm2029_vm0, %v2040_v56, %v2042_v41  ;;  %v8078_v1 = vmul.u32.u64.low %v2044_v45, %v2039_v8  ;;  %v8079_v2 = vmul.u32.u64.high %v2044_v45, %v2039_v8, %v8078_v1 }
 0x127   :  { %7596 = vsinq.f32 %v1981_v53  ;;  %v420_v47 = vsub.s32 32, %v419_v21  ;;  %v424_v17 = vsub.s32 4294967266, %v419_v21  ;;  %v2034_v54 = vsel %vm2030_vm14, %v2018_v16, %v2033_v3 }
 0x128   :  { %vm339_vm3 = vcmp.lt.s32.totalorder %v8037_v25, 2  ;;  %v5410_v9 = vadd.s32 3, %v1982_v50  ;;  %v435_v26 = vsel %vm350_vm12, %v434_v27, %v7999_v58  ;;  %v344_v13 = vxor.u32 2147483648, %v7591_v60 }
 0x129   :  { %v8088_v5 = vmul.u32.u64.low %v2044_v45, %v2043_v0  ;;  %v8089_v12 = vmul.u32.u64.high %v2044_v45, %v2043_v0, %v8088_v5  ;;  %v421_v15 = vshll.u32 %v8011_v6, %v419_v21  ;;  %v422_v18 = vshrl.u32 %v404_v43, %v420_v47 }
 0x12a   :  { %v425_v22 = vadd.s32 127, %v424_v17  ;;  %v341_v28 = vxor.u32 2147483648, %v7593_v62  ;;  %v2035_v30 = vsel %vm2029_vm0, %v2032_v42, %v2034_v54  ;;  %v2054_v16 = vadd.s32 1, %v8079_v2 }
 0x12b   :  { %v454_v48 = vand.u32 2139095040, %v7824_v33  ;;  %vm337_vm4 = vweird.f32 %v7807_v19  ;;  %vm343_vm5 = vcmp.eq.s32.totalorder %v8037_v25, 2  ;;  %vm3748_vm6 = vcmp.lt.s32.totalorder %v8041_v31, 2 }
 0x12c   :  { %v423_v58 = vor.u32 %v422_v18, %v421_v15  ;;  %v426_v29 = vshll.u32 %v425_v22, 23  ;;  %vm3749_vm7 = vcmp.eq.s32.totalorder %v8041_v31, 0  ;;  %v8100_v6 = vand.u32 3, %v5410_v9 }
 0x12d   :  { %v437_v63 = vsel %vm8056_vm15, 0, %v435_v26  ;;  %vm2053_vm8 = vc.u32 %v8089_v12, %v8078_v1  ;;  %vm3752_vm9 = vcmp.eq.s32.totalorder %v8041_v31, 2  ;;  %v2051_v32 = vmul.u32 %v2044_v45, %v2035_v30 }
 0x12e   :  { %v427_v50 = vor.u32 4788187, %v426_v29  ;;  %v451_v36 = vand.u32 2147483647, %v7824_v33  ;;  %v342_v7 = vsel %vm340_vm1, %v7591_v60, %v341_v28  ;;  %v345_v40 = vsel %vm343_vm5, %v344_v13, %v7593_v62 }
 0x12f   :  { %vm1991_vm10 = vcmp.eq.s32.totalorder %v8050_v14, 2  ;;  %v2055_v38 = vsel %vm2053_vm8, %v2054_v16, %v8079_v2  ;;  %v455_v53 = vshrl.u32 %v454_v48, 23  ;;  %v7595_v43 = vpop.eup %7594  ;;  %vm1988_vm11 = vcmp.eq.s32.totalorder %v8050_v14, 0 }
 0x130   :  { %v428_v52 = vand.u32 2147483647, %v427_v50  ;;  %v430_v35 = vcvt.s32.f32 %v423_v58  ;;  %v3850_v56 = vadd.s32 3, %v437_v63  ;;  %v2056_v27 = vadd.s32 %v2055_v38, %v2051_v32 }
 0x131   :  { %v3751_v45 = vsel %vm3749_vm7, %v7591_v60, %v341_v28  ;;  %v3754_v3 = vsel %vm3752_vm9, %v344_v13, %v7593_v62  ;;  %vm5413_vm13 = vcmp.eq.s32.totalorder %v8100_v6, 0  ;;  %v7124_v8 = vadd.s32 4294967169, %v455_v53  ;;  %v7597_v49 = vpop.eup %7596 }
 0x132   :  { %v346_v42 = vsel %vm339_vm3, %v342_v7, %v345_v40  ;;  %v431_v41 = vmul.f32 %v430_v35, %v428_v52  ;;  %v2057_v21 = vadd.s32 536870912, %v2056_v27  ;;  %v458_v0 = vand.u32 8388607, %v451_v36 }
 0x133   :  { %vm5416_vm14 = vcmp.eq.s32.totalorder %v8100_v6, 2  ;;  %v8123_v2 = vand.u32 3, %v437_v63  ;;  %v461_v60 = vadd.s32 1, %v7124_v8  ;;  %v2102_v47 = vand.u32 2139095040, %v7826_v34 }
 0x134   :  { %v1992_v62 = vxor.u32 2147483648, %v7595_v43  ;;  %v432_v17 = vxor.u32 2147483648, %v431_v41  ;;  %v8126_v54 = vand.u32 3, %v3850_v56  ;;  %v8128_v9 = vshrl.u32 %v2057_v21, 30 }
 0x135   :  { %v8132_v25 = vsel %vm337_vm4, nan, %v346_v42  ;;  %v3755_v26 = vsel %vm3748_vm6, %v3751_v45, %v3754_v3  ;;  %v1989_v5 = vxor.u32 2147483648, %v7597_v49  ;;  %vm462_vm0 = vcmp.gt.s32.totalorder %v461_v60, 0 }
 0x136   :  { %v433_v13 = vsel %vm350_vm12, %v432_v17, %v431_v41  ;;  %v2059_v15 = vshll.u32 %v8128_v9, 30  ;;  %v459_v18 = vor.u32 8388608, %v458_v0  ;;  %v463_v22 = vsel %vm462_vm0, %v461_v60, 0 }
 0x137   :  { %v436_v28 = vsel %vm8056_vm15, %v7813_v23, %v433_v13  ;;  %v465_v30 = vand.u32 31, %v463_v22  ;;  %v2099_v16 = vand.u32 2147483647, %v7826_v34  ;;  %v2103_v48 = vshrl.u32 %v2102_v47, 23 }
 0x138   :  { %v8145_v31 = vsel %vm337_vm4, nan, %v3755_v26  ;;  %v8149_v58 = vsel %vm1991_vm10, %v1992_v62, %v7597_v49  ;;  %7598 = vcosq.f32 %v436_v28  ;;  %v8151_v29 = vsub.s32 %v2056_v27, %v2059_v15 }
 0x139   :  { %v8155_v63 = vsel %vm1988_vm11, %v7595_v43, %v1989_v5  ;;  %v8159_v44 = vsel %vm5416_vm14, %v1992_v62, %v7597_v49  ;;  %7600 = vsinq.f32 %v436_v28  ;;  %v466_v50 = vsub.s32 32, %v465_v30  ;;  %v8191_v49 = vpop.f32.mrb[5].mxu0 }
 0x13a   :  { %v8163_v19 = vsel %vm5413_vm13, %v7595_v43, %v1989_v5  ;;  %v8167_v32 = vadd.s32 %v8078_v1, %v8089_v12  ;;  %v2062_v7 = vsub.s32 0, %v8151_v29  ;;  %v8170_v40 = vshll.u32 %v459_v18, 8 }
 0x13b   :  { %v469_v38 = vshrl.u32 %v7720_v55, %v466_v50  ;;  %v472_v53 = vshrl.u32 %v7721_v57, %v466_v50  ;;  %v7188_v52 = vadd.s32 4294967169, %v2103_v48  ;;  %v8176_v35 = vand.u32 8388607, %v2099_v16 }
 0x13c   :  { %vm446_vm12 = vcmp.eq.s32.totalorder %v8123_v2, 2  ;;  %vm3856_vm15 = vcmp.eq.s32.totalorder %v8126_v54, 2  ;;  %v7185_v1 = vmin.u32 %v2062_v7, %v8151_v29  ;;  %v2082_v12 = vsub.s32 4, %v8128_v9 }
 0x13d   :  { %v468_v43 = vshll.u32 %v7719_v51, %v465_v30  ;;  %v557_v56 = vand.u32 2139095040, %v7828_v37  ;;  %vm443_vm1 = vcmp.eq.s32.totalorder %v8123_v2, 0  ;;  %vm3853_vm2 = vcmp.eq.s32.totalorder %v8126_v54, 0 }
 0x13e   :  { %v8186_v27 = vshrl.u32 %v463_v22, 5  ;;  %v471_v45 = vshll.u32 %v7720_v55, %v465_v30  ;;  %v474_v3 = vshll.u32 %v7721_v57, %v465_v30  ;;  %v475_v8 = vshrl.u32 %v7722_v59, %v466_v50 }
 0x13f   :  { %vm442_vm3 = vcmp.lt.s32.totalorder %v8123_v2, 2  ;;  %vm3852_vm4 = vcmp.lt.s32.totalorder %v8126_v54, 2  ;;  %v2064_v42 = vclz %v7185_v1  ;;  %v470_v41 = vor.u32 %v469_v38, %v468_v43 }
 0x140   :  { %v477_v21 = vshll.u32 %v7722_v59, %v465_v30  ;;  %v478_v0 = vshrl.u32 %v7723_v61, %v466_v50  ;;  %vm440_vm5 = vweird.f32 %v7813_v23  ;;  %v467_v60 = vshrl.u32 %v7719_v51, %v466_v50 }
 0x141   :  { %v473_v47 = vor.u32 %v472_v53, %v471_v45  ;;  %v476_v62 = vor.u32 %v475_v8, %v474_v3  ;;  %v2109_v17 = vadd.s32 1, %v7188_v52  ;;  %vm1998_vm6 = vcmp.lt.s32.totalorder %v7815_v24, 0 }
 0x142   :  { %v7186_v26 = vadd.s32 4294967294, %v2064_v42  ;;  %v479_v5 = vor.u32 %v478_v0, %v477_v21  ;;  %v480_v13 = vshll.u32 %v7723_v61, %v465_v30  ;;  %v481_v15 = vshrl.u32 %v7724_v4, %v466_v50  ;;  %v7599_v18 = vpop.eup %7598 }
 0x143   :  { %vm483_vm7 = vcmp.lt.s32.totalorder %v8186_v27, 1  ;;  %vm484_vm8 = vcmp.lt.s32.totalorder %v8186_v27, 2  ;;  %vm485_vm9 = vcmp.lt.s32.totalorder %v8186_v27, 3  ;;  %vm486_vm10 = vcmp.lt.s32.totalorder %v8186_v27, 4  ;;  %v7601_v30 = vpop.eup %7600 }
 0x144   :  { %vm7187_vm11 = vcmp.lt.s32.totalorder %v7186_v26, 0  ;;  %v482_v22 = vor.u32 %v481_v15, %v480_v13  ;;  %v487_v28 = vsel %vm483_vm7, %v467_v60, %v470_v41  ;;  %v488_v48 = vsel %vm486_vm10, %v476_v62, 2102212464 }
 0x145   :  { %v447_v7 = vxor.u32 2147483648, %v7599_v18  ;;  %v2067_v50 = vsel %vm7187_vm11, 0, %v7186_v26  ;;  %v491_v38 = vsel %vm483_vm7, %v470_v41, %v473_v47  ;;  %v492_v53 = vsel %vm486_vm10, %v479_v5, 920167782 }
 0x146   :  { %vm1987_vm13 = vcmp.lt.s32.totalorder %v8050_v14, 2  ;;  %vm5412_vm14 = vcmp.lt.s32.totalorder %v8100_v6, 2  ;;  %v444_v52 = vxor.u32 2147483648, %v7601_v30  ;;  %v2068_v1 = vsub.s32 32, %v2067_v50 }
 0x147   :  { %v2072_v43 = vsub.s32 4294967266, %v2067_v50  ;;  %v489_v45 = vsel %vm485_vm9, %v473_v47, %v488_v48  ;;  %v448_v3 = vsel %vm446_vm12, %v447_v7, %v7601_v30  ;;  %v3858_v8 = vsel %vm3856_vm15, %v447_v7, %v7601_v30 }
 0x148   :  { %v2069_v42 = vshll.u32 %v8151_v29, %v2067_v50  ;;  %v493_v41 = vsel %vm485_vm9, %v476_v62, %v492_v53  ;;  %v445_v21 = vsel %vm443_vm1, %v7599_v18, %v444_v52  ;;  %v3855_v0 = vsel %vm3853_vm2, %v7599_v18, %v444_v52 }
 0x149   :  { %v2070_v60 = vshrl.u32 %v8167_v32, %v2068_v1  ;;  %v2073_v26 = vadd.s32 127, %v2072_v43  ;;  %v449_v13 = vsel %vm442_vm3, %v445_v21, %v448_v3  ;;  %v3859_v15 = vsel %vm3852_vm4, %v3855_v0, %v3858_v8 }
 0x14a   :  { %v494_v29 = vsel %vm484_vm8, %v491_v38, %v493_v41  ;;  %v495_v48 = vsel %vm483_vm7, %v473_v47, %v476_v62  ;;  %v450_v30 = vsel %vm440_vm5, nan, %v449_v13  ;;  %v3860_v18 = vsel %vm440_vm5, nan, %v3859_v15 }
 0x14b   :  { %v2071_v32 = vor.u32 %v2070_v60, %v2069_v42  ;;  %v2074_v7 = vshll.u32 %v2073_v26, 23  ;;  %v7420_v2 = vpack.c.bf16 %v450_v30, %v8132_v25  ;;  %v7436_v50 = vpack.c.bf16 %v3860_v18, %v8145_v31 }
 0x14c   :  { %v2083_v54 = vsel %vm1998_vm6, %v2082_v12, %v8128_v9  ;;  %v496_v47 = vsel %vm486_vm10, %v482_v22, 1326507024  ;;  %v490_v23 = vsel %vm484_vm8, %v487_v28, %v489_v45  ;;  %vm2110_vm0 = vcmp.gt.s32.totalorder %v2109_v17, 0 }
 0x14d   :  { %v2075_v62 = vor.u32 4788187, %v2074_v7  ;;  %v497_v38 = vsel %vm485_vm9, %v479_v5, %v496_v47  ;;  %3637 = vst [vmem:[%s11184_s2] sm:$0xff] %v7420_v2  ;;  %7404 = vst [vmem:[%s11184_s2 + $0x80] sm:$0xff] %v7436_v50  ;;  %v8264_v25 = vmul.u32.u64.low %v8170_v40, %v494_v29  ;;  %v8265_v31 = vmul.u32.u64.high %v8170_v40, %v494_v29, %v8264_v25  ;;  %v8326_v47 = vpop.f32.mrb[5].mxu1 }
 0x14e   :  { %v498_v9 = vsel %vm484_vm8, %v495_v48, %v497_v38  ;;  %v2111_v12 = vsel %vm2110_vm0, %v2109_v17, 0  ;;  %v2078_v5 = vcvt.s32.f32 %v2071_v32  ;;  %v8276_v52 = vsel %vm1987_vm13, %v8155_v63, %v8149_v58 }
 0x14f   :  { %v2076_v22 = vand.u32 2147483647, %v2075_v62  ;;  %v8269_v28 = vmul.u32.u64.low %v8170_v40, %v498_v9  ;;  %v8270_v53 = vmul.u32.u64.high %v8170_v40, %v498_v9, %v8269_v28  ;;  %v8282_v27 = vsel %vm5412_vm14, %v8163_v19, %v8159_v44 }
 0x150   :  { %vm8286_vm12 = vcmp.le.f32.partialorder %v1996_v39, 0.7853982  ;;  %v2113_v1 = vand.u32 31, %v2111_v12  ;;  %v506_v14 = vmul.u32 %v8170_v40, %v490_v23  ;;  %v2107_v58 = vor.u32 8388608, %v8176_v35 }
 0x151   :  { %v2079_v43 = vmul.f32 %v2078_v5, %v2076_v22  ;;  %v2085_v45 = vsel %vm8286_vm12, 0, %v2083_v54  ;;  %v509_v63 = vadd.s32 1, %v8265_v31  ;;  %v8295_v6 = vshrl.u32 %v2111_v12, 5 }
 0x152   :  { %v2114_v44 = vsub.s32 32, %v2113_v1  ;;  %v558_v39 = vshrl.u32 %v557_v56, 23  ;;  %vm508_vm15 = vc.u32 %v8270_v53, %v8264_v25  ;;  %v2116_v3 = vshll.u32 %v7719_v51, %v2113_v1 }
 0x153   :  { %v2080_v19 = vxor.u32 2147483648, %v2079_v43  ;;  %v2119_v8 = vshll.u32 %v7720_v55, %v2113_v1  ;;  %v510_v40 = vsel %vm508_vm15, %v509_v63, %v8265_v31  ;;  %v2122_v41 = vshll.u32 %v7721_v57, %v2113_v1 }
 0x154   :  { %v2117_v35 = vshrl.u32 %v7720_v55, %v2114_v44  ;;  %v2120_v42 = vshrl.u32 %v7721_v57, %v2114_v44  ;;  %v511_v56 = vadd.s32 %v510_v40, %v506_v14  ;;  %v2123_v0 = vshrl.u32 %v7722_v59, %v2114_v44 }
 0x155   :  { %v2081_v21 = vsel %vm1998_vm6, %v2080_v19, %v2079_v43  ;;  %v2125_v60 = vshll.u32 %v7722_v59, %v2113_v1  ;;  %v2126_v29 = vshrl.u32 %v7723_v61, %v2114_v44  ;;  %vm1985_vm1 = vweird.f32 %v7809_v20 }
 0x156   :  { %v2084_v26 = vsel %vm8286_vm12, %v7815_v24, %v2081_v21  ;;  %v2118_v13 = vor.u32 %v2117_v35, %v2116_v3  ;;  %v2121_v15 = vor.u32 %v2120_v42, %v2119_v8  ;;  %v512_v48 = vadd.s32 536870912, %v511_v56 }
 0x157   :  { %7602 = vcosq.f32 %v2084_v26  ;;  %v2124_v30 = vor.u32 %v2123_v0, %v2122_v41  ;;  %vm2131_vm2 = vcmp.lt.s32.totalorder %v8295_v6, 1  ;;  %v2127_v18 = vor.u32 %v2126_v29, %v2125_v60 }
 0x158   :  { %7604 = vsinq.f32 %v2084_v26  ;;  %v2128_v32 = vshll.u32 %v7723_v61, %v2113_v1  ;;  %v2129_v7 = vshrl.u32 %v7724_v4, %v2114_v44  ;;  %v8319_v2 = vshrl.u32 %v512_v48, 30 }
 0x159   :  { %vm2134_vm3 = vcmp.lt.s32.totalorder %v8295_v6, 4  ;;  %v2139_v50 = vsel %vm2131_vm2, %v2118_v13, %v2121_v15  ;;  %v8324_v54 = vshll.u32 %v2107_v58, 8  ;;  %v5514_v62 = vadd.s32 3, %v2085_v45 }
 0x15a   :  { %v2130_v23 = vor.u32 %v2129_v7, %v2128_v32  ;;  %vm2133_vm4 = vcmp.lt.s32.totalorder %v8295_v6, 3  ;;  %v2140_v38 = vsel %vm2134_vm3, %v2127_v18, 920167782  ;;  %v514_v9 = vshll.u32 %v8319_v2, 30 }
 0x15b   :  { %vm2132_vm5 = vcmp.lt.s32.totalorder %v8295_v6, 2  ;;  %v2141_v31 = vsel %vm2133_vm4, %v2124_v30, %v2140_v38  ;;  %v2143_v12 = vsel %vm2131_vm2, %v2121_v15, %v2124_v30  ;;  %v2136_v22 = vsel %vm2134_vm3, %v2124_v30, 2102212464 }
 0x15c   :  { %v2142_v5 = vsel %vm2132_vm5, %v2139_v50, %v2141_v31  ;;  %v2144_v28 = vsel %vm2134_vm3, %v2130_v23, 1326507024  ;;  %v7128_v17 = vadd.s32 4294967169, %v558_v39  ;;  %v2089_v1 = vand.u32 3, %v2085_v45 }
 0x15d   :  { %v8337_v43 = vsub.s32 %v511_v56, %v514_v9  ;;  %v2115_v14 = vshrl.u32 %v7719_v51, %v2114_v44  ;;  %v2145_v58 = vsel %vm2133_vm4, %v2127_v18, %v2144_v28  ;;  %v5515_v63 = vand.u32 3, %v5514_v62 }
 0x15e   :  { %v2146_v19 = vsel %vm2132_vm5, %v2143_v12, %v2145_v58  ;;  %v8345_v3 = vmul.u32.u64.low %v8324_v54, %v2142_v5  ;;  %v8346_v8 = vmul.u32.u64.high %v8324_v54, %v2142_v5, %v8345_v3  ;;  %v2137_v44 = vsel %vm2133_vm4, %v2121_v15, %v2136_v22 }
 0x15f   :  { %v517_v40 = vsub.s32 0, %v8337_v43  ;;  %v2135_v45 = vsel %vm2131_vm2, %v2115_v14, %v2118_v13  ;;  %v564_v39 = vadd.s32 1, %v7128_v17  ;;  %v1995_v35 = vsel %vm1985_vm1, nan, %v8276_v52 }
 0x160   :  { %vm2088_vm6 = vweird.f32 %v7815_v24  ;;  %v8359_v42 = vmul.u32.u64.low %v8324_v54, %v2146_v19  ;;  %v8360_v41 = vmul.u32.u64.high %v8324_v54, %v2146_v19, %v8359_v42  ;;  %v5420_v56 = vsel %vm1985_vm1, nan, %v8282_v27 }
 0x161   :  { %v7603_v21 = vpop.eup %7602  ;;  %vm2090_vm7 = vcmp.lt.s32.totalorder %v2089_v1, 2  ;;  %vm2091_vm8 = vcmp.eq.s32.totalorder %v2089_v1, 0  ;;  %v7125_v0 = vmin.u32 %v517_v40, %v8337_v43  ;;  %vm2094_vm9 = vcmp.eq.s32.totalorder %v2089_v1, 2 }
 0x162   :  { %v7605_v60 = vpop.eup %7604  ;;  %v2095_v26 = vxor.u32 2147483648, %v7603_v21  ;;  %vm5520_vm10 = vcmp.eq.s32.totalorder %v5515_v63, 2  ;;  %v2138_v52 = vsel %vm2132_vm5, %v2135_v45, %v2137_v44  ;;  %v2157_v29 = vadd.s32 1, %v8346_v8 }
 0x163   :  { %v2092_v13 = vxor.u32 2147483648, %v7605_v60  ;;  %v519_v15 = vclz %v7125_v0  ;;  %vm565_vm11 = vcmp.gt.s32.totalorder %v564_v39, 0  ;;  %vm5516_vm13 = vcmp.lt.s32.totalorder %v5515_v63, 2 }
 0x164   :  { %v2096_v48 = vsel %vm2094_vm9, %v2095_v26, %v7605_v60  ;;  %vm5517_vm14 = vcmp.eq.s32.totalorder %v5515_v63, 0  ;;  %v5522_v20 = vsel %vm5520_vm10, %v2095_v26, %v7605_v60  ;;  %v2154_v32 = vmul.u32 %v8324_v54, %v2138_v52 }
 0x165   :  { %v2093_v27 = vsel %vm2091_vm8, %v7603_v21, %v2092_v13  ;;  %v5519_v30 = vsel %vm5517_vm14, %v7603_v21, %v2092_v13  ;;  %v7126_v18 = vadd.s32 4294967294, %v519_v15  ;;  %vm2156_vm0 = vc.u32 %v8360_v41, %v8345_v3 }
 0x166   :  { %v2097_v7 = vsel %vm2090_vm7, %v2093_v27, %v2096_v48  ;;  %v5523_v50 = vsel %vm5516_vm13, %v5519_v30, %v5522_v20  ;;  %v566_v6 = vsel %vm565_vm11, %v564_v39, 0  ;;  %v2158_v38 = vsel %vm2156_vm0, %v2157_v29, %v8346_v8 }
 0x167   :  { %v2098_v62 = vsel %vm2088_vm6, nan, %v2097_v7  ;;  %v5524_v23 = vsel %vm2088_vm6, nan, %v5523_v50  ;;  %vm7127_vm12 = vcmp.lt.s32.totalorder %v7126_v18, 0  ;;  %v2159_v54 = vadd.s32 %v2158_v38, %v2154_v32 }
 0x168   :  { %v7428_v9 = vpack.c.bf16 %v2098_v62, %v1995_v35  ;;  %v7444_v31 = vpack.c.bf16 %v5524_v23, %v5420_v56  ;;  %v522_v12 = vsel %vm7127_vm12, 0, %v7126_v18  ;;  %v554_v24 = vand.u32 2147483647, %v7828_v37  ;;  %v8400_v56 = vpop.f32.mrb[6].mxu0 }
 0x169   :  { %v527_v22 = vsub.s32 4294967266, %v522_v12  ;;  %v523_v5 = vsub.s32 32, %v522_v12  ;;  %v2160_v28 = vadd.s32 536870912, %v2159_v54  ;;  %v568_v17 = vand.u32 31, %v566_v6 }
 0x16a   :  { %3645 = vst [vmem:[%s11184_s2 + $0x40] sm:$0xff] %v7428_v9  ;;  %7412 = vst [vmem:[%s11184_s2 + $0xc0] sm:$0xff] %v7444_v31  ;;  %v507_v14 = vadd.s32 %v8264_v25, %v8270_v53  ;;  %v561_v45 = vand.u32 8388607, %v554_v24  ;;  %v524_v42 = vshll.u32 %v8337_v43, %v522_v12  ;;  %v567_v0 = vshrl.u32 %v566_v6, 5 }
 0x16b   :  { %v528_v1 = vadd.s32 127, %v527_v22  ;;  %v8388_v58 = vshrl.u32 %v2160_v28, 30  ;;  %v569_v63 = vsub.s32 32, %v568_v17  ;;  %v571_v60 = vshll.u32 %v7719_v51, %v568_v17 }
 0x16c   :  { %v525_v8 = vshrl.u32 %v507_v14, %v523_v5  ;;  %v574_v26 = vshll.u32 %v7720_v55, %v568_v17  ;;  %v577_v52 = vshll.u32 %v7721_v57, %v568_v17  ;;  %v562_v29 = vor.u32 8388608, %v561_v45 }
 0x16d   :  { %v529_v19 = vshll.u32 %v528_v1, 23  ;;  %v2162_v40 = vshll.u32 %v8388_v58, 30  ;;  %v572_v44 = vshrl.u32 %v7720_v55, %v569_v63  ;;  %v575_v39 = vshrl.u32 %v7721_v57, %v569_v63 }
 0x16e   :  { %v578_v35 = vshrl.u32 %v7722_v59, %v569_v63  ;;  %v581_v53 = vshrl.u32 %v7723_v61, %v569_v63  ;;  %v526_v13 = vor.u32 %v525_v8, %v524_v42  ;;  %v580_v43 = vshll.u32 %v7722_v59, %v568_v17 }
 0x16f   :  { %v530_v21 = vor.u32 4788187, %v529_v19  ;;  %v8397_v25 = vsub.s32 %v2159_v54, %v2162_v40  ;;  %v573_v48 = vor.u32 %v572_v44, %v571_v60  ;;  %v576_v20 = vor.u32 %v575_v39, %v574_v26 }
 0x170   :  { %v579_v27 = vor.u32 %v578_v35, %v577_v52  ;;  %v584_v30 = vshrl.u32 %v7724_v4, %v569_v63  ;;  %v582_v7 = vor.u32 %v581_v53, %v580_v43  ;;  %v583_v50 = vshll.u32 %v7723_v61, %v568_v17 }
 0x171   :  { %v2165_v15 = vsub.s32 0, %v8397_v25  ;;  %v531_v18 = vand.u32 2147483647, %v530_v21  ;;  %vm586_vm15 = vcmp.lt.s32.totalorder %v567_v0, 1  ;;  %v533_v6 = vcvt.s32.f32 %v526_v13 }
 0x172   :  { %v585_v23 = vor.u32 %v584_v30, %v583_v50  ;;  %vm589_vm1 = vcmp.lt.s32.totalorder %v567_v0, 4  ;;  %v570_v38 = vshrl.u32 %v7719_v51, %v569_v63  ;;  %v594_v31 = vsel %vm586_vm15, %v573_v48, %v576_v20 }
 0x173   :  { %v7189_v32 = vmin.u32 %v2165_v15, %v8397_v25  ;;  %v591_v9 = vsel %vm589_vm1, %v579_v27, 2102212464  ;;  %v602_v12 = vshll.u32 %v562_v29, 8  ;;  %v534_v54 = vmul.f32 %v533_v6, %v531_v18 }
 0x174   :  { %vm588_vm2 = vcmp.lt.s32.totalorder %v567_v0, 3  ;;  %v595_v5 = vsel %vm589_vm1, %v582_v7, 920167782  ;;  %vm587_vm3 = vcmp.lt.s32.totalorder %v567_v0, 2  ;;  %v590_v28 = vsel %vm586_vm15, %v570_v38, %v573_v48 }
 0x175   :  { %v2167_v62 = vclz %v7189_v32  ;;  %v596_v17 = vsel %vm588_vm2, %v579_v27, %v595_v5  ;;  %v598_v1 = vsel %vm586_vm15, %v576_v20, %v579_v27  ;;  %v592_v14 = vsel %vm588_vm2, %v576_v20, %v591_v9 }
 0x176   :  { %v597_v63 = vsel %vm587_vm3, %v594_v31, %v596_v17  ;;  %v599_v19 = vsel %vm589_vm1, %v585_v23, 1326507024  ;;  %v535_v39 = vxor.u32 2147483648, %v534_v54  ;;  %v537_v35 = vsub.s32 4, %v8319_v2 }
 0x177   :  { %v7190_v22 = vadd.s32 4294967294, %v2167_v62  ;;  %v600_v40 = vsel %vm588_vm2, %v582_v7, %v599_v19  ;;  %v8418_v45 = vmul.u32.u64.low %v602_v12, %v597_v63  ;;  %v8419_v44 = vmul.u32.u64.high %v602_v12, %v597_v63, %v8418_v45 }
 0x178   :  { %v601_v21 = vsel %vm587_vm3, %v598_v1, %v600_v40  ;;  %v2205_v26 = vand.u32 2139095040, %v7849_v10  ;;  %v2185_v52 = vsub.s32 4, %v8388_v58  ;;  %v593_v13 = vsel %vm587_vm3, %v590_v28, %v592_v14 }
 0x179   :  { %vm7191_vm4 = vcmp.lt.s32.totalorder %v7190_v22, 0  ;;  %v8423_v53 = vmul.u32.u64.low %v602_v12, %v601_v21  ;;  %v8424_v60 = vmul.u32.u64.high %v602_v12, %v601_v21, %v8423_v53  ;;  %vm453_vm5 = vcmp.lt.s32.totalorder %v7824_v33, 0 }
 0x17a   :  { %v2170_v8 = vsel %vm7191_vm4, 0, %v7190_v22  ;;  %v612_v29 = vadd.s32 1, %v8419_v44  ;;  %v2206_v43 = vshrl.u32 %v2205_v26, 23  ;;  %v536_v48 = vsel %vm453_vm5, %v535_v39, %v534_v54  ;;  %v8472_v53 = vpop.f32.mrb[6].mxu1 }
 0x17b   :  { %v2175_v42 = vsub.s32 4294967266, %v2170_v8  ;;  %v538_v20 = vsel %vm453_vm5, %v537_v35, %v8319_v2  ;;  %vm2101_vm6 = vcmp.lt.s32.totalorder %v7826_v34, 0  ;;  %v2171_v27 = vsub.s32 32, %v2170_v8 }
 0x17c   :  { %v609_v30 = vmul.u32 %v602_v12, %v593_v13  ;;  %vm611_vm7 = vc.u32 %v8424_v60, %v8418_v45  ;;  %v7192_v18 = vadd.s32 4294967169, %v2206_v43  ;;  %vm452_vm8 = vcmp.le.f32.partialorder %v451_v36, 0.7853982 }
 0x17d   :  { %v2176_v15 = vadd.s32 127, %v2175_v42  ;;  %v2155_v0 = vadd.s32 %v8345_v3, %v8360_v41  ;;  %v2186_v32 = vsel %vm2101_vm6, %v2185_v52, %v8388_v58  ;;  %v613_v7 = vsel %vm611_vm7, %v612_v29, %v8419_v44 }
 0x17e   :  { %v539_v2 = vsel %vm452_vm8, %v7824_v33, %v536_v48  ;;  %v614_v6 = vadd.s32 %v613_v7, %v609_v30  ;;  %v2212_v62 = vadd.s32 1, %v7192_v18  ;;  %v540_v23 = vsel %vm452_vm8, 0, %v538_v20 }
 0x17f   :  { %v2177_v50 = vshll.u32 %v2176_v15, 23  ;;  %vm8445_vm9 = vcmp.le.f32.partialorder %v2099_v16, 0.7853982  ;;  %v2202_v36 = vand.u32 2147483647, %v7849_v10  ;;  %v2173_v3 = vshrl.u32 %v2155_v0, %v2171_v27 }
 0x180   :  { %v2188_v41 = vsel %vm8445_vm9, 0, %v2186_v32  ;;  %v615_v58 = vadd.s32 536870912, %v614_v6  ;;  %vm2213_vm10 = vcmp.gt.s32.totalorder %v2212_v62, 0  ;;  %7606 = vcosq.f32 %v539_v2 }
 0x181   :  { %v2214_v9 = vsel %vm2213_vm10, %v2212_v62, 0  ;;  %7608 = vsinq.f32 %v539_v2  ;;  %v2172_v31 = vshll.u32 %v8397_v25, %v2170_v8  ;;  %v2178_v12 = vor.u32 4788187, %v2177_v50 }
 0x182   :  { %v8453_v54 = vshrl.u32 %v615_v58, 30  ;;  %v3954_v16 = vadd.s32 3, %v540_v23  ;;  %v5618_v22 = vadd.s32 3, %v2188_v41  ;;  %v2216_v5 = vand.u32 31, %v2214_v9 }
 0x183   :  { %v2174_v28 = vor.u32 %v2173_v3, %v2172_v31  ;;  %v2209_v1 = vand.u32 8388607, %v2202_v36  ;;  %v2179_v63 = vand.u32 2147483647, %v2178_v12  ;;  %v8462_v40 = vand.u32 3, %v540_v23 }
 0x184   :  { %v617_v17 = vshll.u32 %v8453_v54, 30  ;;  %v8458_v14 = vsub.s32 32, %v2216_v5  ;;  %v8464_v25 = vand.u32 3, %v3954_v16  ;;  %v8466_v8 = vand.u32 3, %v2188_v41 }
 0x185   :  { %v8468_v44 = vand.u32 3, %v5618_v22  ;;  %v2181_v39 = vcvt.s32.f32 %v2174_v28  ;;  %v2210_v42 = vor.u32 8388608, %v2209_v1  ;;  %v657_v21 = vand.u32 2147483647, %v7955_v46 }
 0x186   :  { %v8460_v19 = vsub.s32 %v614_v6, %v617_v17  ;;  %v610_v26 = vadd.s32 %v8418_v45, %v8424_v60  ;;  %v2220_v52 = vshrl.u32 %v7720_v55, %v8458_v14  ;;  %v2223_v13 = vshrl.u32 %v7721_v57, %v8458_v14 }
 0x187   :  { %v660_v15 = vand.u32 2139095040, %v7955_v46  ;;  %v2182_v29 = vmul.f32 %v2181_v39, %v2179_v63  ;;  %v8481_v48 = vshrl.u32 %v2214_v9, 5  ;;  %v2226_v20 = vshrl.u32 %v7722_v59, %v8458_v14 }
 0x188   :  { %v620_v35 = vsub.s32 0, %v8460_v19  ;;  %v2219_v45 = vshll.u32 %v7719_v51, %v2216_v5  ;;  %v2222_v60 = vshll.u32 %v7720_v55, %v2216_v5  ;;  %v2228_v30 = vshll.u32 %v7722_v59, %v2216_v5 }
 0x189   :  { %v2229_v18 = vshrl.u32 %v7723_v61, %v8458_v14  ;;  %vm549_vm11 = vcmp.eq.s32.totalorder %v8462_v40, 2  ;;  %v2225_v7 = vshll.u32 %v7721_v57, %v2216_v5  ;;  %v2231_v2 = vshll.u32 %v7723_v61, %v2216_v5 }
 0x18a   :  { %v7129_v43 = vmin.u32 %v620_v35, %v8460_v19  ;;  %v8485_v27 = vpop.eup %7606  ;;  %v2232_v50 = vshrl.u32 %v7724_v4, %v8458_v14  ;;  %vm546_vm13 = vcmp.eq.s32.totalorder %v8462_v40, 0  ;;  %v2221_v6 = vor.u32 %v2220_v52, %v2219_v45 }
 0x18b   :  { %v8492_v0 = vpop.eup %7608  ;;  %v2224_v62 = vor.u32 %v2223_v13, %v2222_v60  ;;  %v2230_v23 = vor.u32 %v2229_v18, %v2228_v30  ;;  %v8500_v3 = vshll.u32 %v2210_v42, 8  ;;  %v2227_v58 = vor.u32 %v2226_v20, %v2225_v7 }
 0x18c   :  { %v622_v32 = vclz %v7129_v43  ;;  %v2233_v9 = vor.u32 %v2232_v50, %v2231_v2  ;;  %v661_v31 = vshrl.u32 %v660_v15, 23  ;;  %v547_v12 = vxor.u32 2147483648, %v8492_v0 }
 0x18d   :  { %v550_v16 = vxor.u32 2147483648, %v8485_v27  ;;  %vm556_vm14 = vcmp.lt.s32.totalorder %v7828_v37, 0  ;;  %vm2237_vm0 = vcmp.lt.s32.totalorder %v8481_v48, 4  ;;  %v8508_v22 = vand.u32 8388607, %v657_v21 }
 0x18e   :  { %v7130_v41 = vadd.s32 4294967294, %v622_v32  ;;  %vm545_vm12 = vcmp.lt.s32.totalorder %v8462_v40, 2  ;;  %vm3957_vm15 = vcmp.eq.s32.totalorder %v8464_v25, 0  ;;  %vm3960_vm1 = vcmp.eq.s32.totalorder %v8464_v25, 2 }
 0x18f   :  { %v2183_v5 = vxor.u32 2147483648, %v2182_v29  ;;  %vm2234_vm3 = vcmp.lt.s32.totalorder %v8481_v48, 1  ;;  %v2243_v28 = vsel %vm2237_vm0, %v2230_v23, 920167782  ;;  %vm2236_vm4 = vcmp.lt.s32.totalorder %v8481_v48, 3 }
 0x190   :  { %vm7131_vm2 = vcmp.lt.s32.totalorder %v7130_v41, 0  ;;  %v2242_v1 = vsel %vm2234_vm3, %v2221_v6, %v2224_v62  ;;  %v2247_v63 = vsel %vm2237_vm0, %v2233_v9, 1326507024  ;;  %vm8523_vm5 = vcmp.le.f32.partialorder %v554_v24, 0.7853982 }
 0x191   :  { %v625_v17 = vsel %vm7131_vm2, 0, %v7130_v41  ;;  %v2244_v52 = vsel %vm2236_vm4, %v2227_v58, %v2243_v28  ;;  %v2246_v13 = vsel %vm2234_vm3, %v2224_v62, %v2227_v58  ;;  %vm3956_vm7 = vcmp.lt.s32.totalorder %v8464_v25, 2 }
 0x192   :  { %v626_v35 = vsub.s32 32, %v625_v17  ;;  %v630_v42 = vsub.s32 4294967266, %v625_v17  ;;  %v640_v15 = vsub.s32 4, %v8453_v54  ;;  %vm2235_vm8 = vcmp.lt.s32.totalorder %v8481_v48, 2 }
 0x193   :  { %v2248_v24 = vsel %vm2236_vm4, %v2230_v23, %v2247_v63  ;;  %v7132_v43 = vadd.s32 4294967169, %v661_v31  ;;  %vm543_vm10 = vweird.f32 %v7824_v33  ;;  %v627_v20 = vshll.u32 %v8460_v19, %v625_v17 }
 0x194   :  { %v628_v45 = vshrl.u32 %v610_v26, %v626_v35  ;;  %v631_v60 = vadd.s32 127, %v630_v42  ;;  %v2239_v30 = vsel %vm2237_vm0, %v2227_v58, 2102212464  ;;  %v551_v18 = vsel %vm549_vm11, %v550_v16, %v8492_v0 }
 0x195   :  { %v2218_v32 = vshrl.u32 %v7719_v51, %v8458_v14  ;;  %v2245_v7 = vsel %vm2235_vm8, %v2242_v1, %v2244_v52  ;;  %v2249_v2 = vsel %vm2235_vm8, %v2246_v13, %v2248_v24  ;;  %v548_v19 = vsel %vm546_vm13, %v8485_v27, %v547_v12 }
 0x196   :  { %v2184_v26 = vsel %vm2101_vm6, %v2183_v5, %v2182_v29  ;;  %v629_v50 = vor.u32 %v628_v45, %v627_v20  ;;  %v632_v23 = vshll.u32 %v631_v60, 23  ;;  %v2240_v14 = vsel %vm2236_vm4, %v2224_v62, %v2239_v30 }
 0x197   :  { %v2238_v41 = vsel %vm2234_vm3, %v2218_v32, %v2221_v6  ;;  %v8559_v58 = vmul.u32.u64.low %v8500_v3, %v2249_v2  ;;  %v8560_v9 = vmul.u32.u64.high %v8500_v3, %v2249_v2, %v8559_v58  ;;  %v641_v28 = vsel %vm556_vm14, %v640_v15, %v8453_v54 }
 0x198   :  { %v633_v31 = vor.u32 4788187, %v632_v23  ;;  %v8566_v17 = vmul.u32.u64.low %v8500_v3, %v2245_v7  ;;  %v8567_v29 = vmul.u32.u64.high %v8500_v3, %v2245_v7, %v8566_v17  ;;  %v552_v6 = vsel %vm545_vm12, %v548_v19, %v551_v18  ;;  %v8611_v23 = vpop.f32.mrb[7].mxu0 }
 0x199   :  { %v3959_v62 = vsel %vm3957_vm15, %v8485_v27, %v547_v12  ;;  %v3962_v5 = vsel %vm3960_vm1, %v550_v16, %v8492_v0  ;;  %v667_v1 = vadd.s32 1, %v7132_v43  ;;  %v2187_v54 = vsel %vm8445_vm9, %v7826_v34, %v2184_v26 }
 0x19a   :  { %v634_v63 = vand.u32 2147483647, %v633_v31  ;;  %v636_v35 = vcvt.s32.f32 %v629_v50  ;;  %v2241_v42 = vsel %vm2235_vm8, %v2238_v41, %v2240_v14  ;;  %v643_v40 = vsel %vm8523_vm5, 0, %v641_v28 }
 0x19b   :  { %vm2259_vm6 = vc.u32 %v8560_v9, %v8566_v17  ;;  %vm668_vm11 = vcmp.gt.s32.totalorder %v667_v1, 0  ;;  %v2308_v27 = vand.u32 2139095040, %v8014_v11  ;;  %v3963_v0 = vsel %vm3956_vm7, %v3959_v62, %v3962_v5 }
 0x19c   :  { %v637_v12 = vmul.f32 %v636_v35, %v634_v63  ;;  %v2260_v38 = vadd.s32 1, %v8567_v29  ;;  %v669_v16 = vsel %vm668_vm11, %v667_v1, 0  ;;  %v8593_v48 = vsel %vm543_vm10, nan, %v552_v6 }
 0x19d   :  { %7610 = vcosq.f32 %v2187_v54  ;;  %v2257_v52 = vmul.u32 %v8500_v3, %v2241_v42  ;;  %v671_v13 = vand.u32 31, %v669_v16  ;;  %v8596_v24 = vand.u32 3, %v643_v40 }
 0x19e   :  { %v638_v15 = vxor.u32 2147483648, %v637_v12  ;;  %v4058_v43 = vadd.s32 3, %v643_v40  ;;  %v2261_v20 = vsel %vm2259_vm6, %v2260_v38, %v8567_v29  ;;  %v8599_v45 = vshrl.u32 %v669_v16, 5 }
 0x19f   :  { %v2262_v25 = vadd.s32 %v2261_v20, %v2257_v52  ;;  %v672_v60 = vsub.s32 32, %v671_v13  ;;  %v2309_v30 = vshrl.u32 %v2308_v27, 23  ;;  %v674_v32 = vshll.u32 %v7719_v51, %v671_v13 }
 0x1a0   :  { %v639_v18 = vsel %vm556_vm14, %v638_v15, %v637_v12  ;;  %v677_v7 = vshll.u32 %v7720_v55, %v671_v13  ;;  %v680_v3 = vshll.u32 %v7721_v57, %v671_v13  ;;  %v683_v50 = vshll.u32 %v7722_v59, %v671_v13 }
 0x1a1   :  { %v642_v2 = vsel %vm8523_vm5, %v7828_v37, %v639_v18  ;;  %v2263_v19 = vadd.s32 536870912, %v2262_v25  ;;  %v675_v26 = vshrl.u32 %v7720_v55, %v672_v60  ;;  %v678_v41 = vshrl.u32 %v7721_v57, %v672_v60 }
 0x1a2   :  { %7612 = vcosq.f32 %v642_v2  ;;  %v681_v14 = vshrl.u32 %v7722_v59, %v672_v60  ;;  %v684_v58 = vshrl.u32 %v7723_v61, %v672_v60  ;;  %v687_v39 = vshrl.u32 %v7724_v4, %v672_v60 }
 0x1a3   :  { %7614 = vsinq.f32 %v642_v2  ;;  %v8616_v31 = vshrl.u32 %v2263_v19, 30  ;;  %v676_v28 = vor.u32 %v675_v26, %v674_v32  ;;  %v679_v29 = vor.u32 %v678_v41, %v677_v7 }
 0x1a4   :  { %v682_v6 = vor.u32 %v681_v14, %v680_v3  ;;  %v685_v62 = vor.u32 %v684_v58, %v683_v50  ;;  %v686_v5 = vshll.u32 %v7723_v61, %v671_v13  ;;  %v8622_v1 = vsel %vm543_vm10, nan, %v3963_v0 }
 0x1a5   :  { %7616 = vsinq.f32 %v2187_v54  ;;  %v2265_v63 = vshll.u32 %v8616_v31, 30  ;;  %v665_v35 = vor.u32 8388608, %v8508_v22  ;;  %vm689_vm9 = vcmp.lt.s32.totalorder %v8599_v45, 1 }
 0x1a6   :  { %v688_v42 = vor.u32 %v687_v39, %v686_v5  ;;  %vm692_vm13 = vcmp.lt.s32.totalorder %v8599_v45, 4  ;;  %v7196_v40 = vadd.s32 4294967169, %v2309_v30  ;;  %vm691_vm14 = vcmp.lt.s32.totalorder %v8599_v45, 3 }
 0x1a7   :  { %v8628_v27 = vpop.eup %7610  ;;  %v8630_v12 = vsub.s32 %v2262_v25, %v2265_v63  ;;  %v697_v33 = vsel %vm689_vm9, %v676_v28, %v679_v29  ;;  %v698_v54 = vsel %vm692_vm13, %v685_v62, 920167782  ;;  %vm648_vm0 = vcmp.lt.s32.totalorder %v8596_v24, 2 }
 0x1a8   :  { %vm649_vm12 = vcmp.eq.s32.totalorder %v8596_v24, 0  ;;  %v4059_v22 = vand.u32 3, %v4058_v43  ;;  %v694_v0 = vsel %vm692_vm13, %v682_v6, 2102212464  ;;  %v699_v38 = vsel %vm691_vm14, %v682_v6, %v698_v54 }
 0x1a9   :  { %vm646_vm15 = vweird.f32 %v7828_v37  ;;  %v2268_v16 = vsub.s32 0, %v8630_v12  ;;  %v673_v52 = vshrl.u32 %v7719_v51, %v672_v60  ;;  %vm690_vm1 = vcmp.lt.s32.totalorder %v8599_v45, 2 }
 0x1aa   :  { %v705_v13 = vshll.u32 %v665_v35, 8  ;;  %v700_v15 = vsel %vm690_vm1, %v697_v33, %v699_v38  ;;  %v701_v43 = vsel %vm689_vm9, %v679_v29, %v682_v6  ;;  %v702_v20 = vsel %vm692_vm13, %v688_v42, 1326507024 }
 0x1ab   :  { %v2315_v25 = vadd.s32 1, %v7196_v40  ;;  %vm652_vm2 = vcmp.eq.s32.totalorder %v8596_v24, 2  ;;  %v7193_v30 = vmin.u32 %v2268_v16, %v8630_v12  ;;  %v693_v60 = vsel %vm689_vm9, %v673_v52, %v676_v28 }
 0x1ac   :  { %v695_v18 = vsel %vm691_vm14, %v679_v29, %v694_v0  ;;  %v7613_v32 = vpop.eup %7612  ;;  %vm4060_vm3 = vcmp.lt.s32.totalorder %v4059_v22, 2  ;;  %v703_v7 = vsel %vm691_vm14, %v685_v62, %v702_v20  ;;  %vm4061_vm5 = vcmp.eq.s32.totalorder %v4059_v22, 0 }
 0x1ad   :  { %v8661_v3 = vmul.u32.u64.low %v705_v13, %v700_v15  ;;  %v8662_v2 = vmul.u32.u64.high %v705_v13, %v700_v15, %v8661_v3  ;;  %v7615_v19 = vpop.eup %7614  ;;  %v653_v26 = vxor.u32 2147483648, %v7613_v32  ;;  %v2270_v50 = vclz %v7193_v30 }
 0x1ae   :  { %v704_v41 = vsel %vm690_vm1, %v701_v43, %v703_v7  ;;  %vm2316_vm4 = vcmp.gt.s32.totalorder %v2315_v25, 0  ;;  %v650_v14 = vxor.u32 2147483648, %v7615_v19  ;;  %vm4064_vm7 = vcmp.eq.s32.totalorder %v4059_v22, 2 }
 0x1af   :  { %v696_v58 = vsel %vm690_vm1, %v693_v60, %v695_v18  ;;  %v8669_v28 = vpop.eup %7616  ;;  %v654_v39 = vsel %vm652_vm2, %v653_v26, %v7615_v19  ;;  %v4066_v29 = vsel %vm4064_vm7, %v653_v26, %v7615_v19  ;;  %v7194_v6 = vadd.s32 4294967294, %v2270_v50 }
 0x1b0   :  { %v2317_v62 = vsel %vm2316_vm4, %v2315_v25, 0  ;;  %v651_v5 = vsel %vm649_vm12, %v7613_v32, %v650_v14  ;;  %v4063_v63 = vsel %vm4061_vm5, %v7613_v32, %v650_v14  ;;  %v715_v33 = vadd.s32 1, %v8662_v2 }
 0x1b1   :  { %v8675_v35 = vmul.u32.u64.low %v705_v13, %v704_v41  ;;  %v8676_v42 = vmul.u32.u64.high %v705_v13, %v704_v41, %v8675_v35  ;;  %v655_v40 = vsel %vm648_vm0, %v651_v5, %v654_v39  ;;  %v4067_v45 = vsel %vm4060_vm3, %v4063_v63, %v4066_v29 }
 0x1b2   :  { %vm7195_vm8 = vcmp.lt.s32.totalorder %v7194_v6, 0  ;;  %v656_v54 = vsel %vm646_vm15, nan, %v655_v40  ;;  %v4068_v0 = vsel %vm646_vm15, nan, %v4067_v45  ;;  %v2305_v16 = vand.u32 2147483647, %v8014_v11 }
 0x1b3   :  { %v2273_v38 = vsel %vm7195_vm8, 0, %v7194_v6  ;;  %v7421_v52 = vpack.c.bf16 %v656_v54, %v8593_v48  ;;  %v7437_v15 = vpack.c.bf16 %v4068_v0, %v8622_v1  ;;  %v2258_v24 = vadd.s32 %v8566_v17, %v8560_v9 }
 0x1b4   :  { %v2274_v22 = vsub.s32 32, %v2273_v38  ;;  %vm2197_vm10 = vcmp.eq.s32.totalorder %v8466_v8, 2  ;;  %vm5624_vm6 = vcmp.eq.s32.totalorder %v8468_v44, 2  ;;  %v2278_v43 = vsub.s32 4294967266, %v2273_v38 }
 0x1b5   :  { %v712_v20 = vmul.u32 %v705_v13, %v696_v58  ;;  %vm714_vm11 = vc.u32 %v8676_v42, %v8661_v3  ;;  %v2319_v37 = vand.u32 31, %v2317_v62  ;;  %v2198_v25 = vxor.u32 2147483648, %v8628_v27  ;;  %3638 = vst [vmem:[%s11184_s2 + $0x8] sm:$0xff] %v7421_v52  ;;  %7405 = vst [vmem:[%s11184_s2 + $0x88] sm:$0xff] %v7437_v15 }
 0x1b6   :  { %vm2204_vm9 = vcmp.lt.s32.totalorder %v7849_v10, 0  ;;  %v2275_v9 = vshll.u32 %v8630_v12, %v2273_v38  ;;  %v2276_v17 = vshrl.u32 %v2258_v24, %v2274_v22  ;;  %v716_v48 = vsel %vm714_vm11, %v715_v33, %v8662_v2 }
 0x1b7   :  { %vm2194_vm13 = vcmp.eq.s32.totalorder %v8466_v8, 0  ;;  %v2195_v1 = vxor.u32 2147483648, %v8669_v28  ;;  %v2279_v13 = vadd.s32 127, %v2278_v43  ;;  %v717_v30 = vadd.s32 %v716_v48, %v712_v20  ;;  %v8738_v43 = vpop.f32.mrb[7].mxu1 }
 0x1b8   :  { %v2320_v60 = vsub.s32 32, %v2319_v37  ;;  %v2277_v18 = vor.u32 %v2276_v17, %v2275_v9  ;;  %v2288_v32 = vsub.s32 4, %v8616_v31  ;;  %v2312_v7 = vand.u32 8388607, %v2305_v16 }
 0x1b9   :  { %v8710_v19 = vshrl.u32 %v2317_v62, 5  ;;  %vm5621_vm14 = vcmp.eq.s32.totalorder %v8468_v44, 0  ;;  %vm8715_vm0 = vcmp.le.f32.partialorder %v2202_v36, 0.7853982  ;;  %v2280_v2 = vshll.u32 %v2279_v13, 23 }
 0x1ba   :  { %v718_v26 = vadd.s32 536870912, %v717_v30  ;;  %v2322_v50 = vshll.u32 %v7719_v51, %v2319_v37  ;;  %v2323_v41 = vshrl.u32 %v7720_v55, %v2320_v60  ;;  %v2326_v14 = vshrl.u32 %v7721_v57, %v2320_v60 }
 0x1bb   :  { %v2329_v58 = vshrl.u32 %v7722_v59, %v2320_v60  ;;  %v2331_v39 = vshll.u32 %v7722_v59, %v2319_v37  ;;  %v2332_v29 = vshrl.u32 %v7723_v61, %v2320_v60  ;;  %v2281_v6 = vor.u32 4788187, %v2280_v2 }
 0x1bc   :  { %v8725_v62 = vshrl.u32 %v718_v26, 30  ;;  %v2325_v36 = vshll.u32 %v7720_v55, %v2319_v37  ;;  %v2328_v5 = vshll.u32 %v7721_v57, %v2319_v37  ;;  %v2284_v63 = vcvt.s32.f32 %v2277_v18 }
 0x1bd   :  { %v2333_v35 = vor.u32 %v2332_v29, %v2331_v39  ;;  %v2334_v40 = vshll.u32 %v7723_v61, %v2319_v37  ;;  %v2335_v45 = vshrl.u32 %v7724_v4, %v2320_v60  ;;  %v2282_v33 = vand.u32 2147483647, %v2281_v6 }
 0x1be   :  { %v720_v54 = vshll.u32 %v8725_v62, 30  ;;  %v2324_v0 = vor.u32 %v2323_v41, %v2322_v50  ;;  %v2327_v38 = vor.u32 %v2326_v14, %v2325_v36  ;;  %v2199_v52 = vsel %vm2197_vm10, %v2198_v25, %v8669_v28 }
 0x1bf   :  { %v5626_v15 = vsel %vm5624_vm6, %v2198_v25, %v8669_v28  ;;  %v2330_v24 = vor.u32 %v2329_v58, %v2328_v5  ;;  %v2336_v22 = vor.u32 %v2335_v45, %v2334_v40  ;;  %v2285_v20 = vmul.f32 %v2284_v63, %v2282_v33 }
 0x1c0   :  { %v2289_v37 = vsel %vm2204_vm9, %v2288_v32, %v8616_v31  ;;  %v8743_v9 = vsub.s32 %v717_v30, %v720_v54  ;;  %vm2340_vm12 = vcmp.lt.s32.totalorder %v8710_v19, 4  ;;  %v2196_v17 = vsel %vm2194_vm13, %v8628_v27, %v2195_v1 }
 0x1c1   :  { %v2313_v48 = vor.u32 8388608, %v2312_v7  ;;  %vm2337_vm15 = vcmp.lt.s32.totalorder %v8710_v19, 1  ;;  %v2346_v28 = vsel %vm2340_vm12, %v2333_v35, 920167782  ;;  %v2286_v25 = vxor.u32 2147483648, %v2285_v20 }
 0x1c2   :  { %v723_v13 = vsub.s32 0, %v8743_v9  ;;  %vm2339_vm1 = vcmp.lt.s32.totalorder %v8710_v19, 3  ;;  %v2345_v31 = vsel %vm2337_vm15, %v2324_v0, %v2327_v38  ;;  %v5623_v30 = vsel %vm5621_vm14, %v8628_v27, %v2195_v1 }
 0x1c3   :  { %v2291_v18 = vsel %vm8715_vm0, 0, %v2289_v37  ;;  %v2347_v32 = vsel %vm2339_vm1, %v2330_v24, %v2346_v28  ;;  %v2350_v7 = vsel %vm2340_vm12, %v2336_v22, 1326507024  ;;  %v2287_v2 = vsel %vm2204_vm9, %v2286_v25, %v2285_v20 }
 0x1c4   :  { %v7133_v26 = vmin.u32 %v723_v13, %v8743_v9  ;;  %vm2338_vm2 = vcmp.lt.s32.totalorder %v8710_v19, 2  ;;  %v2342_v50 = vsel %vm2340_vm12, %v2330_v24, 2102212464  ;;  %v2290_v27 = vsel %vm8715_vm0, %v7849_v10, %v2287_v2 }
 0x1c5   :  { %v2321_v1 = vshrl.u32 %v7719_v51, %v2320_v60  ;;  %v2348_v41 = vsel %vm2338_vm2, %v2345_v31, %v2347_v32  ;;  %v2349_v14 = vsel %vm2337_vm15, %v2327_v38, %v2330_v24  ;;  %7618 = vcosq.f32 %v2290_v27 }
 0x1c6   :  { %v725_v58 = vclz %v7133_v26  ;;  %v2351_v39 = vsel %vm2339_vm1, %v2333_v35, %v2350_v7  ;;  %v2353_v29 = vshll.u32 %v2313_v48, 8  ;;  %7620 = vsinq.f32 %v2290_v27 }
 0x1c7   :  { %v5722_v6 = vadd.s32 3, %v2291_v18  ;;  %v2341_v12 = vsel %vm2337_vm15, %v2321_v1, %v2324_v0  ;;  %v2343_v60 = vsel %vm2339_vm1, %v2327_v38, %v2342_v50  ;;  %v2352_v5 = vsel %vm2338_vm2, %v2349_v14, %v2351_v39 }
 0x1c8   :  { %v7134_v36 = vadd.s32 4294967294, %v725_v58  ;;  %v8787_v63 = vmul.u32.u64.low %v2353_v29, %v2348_v41  ;;  %v8788_v40 = vmul.u32.u64.high %v2353_v29, %v2348_v41, %v8787_v63  ;;  %vm2193_vm3 = vcmp.lt.s32.totalorder %v8466_v8, 2 }
 0x1c9   :  { %v8792_v35 = vmul.u32.u64.low %v2353_v29, %v2352_v5  ;;  %v8793_v45 = vmul.u32.u64.high %v2353_v29, %v2352_v5, %v8792_v35  ;;  %v763_v33 = vand.u32 2139095040, %v8191_v49  ;;  %v2200_v54 = vsel %vm2193_vm3, %v2196_v17, %v2199_v52 }
 0x1ca   :  { %vm5620_vm4 = vcmp.lt.s32.totalorder %v8468_v44, 2  ;;  %vm7135_vm5 = vcmp.lt.s32.totalorder %v7134_v36, 0  ;;  %v2344_v0 = vsel %vm2338_vm2, %v2341_v12, %v2343_v60  ;;  %v2295_v24 = vand.u32 3, %v2291_v18 }
 0x1cb   :  { %v5627_v38 = vsel %vm5620_vm4, %v5623_v30, %v5626_v15  ;;  %v728_v22 = vsel %vm7135_vm5, 0, %v7134_v36  ;;  %v764_v20 = vshrl.u32 %v763_v33, 23  ;;  %vm2191_vm7 = vweird.f32 %v7826_v34 }
 0x1cc   :  { %v5723_v37 = vand.u32 3, %v5722_v6  ;;  %v2363_v8 = vadd.s32 1, %v8788_v40  ;;  %v733_v48 = vsub.s32 4294967266, %v728_v22  ;;  %v2360_v28 = vmul.u32 %v2353_v29, %v2344_v0 }
 0x1cd   :  { %vm2362_vm8 = vc.u32 %v8793_v45, %v8787_v63  ;;  %v7136_v52 = vadd.s32 4294967169, %v764_v20  ;;  %v2201_v44 = vsel %vm2191_vm7, nan, %v2200_v54  ;;  %v5628_v17 = vsel %vm2191_vm7, nan, %v5627_v38 }
 0x1ce   :  { %vm2294_vm10 = vweird.f32 %v7849_v10  ;;  %v2364_v19 = vsel %vm2362_vm8, %v2363_v8, %v8788_v40  ;;  %vm2296_vm6 = vcmp.lt.s32.totalorder %v2295_v24, 2  ;;  %v760_v25 = vand.u32 2147483647, %v8191_v49 }
 0x1cf   :  { %v2365_v15 = vadd.s32 %v2364_v19, %v2360_v28  ;;  %v770_v34 = vadd.s32 1, %v7136_v52  ;;  %v7619_v13 = vpop.eup %7618  ;;  %vm2297_vm11 = vcmp.eq.s32.totalorder %v2295_v24, 0  ;;  %vm2300_vm9 = vcmp.eq.s32.totalorder %v2295_v24, 2 }
 0x1d0   :  { %vm5724_vm13 = vcmp.lt.s32.totalorder %v5723_v37, 2  ;;  %vm5725_vm14 = vcmp.eq.s32.totalorder %v5723_v37, 0  ;;  %v7621_v31 = vpop.eup %7620  ;;  %v2301_v30 = vxor.u32 2147483648, %v7619_v13  ;;  %v734_v18 = vadd.s32 127, %v733_v48  ;;  %v8829_v48 = vpop.f32.mrb[8].mxu0 }
 0x1d1   :  { %v2366_v32 = vadd.s32 536870912, %v2365_v15  ;;  %vm771_vm0 = vcmp.gt.s32.totalorder %v770_v34, 0  ;;  %v2298_v7 = vxor.u32 2147483648, %v7621_v31  ;;  %vm5728_vm12 = vcmp.eq.s32.totalorder %v5723_v37, 2 }
 0x1d2   :  { %v729_v2 = vsub.s32 32, %v728_v22  ;;  %v772_v26 = vsel %vm771_vm0, %v770_v34, 0  ;;  %v2302_v50 = vsel %vm2300_vm9, %v2301_v30, %v7621_v31  ;;  %v5730_v27 = vsel %vm5728_vm12, %v2301_v30, %v7621_v31 }
 0x1d3   :  { %v713_v1 = vadd.s32 %v8661_v3, %v8676_v42  ;;  %v8808_v41 = vshrl.u32 %v2366_v32, 30  ;;  %v2299_v14 = vsel %vm2297_vm11, %v7619_v13, %v2298_v7  ;;  %v5727_v58 = vsel %vm5725_vm14, %v7619_v13, %v2298_v7 }
 0x1d4   :  { %v767_v39 = vand.u32 8388607, %v760_v25  ;;  %v774_v29 = vand.u32 31, %v772_v26  ;;  %v2303_v6 = vsel %vm2296_vm6, %v2299_v14, %v2302_v50  ;;  %v5731_v12 = vsel %vm5724_vm13, %v5727_v58, %v5730_v27 }
 0x1d5   :  { %v735_v60 = vshll.u32 %v734_v18, 23  ;;  %v2368_v36 = vshll.u32 %v8808_v41, 30  ;;  %v2304_v5 = vsel %vm2294_vm10, nan, %v2303_v6  ;;  %v5732_v3 = vsel %vm2294_vm10, nan, %v5731_v12 }
 0x1d6   :  { %v731_v42 = vshrl.u32 %v713_v1, %v729_v2  ;;  %v775_v40 = vsub.s32 32, %v774_v29  ;;  %v7429_v35 = vpack.c.bf16 %v2304_v5, %v2201_v44  ;;  %v7445_v33 = vpack.c.bf16 %v5732_v3, %v5628_v17 }
 0x1d7   :  { %v2369_v54 = vsub.s32 %v2365_v15, %v2368_v36  ;;  %v730_v0 = vshll.u32 %v8743_v9, %v728_v22  ;;  %v2411_v38 = vand.u32 2139095040, %v8326_v47  ;;  %v736_v24 = vor.u32 4788187, %v735_v60 }
 0x1d8   :  { %3646 = vst [vmem:[%s11184_s2 + $0x48] sm:$0xff] %v7429_v35  ;;  %7413 = vst [vmem:[%s11184_s2 + $0xc8] sm:$0xff] %v7445_v33  ;;  %v768_v37 = vor.u32 8388608, %v767_v39  ;;  %v778_v8 = vshrl.u32 %v7720_v55, %v775_v40  ;;  %v743_v9 = vsub.s32 4, %v8725_v62  ;;  %v781_v28 = vshrl.u32 %v7721_v57, %v775_v40 }
 0x1d9   :  { %v2371_v10 = vsub.s32 0, %v2369_v54  ;;  %v732_v20 = vor.u32 %v731_v42, %v730_v0  ;;  %v2361_v52 = vadd.s32 %v8787_v63, %v8793_v45  ;;  %v8835_v44 = vshrl.u32 %v772_v26, 5 }
 0x1da   :  { %v777_v17 = vshll.u32 %v7719_v51, %v774_v29  ;;  %v2412_v19 = vshrl.u32 %v2411_v38, 23  ;;  %v737_v15 = vand.u32 2147483647, %v736_v24  ;;  %v780_v13 = vshll.u32 %v7720_v55, %v774_v29 }
 0x1db   :  { %v7197_v22 = vmin.u32 %v2371_v10, %v2369_v54  ;;  %v784_v31 = vshrl.u32 %v7722_v59, %v775_v40  ;;  %v739_v30 = vcvt.s32.f32 %v732_v20  ;;  %v783_v32 = vshll.u32 %v7721_v57, %v774_v29 }
 0x1dc   :  { %v779_v18 = vor.u32 %v778_v8, %v777_v17  ;;  %v8841_v7 = vshll.u32 %v768_v37, 8  ;;  %v782_v50 = vor.u32 %v781_v28, %v780_v13  ;;  %v786_v63 = vshll.u32 %v7722_v59, %v774_v29 }
 0x1dd   :  { %v2373_v34 = vclz %v7197_v22  ;;  %v787_v45 = vshrl.u32 %v7723_v61, %v775_v40  ;;  %vm659_vm15 = vcmp.lt.s32.totalorder %v7955_v46, 0  ;;  %v785_v26 = vor.u32 %v784_v31, %v783_v32 }
 0x1de   :  { %v789_v27 = vshll.u32 %v7723_v61, %v774_v29  ;;  %v790_v1 = vshrl.u32 %v7724_v4, %v775_v40  ;;  %v7200_v14 = vadd.s32 4294967169, %v2412_v19  ;;  %v740_v58 = vmul.f32 %v739_v30, %v737_v15 }
 0x1df   :  { %v7198_v2 = vadd.s32 4294967294, %v2373_v34  ;;  %v788_v39 = vor.u32 %v787_v45, %v786_v63  ;;  %vm792_vm2 = vcmp.lt.s32.totalorder %v8835_v44, 1  ;;  %vm793_vm3 = vcmp.lt.s32.totalorder %v8835_v44, 2 }
 0x1e0   :  { %v791_v12 = vor.u32 %v790_v1, %v789_v27  ;;  %vm794_vm4 = vcmp.lt.s32.totalorder %v8835_v44, 3  ;;  %vm795_vm5 = vcmp.lt.s32.totalorder %v8835_v44, 4  ;;  %v800_v29 = vsel %vm792_vm2, %v779_v18, %v782_v50 }
 0x1e1   :  { %vm7199_vm1 = vcmp.lt.s32.totalorder %v7198_v2, 0  ;;  %v801_v3 = vsel %vm795_vm5, %v788_v39, 920167782  ;;  %v804_v42 = vsel %vm792_vm2, %v782_v50, %v785_v26  ;;  %v741_v10 = vxor.u32 2147483648, %v740_v58 }
 0x1e2   :  { %v2376_v6 = vsel %vm7199_vm1, 0, %v7198_v2  ;;  %v805_v35 = vsel %vm795_vm5, %v791_v12, 1326507024  ;;  %v802_v38 = vsel %vm794_vm4, %v785_v26, %v801_v3  ;;  %v776_v20 = vshrl.u32 %v7719_v51, %v775_v40 }
 0x1e3   :  { %v2377_v60 = vsub.s32 32, %v2376_v6  ;;  %v2381_v36 = vsub.s32 4294967266, %v2376_v6  ;;  %v2378_v5 = vshll.u32 %v2369_v54, %v2376_v6  ;;  %v806_v24 = vsel %vm794_vm4, %v788_v39, %v805_v35 }
 0x1e4   :  { %v797_v37 = vsel %vm795_vm5, %v785_v26, 2102212464  ;;  %v807_v54 = vsel %vm793_vm3, %v804_v42, %v806_v24  ;;  %v803_v28 = vsel %vm793_vm3, %v800_v29, %v802_v38  ;;  %vm8867_vm7 = vcmp.le.f32.partialorder %v657_v21, 0.7853982 }
 0x1e5   :  { %v2379_v33 = vshrl.u32 %v2361_v52, %v2377_v60  ;;  %v2382_v0 = vadd.s32 127, %v2381_v36  ;;  %v2418_v52 = vadd.s32 1, %v7200_v14  ;;  %v2391_v19 = vsub.s32 4, %v8808_v41 }
 0x1e6   :  { %v8873_v40 = vmul.u32.u64.low %v8841_v7, %v807_v54  ;;  %v8874_v15 = vmul.u32.u64.high %v8841_v7, %v807_v54, %v8873_v40  ;;  %v744_v34 = vsel %vm659_vm15, %v743_v9, %v8725_v62  ;;  %v796_v31 = vsel %vm792_vm2, %v776_v20, %v779_v18 }
 0x1e7   :  { %v2380_v8 = vor.u32 %v2379_v33, %v2378_v5  ;;  %v2383_v22 = vshll.u32 %v2382_v0, 23  ;;  %v798_v21 = vsel %vm794_vm4, %v782_v50, %v797_v37  ;;  %v742_v30 = vsel %vm659_vm15, %v741_v10, %v740_v58  ;;  %v8926_v0 = vpop.f32.mrb[8].mxu1 }
 0x1e8   :  { %vm2307_vm8 = vcmp.lt.s32.totalorder %v8014_v11, 0  ;;  %v8887_v32 = vmul.u32.u64.low %v8841_v7, %v803_v28  ;;  %v8888_v2 = vmul.u32.u64.high %v8841_v7, %v803_v28, %v8887_v32  ;;  %v2408_v62 = vand.u32 2147483647, %v8326_v47 }
 0x1e9   :  { %v2384_v13 = vor.u32 4788187, %v2383_v22  ;;  %v2387_v45 = vcvt.s32.f32 %v2380_v8  ;;  %vm2419_vm10 = vcmp.gt.s32.totalorder %v2418_v52, 0  ;;  %v746_v9 = vsel %vm8867_vm7, 0, %v744_v34 }
 0x1ea   :  { %v2392_v18 = vsel %vm2307_vm8, %v2391_v19, %v8808_v41  ;;  %v799_v50 = vsel %vm793_vm3, %v796_v31, %v798_v21  ;;  %v745_v26 = vsel %vm8867_vm7, %v7955_v46, %v742_v30  ;;  %vm817_vm6 = vc.u32 %v8874_v15, %v8887_v32 }
 0x1eb   :  { %v2385_v63 = vand.u32 2147483647, %v2384_v13  ;;  %v2420_v1 = vsel %vm2419_vm10, %v2418_v52, 0  ;;  %vm8906_vm11 = vcmp.le.f32.partialorder %v2305_v16, 0.7853982  ;;  %v818_v41 = vadd.s32 1, %v8888_v2 }
 0x1ec   :  { %v2422_v58 = vand.u32 31, %v2420_v1  ;;  %v4162_v44 = vadd.s32 3, %v746_v9  ;;  %v8913_v39 = vsel %vm8906_vm11, 0, %v2392_v18  ;;  %v815_v6 = vmul.u32 %v8841_v7, %v799_v50 }
 0x1ed   :  { %v2388_v27 = vmul.f32 %v2387_v45, %v2385_v63  ;;  %v2415_v12 = vand.u32 8388607, %v2408_v62  ;;  %7622 = vcosq.f32 %v745_v26  ;;  %v819_v16 = vsel %vm817_vm6, %v818_v41, %v8888_v2 }
 0x1ee   :  { %v2423_v36 = vsub.s32 32, %v2422_v58  ;;  %7624 = vsinq.f32 %v745_v26  ;;  %v820_v29 = vadd.s32 %v819_v16, %v815_v6  ;;  %v8919_v5 = vshrl.u32 %v2420_v1, 5 }
 0x1ef   :  { %v2389_v60 = vxor.u32 2147483648, %v2388_v27  ;;  %v2425_v3 = vshll.u32 %v7719_v51, %v2422_v58  ;;  %v2428_v35 = vshll.u32 %v7720_v55, %v2422_v58  ;;  %v2431_v33 = vshll.u32 %v7721_v57, %v2422_v58 }
 0x1f0   :  { %v2426_v42 = vshrl.u32 %v7720_v55, %v2423_v36  ;;  %v2429_v7 = vshrl.u32 %v7721_v57, %v2423_v36  ;;  %v821_v38 = vadd.s32 536870912, %v820_v29  ;;  %v2432_v24 = vshrl.u32 %v7722_v59, %v2423_v36 }
 0x1f1   :  { %v2434_v10 = vshll.u32 %v7722_v59, %v2422_v58  ;;  %v2435_v20 = vshrl.u32 %v7723_v61, %v2423_v36  ;;  %v2390_v37 = vsel %vm2307_vm8, %v2389_v60, %v2388_v27  ;;  %v2437_v22 = vshll.u32 %v7723_v61, %v2422_v58 }
 0x1f2   :  { %v2427_v54 = vor.u32 %v2426_v42, %v2425_v3  ;;  %v2430_v8 = vor.u32 %v2429_v7, %v2428_v35  ;;  %v822_v28 = vshrl.u32 %v821_v38, 30  ;;  %v2433_v52 = vor.u32 %v2432_v24, %v2431_v33 }
 0x1f3   :  { %v2436_v17 = vor.u32 %v2435_v20, %v2434_v10  ;;  %v2438_v19 = vshrl.u32 %v7724_v4, %v2423_v36  ;;  %v8935_v40 = vand.u32 3, %v746_v9  ;;  %v8937_v34 = vand.u32 3, %v4162_v44 }
 0x1f4   :  { %v5826_v13 = vadd.s32 3, %v8913_v39  ;;  %v2416_v31 = vor.u32 8388608, %v2415_v12  ;;  %v823_v21 = vshll.u32 %v822_v28, 30  ;;  %vm2440_vm9 = vcmp.lt.s32.totalorder %v8919_v5, 1 }
 0x1f5   :  { %v2439_v30 = vor.u32 %v2438_v19, %v2437_v22  ;;  %vm2443_vm13 = vcmp.lt.s32.totalorder %v8919_v5, 4  ;;  %v2393_v2 = vsel %vm8906_vm11, %v8014_v11, %v2390_v37  ;;  %vm2442_vm14 = vcmp.lt.s32.totalorder %v8919_v5, 3 }
 0x1f6   :  { %v2448_v63 = vsel %vm2440_vm9, %v2427_v54, %v2430_v8  ;;  %v2449_v45 = vsel %vm2443_vm13, %v2436_v17, 920167782  ;;  %vm762_vm0 = vcmp.lt.s32.totalorder %v8191_v49, 0  ;;  %v8951_v9 = vsub.s32 %v820_v29, %v823_v21 }
 0x1f7   :  { %vm2441_vm12 = vcmp.lt.s32.totalorder %v8919_v5, 2  ;;  %v2450_v18 = vsel %vm2442_vm14, %v2433_v52, %v2449_v45  ;;  %v2452_v50 = vsel %vm2440_vm9, %v2430_v8, %v2433_v52  ;;  %v7623_v26 = vpop.eup %7622  ;;  %vm752_vm15 = vcmp.eq.s32.totalorder %v8935_v40, 0 }
 0x1f8   :  { %v2451_v27 = vsel %vm2441_vm12, %v2448_v63, %v2450_v18  ;;  %v2453_v1 = vsel %vm2443_vm13, %v2439_v30, 1326507024  ;;  %v2456_v14 = vshll.u32 %v2416_v31, 8  ;;  %v866_v41 = vand.u32 2139095040, %v8400_v56  ;;  %v7625_v58 = vpop.eup %7624 }
 0x1f9   :  { %v826_v44 = vsub.s32 0, %v8951_v9  ;;  %v2424_v6 = vshrl.u32 %v7719_v51, %v2423_v36  ;;  %v2445_v12 = vsel %vm2443_vm13, %v2433_v52, 2102212464  ;;  %v2454_v60 = vsel %vm2442_vm14, %v2436_v17, %v2453_v1 }
 0x1fa   :  { %7626 = vcosq.f32 %v2393_v2  ;;  %vm8972_vm1 = vcmp.le.f32.partialorder %v760_v25, 0.7853982  ;;  %v2455_v29 = vsel %vm2441_vm12, %v2452_v50, %v2454_v60  ;;  %vm751_vm2 = vcmp.lt.s32.totalorder %v8935_v40, 2 }
 0x1fb   :  { %v8978_v3 = vmul.u32.u64.low %v2456_v14, %v2451_v27  ;;  %v8979_v42 = vmul.u32.u64.high %v2456_v14, %v2451_v27, %v8978_v3  ;;  %v756_v36 = vxor.u32 2147483648, %v7623_v26  ;;  %7628 = vsinq.f32 %v2393_v2 }
 0x1fc   :  { %v7137_v35 = vmin.u32 %v826_v44, %v8951_v9  ;;  %v846_v7 = vsub.s32 4, %v822_v28  ;;  %v2444_v25 = vsel %vm2440_vm9, %v2424_v6, %v2427_v54  ;;  %v2446_v33 = vsel %vm2442_vm14, %v2430_v8, %v2445_v12 }
 0x1fd   :  { %v8988_v38 = vmul.u32.u64.low %v2456_v14, %v2455_v29  ;;  %v8989_v24 = vmul.u32.u64.high %v2456_v14, %v2455_v29, %v8988_v38  ;;  %v753_v10 = vxor.u32 2147483648, %v7625_v58  ;;  %vm755_vm3 = vcmp.eq.s32.totalorder %v8935_v40, 2 }
 0x1fe   :  { %vm4164_vm4 = vcmp.lt.s32.totalorder %v8937_v34, 2  ;;  %v828_v20 = vclz %v7137_v35  ;;  %vm4165_vm5 = vcmp.eq.s32.totalorder %v8937_v34, 0  ;;  %vm4168_vm7 = vcmp.eq.s32.totalorder %v8937_v34, 2 }
 0x1ff   :  { %v8996_v37 = vand.u32 3, %v8913_v39  ;;  %v867_v54 = vshrl.u32 %v866_v41, 23  ;;  %vm749_vm8 = vweird.f32 %v7955_v46  ;;  %v8999_v8 = vand.u32 3, %v5826_v13 }
 0x200   :  { %v7138_v22 = vadd.s32 4294967294, %v828_v20  ;;  %v2447_v52 = vsel %vm2441_vm12, %v2444_v25, %v2446_v33  ;;  %v863_v17 = vand.u32 2147483647, %v8400_v56  ;;  %v757_v19 = vsel %vm755_vm3, %v756_v36, %v7625_v58 }
 0x201   :  { %v4170_v31 = vsel %vm4168_vm7, %v756_v36, %v7625_v58  ;;  %v847_v21 = vsel %vm762_vm0, %v846_v7, %v822_v28  ;;  %vm2465_vm10 = vc.u32 %v8989_v24, %v8978_v3  ;;  %v754_v39 = vsel %vm752_vm15, %v7623_v26, %v753_v10 }
 0x202   :  { %v4167_v30 = vsel %vm4165_vm5, %v7623_v26, %v753_v10  ;;  %vm7139_vm6 = vcmp.lt.s32.totalorder %v7138_v22, 0  ;;  %v2466_v13 = vadd.s32 1, %v8979_v42  ;;  %vm2403_vm11 = vcmp.eq.s32.totalorder %v8996_v37, 2 }
 0x203   :  { %v816_v5 = vadd.s32 %v8887_v32, %v8874_v15  ;;  %v831_v2 = vsel %vm7139_vm6, 0, %v7138_v22  ;;  %v2463_v63 = vmul.u32 %v2456_v14, %v2447_v52  ;;  %v7140_v45 = vadd.s32 4294967169, %v867_v54 }
 0x204   :  { %vm2400_vm9 = vcmp.eq.s32.totalorder %v8996_v37, 0  ;;  %v832_v28 = vsub.s32 32, %v831_v2  ;;  %v836_v18 = vsub.s32 4294967266, %v831_v2  ;;  %v849_v50 = vsel %vm8972_vm1, 0, %v847_v21  ;;  %v7627_v27 = vpop.eup %7626 }
 0x205   :  { %v2467_v26 = vsel %vm2465_vm10, %v2466_v13, %v8979_v42  ;;  %v758_v1 = vsel %vm751_vm2, %v754_v39, %v757_v19  ;;  %vm5829_vm13 = vcmp.eq.s32.totalorder %v8999_v8, 0  ;;  %vm5832_vm14 = vcmp.eq.s32.totalorder %v8999_v8, 2  ;;  %v7629_v14 = vpop.eup %7628 }
 0x206   :  { %v2468_v15 = vadd.s32 %v2467_v26, %v2463_v63  ;;  %v873_v32 = vadd.s32 1, %v7140_v45  ;;  %v4171_v41 = vsel %vm4164_vm4, %v4167_v30, %v4170_v31  ;;  %v833_v58 = vshll.u32 %v8951_v9, %v831_v2  ;;  %v9044_v31 = vpop.f32.mrb[9].mxu0 }
 0x207   :  { %v834_v44 = vshrl.u32 %v816_v5, %v832_v28  ;;  %v837_v6 = vadd.s32 127, %v836_v18  ;;  %v4266_v12 = vadd.s32 3, %v849_v50  ;;  %v870_v40 = vand.u32 8388607, %v863_v17 }
 0x208   :  { %v2469_v60 = vadd.s32 536870912, %v2468_v15  ;;  %vm874_vm12 = vcmp.gt.s32.totalorder %v873_v32, 0  ;;  %v2404_v29 = vxor.u32 2147483648, %v7627_v27  ;;  %v9029_v7 = vsel %vm749_vm8, nan, %v758_v1 }
 0x209   :  { %v835_v42 = vor.u32 %v834_v44, %v833_v58  ;;  %v838_v36 = vshll.u32 %v837_v6, 23  ;;  %v875_v35 = vsel %vm874_vm12, %v873_v32, 0  ;;  %v2401_v34 = vxor.u32 2147483648, %v7629_v14 }
 0x20a   :  { %v9031_v25 = vshrl.u32 %v2469_v60, 30  ;;  %v877_v9 = vand.u32 31, %v875_v35  ;;  %v9035_v33 = vsel %vm749_vm8, nan, %v4171_v41  ;;  %v9037_v10 = vand.u32 3, %v849_v50 }
 0x20b   :  { %v839_v38 = vor.u32 4788187, %v838_v36  ;;  %v2511_v20 = vand.u32 2147483647, %v8472_v53  ;;  %v9040_v54 = vand.u32 3, %v4266_v12  ;;  %v2514_v19 = vand.u32 2139095040, %v8472_v53 }
 0x20c   :  { %v2471_v22 = vshll.u32 %v9031_v25, 30  ;;  %v878_v52 = vsub.s32 32, %v877_v9  ;;  %v9048_v21 = vsel %vm2403_vm11, %v2404_v29, %v7629_v14  ;;  %v842_v39 = vcvt.s32.f32 %v835_v42 }
 0x20d   :  { %v840_v46 = vand.u32 2147483647, %v839_v38  ;;  %v871_v30 = vor.u32 8388608, %v870_v40  ;;  %v9052_v13 = vsel %vm2400_vm9, %v7627_v27, %v2401_v34  ;;  %v9056_v5 = vsel %vm5832_vm14, %v2404_v29, %v7629_v14 }
 0x20e   :  { %v9058_v2 = vsub.s32 %v2468_v15, %v2471_v22  ;;  %v881_v63 = vshrl.u32 %v7720_v55, %v878_v52  ;;  %v9063_v45 = vsel %vm5829_vm13, %v7627_v27, %v2401_v34  ;;  %v884_v18 = vshrl.u32 %v7721_v57, %v878_v52 }
 0x20f   :  { %v843_v28 = vmul.f32 %v842_v39, %v840_v46  ;;  %v887_v50 = vshrl.u32 %v7722_v59, %v878_v52  ;;  %v880_v1 = vshll.u32 %v7719_v51, %v877_v9  ;;  %v883_v32 = vshll.u32 %v7720_v55, %v877_v9 }
 0x210   :  { %v2474_v26 = vsub.s32 0, %v9058_v2  ;;  %v2515_v14 = vshrl.u32 %v2514_v19, 23  ;;  %v886_v41 = vshll.u32 %v7721_v57, %v877_v9  ;;  %v889_v58 = vshll.u32 %v7722_v59, %v877_v9 }
 0x211   :  { %v844_v15 = vxor.u32 2147483648, %v843_v28  ;;  %v890_v27 = vshrl.u32 %v7723_v61, %v878_v52  ;;  %v2464_v44 = vadd.s32 %v8978_v3, %v8989_v24  ;;  %v876_v12 = vshrl.u32 %v875_v35, 5 }
 0x212   :  { %v7201_v6 = vmin.u32 %v2474_v26, %v9058_v2  ;;  %v882_v60 = vor.u32 %v881_v63, %v880_v1  ;;  %v885_v29 = vor.u32 %v884_v18, %v883_v32  ;;  %v888_v42 = vor.u32 %v887_v50, %v886_v41 }
 0x213   :  { %v845_v40 = vsel %vm762_vm0, %v844_v15, %v843_v28  ;;  %v891_v36 = vor.u32 %v890_v27, %v889_v58  ;;  %v892_v22 = vshll.u32 %v7723_v61, %v877_v9  ;;  %v893_v19 = vshrl.u32 %v7724_v4, %v878_v52 }
 0x214   :  { %v848_v34 = vsel %vm8972_vm1, %v8191_v49, %v845_v40  ;;  %v2476_v38 = vclz %v7201_v6  ;;  %v879_v3 = vshrl.u32 %v7719_v51, %v878_v52  ;;  %v9084_v24 = vshll.u32 %v871_v30, 8 }
 0x215   :  { %7630 = vcosq.f32 %v848_v34  ;;  %v7204_v35 = vadd.s32 4294967169, %v2515_v14  ;;  %vm2399_vm0 = vcmp.lt.s32.totalorder %v8996_v37, 2  ;;  %vm5828_vm15 = vcmp.lt.s32.totalorder %v8999_v8, 2 }
 0x216   :  { %7632 = vsinq.f32 %v848_v34  ;;  %v7202_v46 = vadd.s32 4294967294, %v2476_v38  ;;  %v894_v39 = vor.u32 %v893_v19, %v892_v22  ;;  %vm895_vm2 = vcmp.lt.s32.totalorder %v876_v12, 1 }
 0x217   :  { %vm2410_vm1 = vcmp.lt.s32.totalorder %v8326_v47, 0  ;;  %vm897_vm3 = vcmp.lt.s32.totalorder %v876_v12, 3  ;;  %vm898_vm4 = vcmp.lt.s32.totalorder %v876_v12, 4  ;;  %v899_v16 = vsel %vm895_vm2, %v879_v3, %v882_v60 }
 0x218   :  { %v903_v9 = vsel %vm895_vm2, %v882_v60, %v885_v29  ;;  %vm7203_vm5 = vcmp.lt.s32.totalorder %v7202_v46, 0  ;;  %v900_v63 = vsel %vm898_vm4, %v888_v42, 2102212464  ;;  %v904_v52 = vsel %vm898_vm4, %v891_v36, 920167782 }
 0x219   :  { %v907_v30 = vsel %vm895_vm2, %v885_v29, %v888_v42  ;;  %vm858_vm7 = vcmp.eq.s32.totalorder %v9037_v10, 2  ;;  %v2479_v28 = vsel %vm7203_vm5, 0, %v7202_v46  ;;  %v901_v18 = vsel %vm897_vm3, %v885_v29, %v900_v63 }
 0x21a   :  { %v905_v50 = vsel %vm897_vm3, %v888_v42, %v904_v52  ;;  %v908_v26 = vsel %vm898_vm4, %v894_v39, 1326507024  ;;  %vm855_vm8 = vcmp.eq.s32.totalorder %v9037_v10, 0  ;;  %vm4269_vm10 = vcmp.eq.s32.totalorder %v9040_v54, 0 }
 0x21b   :  { %vm9096_vm6 = vcmp.le.f32.partialorder %v2408_v62, 0.7853982  ;;  %v2480_v32 = vsub.s32 32, %v2479_v28  ;;  %v2484_v14 = vsub.s32 4294967266, %v2479_v28  ;;  %v2494_v15 = vsub.s32 4, %v9031_v25 }
 0x21c   :  { %vm896_vm11 = vcmp.lt.s32.totalorder %v876_v12, 2  ;;  %vm854_vm9 = vcmp.lt.s32.totalorder %v9037_v10, 2  ;;  %vm4268_vm13 = vcmp.lt.s32.totalorder %v9040_v54, 2  ;;  %v2481_v41 = vshll.u32 %v9058_v2, %v2479_v28 }
 0x21d   :  { %v906_v58 = vsel %vm896_vm11, %v903_v9, %v905_v50  ;;  %v909_v27 = vsel %vm897_vm3, %v891_v36, %v908_v26  ;;  %v2521_v6 = vadd.s32 1, %v7204_v35  ;;  %vm852_vm14 = vweird.f32 %v8191_v49 }
 0x21e   :  { %v2482_v62 = vshrl.u32 %v2464_v44, %v2480_v32  ;;  %v2485_v60 = vadd.s32 127, %v2484_v14  ;;  %v902_v40 = vsel %vm896_vm11, %v899_v16, %v901_v18  ;;  %v910_v29 = vsel %vm896_vm11, %v907_v30, %v909_v27 }
 0x21f   :  { %v9107_v42 = vmul.u32.u64.low %v9084_v24, %v910_v29  ;;  %v9108_v34 = vmul.u32.u64.high %v9084_v24, %v910_v29, %v9107_v42  ;;  %v9111_v38 = vmul.u32.u64.low %v9084_v24, %v906_v58  ;;  %v9112_v22 = vmul.u32.u64.high %v9084_v24, %v906_v58, %v9111_v38  ;;  %v7631_v36 = vpop.eup %7630 }
 0x220   :  { %vm4272_vm12 = vcmp.eq.s32.totalorder %v9040_v54, 2  ;;  %v2483_v2 = vor.u32 %v2482_v62, %v2481_v41  ;;  %v2486_v12 = vshll.u32 %v2485_v60, 23  ;;  %vm2522_vm2 = vcmp.gt.s32.totalorder %v2521_v6, 0  ;;  %v7633_v46 = vpop.eup %7632 }
 0x221   :  { %v2406_v44 = vsel %vm2399_vm0, %v9052_v13, %v9048_v21  ;;  %v9124_v19 = vsel %vm5828_vm15, %v9063_v45, %v9056_v5  ;;  %v9128_v3 = vand.u32 8388607, %v2511_v20  ;;  %v2523_v35 = vsel %vm2522_vm2, %v2521_v6, 0 }
 0x222   :  { %v859_v39 = vxor.u32 2147483648, %v7631_v36  ;;  %v2487_v16 = vor.u32 4788187, %v2486_v12  ;;  %v2495_v9 = vsel %vm2410_vm1, %v2494_v15, %v9031_v25  ;;  %v918_v37 = vmul.u32 %v9084_v24, %v902_v40 }
 0x223   :  { %v856_v21 = vxor.u32 2147483648, %v7633_v46  ;;  %v2490_v13 = vcvt.s32.f32 %v2483_v2  ;;  %vm920_vm0 = vc.u32 %v9108_v34, %v9111_v38  ;;  %v921_v8 = vadd.s32 1, %v9112_v22 }
 0x224   :  { %v860_v5 = vsel %vm858_vm7, %v859_v39, %v7633_v46  ;;  %v4274_v45 = vsel %vm4272_vm12, %v859_v39, %v7633_v46  ;;  %v2488_v63 = vand.u32 2147483647, %v2487_v16  ;;  %v2525_v52 = vand.u32 31, %v2523_v35  ;;  %v9182_v16 = vpop.f32.mrb[9].mxu1 }
 0x225   :  { %v857_v25 = vsel %vm855_vm8, %v7631_v36, %v856_v21  ;;  %v4271_v24 = vsel %vm4269_vm10, %v7631_v36, %v856_v21  ;;  %v2497_v30 = vsel %vm9096_vm6, 0, %v2495_v9  ;;  %v922_v28 = vsel %vm920_vm0, %v921_v8, %v9112_v22 }
 0x226   :  { %v861_v18 = vsel %vm854_vm9, %v857_v25, %v860_v5  ;;  %v4275_v50 = vsel %vm4268_vm13, %v4271_v24, %v4274_v45  ;;  %v2491_v26 = vmul.f32 %v2490_v13, %v2488_v63  ;;  %v923_v32 = vadd.s32 %v922_v28, %v918_v37 }
 0x227   :  { %v862_v14 = vsel %vm852_vm14, nan, %v861_v18  ;;  %v4276_v15 = vsel %vm852_vm14, nan, %v4275_v50  ;;  %v2519_v41 = vor.u32 8388608, %v9128_v3  ;;  %v2526_v58 = vsub.s32 32, %v2525_v52 }
 0x228   :  { %v7422_v27 = vpack.c.bf16 %v862_v14, %v9029_v7  ;;  %v7438_v6 = vpack.c.bf16 %v4276_v15, %v9035_v33  ;;  %v2492_v10 = vxor.u32 2147483648, %v2491_v26  ;;  %v924_v62 = vadd.s32 536870912, %v923_v32 }
 0x229   :  { %v5930_v60 = vadd.s32 3, %v2497_v30  ;;  %v2528_v54 = vshll.u32 %v7719_v51, %v2525_v52  ;;  %v2529_v40 = vshrl.u32 %v7720_v55, %v2526_v58  ;;  %v2532_v29 = vshrl.u32 %v7721_v57, %v2526_v58 }
 0x22a   :  { %3639 = vst [vmem:[%s11184_s2 + $0x10] sm:$0xff] %v7422_v27  ;;  %7406 = vst [vmem:[%s11184_s2 + $0x90] sm:$0xff] %v7438_v6  ;;  %v2493_v49 = vsel %vm2410_vm1, %v2492_v10, %v2491_v26  ;;  %v9170_v7 = vshrl.u32 %v924_v62, 30  ;;  %v2531_v33 = vshll.u32 %v7720_v55, %v2525_v52  ;;  %v2535_v42 = vshrl.u32 %v7722_v59, %v2526_v58 }
 0x22b   :  { %v2496_v22 = vsel %vm9096_vm6, %v8326_v47, %v2493_v49  ;;  %v9177_v2 = vshrl.u32 %v2523_v35, 5  ;;  %v2530_v12 = vor.u32 %v2529_v40, %v2528_v54  ;;  %v2534_v36 = vshll.u32 %v7721_v57, %v2525_v52 }
 0x22c   :  { %7634 = vcosq.f32 %v2496_v22  ;;  %v926_v3 = vshll.u32 %v9170_v7, 30  ;;  %v2533_v46 = vor.u32 %v2532_v29, %v2531_v33  ;;  %v2537_v39 = vshll.u32 %v7722_v59, %v2525_v52 }
 0x22d   :  { %7636 = vsinq.f32 %v2496_v22  ;;  %v2538_v9 = vshrl.u32 %v7723_v61, %v2526_v58  ;;  %v2540_v37 = vshll.u32 %v7723_v61, %v2525_v52  ;;  %v2541_v1 = vshrl.u32 %v7724_v4, %v2526_v58 }
 0x22e   :  { %vm2397_vm15 = vweird.f32 %v8014_v11  ;;  %v2501_v35 = vand.u32 3, %v2497_v30  ;;  %v9188_v21 = vsub.s32 %v923_v32, %v926_v3  ;;  %v2536_v13 = vor.u32 %v2535_v42, %v2534_v36 }
 0x22f   :  { %v9190_v8 = vsel %vm2397_vm15, nan, %v2406_v44  ;;  %v2539_v5 = vor.u32 %v2538_v9, %v2537_v39  ;;  %v2542_v45 = vor.u32 %v2541_v1, %v2540_v37  ;;  %v9193_v63 = vsel %vm2397_vm15, nan, %v9124_v19 }
 0x230   :  { %v929_v25 = vsub.s32 0, %v9188_v21  ;;  %vm2543_vm1 = vcmp.lt.s32.totalorder %v9177_v2, 1  ;;  %vm2546_vm3 = vcmp.lt.s32.totalorder %v9177_v2, 4  ;;  %v5931_v52 = vand.u32 3, %v5930_v60 }
 0x231   :  { %v2551_v11 = vsel %vm2543_vm1, %v2530_v12, %v2533_v46  ;;  %v2552_v24 = vsel %vm2546_vm3, %v2539_v5, 920167782  ;;  %v2559_v44 = vshll.u32 %v2519_v41, 8  ;;  %vm2502_vm4 = vcmp.lt.s32.totalorder %v2501_v35, 2 }
 0x232   :  { %v7141_v30 = vmin.u32 %v929_v25, %v9188_v21  ;;  %vm2545_vm5 = vcmp.lt.s32.totalorder %v9177_v2, 3  ;;  %v2555_v19 = vsel %vm2543_vm1, %v2533_v46, %v2536_v13  ;;  %vm2500_vm7 = vweird.f32 %v8326_v47 }
 0x233   :  { %vm2544_vm8 = vcmp.lt.s32.totalorder %v9177_v2, 2  ;;  %v2553_v28 = vsel %vm2545_vm5, %v2536_v13, %v2552_v24  ;;  %v2556_v18 = vsel %vm2546_vm3, %v2542_v45, 1326507024  ;;  %v969_v50 = vand.u32 2139095040, %v8611_v23 }
 0x234   :  { %vm2503_vm10 = vcmp.eq.s32.totalorder %v2501_v35, 0  ;;  %v931_v26 = vclz %v7141_v30  ;;  %v2554_v32 = vsel %vm2544_vm8, %v2551_v11, %v2553_v28  ;;  %v2557_v14 = vsel %vm2545_vm5, %v2539_v5, %v2556_v18 }
 0x235   :  { %vm2506_vm6 = vcmp.eq.s32.totalorder %v2501_v35, 2  ;;  %vm5936_vm11 = vcmp.eq.s32.totalorder %v5931_v52, 2  ;;  %v2548_v15 = vsel %vm2546_vm3, %v2536_v13, 2102212464  ;;  %v2558_v41 = vsel %vm2544_vm8, %v2555_v19, %v2557_v14 }
 0x236   :  { %v7635_v27 = vpop.eup %7634  ;;  %v7142_v6 = vadd.s32 4294967294, %v931_v26  ;;  %v2527_v10 = vshrl.u32 %v7719_v51, %v2526_v58  ;;  %v9222_v62 = vmul.u32.u64.low %v2559_v44, %v2558_v41  ;;  %v9223_v60 = vmul.u32.u64.high %v2559_v44, %v2558_v41, %v9222_v62 }
 0x237   :  { %v7637_v54 = vpop.eup %7636  ;;  %v2507_v40 = vxor.u32 2147483648, %v7635_v27  ;;  %v9225_v29 = vmul.u32.u64.low %v2559_v44, %v2554_v32  ;;  %v9226_v49 = vmul.u32.u64.high %v2559_v44, %v2554_v32, %v9225_v29  ;;  %v970_v33 = vshrl.u32 %v969_v50, 23 }
 0x238   :  { %v2504_v42 = vxor.u32 2147483648, %v7637_v54  ;;  %vm7143_vm9 = vcmp.lt.s32.totalorder %v7142_v6, 0  ;;  %v2547_v22 = vsel %vm2543_vm1, %v2527_v10, %v2530_v12  ;;  %v2549_v36 = vsel %vm2545_vm5, %v2533_v46, %v2548_v15 }
 0x239   :  { %v2508_v58 = vsel %vm2506_vm6, %v2507_v40, %v7637_v54  ;;  %vm5933_vm13 = vcmp.eq.s32.totalorder %v5931_v52, 0  ;;  %v5938_v3 = vsel %vm5936_vm11, %v2507_v40, %v7637_v54  ;;  %v934_v39 = vsel %vm7143_vm9, 0, %v7142_v6 }
 0x23a   :  { %v2505_v9 = vsel %vm2503_vm10, %v7635_v27, %v2504_v42  ;;  %vm5932_vm14 = vcmp.lt.s32.totalorder %v5931_v52, 2  ;;  %v5935_v37 = vsel %vm5933_vm13, %v7635_v27, %v2504_v42  ;;  %v7144_v1 = vadd.s32 4294967169, %v970_v33 }
 0x23b   :  { %v2509_v13 = vsel %vm2502_vm4, %v2505_v9, %v2508_v58  ;;  %v5939_v5 = vsel %vm5932_vm14, %v5935_v37, %v5938_v3  ;;  %v939_v45 = vsub.s32 4294967266, %v934_v39  ;;  %v2550_v12 = vsel %vm2544_vm8, %v2547_v22, %v2549_v36 }
 0x23c   :  { %v2510_v46 = vsel %vm2500_vm7, nan, %v2509_v13  ;;  %v5940_v25 = vsel %vm2500_vm7, nan, %v5939_v5  ;;  %v935_v11 = vsub.s32 32, %v934_v39  ;;  %vm2568_vm12 = vc.u32 %v9223_v60, %v9225_v29 }
 0x23d   :  { %v7430_v52 = vpack.c.bf16 %v2510_v46, %v9190_v8  ;;  %v7446_v35 = vpack.c.bf16 %v5940_v25, %v9193_v63  ;;  %v940_v24 = vadd.s32 127, %v939_v45  ;;  %v2569_v30 = vadd.s32 1, %v9226_v49 }
 0x23e   :  { %v919_v2 = vadd.s32 %v9111_v38, %v9108_v34  ;;  %v2566_v19 = vmul.u32 %v2559_v44, %v2550_v12  ;;  %v976_v28 = vadd.s32 1, %v7144_v1  ;;  %v966_v63 = vand.u32 2147483647, %v8611_v23 }
 0x23f   :  { %3647 = vst [vmem:[%s11184_s2 + $0x50] sm:$0xff] %v7430_v52  ;;  %7414 = vst [vmem:[%s11184_s2 + $0xd0] sm:$0xff] %v7446_v35  ;;  %v941_v47 = vshll.u32 %v940_v24, 23  ;;  %v2570_v8 = vsel %vm2568_vm12, %v2569_v30, %v9226_v49  ;;  %v936_v34 = vshll.u32 %v9188_v21, %v934_v39  ;;  %v2617_v6 = vand.u32 2139095040, %v8738_v43  ;;  %v9267_v49 = vpop.f32.mrb[10].mxu0 }
 0x240   :  { %v937_v18 = vshrl.u32 %v919_v2, %v935_v11  ;;  %v2571_v50 = vadd.s32 %v2570_v8, %v2566_v19  ;;  %vm977_vm2 = vcmp.gt.s32.totalorder %v976_v28, 0  ;;  %v973_v14 = vand.u32 8388607, %v966_v63 }
 0x241   :  { %v978_v26 = vsel %vm977_vm2, %v976_v28, 0  ;;  %v942_v32 = vor.u32 4788187, %v941_v47  ;;  %v2618_v9 = vshrl.u32 %v2617_v6, 23  ;;  %vm865_vm0 = vcmp.lt.s32.totalorder %v8400_v56, 0 }
 0x242   :  { %v2572_v38 = vadd.s32 536870912, %v2571_v50  ;;  %v980_v44 = vand.u32 31, %v978_v26  ;;  %v938_v15 = vor.u32 %v937_v18, %v936_v34  ;;  %v974_v54 = vor.u32 8388608, %v973_v14 }
 0x243   :  { %v943_v62 = vand.u32 2147483647, %v942_v32  ;;  %v979_v1 = vshrl.u32 %v978_v26, 5  ;;  %v7208_v30 = vadd.s32 4294967169, %v2618_v9  ;;  %v949_v2 = vsub.s32 4, %v9170_v7 }
 0x244   :  { %v9261_v41 = vshrl.u32 %v2572_v38, 30  ;;  %v981_v27 = vsub.s32 32, %v980_v44  ;;  %v945_v33 = vcvt.s32.f32 %v938_v15  ;;  %v983_v58 = vshll.u32 %v7719_v51, %v980_v44 }
 0x245   :  { %v986_v3 = vshll.u32 %v7720_v55, %v980_v44  ;;  %v989_v13 = vshll.u32 %v7721_v57, %v980_v44  ;;  %v992_v5 = vshll.u32 %v7722_v59, %v980_v44  ;;  %v995_v25 = vshll.u32 %v7723_v61, %v980_v44 }
 0x246   :  { %v2574_v10 = vshll.u32 %v9261_v41, 30  ;;  %v984_v40 = vshrl.u32 %v7720_v55, %v981_v27  ;;  %v987_v21 = vshrl.u32 %v7721_v57, %v981_v27  ;;  %v990_v22 = vshrl.u32 %v7722_v59, %v981_v27 }
 0x247   :  { %v993_v36 = vshrl.u32 %v7723_v61, %v981_v27  ;;  %v996_v39 = vshrl.u32 %v7724_v4, %v981_v27  ;;  %v946_v45 = vmul.f32 %v945_v33, %v943_v62  ;;  %vm998_vm15 = vcmp.lt.s32.totalorder %v979_v1, 1 }
 0x248   :  { %v9269_v42 = vsub.s32 %v2571_v50, %v2574_v10  ;;  %v985_v12 = vor.u32 %v984_v40, %v983_v58  ;;  %v988_v46 = vor.u32 %v987_v21, %v986_v3  ;;  %v991_v52 = vor.u32 %v990_v22, %v989_v13 }
 0x249   :  { %v994_v35 = vor.u32 %v993_v36, %v992_v5  ;;  %v997_v24 = vor.u32 %v996_v39, %v995_v25  ;;  %v1014_v28 = vshll.u32 %v974_v54, 8  ;;  %v947_v47 = vxor.u32 2147483648, %v946_v45 }
 0x24a   :  { %v2577_v37 = vsub.s32 0, %v9269_v42  ;;  %vm999_vm1 = vcmp.lt.s32.totalorder %v979_v1, 2  ;;  %vm1001_vm3 = vcmp.lt.s32.totalorder %v979_v1, 4  ;;  %v1006_v8 = vsel %vm998_vm15, %v985_v12, %v988_v46 }
 0x24b   :  { %vm1000_vm4 = vcmp.lt.s32.totalorder %v979_v1, 3  ;;  %v1007_v50 = vsel %vm1001_vm3, %v994_v35, 920167782  ;;  %v1010_v26 = vsel %vm998_vm15, %v988_v46, %v991_v52  ;;  %v1003_v34 = vsel %vm1001_vm3, %v991_v52, 2102212464 }
 0x24c   :  { %v7205_v11 = vmin.u32 %v2577_v37, %v9269_v42  ;;  %v1008_v38 = vsel %vm1000_vm4, %v991_v52, %v1007_v50  ;;  %v1011_v44 = vsel %vm1001_vm3, %v997_v24, 1326507024  ;;  %v2624_v32 = vadd.s32 1, %v7208_v30 }
 0x24d   :  { %v982_v14 = vshrl.u32 %v7719_v51, %v981_v27  ;;  %v1009_v15 = vsel %vm999_vm1, %v1006_v8, %v1008_v38  ;;  %v1012_v6 = vsel %vm1000_vm4, %v994_v35, %v1011_v44  ;;  %v1004_v22 = vsel %vm1000_vm4, %v988_v46, %v1003_v34 }
 0x24e   :  { %v2579_v19 = vclz %v7205_v11  ;;  %v1013_v62 = vsel %vm999_vm1, %v1010_v26, %v1012_v6  ;;  %v9290_v54 = vmul.u32.u64.low %v1014_v28, %v1009_v15  ;;  %v9291_v40 = vmul.u32.u64.high %v1014_v28, %v1009_v15, %v9290_v54 }
 0x24f   :  { %v1002_v33 = vsel %vm998_vm15, %v982_v14, %v985_v12  ;;  %vm2625_vm7 = vcmp.gt.s32.totalorder %v2624_v32, 0  ;;  %v948_v27 = vsel %vm865_vm0, %v947_v47, %v946_v45  ;;  %v950_v39 = vsel %vm865_vm0, %v949_v2, %v9170_v7 }
 0x250   :  { %v7206_v18 = vadd.s32 4294967294, %v2579_v19  ;;  %v9298_v36 = vmul.u32.u64.low %v1014_v28, %v1013_v62  ;;  %v9299_v58 = vmul.u32.u64.high %v1014_v28, %v1013_v62, %v9298_v36  ;;  %v2626_v3 = vsel %vm2625_vm7, %v2624_v32, 0 }
 0x251   :  { %vm864_vm8 = vcmp.le.f32.partialorder %v863_v17, 0.7853982  ;;  %v1005_v13 = vsel %vm999_vm1, %v1002_v33, %v1004_v22  ;;  %v1024_v5 = vadd.s32 1, %v9291_v40  ;;  %v2628_v12 = vand.u32 31, %v2626_v3 }
 0x252   :  { %vm7207_vm5 = vcmp.lt.s32.totalorder %v7206_v18, 0  ;;  %v951_v45 = vsel %vm864_vm8, %v8400_v56, %v948_v27  ;;  %v2567_v46 = vadd.s32 %v9225_v29, %v9223_v60  ;;  %v952_v11 = vsel %vm864_vm8, 0, %v950_v39 }
 0x253   :  { %v2582_v10 = vsel %vm7207_vm5, 0, %v7206_v18  ;;  %vm1023_vm10 = vc.u32 %v9299_v58, %v9290_v54  ;;  %v2614_v7 = vand.u32 2147483647, %v8738_v43  ;;  %v1021_v35 = vmul.u32 %v1014_v28, %v1005_v13 }
 0x254   :  { %v2587_v21 = vsub.s32 4294967266, %v2582_v10  ;;  %v2583_v9 = vsub.s32 32, %v2582_v10  ;;  %7638 = vcosq.f32 %v951_v45  ;;  %v1025_v1 = vsel %vm1023_vm10, %v1024_v5, %v9291_v40 }
 0x255   :  { %v9315_v24 = vsub.s32 32, %v2628_v12  ;;  %v9317_v30 = vand.u32 3, %v952_v11  ;;  %v2584_v2 = vshll.u32 %v9269_v42, %v2582_v10  ;;  %v1026_v60 = vadd.s32 %v1025_v1, %v1021_v35 }
 0x256   :  { %v2588_v37 = vadd.s32 127, %v2587_v21  ;;  %v2585_v52 = vshrl.u32 %v2567_v46, %v2583_v9  ;;  %7640 = vsinq.f32 %v951_v45  ;;  %v4370_v29 = vadd.s32 3, %v952_v11  ;;  %v9341_v21 = vpop.f32.mrb[10].mxu1 }
 0x257   :  { %v2621_v19 = vand.u32 8388607, %v2614_v7  ;;  %v9322_v47 = vshrl.u32 %v2626_v3, 5  ;;  %v1027_v28 = vadd.s32 536870912, %v1026_v60  ;;  %v2632_v18 = vshrl.u32 %v7720_v55, %v9315_v24 }
 0x258   :  { %v2589_v25 = vshll.u32 %v2588_v37, 23  ;;  %v2586_v8 = vor.u32 %v2585_v52, %v2584_v2  ;;  %v2635_v50 = vshrl.u32 %v7721_v57, %v9315_v24  ;;  %v2638_v42 = vshrl.u32 %v7722_v59, %v9315_v24 }
 0x259   :  { %v2640_v34 = vshll.u32 %v7722_v59, %v2628_v12  ;;  %v2641_v38 = vshrl.u32 %v7723_v61, %v9315_v24  ;;  %v9333_v44 = vshrl.u32 %v1027_v28, 30  ;;  %v2631_v32 = vshll.u32 %v7719_v51, %v2628_v12 }
 0x25a   :  { %v2590_v17 = vor.u32 4788187, %v2589_v25  ;;  %v2634_v14 = vshll.u32 %v7720_v55, %v2628_v12  ;;  %v2644_v15 = vshrl.u32 %v7724_v4, %v9315_v24  ;;  %v2622_v6 = vor.u32 8388608, %v2621_v19 }
 0x25b   :  { %v2637_v10 = vshll.u32 %v7721_v57, %v2628_v12  ;;  %v2642_v62 = vor.u32 %v2641_v38, %v2640_v34  ;;  %v2643_v40 = vshll.u32 %v7723_v61, %v2628_v12  ;;  %vm9345_vm6 = vcmp.le.f32.partialorder %v2511_v20, 0.7853982 }
 0x25c   :  { %v2591_v26 = vand.u32 2147483647, %v2590_v17  ;;  %v2593_v22 = vcvt.s32.f32 %v2586_v8  ;;  %v1029_v27 = vshll.u32 %v9333_v44, 30  ;;  %v2633_v36 = vor.u32 %v2632_v18, %v2631_v32 }
 0x25d   :  { %v2636_v3 = vor.u32 %v2635_v50, %v2634_v14  ;;  %vm2513_vm11 = vcmp.lt.s32.totalorder %v8472_v53, 0  ;;  %v2597_v39 = vsub.s32 4, %v9261_v41  ;;  %v2639_v9 = vor.u32 %v2638_v42, %v2637_v10 }
 0x25e   :  { %v2645_v37 = vor.u32 %v2644_v15, %v2643_v40  ;;  %v9352_v13 = vand.u32 3, %v4370_v29  ;;  %v2594_v5 = vmul.f32 %v2593_v22, %v2591_v26  ;;  %v9354_v12 = vsub.s32 %v1026_v60, %v1029_v27  ;;  %v7639_v20 = vpop.eup %7638 }
 0x25f   :  { %vm2649_vm9 = vcmp.lt.s32.totalorder %v9322_v47, 4  ;;  %vm961_vm13 = vcmp.eq.s32.totalorder %v9317_v30, 2  ;;  %vm2646_vm14 = vcmp.lt.s32.totalorder %v9322_v47, 1  ;;  %v1072_v46 = vand.u32 2139095040, %v8829_v48 }
 0x260   :  { %v2655_v45 = vsel %vm2649_vm9, %v2642_v62, 920167782  ;;  %v1032_v25 = vsub.s32 0, %v9354_v12  ;;  %vm2648_vm12 = vcmp.lt.s32.totalorder %v9322_v47, 3  ;;  %v2654_v11 = vsel %vm2646_vm14, %v2633_v36, %v2636_v3  ;;  %v7641_v35 = vpop.eup %7640 }
 0x261   :  { %v9366_v52 = vshll.u32 %v2622_v6, 8  ;;  %v2598_v17 = vsel %vm2513_vm11, %v2597_v39, %v9261_v41  ;;  %v2656_v1 = vsel %vm2648_vm12, %v2639_v9, %v2655_v45  ;;  %v2658_v2 = vsel %vm2646_vm14, %v2636_v3, %v2639_v9 }
 0x262   :  { %v2659_v60 = vsel %vm2649_vm9, %v2645_v37, 1326507024  ;;  %vm958_vm2 = vcmp.eq.s32.totalorder %v9317_v30, 0  ;;  %v962_v29 = vxor.u32 2147483648, %v7639_v20  ;;  %vm4373_vm0 = vcmp.eq.s32.totalorder %v9352_v13, 0 }
 0x263   :  { %vm4376_vm15 = vcmp.eq.s32.totalorder %v9352_v13, 2  ;;  %v2595_v19 = vxor.u32 2147483648, %v2594_v5  ;;  %v7145_v8 = vmin.u32 %v1032_v25, %v9354_v12  ;;  %vm2647_vm1 = vcmp.lt.s32.totalorder %v9322_v47, 2 }
 0x264   :  { %v2651_v41 = vsel %vm2649_vm9, %v2639_v9, 2102212464  ;;  %v2657_v28 = vsel %vm2647_vm1, %v2654_v11, %v2656_v1  ;;  %v2660_v18 = vsel %vm2648_vm12, %v2642_v62, %v2659_v60  ;;  %v1073_v50 = vshrl.u32 %v1072_v46, 23 }
 0x265   :  { %vm968_vm3 = vcmp.lt.s32.totalorder %v8611_v23, 0  ;;  %v1034_v26 = vclz %v7145_v8  ;;  %v2661_v42 = vsel %vm2647_vm1, %v2658_v2, %v2660_v18  ;;  %vm957_vm4 = vcmp.lt.s32.totalorder %v9317_v30, 2 }
 0x266   :  { %v9392_v34 = vmul.u32.u64.low %v9366_v52, %v2657_v28  ;;  %v9393_v38 = vmul.u32.u64.high %v9366_v52, %v2657_v28, %v9392_v34  ;;  %v2600_v32 = vsel %vm9345_vm6, 0, %v2598_v17  ;;  %v2630_v14 = vshrl.u32 %v7719_v51, %v9315_v24 }
 0x267   :  { %v1069_v15 = vand.u32 2147483647, %v8829_v48  ;;  %v7148_v6 = vadd.s32 4294967169, %v1073_v50  ;;  %v2596_v10 = vsel %vm2513_vm11, %v2595_v19, %v2594_v5  ;;  %v7146_v62 = vadd.s32 4294967294, %v1034_v26 }
 0x268   :  { %v9405_v40 = vmul.u32.u64.low %v9366_v52, %v2661_v42  ;;  %v9406_v22 = vmul.u32.u64.high %v9366_v52, %v2661_v42, %v9405_v40  ;;  %v959_v27 = vxor.u32 2147483648, %v7641_v35  ;;  %v2650_v39 = vsel %vm2646_vm14, %v2630_v14, %v2633_v36 }
 0x269   :  { %v2652_v9 = vsel %vm2648_vm12, %v2636_v3, %v2651_v41  ;;  %v1079_v37 = vadd.s32 1, %v7148_v6  ;;  %vm955_vm5 = vweird.f32 %v8400_v56  ;;  %v963_v24 = vsel %vm961_vm13, %v962_v29, %v7641_v35 }
 0x26a   :  { %v6034_v45 = vadd.s32 3, %v2600_v32  ;;  %v1022_v5 = vadd.s32 %v9290_v54, %v9299_v58  ;;  %vm7147_vm7 = vcmp.lt.s32.totalorder %v7146_v62, 0  ;;  %v2599_v46 = vsel %vm9345_vm6, %v8472_v53, %v2596_v10 }
 0x26b   :  { %v1037_v25 = vsel %vm7147_vm7, 0, %v7146_v62  ;;  %v1052_v36 = vsub.s32 4, %v9333_v44  ;;  %v2672_v3 = vadd.s32 1, %v9393_v38  ;;  %v2653_v1 = vsel %vm2647_vm1, %v2650_v39, %v2652_v9 }
 0x26c   :  { %v1038_v11 = vsub.s32 32, %v1037_v25  ;;  %v1042_v17 = vsub.s32 4294967266, %v1037_v25  ;;  %vm1080_vm8 = vcmp.gt.s32.totalorder %v1079_v37, 0  ;;  %v960_v2 = vsel %vm958_vm2, %v7639_v20, %v959_v27 }
 0x26d   :  { %v4375_v54 = vsel %vm4373_vm0, %v7639_v20, %v959_v27  ;;  %v4378_v58 = vsel %vm4376_vm15, %v962_v29, %v7641_v35  ;;  %vm2671_vm10 = vc.u32 %v9406_v22, %v9392_v34  ;;  %7642 = vcosq.f32 %v2599_v46 }
 0x26e   :  { %v1039_v33 = vshll.u32 %v9354_v12, %v1037_v25  ;;  %v1040_v60 = vshrl.u32 %v1022_v5, %v1038_v11  ;;  %v1043_v19 = vadd.s32 127, %v1042_v17  ;;  %v1053_v47 = vsel %vm968_vm3, %v1052_v36, %v9333_v44  ;;  %v9474_v36 = vpop.f32.mrb[11].mxu0 }
 0x26f   :  { %v2669_v8 = vmul.u32 %v9366_v52, %v2653_v1  ;;  %v2673_v41 = vsel %vm2671_vm10, %v2672_v3, %v9393_v38  ;;  %v1081_v20 = vsel %vm1080_vm8, %v1079_v37, 0  ;;  %v964_v35 = vsel %vm957_vm4, %v960_v2, %v963_v24 }
 0x270   :  { %vm4372_vm6 = vcmp.lt.s32.totalorder %v9352_v13, 2  ;;  %v1041_v29 = vor.u32 %v1040_v60, %v1039_v33  ;;  %v1044_v28 = vshll.u32 %v1043_v19, 23  ;;  %vm9443_vm11 = vcmp.le.f32.partialorder %v966_v63, 0.7853982 }
 0x271   :  { %v4379_v18 = vsel %vm4372_vm6, %v4375_v54, %v4378_v58  ;;  %v2674_v44 = vadd.s32 %v2673_v41, %v2669_v8  ;;  %v1083_v50 = vand.u32 31, %v1081_v20  ;;  %v9447_v52 = vand.u32 3, %v2600_v32 }
 0x272   :  { %v1045_v26 = vor.u32 4788187, %v1044_v28  ;;  %v1055_v30 = vsel %vm9443_vm11, 0, %v1053_v47  ;;  %v1076_v13 = vand.u32 8388607, %v1069_v15  ;;  %v9455_v42 = vsel %vm955_vm5, nan, %v964_v35 }
 0x273   :  { %v9457_v38 = vand.u32 3, %v6034_v45  ;;  %v2675_v63 = vadd.s32 536870912, %v2674_v44  ;;  %v1084_v14 = vsub.s32 32, %v1083_v50  ;;  %v9461_v6 = vsel %vm955_vm5, nan, %v4379_v18 }
 0x274   :  { %7644 = vsinq.f32 %v2599_v46  ;;  %v1046_v32 = vand.u32 2147483647, %v1045_v26  ;;  %v1048_v10 = vcvt.s32.f32 %v1041_v29  ;;  %v9463_v62 = vand.u32 3, %v1055_v30 }
 0x275   :  { %v9465_v40 = vshrl.u32 %v2675_v63, 30  ;;  %v1087_v27 = vshrl.u32 %v7720_v55, %v1084_v14  ;;  %v1090_v39 = vshrl.u32 %v7721_v57, %v1084_v14  ;;  %v4474_v37 = vadd.s32 3, %v1055_v30 }
 0x276   :  { %v1049_v9 = vmul.f32 %v1048_v10, %v1046_v32  ;;  %v1077_v24 = vor.u32 8388608, %v1076_v13  ;;  %v1096_v45 = vshrl.u32 %v7723_v61, %v1084_v14  ;;  %v1086_v5 = vshll.u32 %v7719_v51, %v1083_v50 }
 0x277   :  { %v2677_v56 = vshll.u32 %v9465_v40, 30  ;;  %v1089_v46 = vshll.u32 %v7720_v55, %v1083_v50  ;;  %v1093_v25 = vshrl.u32 %v7722_v59, %v1084_v14  ;;  %v9476_v3 = vpop.eup %7642  ;;  %v9478_v17 = vshrl.u32 %v1081_v20, 5 }
 0x278   :  { %v1050_v11 = vxor.u32 2147483648, %v1049_v9  ;;  %v1095_v1 = vshll.u32 %v7722_v59, %v1083_v50  ;;  %v1099_v2 = vshrl.u32 %v7724_v4, %v1084_v14  ;;  %v1088_v58 = vor.u32 %v1087_v27, %v1086_v5 }
 0x279   :  { %v9482_v54 = vsub.s32 %v2674_v44, %v2677_v56  ;;  %v1091_v33 = vor.u32 %v1090_v39, %v1089_v46  ;;  %v1092_v60 = vshll.u32 %v7721_v57, %v1083_v50  ;;  %vm2609_vm9 = vcmp.eq.s32.totalorder %v9447_v52, 2 }
 0x27a   :  { %v1051_v19 = vsel %vm968_vm3, %v1050_v11, %v1049_v9  ;;  %v1097_v47 = vor.u32 %v1096_v45, %v1095_v1  ;;  %v1098_v8 = vshll.u32 %v7723_v61, %v1083_v50  ;;  %v2720_v41 = vand.u32 2139095040, %v8926_v0 }
 0x27b   :  { %v1054_v20 = vsel %vm9443_vm11, %v8611_v23, %v1051_v19  ;;  %v9493_v35 = vand.u32 3, %v4474_v37  ;;  %v2680_v29 = vsub.s32 0, %v9482_v54  ;;  %v1094_v28 = vor.u32 %v1093_v25, %v1092_v60 }
 0x27c   :  { %v2610_v18 = vxor.u32 2147483648, %v9476_v3  ;;  %7646 = vcosq.f32 %v1054_v20  ;;  %v1100_v44 = vor.u32 %v1099_v2, %v1098_v8  ;;  %vm1101_vm13 = vcmp.lt.s32.totalorder %v9478_v17, 1 }
 0x27d   :  { %vm6040_vm14 = vcmp.eq.s32.totalorder %v9457_v38, 2  ;;  %7648 = vsinq.f32 %v1054_v20  ;;  %v7209_v50 = vmin.u32 %v2680_v29, %v9482_v54  ;;  %vm1104_vm12 = vcmp.lt.s32.totalorder %v9478_v17, 4 }
 0x27e   :  { %v1109_v12 = vsel %vm1101_vm13, %v1088_v58, %v1091_v33  ;;  %v9503_v26 = vpop.eup %7644  ;;  %vm1103_vm2 = vcmp.lt.s32.totalorder %v9478_v17, 3  ;;  %v1110_v30 = vsel %vm1104_vm12, %v1097_v47, 920167782  ;;  %v9508_v13 = vshll.u32 %v1077_v24, 8 }
 0x27f   :  { %v2721_v63 = vshrl.u32 %v2720_v41, 23  ;;  %vm2606_vm0 = vcmp.eq.s32.totalorder %v9447_v52, 0  ;;  %v2682_v32 = vclz %v7209_v50  ;;  %vm1102_vm15 = vcmp.lt.s32.totalorder %v9478_v17, 2 }
 0x280   :  { %v1106_v10 = vsel %vm1104_vm12, %v1094_v28, 2102212464  ;;  %v1111_v27 = vsel %vm1103_vm2, %v1094_v28, %v1110_v30  ;;  %vm1064_vm1 = vcmp.eq.s32.totalorder %v9463_v62, 2  ;;  %vm4480_vm3 = vcmp.eq.s32.totalorder %v9493_v35, 2 }
 0x281   :  { %v1085_v39 = vshrl.u32 %v7719_v51, %v1084_v14  ;;  %v1112_v9 = vsel %vm1102_vm15, %v1109_v12, %v1111_v27  ;;  %v1113_v37 = vsel %vm1101_vm13, %v1091_v33, %v1094_v28  ;;  %v2717_v24 = vand.u32 2147483647, %v8926_v0 }
 0x282   :  { %vm1061_vm4 = vcmp.eq.s32.totalorder %v9463_v62, 0  ;;  %vm4477_vm5 = vcmp.eq.s32.totalorder %v9493_v35, 0  ;;  %v7210_v45 = vadd.s32 4294967294, %v2682_v32  ;;  %v1114_v56 = vsel %vm1104_vm12, %v1100_v44, 1326507024 }
 0x283   :  { %v9529_v5 = vmul.u32.u64.low %v9508_v13, %v1112_v9  ;;  %v9530_v46 = vmul.u32.u64.high %v9508_v13, %v1112_v9, %v9529_v5  ;;  %vm1060_vm7 = vcmp.lt.s32.totalorder %v9463_v62, 2  ;;  %vm4476_vm8 = vcmp.lt.s32.totalorder %v9493_v35, 2 }
 0x284   :  { %v1105_v14 = vsel %vm1101_vm13, %v1085_v39, %v1088_v58  ;;  %v1107_v25 = vsel %vm1103_vm2, %v1091_v33, %v1106_v10  ;;  %v1115_v11 = vsel %vm1103_vm2, %v1097_v47, %v1114_v56  ;;  %v7212_v1 = vadd.s32 4294967169, %v2721_v63 }
 0x285   :  { %v2607_v2 = vxor.u32 2147483648, %v9503_v26  ;;  %v2611_v60 = vsel %vm2609_vm9, %v2610_v18, %v9503_v26  ;;  %vm1058_vm10 = vweird.f32 %v8611_v23  ;;  %vm7211_vm6 = vcmp.lt.s32.totalorder %v7210_v45, 0 }
 0x286   :  { %v1116_v19 = vsel %vm1102_vm15, %v1113_v37, %v1115_v11  ;;  %v2685_v58 = vsel %vm7211_vm6, 0, %v7210_v45  ;;  %v2727_v41 = vadd.s32 1, %v7212_v1  ;;  %vm2605_vm11 = vcmp.lt.s32.totalorder %v9447_v52, 2  ;;  %v7647_v44 = vpop.eup %7646 }
 0x287   :  { %v9549_v8 = vmul.u32.u64.low %v9508_v13, %v1116_v19  ;;  %v9550_v33 = vmul.u32.u64.high %v9508_v13, %v1116_v19, %v9549_v8  ;;  %vm6037_vm13 = vcmp.eq.s32.totalorder %v9457_v38, 0  ;;  %v2670_v47 = vadd.s32 %v9392_v34, %v9406_v22  ;;  %v7649_v63 = vpop.eup %7648 }
 0x288   :  { %v2686_v20 = vsub.s32 32, %v2685_v58  ;;  %v2690_v29 = vsub.s32 4294967266, %v2685_v58  ;;  %v1108_v28 = vsel %vm1102_vm15, %v1105_v14, %v1107_v25  ;;  %v9561_v50 = vsel %vm6040_vm14, %v2610_v18, %v9503_v26 }
 0x289   :  { %vm2616_vm9 = vcmp.lt.s32.totalorder %v8738_v43, 0  ;;  %v2687_v12 = vshll.u32 %v9482_v54, %v2685_v58  ;;  %v1127_v30 = vadd.s32 1, %v9530_v46  ;;  %vm2728_vm12 = vcmp.gt.s32.totalorder %v2727_v41, 0 }
 0x28a   :  { %v1065_v34 = vxor.u32 2147483648, %v7647_v44  ;;  %v2688_v22 = vshrl.u32 %v2670_v47, %v2686_v20  ;;  %v2691_v32 = vadd.s32 127, %v2690_v29  ;;  %v2729_v10 = vsel %vm2728_vm12, %v2727_v41, 0 }
 0x28b   :  { %v2608_v17 = vsel %vm2606_vm0, %v9476_v3, %v2607_v2  ;;  %v1062_v27 = vxor.u32 2147483648, %v7649_v63  ;;  %v1124_v18 = vmul.u32 %v9508_v13, %v1108_v28  ;;  %vm1126_vm14 = vc.u32 %v9550_v33, %v9529_v5 }
 0x28c   :  { %v1066_v54 = vsel %vm1064_vm1, %v1065_v34, %v7649_v63  ;;  %v4482_v26 = vsel %vm4480_vm3, %v1065_v34, %v7649_v63  ;;  %v2689_v39 = vor.u32 %v2688_v22, %v2687_v12  ;;  %v2692_v9 = vshll.u32 %v2691_v32, 23 }
 0x28d   :  { %v1063_v37 = vsel %vm1061_vm4, %v7647_v44, %v1062_v27  ;;  %v4479_v45 = vsel %vm4477_vm5, %v7647_v44, %v1062_v27  ;;  %v1128_v56 = vsel %vm1126_vm14, %v1127_v30, %v9530_v46  ;;  %v2731_v13 = vand.u32 31, %v2729_v10 }
 0x28e   :  { %v1067_v14 = vsel %vm1060_vm7, %v1063_v37, %v1066_v54  ;;  %v4483_v25 = vsel %vm4476_vm8, %v4479_v45, %v4482_v26  ;;  %vm9587_vm2 = vcmp.le.f32.partialorder %v2614_v7, 0.7853982  ;;  %v2693_v1 = vor.u32 4788187, %v2692_v9 }
 0x28f   :  { %v2700_v19 = vsub.s32 4, %v9465_v40  ;;  %vm6036_vm0 = vcmp.lt.s32.totalorder %v9457_v38, 2  ;;  %v1068_v46 = vsel %vm1058_vm10, nan, %v1067_v14  ;;  %v4484_v62 = vsel %vm1058_vm10, nan, %v4483_v25 }
 0x290   :  { %v1129_v58 = vadd.s32 %v1128_v56, %v1124_v18  ;;  %v2732_v35 = vsub.s32 32, %v2731_v13  ;;  %v7423_v8 = vpack.c.bf16 %v1068_v46, %v9455_v42  ;;  %v7439_v7 = vpack.c.bf16 %v4484_v62, %v9461_v6 }
 0x291   :  { %v2694_v41 = vand.u32 2147483647, %v2693_v1  ;;  %v2696_v47 = vcvt.s32.f32 %v2689_v39  ;;  %v2612_v20 = vsel %vm2605_vm11, %v2608_v17, %v2611_v60  ;;  %v6039_v29 = vsel %vm6037_vm13, %v9476_v3, %v2607_v2 }
 0x292   :  { %v1130_v28 = vadd.s32 536870912, %v1129_v58  ;;  %v2735_v44 = vshrl.u32 %v7720_v55, %v2732_v35  ;;  %3640 = vst [vmem:[%s11184_s2 + $0x18] sm:$0xff] %v7423_v8  ;;  %7407 = vst [vmem:[%s11184_s2 + $0x98] sm:$0xff] %v7439_v7  ;;  %v2701_v52 = vsel %vm2616_vm9, %v2700_v19, %v9465_v40  ;;  %v2724_v42 = vand.u32 8388607, %v2717_v24  ;;  %v9624_v40 = vpop.f32.mrb[11].mxu1 }
 0x293   :  { %v2697_v23 = vmul.f32 %v2696_v47, %v2694_v41  ;;  %v2738_v6 = vshrl.u32 %v7721_v57, %v2732_v35  ;;  %v2734_v2 = vshll.u32 %v7719_v51, %v2731_v13  ;;  %v2741_v60 = vshrl.u32 %v7722_v59, %v2732_v35 }
 0x294   :  { %v9617_v3 = vshrl.u32 %v1130_v28, 30  ;;  %v2744_v12 = vshrl.u32 %v7723_v61, %v2732_v35  ;;  %v2730_v63 = vshrl.u32 %v2729_v10, 5  ;;  %v2737_v34 = vshll.u32 %v7720_v55, %v2731_v13 }
 0x295   :  { %v2698_v30 = vxor.u32 2147483648, %v2697_v23  ;;  %v2743_v22 = vshll.u32 %v7722_v59, %v2731_v13  ;;  %v2736_v17 = vor.u32 %v2735_v44, %v2734_v2  ;;  %v2740_v27 = vshll.u32 %v7721_v57, %v2731_v13 }
 0x296   :  { %v1132_v32 = vshll.u32 %v9617_v3, 30  ;;  %v2747_v18 = vshrl.u32 %v7724_v4, %v2732_v35  ;;  %vm2603_vm15 = vweird.f32 %v8472_v53  ;;  %v2739_v26 = vor.u32 %v2738_v6, %v2737_v34 }
 0x297   :  { %v2699_v54 = vsel %vm2616_vm9, %v2698_v30, %v2697_v23  ;;  %v2745_v10 = vor.u32 %v2744_v12, %v2743_v22  ;;  %v2746_v39 = vshll.u32 %v7723_v61, %v2731_v13  ;;  %v2703_v37 = vsel %vm9587_vm2, 0, %v2701_v52 }
 0x298   :  { %v2702_v9 = vsel %vm9587_vm2, %v8738_v43, %v2699_v54  ;;  %v9638_v45 = vsub.s32 %v1129_v58, %v1132_v32  ;;  %v2742_v56 = vor.u32 %v2741_v60, %v2740_v27  ;;  %v6043_v14 = vsel %vm6036_vm0, %v6039_v29, %v9561_v50 }
 0x299   :  { %7650 = vcosq.f32 %v2702_v9  ;;  %v2725_v25 = vor.u32 8388608, %v2724_v42  ;;  %v2748_v1 = vor.u32 %v2747_v18, %v2746_v39  ;;  %vm2749_vm1 = vcmp.lt.s32.totalorder %v2730_v63, 1 }
 0x29a   :  { %7652 = vsinq.f32 %v2702_v9  ;;  %v1135_v13 = vsub.s32 0, %v9638_v45  ;;  %vm2752_vm3 = vcmp.lt.s32.totalorder %v2730_v63, 4  ;;  %v2707_v19 = vand.u32 3, %v2703_v37 }
 0x29b   :  { %v6138_v46 = vadd.s32 3, %v2703_v37  ;;  %v2757_v11 = vsel %vm2749_vm1, %v2736_v17, %v2739_v26  ;;  %v2758_v62 = vsel %vm2752_vm3, %v2745_v10, 920167782  ;;  %vm2751_vm4 = vcmp.lt.s32.totalorder %v2730_v63, 3 }
 0x29c   :  { %v7149_v58 = vmin.u32 %v1135_v13, %v9638_v45  ;;  %v2754_v8 = vsel %vm2752_vm3, %v2742_v56, 2102212464  ;;  %v2761_v38 = vsel %vm2749_vm1, %v2739_v26, %v2742_v56  ;;  %v2733_v50 = vshrl.u32 %v7719_v51, %v2732_v35 }
 0x29d   :  { %vm2750_vm5 = vcmp.lt.s32.totalorder %v2730_v63, 2  ;;  %v2759_v7 = vsel %vm2751_vm4, %v2742_v56, %v2758_v62  ;;  %v2762_v41 = vsel %vm2752_vm3, %v2748_v1, 1326507024  ;;  %v2765_v44 = vshll.u32 %v2725_v25, 8 }
 0x29e   :  { %v1137_v47 = vclz %v7149_v58  ;;  %v2760_v29 = vsel %vm2750_vm5, %v2757_v11, %v2759_v7  ;;  %v2763_v28 = vsel %vm2751_vm4, %v2745_v10, %v2762_v41  ;;  %v6139_v23 = vand.u32 3, %v6138_v46 }
 0x29f   :  { %v2753_v52 = vsel %vm2749_vm1, %v2733_v50, %v2736_v17  ;;  %v2755_v42 = vsel %vm2751_vm4, %v2739_v26, %v2754_v8  ;;  %v2764_v6 = vsel %vm2750_vm5, %v2761_v38, %v2763_v28  ;;  %v2613_v2 = vsel %vm2603_vm15, nan, %v2612_v20 }
 0x2a0   :  { %vm2706_vm7 = vweird.f32 %v8738_v43  ;;  %v7150_v35 = vadd.s32 4294967294, %v1137_v47  ;;  %v9654_v60 = vmul.u32.u64.low %v2765_v44, %v2764_v6  ;;  %v9655_v12 = vmul.u32.u64.high %v2765_v44, %v2764_v6, %v9654_v60 }
 0x2a1   :  { %v6044_v30 = vsel %vm2603_vm15, nan, %v6043_v14  ;;  %v9659_v34 = vmul.u32.u64.low %v2765_v44, %v2760_v29  ;;  %v9660_v22 = vmul.u32.u64.high %v2765_v44, %v2760_v29, %v9659_v34  ;;  %v1175_v32 = vand.u32 2139095040, %v9044_v31 }
 0x2a2   :  { %vm2708_vm8 = vcmp.lt.s32.totalorder %v2707_v19, 2  ;;  %vm2709_vm10 = vcmp.eq.s32.totalorder %v2707_v19, 0  ;;  %vm7151_vm6 = vcmp.lt.s32.totalorder %v7150_v35, 0  ;;  %v2756_v20 = vsel %vm2750_vm5, %v2753_v52, %v2755_v42 }
 0x2a3   :  { %v7651_v17 = vpop.eup %7650  ;;  %vm2712_vm11 = vcmp.eq.s32.totalorder %v2707_v19, 2  ;;  %vm6140_vm13 = vcmp.lt.s32.totalorder %v6139_v23, 2  ;;  %v1140_v27 = vsel %vm7151_vm6, 0, %v7150_v35  ;;  %v1176_v18 = vshrl.u32 %v1175_v32, 23  ;;  %v9694_v32 = vpop.f32.mrb[12].mxu0 }
 0x2a4   :  { %v7653_v54 = vpop.eup %7652  ;;  %v2713_v26 = vxor.u32 2147483648, %v7651_v17  ;;  %vm6141_vm9 = vcmp.eq.s32.totalorder %v6139_v23, 0  ;;  %vm6144_vm12 = vcmp.eq.s32.totalorder %v6139_v23, 2  ;;  %v1145_v53 = vsub.s32 4294967266, %v1140_v27 }
 0x2a5   :  { %v2710_v10 = vxor.u32 2147483648, %v7653_v54  ;;  %v2772_v39 = vmul.u32 %v2765_v44, %v2756_v20  ;;  %vm2774_vm14 = vc.u32 %v9655_v12, %v9659_v34  ;;  %v2775_v9 = vadd.s32 1, %v9660_v22 }
 0x2a6   :  { %v2714_v37 = vsel %vm2712_vm11, %v2713_v26, %v7653_v54  ;;  %v6146_v63 = vsel %vm6144_vm12, %v2713_v26, %v7653_v54  ;;  %v1141_v56 = vsub.s32 32, %v1140_v27  ;;  %v1146_v14 = vadd.s32 127, %v1145_v53 }
 0x2a7   :  { %v2711_v25 = vsel %vm2709_vm10, %v7651_v17, %v2710_v10  ;;  %v6143_v1 = vsel %vm6141_vm9, %v7651_v17, %v2710_v10  ;;  %v2776_v13 = vsel %vm2774_vm14, %v2775_v9, %v9660_v22  ;;  %v7152_v46 = vadd.s32 4294967169, %v1176_v18 }
 0x2a8   :  { %v2715_v11 = vsel %vm2708_vm8, %v2711_v25, %v2714_v37  ;;  %v6147_v62 = vsel %vm6140_vm13, %v6143_v1, %v6146_v63  ;;  %v1125_v58 = vadd.s32 %v9529_v5, %v9550_v33  ;;  %v1147_v8 = vshll.u32 %v1146_v14, 23 }
 0x2a9   :  { %v2716_v38 = vsel %vm2706_vm7, nan, %v2715_v11  ;;  %v6148_v50 = vsel %vm2706_vm7, nan, %v6147_v62  ;;  %v2777_v7 = vadd.s32 %v2776_v13, %v2772_v39  ;;  %v1182_v41 = vadd.s32 1, %v7152_v46 }
 0x2aa   :  { %v7431_v47 = vpack.c.bf16 %v2716_v38, %v2613_v2  ;;  %v7447_v29 = vpack.c.bf16 %v6148_v50, %v6044_v30  ;;  %v1143_v28 = vshrl.u32 %v1125_v58, %v1141_v56  ;;  %v1172_v19 = vand.u32 2147483647, %v9044_v31 }
 0x2ab   :  { %v2778_v44 = vadd.s32 536870912, %v2777_v7  ;;  %vm1183_vm2 = vcmp.gt.s32.totalorder %v1182_v41, 0  ;;  %v1142_v43 = vshll.u32 %v9638_v45, %v1140_v27  ;;  %v1148_v5 = vor.u32 4788187, %v1147_v8 }
 0x2ac   :  { %3648 = vst [vmem:[%s11184_s2 + $0x58] sm:$0xff] %v7431_v47  ;;  %7415 = vst [vmem:[%s11184_s2 + $0xd8] sm:$0xff] %v7447_v29  ;;  %v1184_v33 = vsel %vm1183_vm2, %v1182_v41, 0  ;;  %v1179_v2 = vand.u32 8388607, %v1172_v19  ;;  %v2823_v30 = vand.u32 2139095040, %v9182_v16  ;;  %v2773_v37 = vadd.s32 %v9659_v34, %v9655_v12 }
 0x2ad   :  { %v9686_v23 = vshrl.u32 %v2778_v44, 30  ;;  %v1186_v52 = vand.u32 31, %v1184_v33  ;;  %v1144_v42 = vor.u32 %v1143_v28, %v1142_v43  ;;  %v1149_v60 = vand.u32 2147483647, %v1148_v5 }
 0x2ae   :  { %v1155_v27 = vsub.s32 4, %v9617_v3  ;;  %v1180_v54 = vor.u32 8388608, %v1179_v2  ;;  %v2824_v9 = vshrl.u32 %v2823_v30, 23  ;;  %v1185_v56 = vshrl.u32 %v1184_v33, 5 }
 0x2af   :  { %v2780_v6 = vshll.u32 %v9686_v23, 30  ;;  %v1187_v35 = vsub.s32 32, %v1186_v52  ;;  %v1151_v45 = vcvt.s32.f32 %v1144_v42  ;;  %v1189_v10 = vshll.u32 %v7719_v51, %v1186_v52 }
 0x2b0   :  { %v1192_v39 = vshll.u32 %v7720_v55, %v1186_v52  ;;  %v1195_v14 = vshll.u32 %v7721_v57, %v1186_v52  ;;  %vm1071_vm0 = vcmp.lt.s32.totalorder %v8829_v48, 0  ;;  %v1198_v13 = vshll.u32 %v7722_v59, %v1186_v52 }
 0x2b1   :  { %v9692_v22 = vsub.s32 %v2777_v7, %v2780_v6  ;;  %v1190_v20 = vshrl.u32 %v7720_v55, %v1187_v35  ;;  %v1193_v17 = vshrl.u32 %v7721_v57, %v1187_v35  ;;  %v1196_v26 = vshrl.u32 %v7722_v59, %v1187_v35 }
 0x2b2   :  { %v1152_v53 = vmul.f32 %v1151_v45, %v1149_v60  ;;  %v1199_v46 = vshrl.u32 %v7723_v61, %v1187_v35  ;;  %v1201_v58 = vshll.u32 %v7723_v61, %v1186_v52  ;;  %v1202_v8 = vshrl.u32 %v7724_v4, %v1187_v35 }
 0x2b3   :  { %v2783_v18 = vsub.s32 0, %v9692_v22  ;;  %v1191_v25 = vor.u32 %v1190_v20, %v1189_v10  ;;  %v1194_v1 = vor.u32 %v1193_v17, %v1192_v39  ;;  %v1197_v62 = vor.u32 %v1196_v26, %v1195_v14 }
 0x2b4   :  { %v1153_v12 = vxor.u32 2147483648, %v1152_v53  ;;  %v1188_v34 = vshrl.u32 %v7719_v51, %v1187_v35  ;;  %v1200_v38 = vor.u32 %v1199_v46, %v1198_v13  ;;  %v7216_v50 = vadd.s32 4294967169, %v2824_v9 }
 0x2b5   :  { %v7213_v63 = vmin.u32 %v2783_v18, %v9692_v22  ;;  %v1203_v41 = vor.u32 %v1202_v8, %v1201_v58  ;;  %vm1204_vm15 = vcmp.lt.s32.totalorder %v1185_v56, 1  ;;  %vm1207_vm1 = vcmp.lt.s32.totalorder %v1185_v56, 4 }
 0x2b6   :  { %vm1205_vm3 = vcmp.lt.s32.totalorder %v1185_v56, 2  ;;  %vm1206_vm4 = vcmp.lt.s32.totalorder %v1185_v56, 3  ;;  %v1212_v47 = vsel %vm1204_vm15, %v1191_v25, %v1194_v1  ;;  %v1213_v29 = vsel %vm1207_vm1, %v1200_v38, 920167782 }
 0x2b7   :  { %v2785_v11 = vclz %v7213_v63  ;;  %v1209_v28 = vsel %vm1207_vm1, %v1197_v62, 2102212464  ;;  %v1214_v44 = vsel %vm1206_vm4, %v1197_v62, %v1213_v29  ;;  %v1216_v43 = vsel %vm1204_vm15, %v1194_v1, %v1197_v62 }
 0x2b8   :  { %v1215_v33 = vsel %vm1205_vm3, %v1212_v47, %v1214_v44  ;;  %v1217_v52 = vsel %vm1207_vm1, %v1203_v41, 1326507024  ;;  %v1220_v42 = vshll.u32 %v1180_v54, 8  ;;  %v1208_v35 = vsel %vm1204_vm15, %v1188_v34, %v1191_v25 }
 0x2b9   :  { %v7214_v7 = vadd.s32 4294967294, %v2785_v11  ;;  %v1218_v60 = vsel %vm1206_vm4, %v1200_v38, %v1217_v52  ;;  %v1210_v30 = vsel %vm1206_vm4, %v1194_v1, %v1209_v28  ;;  %v1154_v18 = vsel %vm1071_vm0, %v1153_v12, %v1152_v53 }
 0x2ba   :  { %v1219_v45 = vsel %vm1205_vm3, %v1216_v43, %v1218_v60  ;;  %v9718_v20 = vmul.u32.u64.low %v1220_v42, %v1215_v33  ;;  %v9719_v17 = vmul.u32.u64.high %v1220_v42, %v1215_v33, %v9718_v20  ;;  %v2830_v39 = vadd.s32 1, %v7216_v50 }
 0x2bb   :  { %vm7215_vm5 = vcmp.lt.s32.totalorder %v7214_v7, 0  ;;  %v9724_v9 = vmul.u32.u64.low %v1220_v42, %v1219_v45  ;;  %v9725_v54 = vmul.u32.u64.high %v1220_v42, %v1219_v45, %v9724_v9  ;;  %vm9729_vm7 = vcmp.le.f32.partialorder %v1069_v15, 0.7853982 }
 0x2bc   :  { %v2788_v5 = vsel %vm7215_vm5, 0, %v7214_v7  ;;  %v1211_v1 = vsel %vm1205_vm3, %v1208_v35, %v1210_v30  ;;  %v1157_v53 = vsel %vm9729_vm7, %v8829_v48, %v1154_v18  ;;  %vm2831_vm8 = vcmp.gt.s32.totalorder %v2830_v39, 0 }
 0x2bd   :  { %v2789_v6 = vsub.s32 32, %v2788_v5  ;;  %v2793_v2 = vsub.s32 4294967266, %v2788_v5  ;;  %v2790_v14 = vshll.u32 %v9692_v22, %v2788_v5  ;;  %v1156_v15 = vsel %vm1071_vm0, %v1155_v27, %v9617_v3 }
 0x2be   :  { %v1227_v11 = vmul.u32 %v1220_v42, %v1211_v1  ;;  %vm1229_vm10 = vc.u32 %v9725_v54, %v9718_v20  ;;  %v2820_v22 = vand.u32 2147483647, %v9182_v16  ;;  %7654 = vcosq.f32 %v1157_v53 }
 0x2bf   :  { %v2791_v26 = vshrl.u32 %v2773_v37, %v2789_v6  ;;  %v2794_v10 = vadd.s32 127, %v2793_v2  ;;  %v1230_v37 = vadd.s32 1, %v9719_v17  ;;  %v2832_v58 = vsel %vm2831_vm8, %v2830_v39, 0  ;;  %v9763_v6 = vpop.f32.mrb[12].mxu1 }
 0x2c0   :  { %v1158_v8 = vsel %vm9729_vm7, 0, %v1156_v15  ;;  %v2834_v34 = vand.u32 31, %v2832_v58  ;;  %vm2719_vm6 = vcmp.lt.s32.totalorder %v8926_v0, 0  ;;  %v2803_v41 = vsub.s32 4, %v9686_v23 }
 0x2c1   :  { %v2795_v25 = vshll.u32 %v2794_v10, 23  ;;  %v2792_v13 = vor.u32 %v2791_v26, %v2790_v14  ;;  %v1231_v62 = vsel %vm1229_vm10, %v1230_v37, %v9719_v17  ;;  %v4578_v50 = vadd.s32 3, %v1158_v8 }
 0x2c2   :  { %v1232_v12 = vadd.s32 %v1231_v62, %v1227_v11  ;;  %v2835_v27 = vsub.s32 32, %v2834_v34  ;;  %v2827_v47 = vand.u32 8388607, %v2820_v22  ;;  %v2837_v28 = vshll.u32 %v7719_v51, %v2834_v34 }
 0x2c3   :  { %v2796_v46 = vor.u32 4788187, %v2795_v25  ;;  %v2799_v38 = vcvt.s32.f32 %v2792_v13  ;;  %v2840_v5 = vshll.u32 %v7720_v55, %v2834_v34  ;;  %v2846_v52 = vshll.u32 %v7722_v59, %v2834_v34 }
 0x2c4   :  { %v1233_v3 = vadd.s32 536870912, %v1232_v12  ;;  %v2838_v44 = vshrl.u32 %v7720_v55, %v2835_v27  ;;  %v2841_v43 = vshrl.u32 %v7721_v57, %v2835_v27  ;;  %v2844_v33 = vshrl.u32 %v7722_v59, %v2835_v27 }
 0x2c5   :  { %v2797_v56 = vand.u32 2147483647, %v2796_v46  ;;  %v2847_v42 = vshrl.u32 %v7723_v61, %v2835_v27  ;;  %7656 = vsinq.f32 %v1157_v53  ;;  %v9766_v35 = vshrl.u32 %v2832_v58, 5 }
 0x2c6   :  { %v9754_v29 = vshrl.u32 %v1233_v3, 30  ;;  %v2850_v60 = vshrl.u32 %v7724_v4, %v2835_v27  ;;  %v2839_v30 = vor.u32 %v2838_v44, %v2837_v28  ;;  %v2842_v45 = vor.u32 %v2841_v43, %v2840_v5 }
 0x2c7   :  { %v2800_v7 = vmul.f32 %v2799_v38, %v2797_v56  ;;  %v2843_v17 = vshll.u32 %v7721_v57, %v2834_v34  ;;  %v2848_v18 = vor.u32 %v2847_v42, %v2846_v52  ;;  %v2804_v10 = vsel %vm2719_vm6, %v2803_v41, %v9686_v23 }
 0x2c8   :  { %v1235_v2 = vshll.u32 %v9754_v29, 30  ;;  %v2849_v9 = vshll.u32 %v7723_v61, %v2834_v34  ;;  %v9776_v63 = vpop.eup %7654  ;;  %v9778_v14 = vand.u32 3, %v1158_v8  ;;  %vm9782_vm11 = vcmp.le.f32.partialorder %v2717_v24, 0.7853982 }
 0x2c9   :  { %v2801_v26 = vxor.u32 2147483648, %v2800_v7  ;;  %v2828_v1 = vor.u32 8388608, %v2827_v47  ;;  %v2845_v53 = vor.u32 %v2844_v33, %v2843_v17  ;;  %vm2852_vm13 = vcmp.lt.s32.totalorder %v9766_v35, 1 }
 0x2ca   :  { %v9773_v39 = vsub.s32 %v1232_v12, %v1235_v2  ;;  %v2851_v15 = vor.u32 %v2850_v60, %v2849_v9  ;;  %vm2855_vm9 = vcmp.lt.s32.totalorder %v9766_v35, 4  ;;  %v9789_v23 = vand.u32 3, %v4578_v50 }
 0x2cb   :  { %v9793_v13 = vsel %vm9782_vm11, 0, %v2804_v10  ;;  %v2860_v24 = vsel %vm2852_vm13, %v2839_v30, %v2842_v45  ;;  %v2861_v46 = vsel %vm2855_vm9, %v2848_v18, 920167782  ;;  %v1168_v11 = vxor.u32 2147483648, %v9776_v63 }
 0x2cc   :  { %v1238_v37 = vsub.s32 0, %v9773_v39  ;;  %v2802_v56 = vsel %vm2719_vm6, %v2801_v26, %v2800_v7  ;;  %vm1174_vm12 = vcmp.lt.s32.totalorder %v9044_v31, 0  ;;  %vm2854_vm14 = vcmp.lt.s32.totalorder %v9766_v35, 3 }
 0x2cd   :  { %vm1167_vm2 = vcmp.eq.s32.totalorder %v9778_v14, 2  ;;  %vm2853_vm0 = vcmp.lt.s32.totalorder %v9766_v35, 2  ;;  %v2862_v58 = vsel %vm2854_vm14, %v2845_v53, %v2861_v46  ;;  %v2864_v8 = vsel %vm2852_vm13, %v2842_v45, %v2845_v53 }
 0x2ce   :  { %v7153_v62 = vmin.u32 %v1238_v37, %v9773_v39  ;;  %v1278_v12 = vand.u32 2139095040, %v9267_v49  ;;  %vm1164_vm15 = vcmp.eq.s32.totalorder %v9778_v14, 0  ;;  %v2863_v38 = vsel %vm2853_vm0, %v2860_v24, %v2862_v58 }
 0x2cf   :  { %v2865_v3 = vsel %vm2855_vm9, %v2851_v15, 1326507024  ;;  %v2868_v50 = vshll.u32 %v2828_v1, 8  ;;  %v2805_v7 = vsel %vm9782_vm11, %v8926_v0, %v2802_v56  ;;  %vm9822_vm1 = vcmp.le.f32.partialorder %v1172_v19, 0.7853982  ;;  %v7657_v43 = vpop.eup %7656 }
 0x2d0   :  { %v1240_v34 = vclz %v7153_v62  ;;  %v2836_v47 = vshrl.u32 %v7719_v51, %v2835_v27  ;;  %v2857_v28 = vsel %vm2855_vm9, %v2845_v53, 2102212464  ;;  %v2866_v44 = vsel %vm2854_vm14, %v2848_v18, %v2865_v3 }
 0x2d1   :  { %v2867_v33 = vsel %vm2853_vm0, %v2864_v8, %v2866_v44  ;;  %v9833_v52 = vmul.u32.u64.low %v2868_v50, %v2863_v38  ;;  %v9834_v42 = vmul.u32.u64.high %v2868_v50, %v2863_v38, %v9833_v52  ;;  %vm1163_vm3 = vcmp.lt.s32.totalorder %v9778_v14, 2 }
 0x2d2   :  { %v7154_v5 = vadd.s32 4294967294, %v1240_v34  ;;  %v1258_v19 = vsub.s32 4, %v9754_v29  ;;  %v9839_v27 = vmul.u32.u64.low %v2868_v50, %v2867_v33  ;;  %v9840_v2 = vmul.u32.u64.high %v2868_v50, %v2867_v33, %v9839_v27 }
 0x2d3   :  { %v1279_v60 = vshrl.u32 %v1278_v12, 23  ;;  %vm4580_vm4 = vcmp.lt.s32.totalorder %v9789_v23, 2  ;;  %7658 = vcosq.f32 %v2805_v7  ;;  %v2856_v17 = vsel %vm2852_vm13, %v2836_v47, %v2839_v30 }
 0x2d4   :  { %vm7155_vm5 = vcmp.lt.s32.totalorder %v7154_v5, 0  ;;  %v2858_v18 = vsel %vm2854_vm14, %v2842_v45, %v2857_v28  ;;  %v1165_v26 = vxor.u32 2147483648, %v7657_v43  ;;  %vm4581_vm7 = vcmp.eq.s32.totalorder %v9789_v23, 0 }
 0x2d5   :  { %vm4584_vm8 = vcmp.eq.s32.totalorder %v9789_v23, 2  ;;  %v1243_v10 = vsel %vm7155_vm5, 0, %v7154_v5  ;;  %v1228_v9 = vadd.s32 %v9718_v20, %v9725_v54  ;;  %v1275_v1 = vand.u32 2147483647, %v9267_v49 }
 0x2d6   :  { %v1244_v25 = vsub.s32 32, %v1243_v10  ;;  %v7156_v53 = vadd.s32 4294967169, %v1279_v60  ;;  %v6242_v37 = vadd.s32 3, %v9793_v13  ;;  %v1248_v15 = vsub.s32 4294967266, %v1243_v10 }
 0x2d7   :  { %v1259_v30 = vsel %vm1174_vm12, %v1258_v19, %v9754_v29  ;;  %v2859_v45 = vsel %vm2853_vm0, %v2856_v17, %v2858_v18  ;;  %v1169_v24 = vsel %vm1167_vm2, %v1168_v11, %v7657_v43  ;;  %v4586_v46 = vsel %vm4584_vm8, %v1168_v11, %v7657_v43 }
 0x2d8   :  { %v1246_v56 = vshrl.u32 %v1228_v9, %v1244_v25  ;;  %vm2877_vm10 = vc.u32 %v9840_v2, %v9833_v52  ;;  %v1166_v20 = vsel %vm1164_vm15, %v9776_v63, %v1165_v26  ;;  %v1245_v54 = vshll.u32 %v9773_v39, %v1243_v10 }
 0x2d9   :  { %v1249_v62 = vadd.s32 127, %v1248_v15  ;;  %v2878_v29 = vadd.s32 1, %v9834_v42  ;;  %v4583_v35 = vsel %vm4581_vm7, %v9776_v63, %v1165_v26  ;;  %v1261_v11 = vsel %vm9822_vm1, 0, %v1259_v30 }
 0x2da   :  { %v2875_v58 = vmul.u32 %v2868_v50, %v2859_v45  ;;  %v1285_v8 = vadd.s32 1, %v7156_v53  ;;  %7660 = vsinq.f32 %v2805_v7  ;;  %v1247_v12 = vor.u32 %v1246_v56, %v1245_v54 }
 0x2db   :  { %v1250_v34 = vshll.u32 %v1249_v62, 23  ;;  %v2879_v38 = vsel %vm2877_vm10, %v2878_v29, %v9834_v42  ;;  %v1170_v39 = vsel %vm1163_vm3, %v1166_v20, %v1169_v24  ;;  %v9876_v3 = vand.u32 3, %v9793_v13 }
 0x2dc   :  { %v2880_v47 = vadd.s32 %v2879_v38, %v2875_v58  ;;  %vm1286_vm6 = vcmp.gt.s32.totalorder %v1285_v8, 0  ;;  %v4587_v63 = vsel %vm4580_vm4, %v4583_v35, %v4586_v46  ;;  %v4682_v44 = vadd.s32 3, %v1261_v11 }
 0x2dd   :  { %v1251_v28 = vor.u32 4788187, %v1250_v34  ;;  %v1287_v50 = vsel %vm1286_vm6, %v1285_v8, 0  ;;  %v9880_v43 = vpop.eup %7658  ;;  %v1282_v5 = vand.u32 8388607, %v1275_v1  ;;  %v2926_v14 = vand.u32 2139095040, %v9341_v21 }
 0x2de   :  { %v2881_v7 = vadd.s32 536870912, %v2880_v47  ;;  %v1289_v33 = vand.u32 31, %v1287_v50  ;;  %vm1161_vm11 = vweird.f32 %v8829_v48  ;;  %v9886_v13 = vand.u32 3, %v6242_v37  ;;  %v9900_v48 = vpop.f32.mrb[13].mxu0 }
 0x2df   :  { %v1252_v42 = vand.u32 2147483647, %v1251_v28  ;;  %v1254_v19 = vcvt.s32.f32 %v1247_v12  ;;  %v9888_v23 = vsel %vm1161_vm11, nan, %v1170_v39  ;;  %v9890_v27 = vsel %vm1161_vm11, nan, %v4587_v63 }
 0x2e0   :  { %vm2815_vm13 = vcmp.eq.s32.totalorder %v9876_v3, 2  ;;  %v9893_v60 = vshrl.u32 %v2881_v7, 30  ;;  %v1290_v17 = vsub.s32 32, %v1289_v33  ;;  %v2816_v18 = vxor.u32 2147483648, %v9880_v43 }
 0x2e1   :  { %v1255_v26 = vmul.f32 %v1254_v19, %v1252_v42  ;;  %v9896_v10 = vand.u32 3, %v1261_v11  ;;  %v9898_v9 = vand.u32 3, %v4682_v44  ;;  %v1283_v53 = vor.u32 8388608, %v1282_v5 }
 0x2e2   :  { %v2883_v25 = vshll.u32 %v9893_v60, 30  ;;  %v2923_v37 = vand.u32 2147483647, %v9341_v21  ;;  %v2927_v15 = vshrl.u32 %v2926_v14, 23  ;;  %v1293_v45 = vshrl.u32 %v7720_v55, %v1290_v17 }
 0x2e3   :  { %v1256_v30 = vxor.u32 2147483648, %v1255_v26  ;;  %v1296_v24 = vshrl.u32 %v7721_v57, %v1290_v17  ;;  %v1299_v46 = vshrl.u32 %v7722_v59, %v1290_v17  ;;  %v9909_v20 = vshrl.u32 %v1287_v50, 5 }
 0x2e4   :  { %v9907_v56 = vsub.s32 %v2880_v47, %v2883_v25  ;;  %v1292_v54 = vshll.u32 %v7719_v51, %v1289_v33  ;;  %v1302_v62 = vshrl.u32 %v7723_v61, %v1290_v17  ;;  %v9913_v29 = vpop.eup %7660  ;;  %v1295_v11 = vshll.u32 %v7720_v55, %v1289_v33 }
 0x2e5   :  { %v1257_v35 = vsel %vm1174_vm12, %v1256_v30, %v1255_v26  ;;  %v1298_v58 = vshll.u32 %v7721_v57, %v1289_v33  ;;  %v1305_v8 = vshrl.u32 %v7724_v4, %v1290_v17  ;;  %v1301_v38 = vshll.u32 %v7722_v59, %v1289_v33 }
 0x2e6   :  { %v1260_v12 = vsel %vm9822_vm1, %v9044_v31, %v1257_v35  ;;  %v2886_v34 = vsub.s32 0, %v9907_v56  ;;  %v1304_v39 = vshll.u32 %v7723_v61, %v1289_v33  ;;  %v1294_v47 = vor.u32 %v1293_v45, %v1292_v54 }
 0x2e7   :  { %7662 = vcosq.f32 %v1260_v12  ;;  %v1297_v63 = vor.u32 %v1296_v24, %v1295_v11  ;;  %v1300_v28 = vor.u32 %v1299_v46, %v1298_v58  ;;  %v2813_v44 = vxor.u32 2147483648, %v9913_v29 }
 0x2e8   :  { %7664 = vsinq.f32 %v1260_v12  ;;  %v7217_v50 = vmin.u32 %v2886_v34, %v9907_v56  ;;  %v1303_v7 = vor.u32 %v1302_v62, %v1301_v38  ;;  %v9933_v41 = vsel %vm2815_vm13, %v2816_v18, %v9913_v29 }
 0x2e9   :  { %v1306_v5 = vor.u32 %v1305_v8, %v1304_v39  ;;  %v9935_v14 = vshll.u32 %v1283_v53, 8  ;;  %v7220_v33 = vadd.s32 4294967169, %v2927_v15  ;;  %vm2822_vm9 = vcmp.lt.s32.totalorder %v9182_v16, 0 }
 0x2ea   :  { %v2888_v42 = vclz %v7217_v50  ;;  %v2906_v19 = vsub.s32 4, %v9893_v60  ;;  %vm1307_vm12 = vcmp.lt.s32.totalorder %v9909_v20, 1  ;;  %vm1310_vm14 = vcmp.lt.s32.totalorder %v9909_v20, 4 }
 0x2eb   :  { %vm1270_vm2 = vcmp.eq.s32.totalorder %v9896_v10, 2  ;;  %vm4688_vm0 = vcmp.eq.s32.totalorder %v9898_v9, 2  ;;  %v1291_v26 = vshrl.u32 %v7719_v51, %v1290_v17  ;;  %vm1308_vm15 = vcmp.lt.s32.totalorder %v9909_v20, 2 }
 0x2ec   :  { %v1312_v25 = vsel %vm1310_vm14, %v1300_v28, 2102212464  ;;  %v1315_v53 = vsel %vm1307_vm12, %v1294_v47, %v1297_v63  ;;  %vm1267_vm1 = vcmp.eq.s32.totalorder %v9896_v10, 0  ;;  %vm4685_vm3 = vcmp.eq.s32.totalorder %v9898_v9, 0 }
 0x2ed   :  { %v7218_v15 = vadd.s32 4294967294, %v2888_v42  ;;  %vm1309_vm4 = vcmp.lt.s32.totalorder %v9909_v20, 3  ;;  %v1316_v30 = vsel %vm1310_vm14, %v1303_v7, 920167782  ;;  %v1319_v17 = vsel %vm1307_vm12, %v1297_v63, %v1300_v28 }
 0x2ee   :  { %vm1266_vm5 = vcmp.lt.s32.totalorder %v9896_v10, 2  ;;  %vm4684_vm7 = vcmp.lt.s32.totalorder %v9898_v9, 2  ;;  %v1311_v45 = vsel %vm1307_vm12, %v1291_v26, %v1294_v47  ;;  %v1317_v24 = vsel %vm1309_vm4, %v1300_v28, %v1316_v30 }
 0x2ef   :  { %v1320_v46 = vsel %vm1310_vm14, %v1306_v5, 1326507024  ;;  %v2933_v54 = vadd.s32 1, %v7220_v33  ;;  %vm1264_vm8 = vweird.f32 %v9044_v31  ;;  %vm7219_vm10 = vcmp.lt.s32.totalorder %v7218_v15, 0 }
 0x2f0   :  { %v1313_v62 = vsel %vm1309_vm4, %v1297_v63, %v1312_v25  ;;  %v1318_v35 = vsel %vm1308_vm15, %v1315_v53, %v1317_v24  ;;  %v1321_v11 = vsel %vm1309_vm4, %v1303_v7, %v1320_v46  ;;  %v2891_v58 = vsel %vm7219_vm10, 0, %v7218_v15 }
 0x2f1   :  { %v1322_v8 = vsel %vm1308_vm15, %v1319_v17, %v1321_v11  ;;  %v9968_v12 = vmul.u32.u64.low %v9935_v14, %v1318_v35  ;;  %v9969_v34 = vmul.u32.u64.high %v9935_v14, %v1318_v35, %v9968_v12  ;;  %vm2812_vm6 = vcmp.eq.s32.totalorder %v9876_v3, 0  ;;  %v7663_v63 = vpop.eup %7662 }
 0x2f2   :  { %vm6245_vm11 = vcmp.eq.s32.totalorder %v9886_v13, 0  ;;  %vm6248_vm13 = vcmp.eq.s32.totalorder %v9886_v13, 2  ;;  %v2876_v38 = vadd.s32 %v9833_v52, %v9840_v2  ;;  %v2892_v39 = vsub.s32 32, %v2891_v58  ;;  %v7665_v33 = vpop.eup %7664 }
 0x2f3   :  { %v2896_v47 = vsub.s32 4294967266, %v2891_v58  ;;  %vm2934_vm12 = vcmp.gt.s32.totalorder %v2933_v54, 0  ;;  %v1314_v28 = vsel %vm1308_vm15, %v1311_v45, %v1313_v62  ;;  %v1271_v42 = vxor.u32 2147483648, %v7663_v63 }
 0x2f4   :  { %v9980_v50 = vmul.u32.u64.low %v9935_v14, %v1322_v8  ;;  %v9981_v7 = vmul.u32.u64.high %v9935_v14, %v1322_v8, %v9980_v50  ;;  %v2935_v5 = vsel %vm2934_vm12, %v2933_v54, 0  ;;  %vm9985_vm14 = vcmp.le.f32.partialorder %v2820_v22, 0.7853982 }
 0x2f5   :  { %v2893_v52 = vshll.u32 %v9907_v56, %v2891_v58  ;;  %v2894_v2 = vshrl.u32 %v2876_v38, %v2892_v39  ;;  %v2897_v25 = vadd.s32 127, %v2896_v47  ;;  %v1268_v53 = vxor.u32 2147483648, %v7665_v33 }
 0x2f6   :  { %v2907_v20 = vsel %vm2822_vm9, %v2906_v19, %v9893_v60  ;;  %v1333_v15 = vadd.s32 1, %v9969_v34  ;;  %v2937_v30 = vand.u32 31, %v2935_v5  ;;  %v1272_v17 = vsel %vm1270_vm2, %v1271_v42, %v7665_v33 }
 0x2f7   :  { %v4690_v22 = vsel %vm4688_vm0, %v1271_v42, %v7665_v33  ;;  %v2895_v45 = vor.u32 %v2894_v2, %v2893_v52  ;;  %v2898_v24 = vshll.u32 %v2897_v25, 23  ;;  %v1269_v56 = vsel %vm1267_vm1, %v7663_v63, %v1268_v53 }
 0x2f8   :  { %v4687_v46 = vsel %vm4685_vm3, %v7663_v63, %v1268_v53  ;;  %v1330_v54 = vmul.u32 %v9935_v14, %v1314_v28  ;;  %vm1332_vm15 = vc.u32 %v9981_v7, %v9968_v12  ;;  %v1273_v60 = vsel %vm1266_vm5, %v1269_v56, %v1272_v17 }
 0x2f9   :  { %v4691_v19 = vsel %vm4684_vm7, %v4687_v46, %v4690_v22  ;;  %v2899_v62 = vor.u32 4788187, %v2898_v24  ;;  %v2902_v35 = vcvt.s32.f32 %v2895_v45  ;;  %vm2811_vm2 = vcmp.lt.s32.totalorder %v9876_v3, 2 }
 0x2fa   :  { %v1274_v11 = vsel %vm1264_vm8, nan, %v1273_v60  ;;  %v4692_v58 = vsel %vm1264_vm8, nan, %v4691_v19  ;;  %v1334_v14 = vsel %vm1332_vm15, %v1333_v15, %v9969_v34  ;;  %v10015_v8 = vsub.s32 32, %v2937_v30  ;;  %v10065_v15 = vpop.f32.mrb[13].mxu1 }
 0x2fb   :  { %vm6244_vm0 = vcmp.lt.s32.totalorder %v9886_v13, 2  ;;  %v7424_v10 = vpack.c.bf16 %v1274_v11, %v9888_v23  ;;  %v7440_v9 = vpack.c.bf16 %v4692_v58, %v9890_v27  ;;  %v2900_v38 = vand.u32 2147483647, %v2899_v62 }
 0x2fc   :  { %v1335_v39 = vadd.s32 %v1334_v14, %v1330_v54  ;;  %v2814_v47 = vsel %vm2812_vm6, %v9880_v43, %v2813_v44  ;;  %v6247_v31 = vsel %vm6245_vm11, %v9880_v43, %v2813_v44  ;;  %v6250_v23 = vsel %vm6248_vm13, %v2816_v18, %v9913_v29 }
 0x2fd   :  { %v2930_v27 = vand.u32 8388607, %v2923_v37  ;;  %3641 = vst [vmem:[%s11184_s2 + $0x20] sm:$0xff] %v7424_v10  ;;  %7408 = vst [vmem:[%s11184_s2 + $0xa0] sm:$0xff] %v7440_v9  ;;  %v2903_v34 = vmul.f32 %v2902_v35, %v2900_v38  ;;  %v2941_v44 = vshrl.u32 %v7720_v55, %v10015_v8  ;;  %v2944_v43 = vshrl.u32 %v7721_v57, %v10015_v8 }
 0x2fe   :  { %v1336_v63 = vadd.s32 536870912, %v1335_v39  ;;  %vm2809_vm1 = vweird.f32 %v8926_v0  ;;  %v2909_v18 = vsel %vm9985_vm14, 0, %v2907_v20  ;;  %v10050_v29 = vshrl.u32 %v2935_v5, 5 }
 0x2ff   :  { %v2947_v28 = vshrl.u32 %v7722_v59, %v10015_v8  ;;  %v2950_v50 = vshrl.u32 %v7723_v61, %v10015_v8  ;;  %v2904_v33 = vxor.u32 2147483648, %v2903_v34  ;;  %v2940_v52 = vshll.u32 %v7719_v51, %v2937_v30 }
 0x300   :  { %v10056_v42 = vshrl.u32 %v1336_v63, 30  ;;  %v2943_v2 = vshll.u32 %v7720_v55, %v2937_v30  ;;  %v2946_v25 = vshll.u32 %v7721_v57, %v2937_v30  ;;  %v2949_v53 = vshll.u32 %v7722_v59, %v2937_v30 }
 0x301   :  { %v2952_v5 = vshll.u32 %v7723_v61, %v2937_v30  ;;  %v2953_v20 = vshrl.u32 %v7724_v4, %v10015_v8  ;;  %v2905_v17 = vsel %vm2822_vm9, %v2904_v33, %v2903_v34  ;;  %v2942_v45 = vor.u32 %v2941_v44, %v2940_v52 }
 0x302   :  { %v1338_v22 = vshll.u32 %v10056_v42, 30  ;;  %v2945_v24 = vor.u32 %v2944_v43, %v2943_v2  ;;  %v2908_v56 = vsel %vm9985_vm14, %v9182_v16, %v2905_v17  ;;  %v2948_v46 = vor.u32 %v2947_v28, %v2946_v25 }
 0x303   :  { %v2951_v54 = vor.u32 %v2950_v50, %v2949_v53  ;;  %v2954_v60 = vor.u32 %v2953_v20, %v2952_v5  ;;  %v2818_v30 = vsel %vm2811_vm2, %v2814_v47, %v9933_v41  ;;  %7666 = vcosq.f32 %v2908_v56 }
 0x304   :  { %v10076_v19 = vsub.s32 %v1335_v39, %v1338_v22  ;;  %v2931_v62 = vor.u32 8388608, %v2930_v27  ;;  %v6251_v35 = vsel %vm6244_vm0, %v6247_v31, %v6250_v23  ;;  %7668 = vsinq.f32 %v2908_v56 }
 0x305   :  { %v2913_v11 = vand.u32 3, %v2909_v18  ;;  %v6346_v58 = vadd.s32 3, %v2909_v18  ;;  %vm2955_vm9 = vcmp.lt.s32.totalorder %v10050_v29, 1  ;;  %vm2958_vm3 = vcmp.lt.s32.totalorder %v10050_v29, 4 }
 0x306   :  { %v1341_v26 = vsub.s32 0, %v10076_v19  ;;  %v1381_v14 = vand.u32 2139095040, %v9474_v36  ;;  %v2963_v3 = vsel %vm2955_vm9, %v2942_v45, %v2945_v24  ;;  %v2964_v41 = vsel %vm2958_vm3, %v2951_v54, 920167782 }
 0x307   :  { %v2967_v13 = vsel %vm2955_vm9, %v2945_v24, %v2948_v46  ;;  %v2968_v10 = vsel %vm2958_vm3, %v2954_v60, 1326507024  ;;  %v2819_v9 = vsel %vm2809_vm1, nan, %v2818_v30  ;;  %vm2957_vm4 = vcmp.lt.s32.totalorder %v10050_v29, 3 }
 0x308   :  { %v7157_v38 = vmin.u32 %v1341_v26, %v10076_v19  ;;  %v2971_v39 = vshll.u32 %v2931_v62, 8  ;;  %v6347_v47 = vand.u32 3, %v6346_v58  ;;  %vm2956_vm5 = vcmp.lt.s32.totalorder %v10050_v29, 2 }
 0x309   :  { %v2965_v31 = vsel %vm2957_vm4, %v2948_v46, %v2964_v41  ;;  %v2969_v23 = vsel %vm2957_vm4, %v2951_v54, %v2968_v10  ;;  %v1382_v44 = vshrl.u32 %v1381_v14, 23  ;;  %v6252_v43 = vsel %vm2809_vm1, nan, %v6251_v35 }
 0x30a   :  { %v1343_v27 = vclz %v7157_v38  ;;  %v2966_v34 = vsel %vm2956_vm5, %v2963_v3, %v2965_v31  ;;  %v2970_v63 = vsel %vm2956_vm5, %v2967_v13, %v2969_v23  ;;  %vm2912_vm7 = vweird.f32 %v9182_v16 }
 0x30b   :  { %vm2914_vm8 = vcmp.lt.s32.totalorder %v2913_v11, 2  ;;  %v2939_v18 = vshrl.u32 %v7719_v51, %v10015_v8  ;;  %v2960_v28 = vsel %vm2958_vm3, %v2948_v46, 2102212464  ;;  %v7160_v2 = vadd.s32 4294967169, %v1382_v44 }
 0x30c   :  { %v7158_v50 = vadd.s32 4294967294, %v1343_v27  ;;  %v10112_v33 = vmul.u32.u64.low %v2971_v39, %v2970_v63  ;;  %v10113_v52 = vmul.u32.u64.high %v2971_v39, %v2970_v63, %v10112_v33  ;;  %vm2915_vm10 = vcmp.eq.s32.totalorder %v2913_v11, 0 }
 0x30d   :  { %vm2918_vm6 = vcmp.eq.s32.totalorder %v2913_v11, 2  ;;  %v10115_v25 = vmul.u32.u64.low %v2971_v39, %v2966_v34  ;;  %v10116_v53 = vmul.u32.u64.high %v2971_v39, %v2966_v34, %v10115_v25  ;;  %v7667_v0 = vpop.eup %7666  ;;  %vm6348_vm11 = vcmp.lt.s32.totalorder %v6347_v47, 2 }
 0x30e   :  { %vm7159_vm13 = vcmp.lt.s32.totalorder %v7158_v50, 0  ;;  %v2959_v8 = vsel %vm2955_vm9, %v2939_v18, %v2942_v45  ;;  %v2961_v5 = vsel %vm2957_vm4, %v2945_v24, %v2960_v28  ;;  %v7669_v20 = vpop.eup %7668  ;;  %v2919_v17 = vxor.u32 2147483648, %v7667_v0 }
 0x30f   :  { %vm6349_vm12 = vcmp.eq.s32.totalorder %v6347_v47, 0  ;;  %v1346_v22 = vsel %vm7159_vm13, 0, %v7158_v50  ;;  %v1388_v56 = vadd.s32 1, %v7160_v2  ;;  %v2916_v46 = vxor.u32 2147483648, %v7669_v20 }
 0x310   :  { %vm6352_vm14 = vcmp.eq.s32.totalorder %v6347_v47, 2  ;;  %v1331_v54 = vadd.s32 %v9968_v12, %v9981_v7  ;;  %v1351_v60 = vsub.s32 4294967266, %v1346_v22  ;;  %v2920_v30 = vsel %vm2918_vm6, %v2919_v17, %v7669_v20 }
 0x311   :  { %v6354_v62 = vsel %vm6352_vm14, %v2919_v17, %v7669_v20  ;;  %v1347_v35 = vsub.s32 32, %v1346_v22  ;;  %v2962_v45 = vsel %vm2956_vm5, %v2959_v8, %v2961_v5  ;;  %v2917_v24 = vsel %vm2915_vm10, %v7667_v0, %v2916_v46 }
 0x312   :  { %v6351_v58 = vsel %vm6349_vm12, %v7667_v0, %v2916_v46  ;;  %v1352_v26 = vadd.s32 127, %v1351_v60  ;;  %vm2980_vm15 = vc.u32 %v10113_v52, %v10115_v25  ;;  %v2921_v14 = vsel %vm2914_vm8, %v2917_v24, %v2920_v30 }
 0x313   :  { %v6355_v3 = vsel %vm6348_vm11, %v6351_v58, %v6354_v62  ;;  %v2981_v12 = vadd.s32 1, %v10116_v53  ;;  %vm1389_vm2 = vcmp.gt.s32.totalorder %v1388_v56, 0  ;;  %v2922_v7 = vsel %vm2912_vm7, nan, %v2921_v14 }
 0x314   :  { %v6356_v29 = vsel %vm2912_vm7, nan, %v6355_v3  ;;  %v1353_v41 = vshll.u32 %v1352_v26, 23  ;;  %v2978_v13 = vmul.u32 %v2971_v39, %v2962_v45  ;;  %v7432_v10 = vpack.c.bf16 %v2922_v7, %v2819_v9 }
 0x315   :  { %v7448_v38 = vpack.c.bf16 %v6356_v29, %v6252_v43  ;;  %v2982_v31 = vsel %vm2980_vm15, %v2981_v12, %v10116_v53  ;;  %v1390_v23 = vsel %vm1389_vm2, %v1388_v56, 0  ;;  %v1378_v47 = vand.u32 2147483647, %v9474_v36  ;;  %v10162_v56 = vpop.f32.mrb[14].mxu0 }
 0x316   :  { %v2983_v11 = vadd.s32 %v2982_v31, %v2978_v13  ;;  %3649 = vst [vmem:[%s11184_s2 + $0x60] sm:$0xff] %v7432_v10  ;;  %v1349_v16 = vshrl.u32 %v1331_v54, %v1347_v35  ;;  %v1392_v27 = vand.u32 31, %v1390_v23  ;;  %v1354_v34 = vor.u32 4788187, %v1353_v41 }
 0x317   :  { %7416 = vst [vmem:[%s11184_s2 + $0xe0] sm:$0xff] %v7448_v38  ;;  %v1348_v9 = vshll.u32 %v10076_v19, %v1346_v22  ;;  %v1361_v44 = vsub.s32 4, %v10056_v42  ;;  %v1385_v18 = vand.u32 8388607, %v1378_v47  ;;  %v3029_v2 = vand.u32 2139095040, %v9624_v40 }
 0x318   :  { %v2984_v39 = vadd.s32 536870912, %v2983_v11  ;;  %v1393_v63 = vsub.s32 32, %v1392_v27  ;;  %v1355_v53 = vand.u32 2147483647, %v1354_v34  ;;  %v1395_v5 = vshll.u32 %v7719_v51, %v1392_v27 }
 0x319   :  { %v1350_v28 = vor.u32 %v1349_v16, %v1348_v9  ;;  %v1398_v20 = vshll.u32 %v7720_v55, %v1392_v27  ;;  %v1404_v17 = vshll.u32 %v7722_v59, %v1392_v27  ;;  %v1391_v54 = vshrl.u32 %v1390_v23, 5 }
 0x31a   :  { %v10148_v43 = vshrl.u32 %v2984_v39, 30  ;;  %v1396_v50 = vshrl.u32 %v7720_v55, %v1393_v63  ;;  %v1399_v33 = vshrl.u32 %v7721_v57, %v1393_v63  ;;  %v1402_v19 = vshrl.u32 %v7722_v59, %v1393_v63 }
 0x31b   :  { %v1405_v8 = vshrl.u32 %v7723_v61, %v1393_v63  ;;  %v1408_v22 = vshrl.u32 %v7724_v4, %v1393_v63  ;;  %v1401_v60 = vshll.u32 %v7721_v57, %v1392_v27  ;;  %v1407_v30 = vshll.u32 %v7723_v61, %v1392_v27 }
 0x31c   :  { %v2986_v0 = vshll.u32 %v10148_v43, 30  ;;  %v1357_v62 = vcvt.s32.f32 %v1350_v28  ;;  %v1397_v35 = vor.u32 %v1396_v50, %v1395_v5  ;;  %v1400_v45 = vor.u32 %v1399_v33, %v1398_v20 }
 0x31d   :  { %v1406_v24 = vor.u32 %v1405_v8, %v1404_v17  ;;  %v1403_v26 = vor.u32 %v1402_v19, %v1401_v60  ;;  %v1409_v14 = vor.u32 %v1408_v22, %v1407_v30  ;;  %vm10171_vm0 = vcmp.le.f32.partialorder %v1275_v1, 0.7853982 }
 0x31e   :  { %v10164_v46 = vsub.s32 %v2983_v11, %v2986_v0  ;;  %vm1277_vm1 = vcmp.lt.s32.totalorder %v9267_v49, 0  ;;  %v1358_v12 = vmul.f32 %v1357_v62, %v1355_v53  ;;  %v1386_v7 = vor.u32 8388608, %v1385_v18 }
 0x31f   :  { %v1362_v29 = vsel %vm1277_vm1, %v1361_v44, %v10056_v42  ;;  %vm1410_vm9 = vcmp.lt.s32.totalorder %v1391_v54, 1  ;;  %vm1413_vm3 = vcmp.lt.s32.totalorder %v1391_v54, 4  ;;  %vm1412_vm4 = vcmp.lt.s32.totalorder %v1391_v54, 3 }
 0x320   :  { %v2989_v58 = vsub.s32 0, %v10164_v46  ;;  %v1418_v13 = vsel %vm1410_vm9, %v1397_v35, %v1400_v45  ;;  %v1419_v10 = vsel %vm1413_vm3, %v1406_v24, 920167782  ;;  %v3030_v1 = vshrl.u32 %v3029_v2, 23 }
 0x321   :  { %v1420_v31 = vsel %vm1412_vm4, %v1403_v26, %v1419_v10  ;;  %v1422_v23 = vsel %vm1410_vm9, %v1400_v45, %v1403_v26  ;;  %v1423_v11 = vsel %vm1413_vm3, %v1409_v14, 1326507024  ;;  %v1359_v16 = vxor.u32 2147483648, %v1358_v12 }
 0x322   :  { %v7221_v41 = vmin.u32 %v2989_v58, %v10164_v46  ;;  %v1394_v27 = vshrl.u32 %v7719_v51, %v1393_v63  ;;  %vm1411_vm5 = vcmp.lt.s32.totalorder %v1391_v54, 2  ;;  %v1426_v42 = vshll.u32 %v1386_v7, 8 }
 0x323   :  { %v1415_v39 = vsel %vm1413_vm3, %v1403_v26, 2102212464  ;;  %v1421_v9 = vsel %vm1411_vm5, %v1418_v13, %v1420_v31  ;;  %v1424_v44 = vsel %vm1412_vm4, %v1406_v24, %v1423_v11  ;;  %v7224_v33 = vadd.s32 4294967169, %v3030_v1 }
 0x324   :  { %v2991_v38 = vclz %v7221_v41  ;;  %v1425_v18 = vsel %vm1411_vm5, %v1422_v23, %v1424_v44  ;;  %v10187_v28 = vmul.u32.u64.low %v1426_v42, %v1421_v9  ;;  %v10188_v50 = vmul.u32.u64.high %v1426_v42, %v1421_v9, %v10187_v28 }
 0x325   :  { %v1364_v2 = vsel %vm10171_vm0, 0, %v1362_v29  ;;  %v10193_v63 = vmul.u32.u64.low %v1426_v42, %v1425_v18  ;;  %v10194_v53 = vmul.u32.u64.high %v1426_v42, %v1425_v18, %v10193_v63  ;;  %v1414_v19 = vsel %vm1410_vm9, %v1394_v27, %v1397_v35 }
 0x326   :  { %v7222_v34 = vadd.s32 4294967294, %v2991_v38  ;;  %v1416_v8 = vsel %vm1412_vm4, %v1400_v45, %v1415_v39  ;;  %v3036_v5 = vadd.s32 1, %v7224_v33  ;;  %v1360_v20 = vsel %vm1277_vm1, %v1359_v16, %v1358_v12 }
 0x327   :  { %v2979_v17 = vadd.s32 %v10115_v25, %v10113_v52  ;;  %v3009_v30 = vsub.s32 4, %v10148_v43  ;;  %v1436_v62 = vadd.s32 1, %v10188_v50  ;;  %v3026_v24 = vand.u32 2147483647, %v9624_v40 }
 0x328   :  { %vm7223_vm7 = vcmp.lt.s32.totalorder %v7222_v34, 0  ;;  %vm3037_vm8 = vcmp.gt.s32.totalorder %v3036_v5, 0  ;;  %v1417_v26 = vsel %vm1411_vm5, %v1414_v19, %v1416_v8  ;;  %v1363_v14 = vsel %vm10171_vm0, %v9267_v49, %v1360_v20 }
 0x329   :  { %v2994_v0 = vsel %vm7223_vm7, 0, %v7222_v34  ;;  %vm2925_vm10 = vcmp.lt.s32.totalorder %v9341_v21, 0  ;;  %vm1435_vm6 = vc.u32 %v10194_v53, %v10187_v28  ;;  %v4786_v52 = vadd.s32 3, %v1364_v2 }
 0x32a   :  { %v2995_v22 = vsub.s32 32, %v2994_v0  ;;  %v2999_v60 = vsub.s32 4294967266, %v2994_v0  ;;  %v2996_v35 = vshll.u32 %v10164_v46, %v2994_v0  ;;  %v3038_v7 = vsel %vm3037_vm8, %v3036_v5, 0 }
 0x32b   :  { %v3010_v46 = vsel %vm2925_vm10, %v3009_v30, %v10148_v43  ;;  %v1433_v29 = vmul.u32 %v1426_v42, %v1417_v26  ;;  %v1437_v54 = vsel %vm1435_vm6, %v1436_v62, %v10188_v50  ;;  %v3033_v3 = vand.u32 8388607, %v3026_v24 }
 0x32c   :  { %v2997_v58 = vshrl.u32 %v2979_v17, %v2995_v22  ;;  %v3000_v45 = vadd.s32 127, %v2999_v60  ;;  %7670 = vcosq.f32 %v1363_v14  ;;  %v10219_v13 = vand.u32 3, %v1364_v2  ;;  %v10241_v2 = vpop.f32.mrb[14].mxu1 }
 0x32d   :  { %vm10223_vm11 = vcmp.le.f32.partialorder %v2923_v37, 0.7853982  ;;  %v1438_v1 = vadd.s32 %v1437_v54, %v1433_v29  ;;  %v3040_v38 = vand.u32 31, %v3038_v7  ;;  %v10227_v31 = vand.u32 3, %v4786_v52 }
 0x32e   :  { %v2998_v25 = vor.u32 %v2997_v58, %v2996_v35  ;;  %v3001_v12 = vshll.u32 %v3000_v45, 23  ;;  %v10231_v11 = vsel %vm10223_vm11, 0, %v3010_v46  ;;  %7672 = vsinq.f32 %v1363_v14 }
 0x32f   :  { %v1439_v16 = vadd.s32 536870912, %v1438_v1  ;;  %v3034_v27 = vor.u32 8388608, %v3033_v3  ;;  %v3041_v42 = vsub.s32 32, %v3040_v38  ;;  %v3043_v37 = vshll.u32 %v7719_v51, %v3040_v38 }
 0x330   :  { %v3002_v41 = vor.u32 4788187, %v3001_v12  ;;  %v3005_v23 = vcvt.s32.f32 %v2998_v25  ;;  %v3046_v39 = vshll.u32 %v7720_v55, %v3040_v38  ;;  %v3049_v9 = vshll.u32 %v7721_v57, %v3040_v38 }
 0x331   :  { %v10236_v44 = vshrl.u32 %v1439_v16, 30  ;;  %v3044_v18 = vshrl.u32 %v7720_v55, %v3041_v42  ;;  %v3047_v50 = vshrl.u32 %v7721_v57, %v3041_v42  ;;  %v3052_v33 = vshll.u32 %v7722_v59, %v3040_v38 }
 0x332   :  { %v3003_v43 = vand.u32 2147483647, %v3002_v41  ;;  %v3050_v63 = vshrl.u32 %v7722_v59, %v3041_v42  ;;  %v3053_v0 = vshrl.u32 %v7723_v61, %v3041_v42  ;;  %v3055_v19 = vshll.u32 %v7723_v61, %v3040_v38 }
 0x333   :  { %v3056_v8 = vshrl.u32 %v7724_v4, %v3041_v42  ;;  %v1441_v20 = vshll.u32 %v10236_v44, 30  ;;  %v10248_v17 = vshrl.u32 %v3038_v7, 5  ;;  %v3045_v22 = vor.u32 %v3044_v18, %v3043_v37 }
 0x334   :  { %v3006_v34 = vmul.f32 %v3005_v23, %v3003_v43  ;;  %v3048_v60 = vor.u32 %v3047_v50, %v3046_v39  ;;  %v3051_v30 = vor.u32 %v3050_v63, %v3049_v9  ;;  %v3054_v62 = vor.u32 %v3053_v0, %v3052_v33 }
 0x335   :  { %v3057_v35 = vor.u32 %v3056_v8, %v3055_v19  ;;  %v10250_v58 = vsub.s32 %v1438_v1, %v1441_v20  ;;  %v10253_v26 = vadd.s32 3, %v10231_v11  ;;  %v10255_v14 = vshll.u32 %v3034_v27, 8 }
 0x336   :  { %v3007_v5 = vxor.u32 2147483648, %v3006_v34  ;;  %v7671_v45 = vpop.eup %7670  ;;  %vm1373_vm13 = vcmp.eq.s32.totalorder %v10219_v13, 2  ;;  %vm1380_vm12 = vcmp.lt.s32.totalorder %v9474_v36, 0  ;;  %vm3058_vm14 = vcmp.lt.s32.totalorder %v10248_v17, 1 }
 0x337   :  { %v1444_v25 = vsub.s32 0, %v10250_v58  ;;  %vm3061_vm15 = vcmp.lt.s32.totalorder %v10248_v17, 4  ;;  %vm4792_vm2 = vcmp.eq.s32.totalorder %v10227_v31, 2  ;;  %v3066_v12 = vsel %vm3058_vm14, %v3045_v22, %v3048_v60 }
 0x338   :  { %v3008_v52 = vsel %vm2925_vm10, %v3007_v5, %v3006_v34  ;;  %v3067_v7 = vsel %vm3061_vm15, %v3054_v62, 920167782  ;;  %v3070_v46 = vsel %vm3058_vm14, %v3048_v60, %v3051_v30  ;;  %v3071_v29 = vsel %vm3061_vm15, %v3057_v35, 1326507024  ;;  %v7673_v54 = vpop.eup %7672 }
 0x339   :  { %vm1370_vm0 = vcmp.eq.s32.totalorder %v10219_v13, 0  ;;  %v1374_v3 = vxor.u32 2147483648, %v7671_v45  ;;  %vm4789_vm1 = vcmp.eq.s32.totalorder %v10227_v31, 0  ;;  %v7161_v41 = vmin.u32 %v1444_v25, %v10250_v58 }
 0x33a   :  { %vm3059_vm9 = vcmp.lt.s32.totalorder %v10248_v17, 2  ;;  %vm3060_vm3 = vcmp.lt.s32.totalorder %v10248_v17, 3  ;;  %v3011_v1 = vsel %vm10223_vm11, %v9341_v21, %v3008_v52  ;;  %vm10283_vm4 = vcmp.le.f32.partialorder %v1378_v47, 0.7853982 }
 0x33b   :  { %v3042_v43 = vshrl.u32 %v7719_v51, %v3041_v42  ;;  %v3068_v23 = vsel %vm3060_vm3, %v3051_v30, %v3067_v7  ;;  %v3072_v16 = vsel %vm3060_vm3, %v3054_v62, %v3071_v29  ;;  %v1446_v27 = vclz %v7161_v41 }
 0x33c   :  { %v3063_v34 = vsel %vm3061_vm15, %v3051_v30, 2102212464  ;;  %v3069_v10 = vsel %vm3059_vm9, %v3066_v12, %v3068_v23  ;;  %v3073_v47 = vsel %vm3059_vm9, %v3070_v46, %v3072_v16  ;;  %vm1369_vm5 = vcmp.lt.s32.totalorder %v10219_v13, 2 }
 0x33d   :  { %v1371_v37 = vxor.u32 2147483648, %v7673_v54  ;;  %v1464_v42 = vsub.s32 4, %v10236_v44  ;;  %v3062_v39 = vsel %vm3058_vm14, %v3042_v43, %v3045_v22  ;;  %v1484_v9 = vand.u32 2139095040, %v9694_v32 }
 0x33e   :  { %vm4788_vm7 = vcmp.lt.s32.totalorder %v10227_v31, 2  ;;  %7674 = vcosq.f32 %v3011_v1  ;;  %v7162_v18 = vadd.s32 4294967294, %v1446_v27  ;;  %v3064_v63 = vsel %vm3060_vm3, %v3048_v60, %v3063_v34 }
 0x33f   :  { %v10305_v50 = vmul.u32.u64.low %v10255_v14, %v3073_v47  ;;  %v10306_v33 = vmul.u32.u64.high %v10255_v14, %v3073_v47, %v10305_v50  ;;  %v10311_v0 = vmul.u32.u64.low %v10255_v14, %v3069_v10  ;;  %v10312_v19 = vmul.u32.u64.high %v10255_v14, %v3069_v10, %v10311_v0 }
 0x340   :  { %v1485_v8 = vshrl.u32 %v1484_v9, 23  ;;  %7676 = vsinq.f32 %v3011_v1  ;;  %v1434_v5 = vadd.s32 %v10187_v28, %v10194_v53  ;;  %vm7163_vm8 = vcmp.lt.s32.totalorder %v7162_v18, 0 }
 0x341   :  { %v1481_v20 = vand.u32 2147483647, %v9694_v32  ;;  %v1375_v22 = vsel %vm1373_vm13, %v1374_v3, %v7673_v54  ;;  %v1449_v30 = vsel %vm7163_vm8, 0, %v7162_v18  ;;  %v1465_v60 = vsel %vm1380_vm12, %v1464_v42, %v10236_v44 }
 0x342   :  { %v7164_v62 = vadd.s32 4294967169, %v1485_v8  ;;  %v4794_v35 = vsel %vm4792_vm2, %v1374_v3, %v7673_v54  ;;  %v1450_v52 = vsub.s32 32, %v1449_v30  ;;  %v1454_v25 = vsub.s32 4294967266, %v1449_v30 }
 0x343   :  { %v3065_v28 = vsel %vm3059_vm9, %v3062_v39, %v3064_v63  ;;  %v1372_v53 = vsel %vm1370_vm0, %v7671_v45, %v1371_v37  ;;  %v4791_v12 = vsel %vm4789_vm1, %v7671_v45, %v1371_v37  ;;  %vm3083_vm10 = vc.u32 %v10306_v33, %v10311_v0 }
 0x344   :  { %v3084_v7 = vadd.s32 1, %v10312_v19  ;;  %v1451_v44 = vshll.u32 %v10250_v58, %v1449_v30  ;;  %v1452_v46 = vshrl.u32 %v1434_v5, %v1450_v52  ;;  %v1455_v29 = vadd.s32 127, %v1454_v25  ;;  %v10374_v52 = vpop.f32.mrb[15].mxu0 }
 0x345   :  { %v1467_v54 = vsel %vm10283_vm4, 0, %v1465_v60  ;;  %v10336_v17 = vand.u32 3, %v10231_v11  ;;  %v3081_v3 = vmul.u32 %v10255_v14, %v3065_v28  ;;  %v1491_v1 = vadd.s32 1, %v7164_v62 }
 0x346   :  { %v3085_v41 = vsel %vm3083_vm10, %v3084_v7, %v10312_v19  ;;  %v1376_v45 = vsel %vm1369_vm5, %v1372_v53, %v1375_v22  ;;  %v10343_v43 = vand.u32 3, %v10253_v26  ;;  %v1453_v58 = vor.u32 %v1452_v46, %v1451_v44 }
 0x347   :  { %v1456_v23 = vshll.u32 %v1455_v29, 23  ;;  %v4795_v16 = vsel %vm4788_vm7, %v4791_v12, %v4794_v35  ;;  %v4890_v27 = vadd.s32 3, %v1467_v54  ;;  %v3086_v34 = vadd.s32 %v3085_v41, %v3081_v3 }
 0x348   :  { %vm1492_vm6 = vcmp.gt.s32.totalorder %v1491_v1, 0  ;;  %v10347_v11 = vpop.eup %7674  ;;  %v1488_v10 = vand.u32 8388607, %v1481_v20  ;;  %vm1367_vm11 = vweird.f32 %v9267_v49  ;;  %vm3021_vm13 = vcmp.eq.s32.totalorder %v10336_v17, 2 }
 0x349   :  { %v1457_v14 = vor.u32 4788187, %v1456_v23  ;;  %v1493_v47 = vsel %vm1492_vm6, %v1491_v1, 0  ;;  %v3087_v13 = vadd.s32 536870912, %v3086_v34  ;;  %v10354_v42 = vsel %vm1367_vm11, nan, %v1376_v45 }
 0x34a   :  { %v1495_v26 = vand.u32 31, %v1493_v47  ;;  %v10352_v37 = vpop.eup %7676  ;;  %v10356_v31 = vsel %vm1367_vm11, nan, %v4795_v16  ;;  %v1460_v9 = vcvt.s32.f32 %v1453_v58  ;;  %vm6456_vm14 = vcmp.eq.s32.totalorder %v10343_v43, 2 }
 0x34b   :  { %v1458_v39 = vand.u32 2147483647, %v1457_v14  ;;  %v10360_v18 = vand.u32 3, %v1467_v54  ;;  %v10362_v50 = vand.u32 3, %v4890_v27  ;;  %v10364_v63 = vshrl.u32 %v3087_v13, 30 }
 0x34c   :  { %v1496_v49 = vsub.s32 32, %v1495_v26  ;;  %v1489_v8 = vor.u32 8388608, %v1488_v10  ;;  %v3129_v5 = vand.u32 2147483647, %v9763_v6  ;;  %v3132_v22 = vand.u32 2139095040, %v9763_v6 }
 0x34d   :  { %v1461_v19 = vmul.f32 %v1460_v9, %v1458_v39  ;;  %v3019_v30 = vxor.u32 2147483648, %v10352_v37  ;;  %v3022_v60 = vxor.u32 2147483648, %v10347_v11  ;;  %v10371_v62 = vadd.s32 %v10311_v0, %v10306_v33 }
 0x34e   :  { %v3089_v35 = vshll.u32 %v10364_v63, 30  ;;  %v1499_v28 = vshrl.u32 %v7720_v55, %v1496_v49  ;;  %v1502_v53 = vshrl.u32 %v7721_v57, %v1496_v49  ;;  %v1505_v12 = vshrl.u32 %v7722_v59, %v1496_v49 }
 0x34f   :  { %v1462_v25 = vxor.u32 2147483648, %v1461_v19  ;;  %v10381_v44 = vshrl.u32 %v1493_v47, 5  ;;  %v1498_v46 = vshll.u32 %v7719_v51, %v1495_v26  ;;  %v1508_v33 = vshrl.u32 %v7723_v61, %v1496_v49 }
 0x350   :  { %v10379_v7 = vsub.s32 %v3086_v34, %v3089_v35  ;;  %v1501_v29 = vshll.u32 %v7720_v55, %v1495_v26  ;;  %v1504_v54 = vshll.u32 %v7721_v57, %v1495_v26  ;;  %v1511_v3 = vshrl.u32 %v7724_v4, %v1496_v49 }
 0x351   :  { %v1463_v0 = vsel %vm1380_vm12, %v1462_v25, %v1461_v19  ;;  %v1507_v45 = vshll.u32 %v7722_v59, %v1495_v26  ;;  %v1510_v58 = vshll.u32 %v7723_v61, %v1495_v26  ;;  %vm3018_vm15 = vcmp.eq.s32.totalorder %v10336_v17, 0 }
 0x352   :  { %v1466_v41 = vsel %vm10283_vm4, %v9474_v36, %v1463_v0  ;;  %v3092_v1 = vsub.s32 0, %v10379_v7  ;;  %vm6453_vm12 = vcmp.eq.s32.totalorder %v10343_v43, 0  ;;  %v1500_v23 = vor.u32 %v1499_v28, %v1498_v46 }
 0x353   :  { %7678 = vcosq.f32 %v1466_v41  ;;  %v1503_v16 = vor.u32 %v1502_v53, %v1501_v29  ;;  %v1506_v27 = vor.u32 %v1505_v12, %v1504_v54  ;;  %v10401_v34 = vsel %vm3021_vm13, %v3022_v60, %v10352_v37 }
 0x354   :  { %7680 = vsinq.f32 %v1466_v41  ;;  %v7225_v38 = vmin.u32 %v3092_v1, %v10379_v7  ;;  %v1509_v14 = vor.u32 %v1508_v33, %v1507_v45  ;;  %v10407_v10 = vsel %vm6456_vm14, %v3022_v60, %v10352_v37 }
 0x355   :  { %v1512_v47 = vor.u32 %v1511_v3, %v1510_v58  ;;  %v10409_v13 = vshll.u32 %v1489_v8, 8  ;;  %v3133_v26 = vshrl.u32 %v3132_v22, 23  ;;  %vm3028_vm2 = vcmp.lt.s32.totalorder %v9624_v40, 0 }
 0x356   :  { %v3094_v39 = vclz %v7225_v38  ;;  %v3112_v9 = vsub.s32 4, %v10364_v63  ;;  %vm1513_vm0 = vcmp.lt.s32.totalorder %v10381_v44, 1  ;;  %vm1516_vm1 = vcmp.lt.s32.totalorder %v10381_v44, 4 }
 0x357   :  { %vm1476_vm9 = vcmp.eq.s32.totalorder %v10360_v18, 2  ;;  %vm4896_vm3 = vcmp.eq.s32.totalorder %v10362_v50, 2  ;;  %v1497_v19 = vshrl.u32 %v7719_v51, %v1496_v49  ;;  %vm1514_vm4 = vcmp.lt.s32.totalorder %v10381_v44, 2 }
 0x358   :  { %v1518_v8 = vsel %vm1516_vm1, %v1506_v27, 2102212464  ;;  %v1521_v22 = vsel %vm1513_vm0, %v1500_v23, %v1503_v16  ;;  %vm1473_vm5 = vcmp.eq.s32.totalorder %v10360_v18, 0  ;;  %vm4893_vm7 = vcmp.eq.s32.totalorder %v10362_v50, 0 }
 0x359   :  { %v7226_v60 = vadd.s32 4294967294, %v3094_v39  ;;  %vm1515_vm8 = vcmp.lt.s32.totalorder %v10381_v44, 3  ;;  %v1522_v35 = vsel %vm1516_vm1, %v1509_v14, 920167782  ;;  %v1525_v49 = vsel %vm1513_vm0, %v1503_v16, %v1506_v27 }
 0x35a   :  { %vm1472_vm10 = vcmp.lt.s32.totalorder %v10360_v18, 2  ;;  %vm4892_vm6 = vcmp.lt.s32.totalorder %v10362_v50, 2  ;;  %v1517_v25 = vsel %vm1513_vm0, %v1497_v19, %v1500_v23  ;;  %v1523_v28 = vsel %vm1515_vm8, %v1506_v27, %v1522_v35 }
 0x35b   :  { %v1526_v53 = vsel %vm1516_vm1, %v1512_v47, 1326507024  ;;  %v7228_v12 = vadd.s32 4294967169, %v3133_v26  ;;  %vm1470_vm11 = vweird.f32 %v9474_v36  ;;  %vm7227_vm13 = vcmp.lt.s32.totalorder %v7226_v60, 0 }
 0x35c   :  { %v1519_v46 = vsel %vm1515_vm8, %v1503_v16, %v1518_v8  ;;  %v1524_v33 = vsel %vm1514_vm4, %v1521_v22, %v1523_v28  ;;  %v1527_v0 = vsel %vm1515_vm8, %v1509_v14, %v1526_v53  ;;  %v3097_v29 = vsel %vm7227_vm13, 0, %v7226_v60 }
 0x35d   :  { %v1528_v54 = vsel %vm1514_vm4, %v1525_v49, %v1527_v0  ;;  %v10442_v3 = vmul.u32.u64.low %v10409_v13, %v1524_v33  ;;  %v10443_v41 = vmul.u32.u64.high %v10409_v13, %v1524_v33, %v10442_v3  ;;  %v3020_v1 = vsel %vm3018_vm15, %v10347_v11, %v3019_v30  ;;  %v7679_v27 = vpop.eup %7678 }
 0x35e   :  { %v6455_v45 = vsel %vm6453_vm12, %v10347_v11, %v3019_v30  ;;  %vm10458_vm14 = vcmp.le.f32.partialorder %v3026_v24, 0.7853982  ;;  %v3098_v23 = vsub.s32 32, %v3097_v29  ;;  %v3102_v16 = vsub.s32 4294967266, %v3097_v29  ;;  %v7681_v26 = vpop.eup %7680 }
 0x35f   :  { %v1520_v38 = vsel %vm1514_vm4, %v1517_v25, %v1519_v46  ;;  %v10465_v14 = vmul.u32.u64.low %v10409_v13, %v1528_v54  ;;  %v10466_v47 = vmul.u32.u64.high %v10409_v13, %v1528_v54, %v10465_v14  ;;  %v3139_v37 = vadd.s32 1, %v7228_v12 }
 0x360   :  { %v1477_v39 = vxor.u32 2147483648, %v7679_v27  ;;  %v3099_v11 = vshll.u32 %v10379_v7, %v3097_v29  ;;  %v3100_v24 = vshrl.u32 %v10371_v62, %v3098_v23  ;;  %v3103_v30 = vadd.s32 127, %v3102_v16 }
 0x361   :  { %v1474_v19 = vxor.u32 2147483648, %v7681_v26  ;;  %v3113_v8 = vsel %vm3028_vm2, %v3112_v9, %v10364_v63  ;;  %v1539_v44 = vadd.s32 1, %v10443_v41  ;;  %vm3140_vm15 = vcmp.gt.s32.totalorder %v3139_v37, 0 }
 0x362   :  { %v1478_v22 = vsel %vm1476_vm9, %v1477_v39, %v7681_v26  ;;  %v4898_v60 = vsel %vm4896_vm3, %v1477_v39, %v7681_v26  ;;  %v3101_v35 = vor.u32 %v3100_v24, %v3099_v11  ;;  %v3104_v49 = vshll.u32 %v3103_v30, 23 }
 0x363   :  { %v1475_v62 = vsel %vm1473_vm5, %v7679_v27, %v1474_v19  ;;  %v4895_v7 = vsel %vm4893_vm7, %v7679_v27, %v1474_v19  ;;  %v1536_v25 = vmul.u32 %v10409_v13, %v1520_v38  ;;  %vm1538_vm12 = vc.u32 %v10466_v47, %v10442_v3 }
 0x364   :  { %v1479_v63 = vsel %vm1472_vm10, %v1475_v62, %v1478_v22  ;;  %v4899_v9 = vsel %vm4892_vm6, %v4895_v7, %v4898_v60  ;;  %v3105_v28 = vor.u32 4788187, %v3104_v49  ;;  %v3108_v53 = vcvt.s32.f32 %v3101_v35 }
 0x365   :  { %v1480_v12 = vsel %vm1470_vm11, nan, %v1479_v63  ;;  %v4900_v46 = vsel %vm1470_vm11, nan, %v4899_v9  ;;  %v1540_v33 = vsel %vm1538_vm12, %v1539_v44, %v10443_v41  ;;  %v3141_v13 = vsel %vm3140_vm15, %v3139_v37, 0  ;;  %v10516_v37 = vpop.f32.mrb[15].mxu1 }
 0x366   :  { %v7425_v0 = vpack.c.bf16 %v1480_v12, %v10354_v42  ;;  %v7441_v18 = vpack.c.bf16 %v4900_v46, %v10356_v31  ;;  %v3106_v29 = vand.u32 2147483647, %v3105_v28  ;;  %v1541_v54 = vadd.s32 %v1540_v33, %v1536_v25 }
 0x367   :  { %vm3015_vm0 = vweird.f32 %v9341_v21  ;;  %v3115_v50 = vsel %vm10458_vm14, 0, %v3113_v8  ;;  %v3143_v23 = vand.u32 31, %v3141_v13  ;;  %vm3017_vm1 = vcmp.lt.s32.totalorder %v10336_v17, 2 }
 0x368   :  { %vm6452_vm9 = vcmp.lt.s32.totalorder %v10343_v43, 2  ;;  %3642 = vst [vmem:[%s11184_s2 + $0x28] sm:$0xff] %v7425_v0  ;;  %7409 = vst [vmem:[%s11184_s2 + $0xa8] sm:$0xff] %v7441_v18  ;;  %v3109_v36 = vmul.f32 %v3108_v53, %v3106_v29  ;;  %v1542_v42 = vadd.s32 536870912, %v1541_v54  ;;  %v3024_v31 = vsel %vm3017_vm1, %v3020_v1, %v10401_v34 }
 0x369   :  { %v6459_v41 = vsel %vm6452_vm9, %v6455_v45, %v10407_v10  ;;  %v3136_v16 = vand.u32 8388607, %v3129_v5  ;;  %v3144_v17 = vsub.s32 32, %v3143_v23  ;;  %v10512_v43 = vand.u32 3, %v3115_v50 }
 0x36a   :  { %v3110_v27 = vxor.u32 2147483648, %v3109_v36  ;;  %v6554_v38 = vadd.s32 3, %v3115_v50  ;;  %v10514_v14 = vshrl.u32 %v1542_v42, 30  ;;  %v3146_v26 = vshll.u32 %v7719_v51, %v3143_v23 }
 0x36b   :  { %v3147_v39 = vshrl.u32 %v7720_v55, %v3144_v17  ;;  %v3150_v34 = vshrl.u32 %v7721_v57, %v3144_v17  ;;  %v3153_v10 = vshrl.u32 %v7722_v59, %v3144_v17  ;;  %v3149_v11 = vshll.u32 %v7720_v55, %v3143_v23 }
 0x36c   :  { %v3111_v1 = vsel %vm3028_vm2, %v3110_v27, %v3109_v36  ;;  %v1544_v45 = vshll.u32 %v10514_v14, 30  ;;  %v3156_v24 = vshrl.u32 %v7723_v61, %v3144_v17  ;;  %v3142_v19 = vshrl.u32 %v3141_v13, 5 }
 0x36d   :  { %v3114_v30 = vsel %vm10458_vm14, %v9624_v40, %v3111_v1  ;;  %v3152_v8 = vshll.u32 %v7721_v57, %v3143_v23  ;;  %v3155_v44 = vshll.u32 %v7722_v59, %v3143_v23  ;;  %v3148_v60 = vor.u32 %v3147_v39, %v3146_v26 }
 0x36e   :  { %7682 = vcosq.f32 %v3114_v30  ;;  %v10532_v22 = vsub.s32 %v1541_v54, %v1544_v45  ;;  %v3151_v35 = vor.u32 %v3150_v34, %v3149_v11  ;;  %v3159_v7 = vshrl.u32 %v7724_v4, %v3144_v17 }
 0x36f   :  { %7684 = vsinq.f32 %v3114_v30  ;;  %v3154_v49 = vor.u32 %v3153_v10, %v3152_v8  ;;  %v3157_v62 = vor.u32 %v3156_v24, %v3155_v44  ;;  %v10537_v25 = vsel %vm3015_vm0, nan, %v3024_v31 }
 0x370   :  { %v6555_v58 = vand.u32 3, %v6554_v38  ;;  %v1547_v63 = vsub.s32 0, %v10532_v22  ;;  %v3158_v9 = vshll.u32 %v7723_v61, %v3143_v23  ;;  %v10543_v28 = vsel %vm3015_vm0, nan, %v6459_v41 }
 0x371   :  { %v3137_v53 = vor.u32 8388608, %v3136_v16  ;;  %v3145_v12 = vshrl.u32 %v7719_v51, %v3144_v17  ;;  %v1587_v46 = vand.u32 2139095040, %v9900_v48  ;;  %vm3161_vm2 = vcmp.lt.s32.totalorder %v3142_v19, 1 }
 0x372   :  { %v7165_v33 = vmin.u32 %v1547_v63, %v10532_v22  ;;  %v3160_v13 = vor.u32 %v3159_v7, %v3158_v9  ;;  %vm3164_vm3 = vcmp.lt.s32.totalorder %v3142_v19, 4  ;;  %vm3121_vm4 = vcmp.eq.s32.totalorder %v10512_v43, 0 }
 0x373   :  { %vm3163_vm5 = vcmp.lt.s32.totalorder %v3142_v19, 3  ;;  %v3166_v0 = vsel %vm3164_vm3, %v3154_v49, 2102212464  ;;  %v3169_v18 = vsel %vm3161_vm2, %v3148_v60, %v3151_v35  ;;  %v3170_v21 = vsel %vm3164_vm3, %v3157_v62, 920167782 }
 0x374   :  { %vm3120_vm7 = vcmp.lt.s32.totalorder %v10512_v43, 2  ;;  %vm3124_vm8 = vcmp.eq.s32.totalorder %v10512_v43, 2  ;;  %vm6556_vm10 = vcmp.lt.s32.totalorder %v6555_v58, 2  ;;  %v1549_v29 = vclz %v7165_v33 }
 0x375   :  { %v3171_v54 = vsel %vm3163_vm5, %v3154_v49, %v3170_v21  ;;  %vm3118_vm6 = vweird.f32 %v9624_v40  ;;  %vm3162_vm11 = vcmp.lt.s32.totalorder %v3142_v19, 2  ;;  %v3165_v50 = vsel %vm3161_vm2, %v3145_v12, %v3148_v60 }
 0x376   :  { %v3173_v23 = vsel %vm3161_vm2, %v3151_v35, %v3154_v49  ;;  %v3177_v36 = vshll.u32 %v3137_v53, 8  ;;  %v7166_v42 = vadd.s32 4294967294, %v1549_v29  ;;  %v3167_v31 = vsel %vm3163_vm5, %v3151_v35, %v3166_v0 }
 0x377   :  { %v3172_v41 = vsel %vm3162_vm11, %v3169_v18, %v3171_v54  ;;  %v3174_v16 = vsel %vm3164_vm3, %v3160_v13, 1326507024  ;;  %v1588_v26 = vshrl.u32 %v1587_v46, 23  ;;  %vm6557_vm13 = vcmp.eq.s32.totalorder %v6555_v58, 0 }
 0x378   :  { %v3175_v17 = vsel %vm3163_vm5, %v3157_v62, %v3174_v16  ;;  %v10559_v27 = vmul.u32.u64.low %v3177_v36, %v3172_v41  ;;  %v10560_v38 = vmul.u32.u64.high %v3177_v36, %v3172_v41, %v10559_v27  ;;  %v7683_v39 = vpop.eup %7682  ;;  %vm6560_vm14 = vcmp.eq.s32.totalorder %v6555_v58, 2 }
 0x379   :  { %vm7167_vm15 = vcmp.lt.s32.totalorder %v7166_v42, 0  ;;  %v3176_v34 = vsel %vm3162_vm11, %v3173_v23, %v3175_v17  ;;  %v7685_v10 = vpop.eup %7684  ;;  %v3125_v1 = vxor.u32 2147483648, %v7683_v39  ;;  %v3168_v60 = vsel %vm3162_vm11, %v3165_v50, %v3167_v31 }
 0x37a   :  { %v1552_v45 = vsel %vm7167_vm15, 0, %v7166_v42  ;;  %v10564_v11 = vmul.u32.u64.low %v3177_v36, %v3176_v34  ;;  %v10565_v24 = vmul.u32.u64.high %v3177_v36, %v3176_v34, %v10564_v11  ;;  %v3122_v30 = vxor.u32 2147483648, %v7685_v10 }
 0x37b   :  { %v1553_v8 = vsub.s32 32, %v1552_v45  ;;  %v1557_v44 = vsub.s32 4294967266, %v1552_v45  ;;  %v3126_v35 = vsel %vm3124_vm8, %v3125_v1, %v7685_v10  ;;  %v6562_v49 = vsel %vm6560_vm14, %v3125_v1, %v7685_v10 }
 0x37c   :  { %v3187_v62 = vadd.s32 1, %v10560_v38  ;;  %v7168_v7 = vadd.s32 4294967169, %v1588_v26  ;;  %v3123_v63 = vsel %vm3121_vm4, %v7683_v39, %v3122_v30  ;;  %v6559_v9 = vsel %vm6557_vm13, %v7683_v39, %v3122_v30 }
 0x37d   :  { %v1537_v53 = vadd.s32 %v10442_v3, %v10466_v47  ;;  %v1558_v12 = vadd.s32 127, %v1557_v44  ;;  %v3127_v19 = vsel %vm3120_vm7, %v3123_v63, %v3126_v35  ;;  %v6563_v46 = vsel %vm6556_vm10, %v6559_v9, %v6562_v49 }
 0x37e   :  { %v3184_v33 = vmul.u32 %v3177_v36, %v3168_v60  ;;  %vm3186_vm12 = vc.u32 %v10565_v24, %v10559_v27  ;;  %v3128_v13 = vsel %vm3118_vm6, nan, %v3127_v19  ;;  %v6564_v0 = vsel %vm3118_vm6, nan, %v6563_v46 }
 0x37f   :  { %v1555_v18 = vshrl.u32 %v1537_v53, %v1553_v8  ;;  %v1559_v21 = vshll.u32 %v1558_v12, 23  ;;  %v7433_v3 = vpack.c.bf16 %v3128_v13, %v10537_v25  ;;  %v7449_v47 = vpack.c.bf16 %v6564_v0, %v10543_v28 }
 0x380   :  { %v3188_v43 = vsel %vm3186_vm12, %v3187_v62, %v10560_v38  ;;  %v1594_v58 = vadd.s32 1, %v7168_v7  ;;  %v1554_v40 = vshll.u32 %v10532_v22, %v1552_v45  ;;  %v1584_v50 = vand.u32 2147483647, %v9900_v48 }
 0x381   :  { %v3189_v29 = vadd.s32 %v3188_v43, %v3184_v33  ;;  %3650 = vst [vmem:[%s11184_s2 + $0x68] sm:$0xff] %v7433_v3  ;;  %7417 = vst [vmem:[%s11184_s2 + $0xe8] sm:$0xff] %v7449_v47  ;;  %v1560_v54 = vor.u32 4788187, %v1559_v21  ;;  %vm1483_vm1 = vcmp.lt.s32.totalorder %v9694_v32, 0  ;;  %v3235_v11 = vand.u32 2139095040, %v10065_v15 }
 0x382   :  { %vm1595_vm0 = vcmp.gt.s32.totalorder %v1594_v58, 0  ;;  %v1556_v23 = vor.u32 %v1555_v18, %v1554_v40  ;;  %v1591_v41 = vand.u32 8388607, %v1584_v50  ;;  %v1567_v35 = vsub.s32 4, %v10514_v14 }
 0x383   :  { %v3190_v25 = vadd.s32 536870912, %v3189_v29  ;;  %v1596_v28 = vsel %vm1595_vm0, %v1594_v58, 0  ;;  %v1561_v31 = vand.u32 2147483647, %v1560_v54  ;;  %v3185_v49 = vadd.s32 %v10559_v27, %v10565_v24 }
 0x384   :  { %v1598_v36 = vand.u32 31, %v1596_v28  ;;  %v1563_v38 = vcvt.s32.f32 %v1556_v23  ;;  %v1592_v1 = vor.u32 8388608, %v1591_v41  ;;  %v1597_v62 = vshrl.u32 %v1596_v28, 5 }
 0x385   :  { %v10596_v42 = vshrl.u32 %v3190_v25, 30  ;;  %vm10620_vm9 = vcmp.le.f32.partialorder %v1481_v20, 0.7853982  ;;  %v3236_v21 = vshrl.u32 %v3235_v11, 23  ;;  %vm10664_vm6 = vcmp.le.f32.partialorder %v3129_v5, 0.7853982 }
 0x386   :  { %v1599_v16 = vsub.s32 32, %v1598_v36  ;;  %v1564_v10 = vmul.f32 %v1563_v38, %v1561_v31  ;;  %v1601_v8 = vshll.u32 %v7719_v51, %v1598_v36  ;;  %v1604_v44 = vshll.u32 %v7720_v55, %v1598_v36 }
 0x387   :  { %v3192_v17 = vshll.u32 %v10596_v42, 30  ;;  %v1610_v60 = vshll.u32 %v7722_v59, %v1598_v36  ;;  %v1607_v7 = vshll.u32 %v7721_v57, %v1598_v36  ;;  %v1613_v33 = vshll.u32 %v7723_v61, %v1598_v36 }
 0x388   :  { %v1602_v22 = vshrl.u32 %v7720_v55, %v1599_v16  ;;  %v1605_v39 = vshrl.u32 %v7721_v57, %v1599_v16  ;;  %v1611_v34 = vshrl.u32 %v7723_v61, %v1599_v16  ;;  %v1608_v45 = vshrl.u32 %v7722_v59, %v1599_v16 }
 0x389   :  { %v10601_v26 = vsub.s32 %v3189_v29, %v3192_v17  ;;  %v1614_v13 = vshrl.u32 %v7724_v4, %v1599_v16  ;;  %v1632_v27 = vshll.u32 %v1592_v1, 8  ;;  %v1565_v24 = vxor.u32 2147483648, %v1564_v10 }
 0x38a   :  { %v1603_v9 = vor.u32 %v1602_v22, %v1601_v8  ;;  %v1606_v53 = vor.u32 %v1605_v39, %v1604_v44  ;;  %v1612_v12 = vor.u32 %v1611_v34, %v1610_v60  ;;  %v1609_v46 = vor.u32 %v1608_v45, %v1607_v7 }
 0x38b   :  { %v3195_v30 = vsub.s32 0, %v10601_v26  ;;  %v1600_v18 = vshrl.u32 %v7719_v51, %v1599_v16  ;;  %v1615_v3 = vor.u32 %v1614_v13, %v1613_v33  ;;  %vm1616_vm2 = vcmp.lt.s32.totalorder %v1597_v62, 1 }
 0x38c   :  { %vm1617_vm3 = vcmp.lt.s32.totalorder %v1597_v62, 2  ;;  %vm1619_vm4 = vcmp.lt.s32.totalorder %v1597_v62, 4  ;;  %vm1618_vm5 = vcmp.lt.s32.totalorder %v1597_v62, 3  ;;  %v1624_v20 = vsel %vm1616_vm2, %v1603_v9, %v1606_v53 }
 0x38d   :  { %v7229_v63 = vmin.u32 %v3195_v30, %v10601_v26  ;;  %v1625_v43 = vsel %vm1619_vm4, %v1612_v12, 920167782  ;;  %v1621_v58 = vsel %vm1619_vm4, %v1609_v46, 2102212464  ;;  %v1628_v40 = vsel %vm1616_vm2, %v1606_v53, %v1609_v46 }
 0x38e   :  { %v1626_v29 = vsel %vm1618_vm5, %v1609_v46, %v1625_v43  ;;  %v1629_v54 = vsel %vm1619_vm4, %v1615_v3, 1326507024  ;;  %v1566_v25 = vsel %vm1483_vm1, %v1565_v24, %v1564_v10  ;;  %v1620_v22 = vsel %vm1616_vm2, %v1600_v18, %v1603_v9 }
 0x38f   :  { %v3197_v0 = vclz %v7229_v63  ;;  %v1627_v28 = vsel %vm1617_vm3, %v1624_v20, %v1626_v29  ;;  %v1630_v23 = vsel %vm1618_vm5, %v1612_v12, %v1629_v54  ;;  %v1622_v39 = vsel %vm1618_vm5, %v1606_v53, %v1621_v58 }
 0x390   :  { %v1631_v31 = vsel %vm1617_vm3, %v1628_v40, %v1630_v23  ;;  %v10635_v41 = vmul.u32.u64.low %v1632_v27, %v1627_v28  ;;  %v10636_v16 = vmul.u32.u64.high %v1632_v27, %v1627_v28, %v10635_v41  ;;  %v1568_v34 = vsel %vm1483_vm1, %v1567_v35, %v10514_v14 }
 0x391   :  { %v7230_v47 = vadd.s32 4294967294, %v3197_v0  ;;  %v10644_v10 = vmul.u32.u64.low %v1632_v27, %v1631_v31  ;;  %v10645_v1 = vmul.u32.u64.high %v1632_v27, %v1631_v31, %v10644_v10  ;;  %v7232_v45 = vadd.s32 4294967169, %v3236_v21 }
 0x392   :  { %v1569_v11 = vsel %vm10620_vm9, %v9694_v32, %v1566_v25  ;;  %v1623_v60 = vsel %vm1617_vm3, %v1620_v22, %v1622_v39  ;;  %v1642_v7 = vadd.s32 1, %v10636_v16  ;;  %v1570_v14 = vsel %vm10620_vm9, 0, %v1568_v34 }
 0x393   :  { %vm7231_vm7 = vcmp.lt.s32.totalorder %v7230_v47, 0  ;;  %v3242_v63 = vadd.s32 1, %v7232_v45  ;;  %7686 = vcosq.f32 %v1569_v11  ;;  %vm1641_vm8 = vc.u32 %v10645_v1, %v10635_v41 }
 0x394   :  { %v3200_v36 = vsel %vm7231_vm7, 0, %v7230_v47  ;;  %v3232_v53 = vand.u32 2147483647, %v10065_v15  ;;  %7688 = vsinq.f32 %v1569_v11  ;;  %v4994_v12 = vadd.s32 3, %v1570_v14 }
 0x395   :  { %v3201_v17 = vsub.s32 32, %v3200_v36  ;;  %v3205_v38 = vsub.s32 4294967266, %v3200_v36  ;;  %v3202_v30 = vshll.u32 %v10601_v26, %v3200_v36  ;;  %v1643_v62 = vsel %vm1641_vm8, %v1642_v7, %v10636_v16 }
 0x396   :  { %vm3243_vm10 = vcmp.gt.s32.totalorder %v3242_v63, 0  ;;  %v3239_v24 = vand.u32 8388607, %v3232_v53  ;;  %v3215_v21 = vsub.s32 4, %v10596_v42  ;;  %vm3131_vm11 = vcmp.lt.s32.totalorder %v9763_v6, 0 }
 0x397   :  { %v3203_v8 = vshrl.u32 %v3185_v49, %v3201_v17  ;;  %v3206_v44 = vadd.s32 127, %v3205_v38  ;;  %v1639_v49 = vmul.u32 %v1632_v27, %v1623_v60  ;;  %v3244_v19 = vsel %vm3243_vm10, %v3242_v63, 0 }
 0x398   :  { %v3246_v0 = vand.u32 31, %v3244_v19  ;;  %v10669_v20 = vand.u32 3, %v1570_v14  ;;  %v10671_v43 = vand.u32 3, %v4994_v12  ;;  %v3240_v40 = vor.u32 8388608, %v3239_v24 }
 0x399   :  { %v3204_v35 = vor.u32 %v3203_v8, %v3202_v30  ;;  %v3207_v9 = vshll.u32 %v3206_v44, 23  ;;  %v1644_v13 = vadd.s32 %v1643_v62, %v1639_v49  ;;  %v1687_v5 = vand.u32 2147483647, %v10162_v56 }
 0x39a   :  { %v3247_v47 = vsub.s32 32, %v3246_v0  ;;  %v3216_v28 = vsel %vm3131_vm11, %v3215_v21, %v10596_v42  ;;  %v3249_v17 = vshll.u32 %v7719_v51, %v3246_v0  ;;  %v3252_v38 = vshll.u32 %v7720_v55, %v3246_v0 }
 0x39b   :  { %v3208_v26 = vor.u32 4788187, %v3207_v9  ;;  %v3211_v33 = vcvt.s32.f32 %v3204_v35  ;;  %v1645_v3 = vadd.s32 536870912, %v1644_v13  ;;  %v3258_v22 = vshll.u32 %v7722_v59, %v3246_v0 }
 0x39c   :  { %v3250_v54 = vshrl.u32 %v7720_v55, %v3247_v47  ;;  %v3253_v25 = vshrl.u32 %v7721_v57, %v3247_v47  ;;  %v3256_v36 = vshrl.u32 %v7722_v59, %v3247_v47  ;;  %v3259_v31 = vshrl.u32 %v7723_v61, %v3247_v47 }
 0x39d   :  { %v3209_v46 = vand.u32 2147483647, %v3208_v26  ;;  %v10673_v29 = vshrl.u32 %v1645_v3, 30  ;;  %v10684_v16 = vpop.eup %7686  ;;  %v1690_v39 = vand.u32 2139095040, %v10162_v56  ;;  %v3245_v45 = vshrl.u32 %v3244_v19, 5 }
 0x39e   :  { %v10690_v34 = vpop.eup %7688  ;;  %v3255_v11 = vshll.u32 %v7721_v57, %v3246_v0  ;;  %v3251_v30 = vor.u32 %v3250_v54, %v3249_v17  ;;  %v3254_v8 = vor.u32 %v3253_v25, %v3252_v38  ;;  %v3260_v44 = vor.u32 %v3259_v31, %v3258_v22 }
 0x39f   :  { %v3212_v18 = vmul.f32 %v3211_v33, %v3209_v46  ;;  %v1647_v23 = vshll.u32 %v10673_v29, 30  ;;  %v3262_v60 = vshrl.u32 %v7724_v4, %v3247_v47  ;;  %v3218_v7 = vsel %vm10664_vm6, 0, %v3216_v28 }
 0x3a0   :  { %v3257_v14 = vor.u32 %v3256_v36, %v3255_v11  ;;  %v3261_v35 = vshll.u32 %v7723_v61, %v3246_v0  ;;  %v1577_v9 = vxor.u32 2147483648, %v10690_v34  ;;  %v1580_v26 = vxor.u32 2147483648, %v10684_v16 }
 0x3a1   :  { %v3213_v58 = vxor.u32 2147483648, %v3212_v18  ;;  %v10694_v10 = vsub.s32 %v1644_v13, %v1647_v23  ;;  %vm1586_vm13 = vcmp.lt.s32.totalorder %v9900_v48, 0  ;;  %v10708_v12 = vshll.u32 %v3240_v40, 8 }
 0x3a2   :  { %vm1579_vm14 = vcmp.eq.s32.totalorder %v10669_v20, 2  ;;  %v3263_v46 = vor.u32 %v3262_v60, %v3261_v35  ;;  %vm3264_vm15 = vcmp.lt.s32.totalorder %v3245_v45, 1  ;;  %vm3267_vm12 = vcmp.lt.s32.totalorder %v3245_v45, 4 }
 0x3a3   :  { %v3214_v42 = vsel %vm3131_vm11, %v3213_v58, %v3212_v18  ;;  %v1650_v63 = vsub.s32 0, %v10694_v10  ;;  %vm1576_vm0 = vcmp.eq.s32.totalorder %v10669_v20, 0  ;;  %vm3266_vm1 = vcmp.lt.s32.totalorder %v3245_v45, 3 }
 0x3a4   :  { %v3217_v49 = vsel %vm10664_vm6, %v9763_v6, %v3214_v42  ;;  %v3272_v33 = vsel %vm3264_vm15, %v3251_v30, %v3254_v8  ;;  %v3273_v13 = vsel %vm3267_vm12, %v3260_v44, 920167782  ;;  %v1691_v19 = vshrl.u32 %v1690_v39, 23 }
 0x3a5   :  { %v7169_v62 = vmin.u32 %v1650_v63, %v10694_v10  ;;  %vm5000_vm9 = vcmp.eq.s32.totalorder %v10671_v43, 2  ;;  %vm10718_vm2 = vcmp.le.f32.partialorder %v1584_v50, 0.7853982  ;;  %v1670_v18 = vsub.s32 4, %v10673_v29 }
 0x3a6   :  { %v3248_v21 = vshrl.u32 %v7719_v51, %v3247_v47  ;;  %v3274_v3 = vsel %vm3266_vm1, %v3257_v14, %v3273_v13  ;;  %vm4997_vm3 = vcmp.eq.s32.totalorder %v10671_v43, 0  ;;  %7690 = vcosq.f32 %v3217_v49 }
 0x3a7   :  { %v1652_v0 = vclz %v7169_v62  ;;  %vm3265_vm4 = vcmp.lt.s32.totalorder %v3245_v45, 2  ;;  %v3269_v27 = vsel %vm3267_vm12, %v3257_v14, 2102212464  ;;  %v3276_v58 = vsel %vm3264_vm15, %v3254_v8, %v3257_v14 }
 0x3a8   :  { %vm1575_vm5 = vcmp.lt.s32.totalorder %v10669_v20, 2  ;;  %7692 = vsinq.f32 %v3217_v49  ;;  %v3275_v40 = vsel %vm3265_vm4, %v3272_v33, %v3274_v3  ;;  %v3277_v54 = vsel %vm3267_vm12, %v3263_v46, 1326507024 }
 0x3a9   :  { %v7170_v50 = vadd.s32 4294967294, %v1652_v0  ;;  %v3278_v47 = vsel %vm3266_vm1, %v3260_v44, %v3277_v54  ;;  %v10733_v25 = vmul.u32.u64.low %v10708_v12, %v3275_v40  ;;  %v10734_v28 = vmul.u32.u64.high %v10708_v12, %v3275_v40, %v10733_v25 }
 0x3aa   :  { %v7172_v23 = vadd.s32 4294967169, %v1691_v19  ;;  %v3268_v36 = vsel %vm3264_vm15, %v3248_v21, %v3251_v30  ;;  %v3270_v31 = vsel %vm3266_vm1, %v3254_v8, %v3269_v27  ;;  %v3279_v17 = vsel %vm3265_vm4, %v3276_v58, %v3278_v47 }
 0x3ab   :  { %vm7171_vm7 = vcmp.lt.s32.totalorder %v7170_v50, 0  ;;  %v10740_v38 = vand.u32 3, %v3218_v7  ;;  %v10743_v39 = vmul.u32.u64.low %v10708_v12, %v3279_v17  ;;  %v10744_v42 = vmul.u32.u64.high %v10708_v12, %v3279_v17, %v10743_v39 }
 0x3ac   :  { %v1655_v22 = vsel %vm7171_vm7, 0, %v7170_v50  ;;  %v1640_v11 = vadd.s32 %v10635_v41, %v10645_v1  ;;  %v1671_v30 = vsel %vm1586_vm13, %v1670_v18, %v10673_v29  ;;  %v1581_v8 = vsel %vm1579_vm14, %v1580_v26, %v10690_v34 }
 0x3ad   :  { %v1656_v44 = vsub.s32 32, %v1655_v22  ;;  %v1660_v60 = vsub.s32 4294967266, %v1655_v22  ;;  %v3271_v63 = vsel %vm3265_vm4, %v3268_v36, %v3270_v31  ;;  %v3290_v14 = vadd.s32 1, %v10734_v28 }
 0x3ae   :  { %v1697_v35 = vadd.s32 1, %v7172_v23  ;;  %v1578_v49 = vsel %vm1576_vm0, %v10684_v16, %v1577_v9  ;;  %v1657_v41 = vshll.u32 %v10694_v10, %v1655_v22  ;;  %v5002_v29 = vsel %vm5000_vm9, %v1580_v26, %v10690_v34 }
 0x3af   :  { %v1658_v1 = vshrl.u32 %v1640_v11, %v1656_v44  ;;  %v1661_v62 = vadd.s32 127, %v1660_v60  ;;  %v6658_v46 = vadd.s32 3, %v3218_v7  ;;  %v1673_v45 = vsel %vm10718_vm2, 0, %v1671_v30 }
 0x3b0   :  { %vm3289_vm8 = vc.u32 %v10744_v42, %v10733_v25  ;;  %v4999_v33 = vsel %vm4997_vm3, %v10684_v16, %v1577_v9  ;;  %v3287_v10 = vmul.u32 %v10708_v12, %v3271_v63  ;;  %v10771_v0 = vpop.eup %7690  ;;  %v1582_v34 = vsel %vm1575_vm5, %v1578_v49, %v1581_v8 }
 0x3b1   :  { %v1659_v13 = vor.u32 %v1658_v1, %v1657_v41  ;;  %v1662_v19 = vshll.u32 %v1661_v62, 23  ;;  %v3291_v7 = vsel %vm3289_vm8, %v3290_v14, %v10734_v28  ;;  %v1694_v26 = vand.u32 8388607, %v1687_v5 }
 0x3b2   :  { %vm1698_vm10 = vcmp.gt.s32.totalorder %v1697_v35, 0  ;;  %v10778_v18 = vpop.eup %7692  ;;  %v5098_v3 = vadd.s32 3, %v1673_v45  ;;  %v3292_v16 = vadd.s32 %v3291_v7, %v3287_v10  ;;  %vm1573_vm6 = vweird.f32 %v9694_v32 }
 0x3b3   :  { %v1663_v21 = vor.u32 4788187, %v1662_v19  ;;  %v1699_v9 = vsel %vm1698_vm10, %v1697_v35, 0  ;;  %vm4996_vm11 = vcmp.lt.s32.totalorder %v10671_v43, 2  ;;  %v10782_v12 = vand.u32 3, %v6658_v46 }
 0x3b4   :  { %v1701_v20 = vand.u32 31, %v1699_v9  ;;  %v5003_v27 = vsel %vm4996_vm11, %v4999_v33, %v5002_v29  ;;  %v1666_v50 = vcvt.s32.f32 %v1659_v13  ;;  %v3293_v40 = vadd.s32 536870912, %v3292_v16 }
 0x3b5   :  { %v1664_v58 = vand.u32 2147483647, %v1663_v21  ;;  %v10786_v54 = vsel %vm1573_vm6, nan, %v1582_v34  ;;  %vm3224_vm14 = vcmp.eq.s32.totalorder %v10740_v38, 0  ;;  %vm3227_vm15 = vcmp.eq.s32.totalorder %v10740_v38, 2 }
 0x3b6   :  { %v10790_v47 = vand.u32 3, %v1673_v45  ;;  %v1695_v28 = vor.u32 8388608, %v1694_v26  ;;  %v1702_v23 = vsub.s32 32, %v1701_v20  ;;  %v3228_v43 = vxor.u32 2147483648, %v10771_v0 }
 0x3b7   :  { %v1667_v36 = vmul.f32 %v1666_v50, %v1664_v58  ;;  %v10793_v31 = vand.u32 3, %v5098_v3  ;;  %v10795_v17 = vshrl.u32 %v3293_v40, 30  ;;  %v3225_v22 = vxor.u32 2147483648, %v10778_v18 }
 0x3b8   :  { %v1705_v39 = vshrl.u32 %v7720_v55, %v1702_v23  ;;  %v1708_v11 = vshrl.u32 %v7721_v57, %v1702_v23  ;;  %v3338_v44 = vand.u32 2139095040, %v10241_v2  ;;  %v1711_v8 = vshrl.u32 %v7722_v59, %v1702_v23 }
 0x3b9   :  { %v1668_v60 = vxor.u32 2147483648, %v1667_v36  ;;  %v3295_v30 = vshll.u32 %v10795_v17, 30  ;;  %v1714_v63 = vshrl.u32 %v7723_v61, %v1702_v23  ;;  %v10804_v14 = vshrl.u32 %v1699_v9, 5 }
 0x3ba   :  { %v1704_v35 = vshll.u32 %v7719_v51, %v1701_v20  ;;  %v1707_v49 = vshll.u32 %v7720_v55, %v1701_v20  ;;  %v1710_v41 = vshll.u32 %v7721_v57, %v1701_v20  ;;  %v1713_v29 = vshll.u32 %v7722_v59, %v1701_v20 }
 0x3bb   :  { %v1669_v1 = vsel %vm1586_vm13, %v1668_v60, %v1667_v36  ;;  %v10811_v62 = vsub.s32 %v3292_v16, %v3295_v30  ;;  %v1717_v46 = vshrl.u32 %v7724_v4, %v1702_v23  ;;  %v1716_v19 = vshll.u32 %v7723_v61, %v1701_v20 }
 0x3bc   :  { %v1672_v45 = vsel %vm10718_vm2, %v9900_v48, %v1669_v1  ;;  %v1706_v33 = vor.u32 %v1705_v39, %v1704_v35  ;;  %v1709_v13 = vor.u32 %v1708_v11, %v1707_v49  ;;  %v1712_v34 = vor.u32 %v1711_v8, %v1710_v41 }
 0x3bd   :  { %7694 = vcosq.f32 %v1672_v45  ;;  %v3298_v10 = vsub.s32 0, %v10811_v62  ;;  %v1715_v7 = vor.u32 %v1714_v63, %v1713_v29  ;;  %v10822_v26 = vsel %vm1573_vm6, nan, %v5003_v27 }
 0x3be   :  { %7696 = vsinq.f32 %v1672_v45  ;;  %v10824_v21 = vshll.u32 %v1695_v28, 8  ;;  %v3335_v3 = vand.u32 2147483647, %v10241_v2  ;;  %v10832_v24 = vsel %vm3224_vm14, %v10771_v0, %v3225_v22 }
 0x3bf   :  { %v10839_v32 = vsel %vm3227_vm15, %v3228_v43, %v10778_v18  ;;  %v7233_v16 = vmin.u32 %v3298_v10, %v10811_v62  ;;  %v1718_v9 = vor.u32 %v1717_v46, %v1716_v19  ;;  %v1703_v20 = vshrl.u32 %v7719_v51, %v1702_v23 }
 0x3c0   :  { %vm1719_vm13 = vcmp.lt.s32.totalorder %v10804_v14, 1  ;;  %vm1722_vm12 = vcmp.lt.s32.totalorder %v10804_v14, 4  ;;  %v3339_v27 = vshrl.u32 %v3338_v44, 23  ;;  %vm1682_vm0 = vcmp.eq.s32.totalorder %v10790_v47, 2 }
 0x3c1   :  { %vm5104_vm1 = vcmp.eq.s32.totalorder %v10793_v31, 2  ;;  %v3300_v58 = vclz %v7233_v16  ;;  %v1724_v50 = vsel %vm1722_vm12, %v1712_v34, 2102212464  ;;  %v1727_v40 = vsel %vm1719_vm13, %v1706_v33, %v1709_v13 }
 0x3c2   :  { %v1728_v28 = vsel %vm1722_vm12, %v1715_v7, 920167782  ;;  %vm1679_vm9 = vcmp.eq.s32.totalorder %v10790_v47, 0  ;;  %vm5101_vm2 = vcmp.eq.s32.totalorder %v10793_v31, 0  ;;  %v3288_v23 = vadd.s32 %v10733_v25, %v10744_v42 }
 0x3c3   :  { %vm1720_vm3 = vcmp.lt.s32.totalorder %v10804_v14, 2  ;;  %vm1721_vm4 = vcmp.lt.s32.totalorder %v10804_v14, 3  ;;  %v1731_v36 = vsel %vm1719_vm13, %v1709_v13, %v1712_v34  ;;  %vm1678_vm5 = vcmp.lt.s32.totalorder %v10790_v47, 2 }
 0x3c4   :  { %vm5100_vm7 = vcmp.lt.s32.totalorder %v10793_v31, 2  ;;  %v7234_v39 = vadd.s32 4294967294, %v3300_v58  ;;  %v1723_v11 = vsel %vm1719_vm13, %v1703_v20, %v1706_v33  ;;  %v1729_v44 = vsel %vm1721_vm4, %v1712_v34, %v1728_v28 }
 0x3c5   :  { %v1732_v60 = vsel %vm1722_vm12, %v1718_v9, 1326507024  ;;  %vm1676_vm8 = vweird.f32 %v9900_v48  ;;  %vm3234_vm10 = vcmp.lt.s32.totalorder %v10065_v15, 0  ;;  %v1725_v25 = vsel %vm1721_vm4, %v1709_v13, %v1724_v50 }
 0x3c6   :  { %v1730_v42 = vsel %vm1720_vm3, %v1727_v40, %v1729_v44  ;;  %v1733_v30 = vsel %vm1721_vm4, %v1715_v7, %v1732_v60  ;;  %v7236_v8 = vadd.s32 4294967169, %v3339_v27  ;;  %vm7235_vm6 = vcmp.lt.s32.totalorder %v7234_v39, 0 }
 0x3c7   :  { %v1734_v63 = vsel %vm1720_vm3, %v1731_v36, %v1733_v30  ;;  %v10874_v35 = vmul.u32.u64.low %v10824_v21, %v1730_v42  ;;  %v10875_v49 = vmul.u32.u64.high %v10824_v21, %v1730_v42, %v10874_v35  ;;  %v3303_v41 = vsel %vm7235_vm6, 0, %v7234_v39  ;;  %v7695_v45 = vpop.eup %7694 }
 0x3c8   :  { %v10879_v1 = vmul.u32.u64.low %v10824_v21, %v1734_v63  ;;  %v10880_v29 = vmul.u32.u64.high %v10824_v21, %v1734_v63, %v10879_v1  ;;  %v3345_v46 = vadd.s32 1, %v7236_v8  ;;  %vm3223_vm11 = vcmp.lt.s32.totalorder %v10740_v38, 2  ;;  %v7697_v7 = vpop.eup %7696 }
 0x3c9   :  { %vm6661_vm14 = vcmp.eq.s32.totalorder %v10782_v12, 0  ;;  %vm10886_vm15 = vcmp.le.f32.partialorder %v3232_v53, 0.7853982  ;;  %v3304_v13 = vsub.s32 32, %v3303_v41  ;;  %v3308_v19 = vsub.s32 4294967266, %v3303_v41 }
 0x3ca   :  { %v1726_v10 = vsel %vm1720_vm3, %v1723_v11, %v1725_v25  ;;  %v10894_v34 = vand.u32 8388607, %v3335_v3  ;;  %v1683_v16 = vxor.u32 2147483648, %v7695_v45  ;;  %v3305_v9 = vshll.u32 %v10811_v62, %v3303_v41 }
 0x3cb   :  { %v3318_v20 = vsub.s32 4, %v10795_v17  ;;  %vm3346_vm13 = vcmp.gt.s32.totalorder %v3345_v46, 0  ;;  %v1680_v53 = vxor.u32 2147483648, %v7697_v7  ;;  %v3306_v27 = vshrl.u32 %v3288_v23, %v3304_v13 }
 0x3cc   :  { %v3309_v58 = vadd.s32 127, %v3308_v19  ;;  %v1745_v50 = vadd.s32 1, %v10875_v49  ;;  %v1684_v14 = vsel %vm1682_vm0, %v1683_v16, %v7697_v7  ;;  %v5106_v40 = vsel %vm5104_vm1, %v1683_v16, %v7697_v7 }
 0x3cd   :  { %v1742_v28 = vmul.u32 %v10824_v21, %v1726_v10  ;;  %vm1744_vm12 = vc.u32 %v10880_v29, %v10874_v35  ;;  %v1681_v62 = vsel %vm1679_vm9, %v7695_v45, %v1680_v53  ;;  %v5103_v23 = vsel %vm5101_vm2, %v7695_v45, %v1680_v53 }
 0x3ce   :  { %v3307_v36 = vor.u32 %v3306_v27, %v3305_v9  ;;  %v3310_v39 = vshll.u32 %v3309_v58, 23  ;;  %v1685_v11 = vsel %vm1678_vm5, %v1681_v62, %v1684_v14  ;;  %v5107_v44 = vsel %vm5100_vm7, %v5103_v23, %v5106_v40 }
 0x3cf   :  { %v1746_v60 = vsel %vm1744_vm12, %v1745_v50, %v10875_v49  ;;  %v3347_v21 = vsel %vm3346_vm13, %v3345_v46, 0  ;;  %vm6660_vm0 = vcmp.lt.s32.totalorder %v10782_v12, 2  ;;  %v1686_v25 = vsel %vm1676_vm8, nan, %v1685_v11 }
 0x3d0   :  { %v5108_v42 = vsel %vm1676_vm8, nan, %v5107_v44  ;;  %v3311_v30 = vor.u32 4788187, %v3310_v39  ;;  %v3319_v47 = vsel %vm3234_vm10, %v3318_v20, %v10795_v17  ;;  %vm6664_vm1 = vcmp.eq.s32.totalorder %v10782_v12, 2 }
 0x3d1   :  { %v7426_v31 = vpack.c.bf16 %v1686_v25, %v10786_v54  ;;  %v7442_v8 = vpack.c.bf16 %v5108_v42, %v10822_v26  ;;  %v1747_v63 = vadd.s32 %v1746_v60, %v1742_v28  ;;  %v6666_v49 = vsel %vm6664_vm1, %v3228_v43, %v10778_v18 }
 0x3d2   :  { %v3312_v41 = vand.u32 2147483647, %v3311_v30  ;;  %v3314_v1 = vcvt.s32.f32 %v3307_v36  ;;  %v3349_v48 = vand.u32 31, %v3347_v21  ;;  %v10934_v46 = vsel %vm3223_vm11, %v10832_v24, %v10839_v32 }
 0x3d3   :  { %v6663_v54 = vsel %vm6661_vm14, %v10771_v0, %v3225_v22  ;;  %3643 = vst [vmem:[%s11184_s2 + $0x30] sm:$0xff] %v7426_v31  ;;  %7410 = vst [vmem:[%s11184_s2 + $0xb0] sm:$0xff] %v7442_v8  ;;  %v3321_v43 = vsel %vm10886_vm15, 0, %v3319_v47  ;;  %v1748_v38 = vadd.s32 536870912, %v1747_v63  ;;  %v3343_v26 = vor.u32 8388608, %v10894_v34 }
 0x3d4   :  { %v3315_v17 = vmul.f32 %v3314_v1, %v3312_v41  ;;  %v10950_v18 = vshrl.u32 %v3347_v21, 5  ;;  %v3350_v24 = vsub.s32 32, %v3349_v48  ;;  %v3352_v0 = vshll.u32 %v7719_v51, %v3349_v48 }
 0x3d5   :  { %v10952_v32 = vshrl.u32 %v1748_v38, 30  ;;  %v3355_v22 = vshll.u32 %v7720_v55, %v3349_v48  ;;  %v3358_v45 = vshll.u32 %v7721_v57, %v3349_v48  ;;  %v3361_v7 = vshll.u32 %v7722_v59, %v3349_v48 }
 0x3d6   :  { %v3316_v13 = vxor.u32 2147483648, %v3315_v17  ;;  %v3353_v19 = vshrl.u32 %v7720_v55, %v3350_v24  ;;  %v3356_v10 = vshrl.u32 %v7721_v57, %v3350_v24  ;;  %v3359_v16 = vshrl.u32 %v7722_v59, %v3350_v24 }
 0x3d7   :  { %v1750_v34 = vshll.u32 %v10952_v32, 30  ;;  %v3362_v9 = vshrl.u32 %v7723_v61, %v3350_v24  ;;  %v3364_v20 = vshll.u32 %v7723_v61, %v3349_v48  ;;  %v3365_v50 = vshrl.u32 %v7724_v4, %v3350_v24 }
 0x3d8   :  { %v3317_v53 = vsel %vm3234_vm10, %v3316_v13, %v3315_v17  ;;  %v3354_v27 = vor.u32 %v3353_v19, %v3352_v0  ;;  %v3357_v58 = vor.u32 %v3356_v10, %v3355_v22  ;;  %v6667_v14 = vsel %vm6660_vm0, %v6663_v54, %v6666_v49 }
 0x3d9   :  { %v3320_v40 = vsel %vm10886_vm15, %v10065_v15, %v3317_v53  ;;  %v10972_v28 = vsub.s32 %v1747_v63, %v1750_v34  ;;  %v3360_v62 = vor.u32 %v3359_v16, %v3358_v45  ;;  %v10974_v23 = vand.u32 3, %v3321_v43 }
 0x3da   :  { %7698 = vcosq.f32 %v3320_v40  ;;  %v3363_v36 = vor.u32 %v3362_v9, %v3361_v7  ;;  %v3366_v39 = vor.u32 %v3365_v50, %v3364_v20  ;;  %v6762_v11 = vadd.s32 3, %v3321_v43 }
 0x3db   :  { %7700 = vsinq.f32 %v3320_v40  ;;  %v1753_v44 = vsub.s32 0, %v10972_v28  ;;  %vm3367_vm9 = vcmp.lt.s32.totalorder %v10950_v18, 1  ;;  %vm3370_vm2 = vcmp.lt.s32.totalorder %v10950_v18, 4 }
 0x3dc   :  { %v3375_v12 = vsel %vm3367_vm9, %v3354_v27, %v3357_v58  ;;  %v3383_v33 = vshll.u32 %v3343_v26, 8  ;;  %v1793_v60 = vand.u32 2139095040, %v10374_v52  ;;  %vm3369_vm3 = vcmp.lt.s32.totalorder %v10950_v18, 3 }
 0x3dd   :  { %v7173_v21 = vmin.u32 %v1753_v44, %v10972_v28  ;;  %v3376_v25 = vsel %vm3370_vm2, %v3363_v36, 920167782  ;;  %v3379_v42 = vsel %vm3367_vm9, %v3357_v58, %v3360_v62  ;;  %vm3368_vm4 = vcmp.lt.s32.totalorder %v10950_v18, 2 }
 0x3de   :  { %v3372_v30 = vsel %vm3370_vm2, %v3360_v62, 2102212464  ;;  %v3377_v47 = vsel %vm3369_vm3, %v3360_v62, %v3376_v25  ;;  %v3380_v31 = vsel %vm3370_vm2, %v3366_v39, 1326507024  ;;  %v3351_v63 = vshrl.u32 %v7719_v51, %v3350_v24 }
 0x3df   :  { %v1755_v8 = vclz %v7173_v21  ;;  %v3378_v49 = vsel %vm3368_vm4, %v3375_v12, %v3377_v47  ;;  %v3381_v41 = vsel %vm3369_vm3, %v3363_v36, %v3380_v31  ;;  %v6763_v1 = vand.u32 3, %v6762_v11 }
 0x3e0   :  { %v3382_v48 = vsel %vm3368_vm4, %v3379_v42, %v3381_v41  ;;  %v10992_v54 = vmul.u32.u64.low %v3383_v33, %v3378_v49  ;;  %v10993_v43 = vmul.u32.u64.high %v3383_v33, %v3378_v49, %v10992_v54  ;;  %v3371_v38 = vsel %vm3367_vm9, %v3351_v63, %v3354_v27 }
 0x3e1   :  { %v3373_v17 = vsel %vm3369_vm3, %v3357_v58, %v3372_v30  ;;  %v10998_v26 = vmul.u32.u64.low %v3383_v33, %v3382_v48  ;;  %v10999_v0 = vmul.u32.u64.high %v3383_v33, %v3382_v48, %v10998_v26  ;;  %vm3221_vm5 = vweird.f32 %v9763_v6 }
 0x3e2   :  { %v7174_v24 = vadd.s32 4294967294, %v1755_v8  ;;  %v1794_v22 = vshrl.u32 %v1793_v60, 23  ;;  %v3231_v45 = vsel %vm3221_vm5, nan, %v10934_v46  ;;  %v6668_v13 = vsel %vm3221_vm5, nan, %v6667_v14 }
 0x3e3   :  { %vm3326_vm7 = vcmp.lt.s32.totalorder %v10974_v23, 2  ;;  %v1790_v19 = vand.u32 2147483647, %v10374_v52  ;;  %vm3327_vm8 = vcmp.eq.s32.totalorder %v10974_v23, 0  ;;  %v3374_v7 = vsel %vm3368_vm4, %v3371_v38, %v3373_v17 }
 0x3e4   :  { %v7699_v10 = vpop.eup %7698  ;;  %v3393_v34 = vadd.s32 1, %v10993_v43  ;;  %v7176_v16 = vadd.s32 4294967169, %v1794_v22  ;;  %vm3330_vm10 = vcmp.eq.s32.totalorder %v10974_v23, 2  ;;  %vm6764_vm6 = vcmp.lt.s32.totalorder %v6763_v1, 2 }
 0x3e5   :  { %v7701_v9 = vpop.eup %7700  ;;  %v3331_v6 = vxor.u32 2147483648, %v7699_v10  ;;  %vm6768_vm11 = vcmp.eq.s32.totalorder %v6763_v1, 2  ;;  %vm7175_vm14 = vcmp.lt.s32.totalorder %v7174_v24, 0  ;;  %vm3392_vm15 = vc.u32 %v10999_v0, %v10992_v54 }
 0x3e6   :  { %v3328_v46 = vxor.u32 2147483648, %v7701_v9  ;;  %v1800_v20 = vadd.s32 1, %v7176_v16  ;;  %vm6765_vm13 = vcmp.eq.s32.totalorder %v6763_v1, 0  ;;  %v3390_v18 = vmul.u32 %v3383_v33, %v3374_v7 }
 0x3e7   :  { %v3332_v53 = vsel %vm3330_vm10, %v3331_v6, %v7701_v9  ;;  %v6770_v27 = vsel %vm6768_vm11, %v3331_v6, %v7701_v9  ;;  %v3394_v14 = vsel %vm3392_vm15, %v3393_v34, %v10993_v43  ;;  %vm3324_vm0 = vweird.f32 %v10065_v15 }
 0x3e8   :  { %v3329_v58 = vsel %vm3327_vm8, %v7699_v10, %v3328_v46  ;;  %v6767_v50 = vsel %vm6765_vm13, %v7699_v10, %v3328_v46  ;;  %vm1801_vm12 = vcmp.gt.s32.totalorder %v1800_v20, 0  ;;  %v11019_v36 = vsel %vm7175_vm14, 0, %v7174_v24 }
 0x3e9   :  { %v3333_v40 = vsel %vm3326_vm7, %v3329_v58, %v3332_v53  ;;  %v6771_v62 = vsel %vm6764_vm6, %v6767_v50, %v6770_v27  ;;  %v3395_v44 = vadd.s32 %v3394_v14, %v3390_v18  ;;  %v1802_v12 = vsel %vm1801_vm12, %v1800_v20, 0 }
 0x3ea   :  { %v3334_v39 = vsel %vm3324_vm0, nan, %v3333_v40  ;;  %v6772_v11 = vsel %vm3324_vm0, nan, %v6771_v62  ;;  %v1797_v21 = vand.u32 8388607, %v1790_v19  ;;  %v1763_v25 = vsub.s32 4294967266, %v11019_v36 }
 0x3eb   :  { %v7434_v33 = vpack.c.bf16 %v3334_v39, %v3231_v45  ;;  %v7450_v60 = vpack.c.bf16 %v6772_v11, %v6668_v13  ;;  %v3396_v42 = vadd.s32 536870912, %v3395_v44  ;;  %v1804_v15 = vand.u32 31, %v1802_v12 }
 0x3ec   :  { %v1759_v47 = vsub.s32 32, %v11019_v36  ;;  %v1798_v31 = vor.u32 8388608, %v1797_v21  ;;  %v1764_v8 = vadd.s32 127, %v1763_v25  ;;  %v1803_v26 = vshrl.u32 %v1802_v12, 5 }
 0x3ed   :  { %3651 = vst [vmem:[%s11184_s2 + $0x70] sm:$0xff] %v7434_v33  ;;  %7418 = vst [vmem:[%s11184_s2 + $0xf0] sm:$0xff] %v7450_v60  ;;  %v11030_v23 = vshrl.u32 %v3396_v42, 30  ;;  %v1805_v30 = vsub.s32 32, %v1804_v15  ;;  %v1807_v49 = vshll.u32 %v7719_v51, %v1804_v15  ;;  %v1810_v1 = vshll.u32 %v7720_v55, %v1804_v15 }
 0x3ee   :  { %v1813_v24 = vshll.u32 %v7721_v57, %v1804_v15  ;;  %v1816_v10 = vshll.u32 %v7722_v59, %v1804_v15  ;;  %v1819_v7 = vshll.u32 %v7723_v61, %v1804_v15  ;;  %v1743_v34 = vadd.s32 %v10874_v35, %v10880_v29 }
 0x3ef   :  { %v3398_v63 = vshll.u32 %v11030_v23, 30  ;;  %v1808_v41 = vshrl.u32 %v7720_v55, %v1805_v30  ;;  %v1811_v48 = vshrl.u32 %v7721_v57, %v1805_v30  ;;  %v1814_v43 = vshrl.u32 %v7722_v59, %v1805_v30 }
 0x3f0   :  { %v1817_v38 = vshrl.u32 %v7723_v61, %v1805_v30  ;;  %v1820_v22 = vshrl.u32 %v7724_v4, %v1805_v30  ;;  %v1838_v20 = vshll.u32 %v1798_v31, 8  ;;  %v1760_v53 = vshll.u32 %v10972_v28, %v11019_v36 }
 0x3f1   :  { %v11040_v17 = vsub.s32 %v3395_v44, %v3398_v63  ;;  %v1809_v45 = vor.u32 %v1808_v41, %v1807_v49  ;;  %v1812_v13 = vor.u32 %v1811_v48, %v1810_v1  ;;  %v1815_v16 = vor.u32 %v1814_v43, %v1813_v24 }
 0x3f2   :  { %v1818_v6 = vor.u32 %v1817_v38, %v1816_v10  ;;  %v1821_v46 = vor.u32 %v1820_v22, %v1819_v7  ;;  %v1761_v27 = vshrl.u32 %v1743_v34, %v1759_v47  ;;  %v1765_v18 = vshll.u32 %v1764_v8, 23 }
 0x3f3   :  { %v3401_v9 = vsub.s32 0, %v11040_v17  ;;  %vm1822_vm1 = vcmp.lt.s32.totalorder %v1803_v26, 1  ;;  %v1806_v58 = vshrl.u32 %v7719_v51, %v1805_v30  ;;  %vm1825_vm9 = vcmp.lt.s32.totalorder %v1803_v26, 4 }
 0x3f4   :  { %v1830_v50 = vsel %vm1822_vm1, %v1809_v45, %v1812_v13  ;;  %v3441_v14 = vand.u32 2139095040, %v10516_v37  ;;  %vm1824_vm2 = vcmp.lt.s32.totalorder %v1803_v26, 3  ;;  %v1827_v35 = vsel %vm1825_vm9, %v1815_v16, 2102212464 }
 0x3f5   :  { %v1831_v29 = vsel %vm1825_vm9, %v1818_v6, 920167782  ;;  %v1834_v40 = vsel %vm1822_vm1, %v1812_v13, %v1815_v16  ;;  %v7237_v62 = vmin.u32 %v3401_v9, %v11040_v17  ;;  %vm1823_vm3 = vcmp.lt.s32.totalorder %v1803_v26, 2 }
 0x3f6   :  { %v1832_v39 = vsel %vm1824_vm2, %v1815_v16, %v1831_v29  ;;  %v1835_v11 = vsel %vm1825_vm9, %v1821_v46, 1326507024  ;;  %v1766_v44 = vor.u32 4788187, %v1765_v18  ;;  %v1826_v28 = vsel %vm1822_vm1, %v1806_v58, %v1809_v45 }
 0x3f7   :  { %v1833_v36 = vsel %vm1823_vm3, %v1830_v50, %v1832_v39  ;;  %v1836_v12 = vsel %vm1824_vm2, %v1818_v6, %v1835_v11  ;;  %v1828_v33 = vsel %vm1824_vm2, %v1812_v13, %v1827_v35  ;;  %v1762_v42 = vor.u32 %v1761_v27, %v1760_v53 }
 0x3f8   :  { %v1837_v60 = vsel %vm1823_vm3, %v1834_v40, %v1836_v12  ;;  %v11056_v21 = vmul.u32.u64.low %v1838_v20, %v1833_v36  ;;  %v11057_v25 = vmul.u32.u64.high %v1838_v20, %v1833_v36, %v11056_v21  ;;  %v3403_v47 = vclz %v7237_v62 }
 0x3f9   :  { %v11059_v15 = vmul.u32.u64.low %v1838_v20, %v1837_v60  ;;  %v11060_v30 = vmul.u32.u64.high %v1838_v20, %v1837_v60, %v11059_v15  ;;  %v3442_v31 = vshrl.u32 %v3441_v14, 23  ;;  %v1767_v8 = vand.u32 2147483647, %v1766_v44 }
 0x3fa   :  { %v1829_v63 = vsel %vm1823_vm3, %v1826_v28, %v1828_v33  ;;  %v1848_v49 = vadd.s32 1, %v11057_v25  ;;  %v1769_v1 = vcvt.s32.f32 %v1762_v42  ;;  %v7238_v48 = vadd.s32 4294967294, %v3403_v47 }
 0x3fb   :  { %v7240_v41 = vadd.s32 4294967169, %v3442_v31  ;;  %v1845_v43 = vmul.u32 %v1838_v20, %v1829_v63  ;;  %vm1847_vm4 = vc.u32 %v11060_v30, %v11056_v21  ;;  %v1773_v16 = vsub.s32 4, %v10952_v32 }
 0x3fc   :  { %v1770_v24 = vmul.f32 %v1769_v1, %v1767_v8  ;;  %v1849_v22 = vsel %vm1847_vm4, %v1848_v49, %v11057_v25  ;;  %vm7239_vm5 = vcmp.lt.s32.totalorder %v7238_v48, 0  ;;  %vm1689_vm8 = vcmp.lt.s32.totalorder %v10162_v56, 0 }
 0x3fd   :  { %v3448_v38 = vadd.s32 1, %v7240_v41  ;;  %v1850_v45 = vadd.s32 %v1849_v22, %v1845_v43  ;;  %v11069_v9 = vsel %vm7239_vm5, 0, %v7238_v48  ;;  %v3438_v53 = vand.u32 2147483647, %v10516_v37 }
 0x3fe   :  { %v1771_v10 = vxor.u32 2147483648, %v1770_v24  ;;  %v3411_v27 = vsub.s32 4294967266, %v11069_v9  ;;  %vm11077_vm10 = vcmp.le.f32.partialorder %v1687_v5, 0.7853982  ;;  %v11082_v50 = vsel %vm1689_vm8, %v1773_v16, %v10952_v32 }
 0x3ff   :  { %v1851_v13 = vadd.s32 536870912, %v1850_v45  ;;  %vm3449_vm7 = vcmp.gt.s32.totalorder %v3448_v38, 0  ;;  %v3391_v40 = vadd.s32 %v10992_v54, %v10999_v0  ;;  %v3407_v39 = vsub.s32 32, %v11069_v9 }
 0x400   :  { %v3450_v7 = vsel %vm3449_vm7, %v3448_v38, 0  ;;  %v1772_v20 = vsel %vm1689_vm8, %v1771_v10, %v1770_v24  ;;  %v3445_v32 = vand.u32 8388607, %v3438_v53  ;;  %v3412_v28 = vadd.s32 127, %v3411_v27 }
 0x401   :  { %v11066_v26 = vshrl.u32 %v1851_v13, 30  ;;  %v3452_v34 = vand.u32 31, %v3450_v7  ;;  %v1775_v29 = vsel %vm11077_vm10, %v10162_v56, %v1772_v20  ;;  %v3451_v12 = vshrl.u32 %v3450_v7, 5 }
 0x402   :  { %v1846_v8 = vadd.s32 %v11056_v21, %v11060_v30  ;;  %7702 = vcosq.f32 %v1775_v29  ;;  %v3413_v20 = vshll.u32 %v3412_v28, 23  ;;  %vm1791_vm0 = vcmp.le.f32.partialorder %v1790_v19, 0.7853982 }
 0x403   :  { %v1853_v6 = vshll.u32 %v11066_v26, 30  ;;  %v3453_v46 = vsub.s32 32, %v3452_v34  ;;  %v3455_v11 = vshll.u32 %v7719_v51, %v3452_v34  ;;  %v3458_v44 = vshll.u32 %v7720_v55, %v3452_v34 }
 0x404   :  { %v3461_v33 = vshll.u32 %v7721_v57, %v3452_v34  ;;  %v3464_v54 = vshll.u32 %v7722_v59, %v3452_v34  ;;  %v3467_v47 = vshll.u32 %v7723_v61, %v3452_v34  ;;  %vm3470_vm6 = vcmp.lt.s32.totalorder %v3451_v12, 1 }
 0x405   :  { %v1854_v18 = vsub.s32 %v1850_v45, %v1853_v6  ;;  %v3456_v14 = vshrl.u32 %v7720_v55, %v3453_v46  ;;  %v3459_v35 = vshrl.u32 %v7721_v57, %v3453_v46  ;;  %v3462_v5 = vshrl.u32 %v7722_v59, %v3453_v46 }
 0x406   :  { %v3465_v0 = vshrl.u32 %v7723_v61, %v3453_v46  ;;  %v3468_v31 = vshrl.u32 %v7724_v4, %v3453_v46  ;;  %v3446_v55 = vor.u32 8388608, %v3445_v32  ;;  %v3454_v63 = vshrl.u32 %v7719_v51, %v3453_v46 }
 0x407   :  { %v1856_v62 = vsub.s32 0, %v1854_v18  ;;  %v3457_v60 = vor.u32 %v3456_v14, %v3455_v11  ;;  %v3460_v25 = vor.u32 %v3459_v35, %v3458_v44  ;;  %v3463_v15 = vor.u32 %v3462_v5, %v3461_v33 }
 0x408   :  { %v3466_v49 = vor.u32 %v3465_v0, %v3464_v54  ;;  %v3469_v57 = vor.u32 %v3468_v31, %v3467_v47  ;;  %vm3473_vm11 = vcmp.lt.s32.totalorder %v3451_v12, 4  ;;  %vm3471_vm14 = vcmp.lt.s32.totalorder %v3451_v12, 2 }
 0x409   :  { %v7177_v36 = vmin.u32 %v1856_v62, %v1854_v18  ;;  %vm3472_vm15 = vcmp.lt.s32.totalorder %v3451_v12, 3  ;;  %v3478_v59 = vsel %vm3470_vm6, %v3457_v60, %v3460_v25  ;;  %v3475_v48 = vsel %vm3473_vm11, %v3463_v15, 2102212464 }
 0x40a   :  { %v3479_v1 = vsel %vm3473_vm11, %v3466_v49, 920167782  ;;  %v3482_v4 = vsel %vm3470_vm6, %v3460_v25, %v3463_v15  ;;  %v3483_v30 = vsel %vm3473_vm11, %v3469_v57, 1326507024  ;;  %v3486_v51 = vshll.u32 %v3446_v55, 8 }
 0x40b   :  { %v1858_v42 = vclz %v7177_v36  ;;  %v3480_v61 = vsel %vm3472_vm15, %v3463_v15, %v3479_v1  ;;  %v3474_v22 = vsel %vm3470_vm6, %v3454_v63, %v3457_v60  ;;  %v3484_v45 = vsel %vm3472_vm15, %v3466_v49, %v3483_v30 }
 0x40c   :  { %v3481_v21 = vsel %vm3471_vm14, %v3478_v59, %v3480_v61  ;;  %v3476_v13 = vsel %vm3472_vm15, %v3460_v25, %v3475_v48  ;;  %v3485_v10 = vsel %vm3471_vm14, %v3482_v4, %v3484_v45  ;;  %7704 = vsinq.f32 %v1775_v29 }
 0x40d   :  { %v7178_v41 = vadd.s32 4294967294, %v1858_v42  ;;  %v11109_v7 = vmul.u32.u64.low %v3486_v51, %v3481_v21  ;;  %v11110_v34 = vmul.u32.u64.high %v3486_v51, %v3481_v21, %v11109_v7  ;;  %v3477_v5 = vsel %vm3471_vm14, %v3474_v22, %v3476_v13  ;;  %v7703_v42 = vpop.eup %7702 }
 0x40e   :  { %v11113_v27 = vmul.u32.u64.low %v3486_v51, %v3485_v10  ;;  %v11114_v14 = vmul.u32.u64.high %v3486_v51, %v3485_v10, %v11113_v27  ;;  %v3409_v32 = vshrl.u32 %v3391_v40, %v3407_v39  ;;  %v1776_v44 = vsel %vm11077_vm10, 0, %v11082_v50 }
 0x40f   :  { %vm7179_vm13 = vcmp.lt.s32.totalorder %v7178_v41, 0  ;;  %v3496_v11 = vadd.s32 1, %v11110_v34  ;;  %v3414_v29 = vor.u32 4788187, %v3413_v20  ;;  %v3493_v28 = vmul.u32 %v3486_v51, %v3477_v5 }
 0x410   :  { %v1861_v43 = vsel %vm7179_vm13, 0, %v7178_v41  ;;  %vm3495_vm12 = vc.u32 %v11114_v14, %v11109_v7  ;;  %v5202_v25 = vadd.s32 3, %v1776_v44  ;;  %v1876_v58 = vsub.s32 4, %v11066_v26 }
 0x411   :  { %v1862_v38 = vsub.s32 32, %v1861_v43  ;;  %v1866_v24 = vsub.s32 4294967266, %v1861_v43  ;;  %v1863_v16 = vshll.u32 %v1854_v18, %v1861_v43  ;;  %v3408_v18 = vshll.u32 %v11040_v17, %v11069_v9 }
 0x412   :  { %v3497_v12 = vsel %vm3495_vm12, %v3496_v11, %v11110_v34  ;;  %v3415_v50 = vand.u32 2147483647, %v3414_v29  ;;  %vm1792_vm1 = vcmp.lt.s32.totalorder %v10374_v52, 0  ;;  %v1780_v31 = vand.u32 3, %v1776_v44 }
 0x413   :  { %v1864_v6 = vshrl.u32 %v1846_v8, %v1862_v38  ;;  %v1867_v46 = vadd.s32 127, %v1866_v24  ;;  %v3410_v40 = vor.u32 %v3409_v32, %v3408_v18  ;;  %v3498_v39 = vadd.s32 %v3497_v12, %v3493_v28 }
 0x414   :  { %v5203_v8 = vand.u32 3, %v5202_v25  ;;  %v1877_v63 = vsel %vm1792_vm1, %v1876_v58, %v11066_v26  ;;  %v1786_v41 = vxor.u32 2147483648, %v7703_v42  ;;  %vm1782_vm9 = vcmp.eq.s32.totalorder %v1780_v31, 0 }
 0x415   :  { %v1865_v35 = vor.u32 %v1864_v6, %v1863_v16  ;;  %v1868_v62 = vshll.u32 %v1867_v46, 23  ;;  %v3499_v0 = vadd.s32 536870912, %v3498_v39  ;;  %v3417_v9 = vcvt.s32.f32 %v3410_v40 }
 0x416   :  { %v7705_v17 = vpop.eup %7704  ;;  %v1879_v48 = vsel %vm1791_vm0, 0, %v1877_v63  ;;  %vm1785_vm2 = vcmp.eq.s32.totalorder %v1780_v31, 2  ;;  %vm5205_vm3 = vcmp.eq.s32.totalorder %v5203_v8, 0  ;;  %vm5208_vm4 = vcmp.eq.s32.totalorder %v5203_v8, 2 }
 0x417   :  { %v1869_v36 = vor.u32 4788187, %v1868_v62  ;;  %v1872_v60 = vcvt.s32.f32 %v1865_v35  ;;  %v11130_v47 = vshrl.u32 %v3499_v0, 30  ;;  %v3418_v49 = vmul.f32 %v3417_v9, %v3415_v50 }
 0x418   :  { %v1783_v1 = vxor.u32 2147483648, %v7705_v17  ;;  %v1787_v4 = vsel %vm1785_vm2, %v1786_v41, %v7705_v17  ;;  %v5210_v30 = vsel %vm5208_vm4, %v1786_v41, %v7705_v17  ;;  %v5306_v51 = vadd.s32 3, %v1879_v48 }
 0x419   :  { %v1870_v33 = vand.u32 2147483647, %v1869_v36  ;;  %v3501_v59 = vshll.u32 %v11130_v47, 30  ;;  %v3419_v61 = vxor.u32 2147483648, %v3418_v49  ;;  %vm3337_vm5 = vcmp.lt.s32.totalorder %v10241_v2, 0 }
 0x41a   :  { %v1784_v21 = vsel %vm1782_vm9, %v7703_v42, %v1783_v1  ;;  %v5207_v26 = vsel %vm5205_vm3, %v7703_v42, %v1783_v1  ;;  %vm1781_vm7 = vcmp.lt.s32.totalorder %v1780_v31, 2  ;;  %v1883_v24 = vand.u32 3, %v1879_v48 }
 0x41b   :  { %v1873_v54 = vmul.f32 %v1872_v60, %v1870_v33  ;;  %v3502_v19 = vsub.s32 %v3498_v39, %v3501_v59  ;;  %vm5204_vm8 = vcmp.lt.s32.totalorder %v5203_v8, 2  ;;  %v3420_v22 = vsel %vm3337_vm5, %v3419_v61, %v3418_v49 }
 0x41c   :  { %v1788_v45 = vsel %vm1781_vm7, %v1784_v21, %v1787_v4  ;;  %v5211_v13 = vsel %vm5204_vm8, %v5207_v26, %v5210_v30  ;;  %v5307_v34 = vand.u32 3, %v5306_v51  ;;  %vm1779_vm10 = vweird.f32 %v10162_v56 }
 0x41d   :  { %v1874_v15 = vxor.u32 2147483648, %v1873_v54  ;;  %v3504_v43 = vsub.s32 0, %v3502_v19  ;;  %vm11141_vm6 = vcmp.le.f32.partialorder %v3335_v3, 0.7853982  ;;  %vm1882_vm11 = vweird.f32 %v10374_v52 }
 0x41e   :  { %v3423_v20 = vsel %vm11141_vm6, %v10241_v2, %v3420_v22  ;;  %v1789_v27 = vsel %vm1779_vm10, nan, %v1788_v45  ;;  %vm1884_vm14 = vcmp.lt.s32.totalorder %v1883_v24, 2  ;;  %v5212_v35 = vsel %vm1779_vm10, nan, %v5211_v13 }
 0x41f   :  { %v1875_v55 = vsel %vm1792_vm1, %v1874_v15, %v1873_v54  ;;  %v7241_v38 = vmin.u32 %v3504_v43, %v3502_v19  ;;  %vm1885_vm15 = vcmp.eq.s32.totalorder %v1883_v24, 0  ;;  %vm1888_vm13 = vcmp.eq.s32.totalorder %v1883_v24, 2 }
 0x420   :  { %v1878_v57 = vsel %vm1791_vm0, %v10374_v52, %v1875_v55  ;;  %vm5309_vm0 = vcmp.eq.s32.totalorder %v5307_v34, 0  ;;  %vm5312_vm1 = vcmp.eq.s32.totalorder %v5307_v34, 2  ;;  %v3494_v44 = vadd.s32 %v11109_v7, %v11114_v14 }
 0x421   :  { %7706 = vcosq.f32 %v1878_v57  ;;  %v3506_v10 = vclz %v7241_v38  ;;  %vm5308_vm9 = vcmp.lt.s32.totalorder %v5307_v34, 2  ;;  %v3421_v33 = vsub.s32 4, %v11030_v23 }
 0x422   :  { %7708 = vsinq.f32 %v1878_v57  ;;  %v3524_v8 = vsub.s32 4, %v11130_v47  ;;  %vm3440_vm2 = vcmp.lt.s32.totalorder %v10516_v37, 0  ;;  %vm3439_vm3 = vcmp.le.f32.partialorder %v3438_v53, 0.7853982 }
 0x423   :  { %v7242_v6 = vadd.s32 4294967294, %v3506_v10  ;;  %7710 = vcosq.f32 %v3423_v20  ;;  %v3422_v52 = vsel %vm3337_vm5, %v3421_v33, %v11030_v23 }
 0x424   :  { %7712 = vsinq.f32 %v3423_v20  ;;  %v3424_v9 = vsel %vm11141_vm6, 0, %v3422_v52  ;;  %v3525_v23 = vsel %vm3440_vm2, %v3524_v8, %v11130_v47 }
 0x425   :  { %vm7243_vm12 = vcmp.lt.s32.totalorder %v7242_v6, 0  ;;  %v6866_v55 = vadd.s32 3, %v3424_v9  ;;  %v3428_v1 = vand.u32 3, %v3424_v9  ;;  %v3527_v4 = vsel %vm3439_vm3, 0, %v3525_v23 }
 0x426   :  { %v3509_v5 = vsel %vm7243_vm12, 0, %v7242_v6  ;;  %v6970_v43 = vadd.s32 3, %v3527_v4  ;;  %v3531_v51 = vand.u32 3, %v3527_v4 }
 0x427   :  { %v3510_v36 = vsub.s32 32, %v3509_v5  ;;  %v3514_v28 = vsub.s32 4294967266, %v3509_v5  ;;  %v3511_v54 = vshll.u32 %v3502_v19, %v3509_v5  ;;  %v6867_v48 = vand.u32 3, %v6866_v55 }
 0x428   :  { %vm3430_vm4 = vcmp.eq.s32.totalorder %v3428_v1, 0  ;;  %vm3433_vm5 = vcmp.eq.s32.totalorder %v3428_v1, 2  ;;  %vm3429_vm10 = vcmp.lt.s32.totalorder %v3428_v1, 2  ;;  %v6971_v38 = vand.u32 3, %v6970_v43 }
 0x429   :  { %v3512_v40 = vshrl.u32 %v3494_v44, %v3510_v36  ;;  %v3515_v58 = vadd.s32 127, %v3514_v28  ;;  %vm6869_vm7 = vcmp.eq.s32.totalorder %v6867_v48, 0  ;;  %vm6872_vm8 = vcmp.eq.s32.totalorder %v6867_v48, 2 }
 0x42a   :  { %vm6868_vm6 = vcmp.lt.s32.totalorder %v6867_v48, 2  ;;  %vm6973_vm12 = vcmp.eq.s32.totalorder %v6971_v38, 0 }
 0x42b   :  { %v7707_v46 = vpop.eup %7706  ;;  %v3513_v50 = vor.u32 %v3512_v40, %v3511_v54  ;;  %v3516_v0 = vshll.u32 %v3515_v58, 23 }
 0x42c   :  { %v7709_v62 = vpop.eup %7708  ;;  %v1889_v56 = vxor.u32 2147483648, %v7707_v46 }
 0x42d   :  { %v1886_v3 = vxor.u32 2147483648, %v7709_v62  ;;  %v3517_v42 = vor.u32 4788187, %v3516_v0  ;;  %v3520_v17 = vcvt.s32.f32 %v3513_v50  ;;  %v7711_v49 = vpop.eup %7710 }
 0x42e   :  { %v1890_v32 = vsel %vm1888_vm13, %v1889_v56, %v7709_v62  ;;  %v5314_v11 = vsel %vm5312_vm1, %v1889_v56, %v7709_v62  ;;  %v7713_v41 = vpop.eup %7712  ;;  %v3434_v61 = vxor.u32 2147483648, %v7711_v49  ;;  %vm3533_vm13 = vcmp.eq.s32.totalorder %v3531_v51, 0 }
 0x42f   :  { %v1887_v18 = vsel %vm1885_vm15, %v7707_v46, %v1886_v3  ;;  %v5311_v29 = vsel %vm5309_vm0, %v7707_v46, %v1886_v3  ;;  %v3518_v15 = vand.u32 2147483647, %v3517_v42  ;;  %v3431_v19 = vxor.u32 2147483648, %v7713_v41 }
 0x430   :  { %v1891_v60 = vsel %vm1884_vm14, %v1887_v18, %v1890_v32  ;;  %v5315_v12 = vsel %vm5308_vm9, %v5311_v29, %v5314_v11  ;;  %v3435_v26 = vsel %vm3433_vm5, %v3434_v61, %v7713_v41  ;;  %v6874_v30 = vsel %vm6872_vm8, %v3434_v61, %v7713_v41 }
 0x431   :  { %v1892_v39 = vsel %vm1882_vm11, nan, %v1891_v60  ;;  %v5316_v25 = vsel %vm1882_vm11, nan, %v5315_v12  ;;  %v3521_v31 = vmul.f32 %v3520_v17, %v3518_v15  ;;  %v3432_v21 = vsel %vm3430_vm4, %v7711_v49, %v3431_v19 }
 0x432   :  { %v7427_v7 = vpack.c.bf16 %v1892_v39, %v1789_v27  ;;  %v7443_v14 = vpack.c.bf16 %v5316_v25, %v5212_v35  ;;  %v6871_v53 = vsel %vm6869_vm7, %v7711_v49, %v3431_v19  ;;  %v3436_v47 = vsel %vm3429_vm10, %v3432_v21, %v3435_v26 }
 0x433   :  { %v3522_v63 = vxor.u32 2147483648, %v3521_v31  ;;  %v6875_v24 = vsel %vm6868_vm6, %v6871_v53, %v6874_v30  ;;  %vm3427_vm11 = vweird.f32 %v10241_v2  ;;  %vm3536_vm14 = vcmp.eq.s32.totalorder %v3531_v51, 2 }
 0x434   :  { %3644 = vst [vmem:[%s11184_s2 + $0x38] sm:$0xff] %v7427_v7  ;;  %7411 = vst [vmem:[%s11184_s2 + $0xb8] sm:$0xff] %v7443_v14  ;;  %v3437_v13 = vsel %vm3427_vm11, nan, %v3436_v47  ;;  %v6876_v16 = vsel %vm3427_vm11, nan, %v6875_v24  ;;  %vm6976_vm15 = vcmp.eq.s32.totalorder %v6971_v38, 2  ;;  %vm3532_vm0 = vcmp.lt.s32.totalorder %v3531_v51, 2 }
 0x435   :  { %v3523_v57 = vsel %vm3440_vm2, %v3522_v63, %v3521_v31  ;;  %vm6972_vm1 = vcmp.lt.s32.totalorder %v6971_v38, 2  ;;  %vm3530_vm9 = vweird.f32 %v10516_v37 }
 0x436   :  { %v3526_v59 = vsel %vm3439_vm3, %v10516_v37, %v3523_v57 }
 0x437   :  { %7714 = vcosq.f32 %v3526_v59 }
 0x438   :  { %7716 = vsinq.f32 %v3526_v59 }
 0x441   :  { %v7715_v22 = vpop.eup %7714 }
 0x442   :  { %v7717_v45 = vpop.eup %7716  ;;  %v3537_v10 = vxor.u32 2147483648, %v7715_v22 }
 0x443   :  { %v3534_v34 = vxor.u32 2147483648, %v7717_v45 }
 0x444   :  { %v3538_v6 = vsel %vm3536_vm14, %v3537_v10, %v7717_v45  ;;  %v6978_v46 = vsel %vm6976_vm15, %v3537_v10, %v7717_v45 }
 0x445   :  { %v3535_v20 = vsel %vm3533_vm13, %v7715_v22, %v3534_v34  ;;  %v6975_v27 = vsel %vm6973_vm12, %v7715_v22, %v3534_v34 }
 0x446   :  { %v3539_v35 = vsel %vm3532_vm0, %v3535_v20, %v3538_v6  ;;  %v6979_v62 = vsel %vm6972_vm1, %v6975_v27, %v6978_v46 }
 0x447   :  { %v3540_v2 = vsel %vm3530_vm9, nan, %v3539_v35  ;;  %v6980_v56 = vsel %vm3530_vm9, nan, %v6979_v62 }
 0x448   :  { %v7435_v3 = vpack.c.bf16 %v3540_v2, %v3437_v13  ;;  %v7451_v5 = vpack.c.bf16 %v6980_v56, %v6876_v16 }
 0x44a   :  { %3652 = vst [vmem:[%s11184_s2 + $0x78] sm:$0xff] %v7435_v3  ;;  %7419 = vst [vmem:[%s11184_s2 + $0xf8] sm:$0xff] %v7451_v5 }

// kernel: rff_gram.3
= control target key start
LH: loop header
LB: loop body
LE: loop exit
PB: predicated region body
PF: predicated region fallthrough
CT: control target
= control target key end

     0   :  { %vm92_vm0 = vcmask 1043456   ;;  %v8144_v1 = vmov 0.0   ;;  %vm43_vm1 = vcmask 31744   ;;  %v11699_v51 = vmov 683565275   ;;  %s11682_s2 = inlined_call_operand.vmem [shape: f32[4,256], index: 2, kind: input, shape index: {}]   ;;  %s11683_s1 = inlined_call_operand.vmem [shape: f32[128,4], index: 1, kind: input, shape index: {}]   ;;  %s11684_s3 = inlined_call_operand.vmem [shape: bf16[2,128,256], index: 3, kind: input, shape index: {}]   ;;  %s11685_s0 = inlined_call_operand.<no memory space> [shape: f32[1], index: 0, kind: input, shape index: {}]   ;;  %s11686_s4 = inlined_call_operand.vmem [shape: f32[128,128], index: 4, kind: output, shape index: {}]  }
   0x1   :  { %v40_v0 = vld [vmem:[%s11682_s2] sm:$0xff]  ;;  %161 = vmatprep.mubr.f32.mxu0 %v8144_v1  ;;  %v25_v4 = vld [vmem:[%s11683_s1 + $0x8] sm:$0xff]  ;;  %v26_v5 = vld [vmem:[%s11683_s1 + $0x10] sm:$0xff]  ;;  %v11697_v56 = vmov 2475754826  }
   0x2   :  { %v42_v2 = vcombine.high %v40_v0, %v40_v0  ;;  %v24_v3 = vld [vmem:[%s11683_s1] sm:$0xff]  ;;  %v27_v6 = vld [vmem:[%s11683_s1 + $0x18] sm:$0xff]  ;;  %v29_v8 = vld [vmem:[%s11683_s1 + $0x28] sm:$0xff]  ;;  %v11694_v58 = vmov 2131351028  }
   0x3   :  { %v28_v7 = vld [vmem:[%s11683_s1 + $0x20] sm:$0xff]  ;;  %v30_v9 = vld [vmem:[%s11683_s1 + $0x30] sm:$0xff]  ;;  %v31_v10 = vld [vmem:[%s11683_s1 + $0x38] sm:$0xff]  ;;  %v11692_v60 = vmov 2102212464  }
   0x4   :  { %7510 = vmatprep.subr.msk.mxu0 %vm92_vm0, %v42_v2  ;;  %v32_v11 = vld [vmem:[%s11683_s1 + $0x40] sm:$0xff]  ;;  %v33_v12 = vld [vmem:[%s11683_s1 + $0x48] sm:$0xff]  ;;  %v34_v13 = vld [vmem:[%s11683_s1 + $0x50] sm:$0xff]  ;;  %v11701_v62 = vmov 920167782  }
   0x5   :  { %7511 = vmatpush1.msk.msra.mxu0 %vm92_vm0, %v40_v0  ;;  %v35_v14 = vld [vmem:[%s11683_s1 + $0x58] sm:$0xff]  ;;  %v36_v15 = vld [vmem:[%s11683_s1 + $0x60] sm:$0xff]  ;;  %v37_v16 = vld [vmem:[%s11683_s1 + $0x68] sm:$0xff] }
   0x6   :  { %7512 = vmatmul.mubr.msk.f32.vlgmr.msra.gmra.mrb[0].mxu0 %vm43_vm1, %v24_v3  ;;  %v38_v17 = vld [vmem:[%s11683_s1 + $0x70] sm:$0xff]  ;;  %v39_v18 = vld [vmem:[%s11683_s1 + $0x78] sm:$0xff] }
   0x7   :  { %167 = vmatprep.mubr.f32.mxu0 %v8144_v1 }
   0xa   :  { %7513 = vmatmul.mubr.msk.f32.gmra.mrb[2].mxu0 %vm43_vm1, %v25_v4 }
   0xb   :  { %173 = vmatprep.mubr.f32.mxu0 %v8144_v1 }
   0xe   :  { %7514 = vmatmul.mubr.msk.f32.gmra.mrb[4].mxu0 %vm43_vm1, %v26_v5  ;;  %v11706_v5 = vmov 1326507024  }
   0xf   :  { %179 = vmatprep.mubr.f32.mxu0 %v8144_v1 }
  0x12   :  { %7515 = vmatmul.mubr.msk.f32.gmra.mrb[6].mxu0 %vm43_vm1, %v27_v6 }
  0x13   :  { %185 = vmatprep.mubr.f32.mxu0 %v8144_v1 }
  0x16   :  { %7516 = vmatmul.mubr.msk.f32.gmra.mrb[8].mxu0 %vm43_vm1, %v28_v7 }
  0x17   :  { %191 = vmatprep.mubr.f32.mxu0 %v8144_v1 }
  0x1a   :  { %7517 = vmatmul.mubr.msk.f32.gmra.mrb[10].mxu0 %vm43_vm1, %v29_v8 }
  0x1b   :  { %197 = vmatprep.mubr.f32.mxu0 %v8144_v1 }
  0x1e   :  { %7518 = vmatmul.mubr.msk.f32.gmra.mrb[12].mxu0 %vm43_vm1, %v30_v9 }
  0x1f   :  { %203 = vmatprep.mubr.f32.mxu0 %v8144_v1 }
  0x22   :  { %7519 = vmatmul.mubr.msk.f32.gmra.mrb[14].mxu0 %vm43_vm1, %v31_v10 }
  0x23   :  { %209 = vmatprep.mubr.f32.mxu0 %v8144_v1 }
  0x26   :  { %7520 = vmatmul.mubr.msk.f32.gmra.mrb[16].mxu0 %vm43_vm1, %v32_v11 }
  0x27   :  { %215 = vmatprep.mubr.f32.mxu0 %v8144_v1 }
  0x2a   :  { %7521 = vmatmul.mubr.msk.f32.gmra.mrb[18].mxu0 %vm43_vm1, %v33_v12 }
  0x2b   :  { %221 = vmatprep.mubr.f32.mxu0 %v8144_v1 }
  0x2e   :  { %7522 = vmatmul.mubr.msk.f32.gmra.mrb[20].mxu0 %vm43_vm1, %v34_v13 }
  0x2f   :  { %227 = vmatprep.mubr.f32.mxu0 %v8144_v1 }
  0x32   :  { %7523 = vmatmul.mubr.msk.f32.gmra.mrb[22].mxu0 %vm43_vm1, %v35_v14 }
  0x33   :  { %233 = vmatprep.mubr.f32.mxu0 %v8144_v1 }
  0x36   :  { %7524 = vmatmul.mubr.msk.f32.gmra.mrb[24].mxu0 %vm43_vm1, %v36_v15 }
  0x37   :  { %239 = vmatprep.mubr.f32.mxu0 %v8144_v1 }
  0x3a   :  { %7525 = vmatmul.mubr.msk.f32.gmra.mrb[26].mxu0 %vm43_vm1, %v37_v16 }
  0x3b   :  { %245 = vmatprep.mubr.f32.mxu0 %v8144_v1 }
  0x3e   :  { %7526 = vmatmul.mubr.msk.f32.gmra.mrb[28].mxu0 %vm43_vm1, %v38_v17 }
  0x3f   :  { %251 = vmatprep.mubr.f32.mxu0 %v8144_v1 }
  0x42   :  { %7527 = vmatmul.mubr.msk.f32.gmra.mrb[30].mxu0 %vm43_vm1, %v39_v18 }
  0xd9   :  { %v8243_v19 = vpop.f32.mrb[0].mxu0 }
  0xda   :  { %11838 = vst [vmem:[#allocation5_spill] sm:$0xff] %v8243_v19  ;;  %v258_v20 = vand.u32 2147483647, %v8243_v19  ;;  %v261_v21 = vand.u32 2139095040, %v8243_v19  ;;  %v8247_v22 = vpop.f32.mrb[1].mxu0 }
  0xdb   :  { %11839 = vst [vmem:[#allocation6_spill] sm:$0xff] %v8247_v22  ;;  %v11691_v23 = vand.u32 2147483647, %v8247_v22  ;;  %v364_v24 = vand.u32 2139095040, %v8247_v22 }
  0xdc   :  { %v262_v25 = vshrl.u32 %v261_v21, 23  ;;  %v265_v26 = vand.u32 8388607, %v258_v20 }
  0xdd   :  { %v365_v27 = vshrl.u32 %v364_v24, 23  ;;  %v368_v28 = vand.u32 8388607, %v11691_v23  ;;  %v8255_v29 = vpop.f32.mrb[2].mxu0 }
  0xde   :  { %11840 = vst [vmem:[#allocation7_spill] sm:$0xff] %v8255_v29  ;;  %v7528_v30 = vadd.s32 4294967169, %v262_v25  ;;  %v8257_v31 = vpop.f32.mrb[3].mxu0  ;;  %v467_v33 = vand.u32 2139095040, %v8255_v29  ;;  %v266_v35 = vor.u32 8388608, %v265_v26 }
  0xdf   :  { %11841 = vst [vmem:[#allocation8_spill] sm:$0xff] %v8257_v31  ;;  %v7532_v32 = vadd.s32 4294967169, %v365_v27  ;;  %v369_v36 = vor.u32 8388608, %v368_v28 }
  0xe0   :  { %v268_v34 = vadd.s32 1, %v7528_v30  ;;  %v468_v38 = vshrl.u32 %v467_v33, 23  ;;  %v8264_v46 = vshll.u32 %v266_v35, 8 }
  0xe1   :  { %v371_v37 = vadd.s32 1, %v7532_v32  ;;  %v8260_v39 = vpop.f32.mrb[4].mxu0  ;;  %v8268_v48 = vshll.u32 %v369_v36, 8 }
  0xe2   :  { %11842 = vst [vmem:[#allocation9_spill] sm:$0xff] %v8260_v39  ;;  %vm269_vm2 = vcmp.gt.s32.totalorder %v268_v34, 0  ;;  %v8262_v40 = vpop.f32.mrb[5].mxu0  ;;  %v7536_v42 = vadd.s32 4294967169, %v468_v38 }
  0xe3   :  { %11843 = vst [vmem:[#allocation10_spill] sm:$0xff] %v8262_v40  ;;  %v270_v41 = vsel %vm269_vm2, %v268_v34, 0  ;;  %vm372_vm3 = vcmp.gt.s32.totalorder %v371_v37, 0 }
  0xe4   :  { %v271_v43 = vshrl.u32 %v270_v41, 5  ;;  %v272_v44 = vand.u32 31, %v270_v41  ;;  %v373_v45 = vsel %vm372_vm3, %v371_v37, 0  ;;  %v8273_v54 = vadd.s32 1, %v7536_v42 }
  0xe5   :  { %v8266_v47 = vshrl.u32 %v373_v45, 5  ;;  %v8270_v49 = vpop.f32.mrb[6].mxu0  ;;  %v375_v53 = vand.u32 31, %v373_v45 }
  0xe6   :  { %11844 = vst [vmem:[#allocation11_spill] sm:$0xff] %v8270_v49  ;;  %v273_v50 = vsub.s32 32, %v272_v44  ;;  %v275_v52 = vshll.u32 %v11699_v51, %v272_v44  ;;  %v8275_v55 = vpop.f32.mrb[7].mxu0  ;;  %v278_v57 = vshll.u32 %v11697_v56, %v272_v44  ;;  %v281_v59 = vshll.u32 %v11694_v58, %v272_v44 }
  0xe7   :  { %11845 = vst [vmem:[#allocation12_spill] sm:$0xff] %v8275_v55  ;;  %v284_v61 = vshll.u32 %v11692_v60, %v272_v44  ;;  %v287_v63 = vshll.u32 %v11701_v62, %v272_v44  ;;  %vm290_vm4 = vcmp.lt.s32.totalorder %v271_v43, 1  ;;  %vm291_vm5 = vcmp.lt.s32.totalorder %v271_v43, 2 }
  0xe8   :  { %v276_v0 = vshrl.u32 %v11697_v56, %v273_v50  ;;  %v279_v1 = vshrl.u32 %v11694_v58, %v273_v50  ;;  %v282_v2 = vshrl.u32 %v11692_v60, %v273_v50  ;;  %v274_v3 = vshrl.u32 %v11699_v51, %v273_v50 }
  0xe9   :  { %v285_v4 = vshrl.u32 %v11701_v62, %v273_v50  ;;  %v288_v6 = vshrl.u32 %v11706_v5, %v273_v50  ;;  %v376_v10 = vsub.s32 32, %v375_v53  ;;  %vm292_vm6 = vcmp.lt.s32.totalorder %v271_v43, 3  ;;  %v8287_v13 = vpop.f32.mrb[8].mxu0 }
  0xea   :  { %v277_v7 = vor.u32 %v276_v0, %v275_v52  ;;  %v280_v8 = vor.u32 %v279_v1, %v278_v57  ;;  %v283_v9 = vor.u32 %v282_v2, %v281_v59  ;;  %vm293_vm7 = vcmp.lt.s32.totalorder %v271_v43, 4  ;;  %11846 = vst [vmem:[#allocation13_spill] sm:$0xff] %v8287_v13 }
  0xeb   :  { %v286_v11 = vor.u32 %v285_v4, %v284_v61  ;;  %v289_v12 = vor.u32 %v288_v6, %v287_v63  ;;  %v378_v25 = vshll.u32 %v11699_v51, %v375_v53  ;;  %v379_v28 = vshrl.u32 %v11697_v56, %v376_v10 }
  0xec   :  { %v294_v14 = vsel %vm290_vm4, %v274_v3, %v277_v7  ;;  %v295_v15 = vsel %vm293_vm7, %v283_v9, 2102212464  ;;  %v298_v16 = vsel %vm290_vm4, %v277_v7, %v280_v8  ;;  %v302_v17 = vsel %vm290_vm4, %v280_v8, %v283_v9 }
  0xed   :  { %v296_v18 = vsel %vm292_vm6, %v280_v8, %v295_v15  ;;  %v299_v21 = vsel %vm293_vm7, %v286_v11, 920167782  ;;  %v303_v24 = vsel %vm293_vm7, %v289_v12, 1326507024  ;;  %v381_v30 = vshll.u32 %v11697_v56, %v375_v53 }
  0xee   :  { %v300_v26 = vsel %vm292_vm6, %v283_v9, %v299_v21  ;;  %v304_v27 = vsel %vm292_vm6, %v286_v11, %v303_v24  ;;  %v297_v32 = vsel %vm291_vm5, %v294_v14, %v296_v18  ;;  %v382_v35 = vshrl.u32 %v11694_v58, %v376_v10 }
  0xef   :  { %v301_v33 = vsel %vm291_vm5, %v298_v16, %v300_v26  ;;  %v305_v34 = vsel %vm291_vm5, %v302_v17, %v304_v27  ;;  %v380_v42 = vor.u32 %v379_v28, %v378_v25  ;;  %v384_v45 = vshll.u32 %v11694_v58, %v375_v53 }
  0xf0   :  { %v8300_v36 = vmul.u32.u64.low %v8264_v46, %v305_v34  ;;  %v8301_v37 = vmul.u32.u64.high %v8264_v46, %v305_v34, %v8300_v36  ;;  %v8304_v38 = vmul.u32.u64.low %v8264_v46, %v301_v33  ;;  %v8305_v41 = vmul.u32.u64.high %v8264_v46, %v301_v33, %v8304_v38 }
  0xf1   :  { %v383_v44 = vor.u32 %v382_v35, %v381_v30  ;;  %v385_v50 = vshrl.u32 %v11692_v60, %v376_v10  ;;  %v377_v43 = vshrl.u32 %v11699_v51, %v376_v10  ;;  %v387_v52 = vshll.u32 %v11692_v60, %v375_v53 }
  0xf2   :  { %v388_v57 = vshrl.u32 %v11701_v62, %v376_v10  ;;  %v391_v59 = vshrl.u32 %v11706_v5, %v376_v10  ;;  %v313_v61 = vmul.u32 %v8264_v46, %v297_v32  ;;  %v390_v0 = vshll.u32 %v11701_v62, %v375_v53 }
  0xf3   :  { %v386_v63 = vor.u32 %v385_v50, %v384_v45  ;;  %vm393_vm8 = vcmp.lt.s32.totalorder %v8266_v47, 1  ;;  %vm315_vm9 = vc.u32 %v8301_v37, %v8304_v38  ;;  %v316_v1 = vadd.s32 1, %v8305_v41  ;;  %v8356_v50 = vpop.f32.mrb[9].mxu0 }
  0xf4   :  { %v389_v2 = vor.u32 %v388_v57, %v387_v52  ;;  %vm394_vm10 = vcmp.lt.s32.totalorder %v8266_v47, 2  ;;  %v392_v3 = vor.u32 %v391_v59, %v390_v0  ;;  %vm395_vm11 = vcmp.lt.s32.totalorder %v8266_v47, 3  ;;  %11847 = vst [vmem:[#allocation14_spill] sm:$0xff] %v8356_v50 }
  0xf5   :  { %vm396_vm12 = vcmp.lt.s32.totalorder %v8266_v47, 4  ;;  %v401_v4 = vsel %vm393_vm8, %v380_v42, %v383_v44  ;;  %v317_v46 = vsel %vm315_vm9, %v316_v1, %v8305_v41  ;;  %v405_v7 = vsel %vm393_vm8, %v383_v44, %v386_v63 }
  0xf6   :  { %v398_v6 = vsel %vm396_vm12, %v386_v63, 2102212464  ;;  %v402_v53 = vsel %vm396_vm12, %v389_v2, 920167782  ;;  %v318_v8 = vadd.s32 %v317_v46, %v313_v61  ;;  %v397_v9 = vsel %vm393_vm8, %v377_v43, %v380_v42 }
  0xf7   :  { %v403_v10 = vsel %vm395_vm11, %v386_v63, %v402_v53  ;;  %v406_v11 = vsel %vm396_vm12, %v392_v3, 1326507024  ;;  %v399_v12 = vsel %vm395_vm11, %v383_v44, %v398_v6  ;;  %vm475_vm13 = vcmp.gt.s32.totalorder %v8273_v54, 0 }
  0xf8   :  { %v404_v14 = vsel %vm394_vm10, %v401_v4, %v403_v10  ;;  %v407_v15 = vsel %vm395_vm11, %v389_v2, %v406_v11  ;;  %v319_v16 = vadd.s32 536870912, %v318_v8  ;;  %v476_v26 = vsel %vm475_vm13, %v8273_v54, 0 }
  0xf9   :  { %v408_v17 = vsel %vm394_vm10, %v405_v7, %v407_v15  ;;  %v8330_v18 = vmul.u32.u64.low %v8268_v48, %v404_v14  ;;  %v8331_v21 = vmul.u32.u64.high %v8268_v48, %v404_v14, %v8330_v18  ;;  %v400_v28 = vsel %vm394_vm10, %v397_v9, %v399_v12 }
  0xfa   :  { %v8335_v24 = vmul.u32.u64.low %v8268_v48, %v408_v17  ;;  %v8336_v25 = vmul.u32.u64.high %v8268_v48, %v408_v17, %v8335_v24  ;;  %v8339_v27 = vshrl.u32 %v319_v16, 30  ;;  %v478_v30 = vand.u32 31, %v476_v26 }
  0xfb   :  { %v11690_v32 = vand.u32 2147483647, %v8255_v29  ;;  %v419_v34 = vadd.s32 1, %v8331_v21  ;;  %v416_v36 = vmul.u32 %v8268_v48, %v400_v28  ;;  %v570_v57 = vand.u32 2139095040, %v8257_v31 }
  0xfc   :  { %v321_v33 = vshll.u32 %v8339_v27, 30  ;;  %v479_v35 = vsub.s32 32, %v478_v30  ;;  %vm418_vm14 = vc.u32 %v8336_v25, %v8330_v18  ;;  %v481_v48 = vshll.u32 %v11699_v51, %v478_v30 }
  0xfd   :  { %v420_v54 = vsel %vm418_vm14, %v419_v34, %v8331_v21  ;;  %v471_v47 = vand.u32 8388607, %v11690_v32  ;;  %v484_v52 = vshll.u32 %v11697_v56, %v478_v30  ;;  %v477_v61 = vshrl.u32 %v476_v26, 5 }
  0xfe   :  { %v8349_v41 = vsub.s32 %v318_v8, %v321_v33  ;;  %v421_v42 = vadd.s32 %v420_v54, %v416_v36  ;;  %v482_v44 = vshrl.u32 %v11697_v56, %v479_v35  ;;  %v485_v45 = vshrl.u32 %v11694_v58, %v479_v35 }
  0xff   :  { %v487_v63 = vshll.u32 %v11694_v58, %v478_v30  ;;  %v488_v0 = vshrl.u32 %v11692_v60, %v479_v35  ;;  %v490_v3 = vshll.u32 %v11692_v60, %v478_v30  ;;  %v491_v4 = vshrl.u32 %v11701_v62, %v479_v35 }
 0x100   :  { %v324_v43 = vsub.s32 0, %v8349_v41  ;;  %v422_v59 = vadd.s32 536870912, %v421_v42  ;;  %v483_v1 = vor.u32 %v482_v44, %v481_v48  ;;  %v486_v2 = vor.u32 %v485_v45, %v484_v52 }
 0x101   :  { %v493_v6 = vshll.u32 %v11701_v62, %v478_v30  ;;  %v494_v53 = vshrl.u32 %v11706_v5, %v479_v35  ;;  %v489_v7 = vor.u32 %v488_v0, %v487_v63  ;;  %v492_v8 = vor.u32 %v491_v4, %v490_v3 }
 0x102   :  { %v7529_v46 = vmin.u32 %v324_v43, %v8349_v41  ;;  %v472_v9 = vor.u32 8388608, %v471_v47  ;;  %vm496_vm15 = vcmp.lt.s32.totalorder %v477_v61, 1  ;;  %v571_v11 = vshrl.u32 %v570_v57, 23 }
 0x103   :  { %v495_v10 = vor.u32 %v494_v53, %v493_v6  ;;  %v8369_v12 = vshrl.u32 %v422_v59, 30  ;;  %vm499_vm0 = vcmp.lt.s32.totalorder %v477_v61, 4  ;;  %v504_v14 = vsel %vm496_vm15, %v483_v1, %v486_v2 }
 0x104   :  { %v326_v15 = vclz %v7529_v46  ;;  %v480_v16 = vshrl.u32 %v11699_v51, %v479_v35  ;;  %vm498_vm1 = vcmp.lt.s32.totalorder %v477_v61, 3  ;;  %v505_v17 = vsel %vm499_vm0, %v492_v8, 920167782 }
 0x105   :  { %vm497_vm2 = vcmp.lt.s32.totalorder %v477_v61, 2  ;;  %v501_v21 = vsel %vm499_vm0, %v489_v7, 2102212464  ;;  %v506_v24 = vsel %vm498_vm1, %v489_v7, %v505_v17  ;;  %v508_v26 = vsel %vm496_vm15, %v486_v2, %v489_v7 }
 0x106   :  { %v507_v28 = vsel %vm497_vm2, %v504_v14, %v506_v24  ;;  %v509_v30 = vsel %vm499_vm0, %v495_v10, 1326507024  ;;  %v512_v33 = vshll.u32 %v472_v9, 8  ;;  %v7540_v34 = vadd.s32 4294967169, %v571_v11  ;;  %v8396_v9 = vpop.f32.mrb[10].mxu0 }
 0x107   :  { %v424_v36 = vshll.u32 %v8369_v12, 30  ;;  %v500_v54 = vsel %vm496_vm15, %v480_v16, %v483_v1  ;;  %v510_v47 = vsel %vm498_vm1, %v492_v8, %v509_v30  ;;  %v502_v44 = vsel %vm498_vm1, %v486_v2, %v501_v21  ;;  %11848 = vst [vmem:[#allocation15_spill] sm:$0xff] %v8396_v9 }
 0x108   :  { %v511_v35 = vsel %vm497_vm2, %v508_v26, %v510_v47  ;;  %v8378_v45 = vmul.u32.u64.low %v512_v33, %v507_v28  ;;  %v8379_v43 = vmul.u32.u64.high %v512_v33, %v507_v28, %v8378_v45  ;;  %v7530_v48 = vadd.s32 4294967294, %v326_v15 }
 0x109   :  { %v8382_v52 = vmul.u32.u64.low %v512_v33, %v511_v35  ;;  %v8383_v57 = vmul.u32.u64.high %v512_v33, %v511_v35, %v8382_v52  ;;  %v577_v59 = vadd.s32 1, %v7540_v34  ;;  %v8385_v63 = vsub.s32 %v421_v42, %v424_v36 }
 0x10a   :  { %v503_v0 = vsel %vm497_vm2, %v500_v54, %v502_v44  ;;  %v522_v3 = vadd.s32 1, %v8379_v43  ;;  %vm7531_vm4 = vcmp.lt.s32.totalorder %v7530_v48, 0  ;;  %v11688_v4 = vand.u32 2147483647, %v8257_v31 }
 0x10b   :  { %vm578_vm3 = vcmp.gt.s32.totalorder %v577_v59, 0  ;;  %vm521_vm5 = vc.u32 %v8383_v57, %v8378_v45  ;;  %v519_v1 = vmul.u32 %v512_v33, %v503_v0  ;;  %v427_v6 = vsub.s32 0, %v8385_v63 }
 0x10c   :  { %v523_v2 = vsel %vm521_vm5, %v522_v3, %v8379_v43  ;;  %v579_v46 = vsel %vm578_vm3, %v577_v59, 0  ;;  %v329_v53 = vsel %vm7531_vm4, 0, %v7530_v48  ;;  %v574_v61 = vand.u32 8388607, %v11688_v4 }
 0x10d   :  { %v524_v42 = vadd.s32 %v523_v2, %v519_v1  ;;  %v581_v7 = vand.u32 31, %v579_v46  ;;  %v334_v10 = vsub.s32 4294967266, %v329_v53  ;;  %v7533_v11 = vmin.u32 %v427_v6, %v8385_v63 }
 0x10e   :  { %v673_v16 = vand.u32 2139095040, %v8260_v39  ;;  %v314_v17 = vadd.s32 %v8304_v38, %v8301_v37  ;;  %v575_v21 = vor.u32 8388608, %v574_v61  ;;  %v330_v26 = vsub.s32 32, %v329_v53 }
 0x10f   :  { %v582_v8 = vsub.s32 32, %v581_v7  ;;  %v525_v14 = vadd.s32 536870912, %v524_v42  ;;  %v335_v28 = vadd.s32 127, %v334_v10  ;;  %v429_v30 = vclz %v7533_v11 }
 0x110   :  { %v584_v33 = vshll.u32 %v11699_v51, %v581_v7  ;;  %v587_v36 = vshll.u32 %v11697_v56, %v581_v7  ;;  %v590_v54 = vshll.u32 %v11694_v58, %v581_v7  ;;  %v580_v44 = vshrl.u32 %v579_v46, 5 }
 0x111   :  { %v585_v15 = vshrl.u32 %v11697_v56, %v582_v8  ;;  %v588_v24 = vshrl.u32 %v11694_v58, %v582_v8  ;;  %v8405_v34 = vshrl.u32 %v525_v14, 30  ;;  %v591_v47 = vshrl.u32 %v11692_v60, %v582_v8 }
 0x112   :  { %v11687_v37 = vand.u32 2147483647, %v8260_v39  ;;  %v674_v38 = vshrl.u32 %v673_v16, 23  ;;  %v593_v52 = vshll.u32 %v11692_v60, %v581_v7  ;;  %v594_v59 = vshrl.u32 %v11701_v62, %v582_v8 }
 0x113   :  { %v586_v35 = vor.u32 %v585_v15, %v584_v33  ;;  %v589_v43 = vor.u32 %v588_v24, %v587_v36  ;;  %v592_v48 = vor.u32 %v591_v47, %v590_v54  ;;  %v332_v0 = vshrl.u32 %v314_v17, %v330_v26 }
 0x114   :  { %v596_v3 = vshll.u32 %v11701_v62, %v581_v7  ;;  %v597_v1 = vshrl.u32 %v11706_v5, %v582_v8  ;;  %v615_v2 = vshll.u32 %v575_v21, 8  ;;  %v336_v6 = vshll.u32 %v335_v28, 23 }
 0x115   :  { %v7534_v61 = vadd.s32 4294967294, %v429_v30  ;;  %v527_v46 = vshll.u32 %v8405_v34, 30  ;;  %v595_v10 = vor.u32 %v594_v59, %v593_v52  ;;  %vm599_vm6 = vcmp.lt.s32.totalorder %v580_v44, 1 }
 0x116   :  { %v598_v11 = vor.u32 %v597_v1, %v596_v3  ;;  %vm602_vm7 = vcmp.lt.s32.totalorder %v580_v44, 4  ;;  %v7544_v14 = vadd.s32 4294967169, %v674_v38  ;;  %vm601_vm8 = vcmp.lt.s32.totalorder %v580_v44, 3 }
 0x117   :  { %v607_v15 = vsel %vm599_vm6, %v586_v35, %v589_v43  ;;  %v608_v16 = vsel %vm602_vm7, %v595_v10, 920167782  ;;  %v611_v17 = vsel %vm599_vm6, %v589_v43, %v592_v48  ;;  %v583_v7 = vshrl.u32 %v11699_v51, %v582_v8 }
 0x118   :  { %v604_v24 = vsel %vm602_vm7, %v592_v48, 2102212464  ;;  %v609_v21 = vsel %vm601_vm8, %v592_v48, %v608_v16  ;;  %v612_v26 = vsel %vm602_vm7, %v598_v11, 1326507024  ;;  %vm7535_vm9 = vcmp.lt.s32.totalorder %v7534_v61, 0 }
 0x119   :  { %v8420_v28 = vsub.s32 %v524_v42, %v527_v46  ;;  %vm600_vm10 = vcmp.lt.s32.totalorder %v580_v44, 2  ;;  %v613_v30 = vsel %vm601_vm8, %v595_v10, %v612_v26  ;;  %v331_v33 = vshll.u32 %v8349_v41, %v329_v53  ;;  %v8450_v26 = vpop.f32.mrb[11].mxu0 }
 0x11a   :  { %v603_v36 = vsel %vm599_vm6, %v583_v7, %v586_v35  ;;  %v610_v54 = vsel %vm600_vm10, %v607_v15, %v609_v21  ;;  %v614_v47 = vsel %vm600_vm10, %v611_v17, %v613_v30  ;;  %v605_v8 = vsel %vm601_vm8, %v589_v43, %v604_v24  ;;  %11849 = vst [vmem:[#allocation16_spill] sm:$0xff] %v8450_v26 }
 0x11b   :  { %v8428_v38 = vmul.u32.u64.low %v615_v2, %v614_v47  ;;  %v8429_v52 = vmul.u32.u64.high %v615_v2, %v614_v47, %v8428_v38  ;;  %v680_v48 = vadd.s32 1, %v7544_v14  ;;  %v333_v59 = vor.u32 %v332_v0, %v331_v33 }
 0x11c   :  { %v337_v42 = vor.u32 4788187, %v336_v6  ;;  %v8431_v3 = vsel %vm7535_vm9, 0, %v7534_v61  ;;  %v530_v1 = vsub.s32 0, %v8420_v28  ;;  %v606_v53 = vsel %vm600_vm10, %v603_v36, %v605_v8 }
 0x11d   :  { %v8434_v46 = vmul.u32.u64.low %v615_v2, %v610_v54  ;;  %v8435_v41 = vmul.u32.u64.high %v615_v2, %v610_v54, %v8434_v46  ;;  %vm681_vm11 = vcmp.gt.s32.totalorder %v680_v48, 0  ;;  %v677_v35 = vand.u32 8388607, %v11687_v37 }
 0x11e   :  { %v682_v43 = vsel %vm681_vm11, %v680_v48, 0  ;;  %vm260_vm12 = vcmp.lt.s32.totalorder %v8243_v19, 0  ;;  %v344_v0 = vsub.s32 4, %v8339_v27  ;;  %v338_v61 = vand.u32 2147483647, %v337_v42 }
 0x11f   :  { %v684_v6 = vand.u32 31, %v682_v43  ;;  %v340_v10 = vcvt.s32.f32 %v333_v59  ;;  %v437_v11 = vsub.s32 4294967266, %v8431_v3  ;;  %vm624_vm13 = vc.u32 %v8429_v52, %v8434_v46 }
 0x120   :  { %v7537_v14 = vmin.u32 %v530_v1, %v8420_v28  ;;  %v622_v44 = vmul.u32 %v615_v2, %v606_v53  ;;  %v625_v15 = vadd.s32 1, %v8435_v41  ;;  %v678_v17 = vor.u32 8388608, %v677_v35 }
 0x121   :  { %v685_v16 = vsub.s32 32, %v684_v6  ;;  %v683_v7 = vshrl.u32 %v682_v43, 5  ;;  %v687_v24 = vshll.u32 %v11699_v51, %v684_v6  ;;  %v690_v21 = vshll.u32 %v11697_v56, %v684_v6 }
 0x122   :  { %v626_v30 = vsel %vm624_vm13, %v625_v15, %v8435_v41  ;;  %v693_v54 = vshll.u32 %v11694_v58, %v684_v6  ;;  %v696_v8 = vshll.u32 %v11692_v60, %v684_v6  ;;  %v699_v42 = vshll.u32 %v11701_v62, %v684_v6 }
 0x123   :  { %v688_v33 = vshrl.u32 %v11697_v56, %v685_v16  ;;  %v691_v36 = vshrl.u32 %v11694_v58, %v685_v16  ;;  %v627_v2 = vadd.s32 %v626_v30, %v622_v44  ;;  %v694_v47 = vshrl.u32 %v11692_v60, %v685_v16 }
 0x124   :  { %v697_v38 = vshrl.u32 %v11701_v62, %v685_v16  ;;  %v700_v1 = vshrl.u32 %v11706_v5, %v685_v16  ;;  %v417_v41 = vadd.s32 %v8330_v18, %v8336_v25  ;;  %v8463_v15 = vmul.f32 %v340_v10, %v338_v61 }
 0x125   :  { %v689_v48 = vor.u32 %v688_v33, %v687_v24  ;;  %v692_v59 = vor.u32 %v691_v36, %v690_v21  ;;  %v628_v53 = vadd.s32 536870912, %v627_v2  ;;  %v695_v35 = vor.u32 %v694_v47, %v693_v54 }
 0x126   :  { %v698_v43 = vor.u32 %v697_v38, %v696_v8  ;;  %v345_v44 = vsel %vm260_vm12, %v344_v0, %v8339_v27  ;;  %v433_v30 = vsub.s32 32, %v8431_v3  ;;  %v701_v24 = vor.u32 %v700_v1, %v699_v42 }
 0x127   :  { %v532_v21 = vclz %v7537_v14  ;;  %v8469_v33 = vshrl.u32 %v628_v53, 30  ;;  %vm702_vm14 = vcmp.lt.s32.totalorder %v683_v7, 1  ;;  %vm705_vm15 = vcmp.lt.s32.totalorder %v683_v7, 4 }
 0x128   :  { %v438_v6 = vadd.s32 127, %v437_v11  ;;  %v710_v18 = vsel %vm702_vm14, %v689_v48, %v692_v59  ;;  %v711_v25 = vsel %vm705_vm15, %v698_v43, 920167782  ;;  %v718_v36 = vshll.u32 %v678_v17, 8 }
 0x129   :  { %v686_v61 = vshrl.u32 %v11699_v51, %v685_v16  ;;  %vm704_vm0 = vcmp.lt.s32.totalorder %v683_v7, 3  ;;  %v707_v10 = vsel %vm705_vm15, %v695_v35, 2102212464  ;;  %v776_v54 = vand.u32 2139095040, %v8262_v40 }
 0x12a   :  { %vm703_vm1 = vcmp.lt.s32.totalorder %v683_v7, 2  ;;  %v712_v27 = vsel %vm704_vm0, %v695_v35, %v711_v25  ;;  %v714_v0 = vsel %vm702_vm14, %v692_v59, %v695_v35  ;;  %v715_v14 = vsel %vm705_vm15, %v701_v24, 1326507024 }
 0x12b   :  { %v7538_v47 = vadd.s32 4294967294, %v532_v21  ;;  %v630_v8 = vshll.u32 %v8469_v33, 30  ;;  %v706_v11 = vsel %vm702_vm14, %v686_v61, %v689_v48  ;;  %v713_v38 = vsel %vm703_vm1, %v710_v18, %v712_v27 }
 0x12c   :  { %v708_v42 = vsel %vm704_vm0, %v692_v59, %v707_v10  ;;  %v716_v17 = vsel %vm704_vm0, %v698_v43, %v715_v14  ;;  %v8478_v1 = vmul.u32.u64.low %v718_v36, %v713_v38  ;;  %v8479_v16 = vmul.u32.u64.high %v718_v36, %v713_v38, %v8478_v1 }
 0x12d   :  { %v435_v53 = vshrl.u32 %v417_v41, %v433_v30  ;;  %v439_v37 = vshll.u32 %v438_v6, 23  ;;  %v717_v25 = vsel %vm703_vm1, %v714_v0, %v716_v17  ;;  %v777_v4 = vshrl.u32 %v776_v54, 23  ;;  %v8518_v17 = vpop.f32.mrb[12].mxu0 }
 0x12e   :  { %vm8485_vm2 = vcmp.le.f32.partialorder %v258_v20, 0.7853982  ;;  %v434_v48 = vshll.u32 %v8385_v63, %v8431_v3  ;;  %v8491_v59 = vmul.u32.u64.low %v718_v36, %v717_v25  ;;  %v8492_v43 = vmul.u32.u64.high %v718_v36, %v717_v25, %v8491_v59  ;;  %11853 = vst [vmem:[#allocation18_spill] sm:$0xff] %v8518_v17 }
 0x12f   :  { %vm7539_vm3 = vcmp.lt.s32.totalorder %v7538_v47, 0  ;;  %v8494_v24 = vsub.s32 %v627_v2, %v630_v8  ;;  %v709_v41 = vsel %vm703_vm1, %v706_v11, %v708_v42  ;;  %v7548_v30 = vadd.s32 4294967169, %v777_v4 }
 0x130   :  { %v347_v21 = vsel %vm8485_vm2, 0, %v345_v44  ;;  %v728_v20 = vadd.s32 1, %v8479_v16  ;;  %v342_v6 = vxor.u32 2147483648, %v8463_v15  ;;  %v436_v18 = vor.u32 %v435_v53, %v434_v48 }
 0x131   :  { %v440_v61 = vor.u32 4788187, %v439_v37  ;;  %v783_v10 = vadd.s32 1, %v7548_v30  ;;  %v8501_v63 = vsel %vm7539_vm3, 0, %v7538_v47  ;;  %v725_v3 = vmul.u32 %v718_v36, %v709_v41 }
 0x132   :  { %vm727_vm4 = vc.u32 %v8492_v43, %v8478_v1  ;;  %v11689_v7 = vand.u32 2147483647, %v8262_v40  ;;  %v633_v4 = vsub.s32 0, %v8494_v24  ;;  %v879_v44 = vand.u32 2139095040, %v8270_v49 }
 0x133   :  { %v729_v2 = vsel %vm727_vm4, %v728_v20, %v8479_v16  ;;  %vm784_vm5 = vcmp.gt.s32.totalorder %v783_v10, 0  ;;  %vm363_vm6 = vcmp.lt.s32.totalorder %v8247_v22, 0  ;;  %v447_v37 = vsub.s32 4, %v8369_v12 }
 0x134   :  { %v730_v54 = vadd.s32 %v729_v2, %v725_v3  ;;  %v785_v27 = vsel %vm784_vm5, %v783_v10, 0  ;;  %v8511_v0 = vand.u32 3, %v347_v21  ;;  %v441_v36 = vand.u32 2147483647, %v440_v61 }
 0x135   :  { %v540_v14 = vsub.s32 4294967266, %v8501_v63  ;;  %v787_v47 = vand.u32 31, %v785_v27  ;;  %v343_v8 = vsel %vm260_vm12, %v342_v6, %v8463_v15  ;;  %v443_v11 = vcvt.s32.f32 %v436_v18 }
 0x136   :  { %11852 = vst [vmem:[#allocation17_spill] sm:$0xff] %v8511_v0  ;;  %v536_v38 = vsub.s32 32, %v8501_v63  ;;  %v731_v42 = vadd.s32 536870912, %v730_v54  ;;  %v7541_v16 = vmin.u32 %v633_v4, %v8494_v24  ;;  %v780_v53 = vand.u32 8388607, %v11689_v7 }
 0x137   :  { %v788_v25 = vsub.s32 32, %v787_v47  ;;  %v880_v48 = vshrl.u32 %v879_v44, 23  ;;  %v8523_v59 = vadd.s32 3, %v347_v21  ;;  %v8528_v41 = vsel %vm363_vm6, %v447_v37, %v8369_v12 }
 0x138   :  { %v520_v15 = vadd.s32 %v8378_v45, %v8383_v57  ;;  %v8532_v30 = vshrl.u32 %v731_v42, 30  ;;  %v8537_v20 = vsel %vm8485_vm2, %v8243_v19, %v343_v8  ;;  %v8539_v6 = vmul.f32 %v443_v11, %v441_v36 }
 0x139   :  { %11854 = vst [vmem:[#allocation19_spill] sm:$0xff] %v8523_v59  ;;  %v541_v18 = vadd.s32 127, %v540_v14  ;;  %v550_v21 = vsub.s32 4, %v8405_v34  ;;  %v791_v12 = vshrl.u32 %v11697_v56, %v788_v25  ;;  %v794_v10 = vshrl.u32 %v11694_v58, %v788_v25 }
 0x13a   :  { %v733_v61 = vshll.u32 %v8532_v30, 30  ;;  %v797_v45 = vshrl.u32 %v11692_v60, %v788_v25  ;;  %v538_v57 = vshrl.u32 %v520_v15, %v536_v38  ;;  %v635_v3 = vclz %v7541_v16 }
 0x13b   :  { %v781_v4 = vor.u32 8388608, %v780_v53  ;;  %v7552_v2 = vadd.s32 4294967169, %v880_v48  ;;  %v790_v44 = vshll.u32 %v11699_v51, %v787_v47  ;;  %v793_v37 = vshll.u32 %v11697_v56, %v787_v47 }
 0x13c   :  { %v8546_v35 = vsub.s32 %v730_v54, %v733_v61  ;;  %v796_v36 = vshll.u32 %v11694_v58, %v787_v47  ;;  %v542_v14 = vshll.u32 %v541_v18, 23  ;;  %v786_v8 = vshrl.u32 %v785_v27, 5 }
 0x13d   :  { %v799_v11 = vshll.u32 %v11692_v60, %v787_v47  ;;  %v800_v42 = vshrl.u32 %v11701_v62, %v788_v25  ;;  %v792_v38 = vor.u32 %v791_v12, %v790_v44  ;;  %v795_v16 = vor.u32 %v794_v10, %v793_v37 }
 0x13e   :  { %v736_v7 = vsub.s32 0, %v8546_v35  ;;  %v798_v53 = vor.u32 %v797_v45, %v796_v36  ;;  %v802_v54 = vshll.u32 %v11701_v62, %v787_v47  ;;  %v803_v15 = vshrl.u32 %v11706_v5, %v788_v25 }
 0x13f   :  { %v801_v48 = vor.u32 %v800_v42, %v799_v11  ;;  %v11696_v61 = vand.u32 2147483647, %v8270_v49  ;;  %vm466_vm7 = vcmp.lt.s32.totalorder %v8255_v29, 0  ;;  %v7542_v18 = vadd.s32 4294967294, %v635_v3 }
 0x140   :  { %v7545_v27 = vmin.u32 %v736_v7, %v8546_v35  ;;  %v821_v32 = vshll.u32 %v781_v4, 8  ;;  %v886_v23 = vadd.s32 1, %v7552_v2  ;;  %v789_v60 = vshrl.u32 %v11699_v51, %v788_v25 }
 0x141   :  { %v804_v58 = vor.u32 %v803_v15, %v802_v54  ;;  %vm805_vm8 = vcmp.lt.s32.totalorder %v786_v8, 1  ;;  %vm808_vm9 = vcmp.lt.s32.totalorder %v786_v8, 4  ;;  %vm807_vm10 = vcmp.lt.s32.totalorder %v786_v8, 3 }
 0x142   :  { %v810_v12 = vsel %vm808_vm9, %v798_v53, 2102212464  ;;  %v813_v10 = vsel %vm805_vm8, %v792_v38, %v795_v16  ;;  %v814_v47 = vsel %vm808_vm9, %v801_v48, 920167782  ;;  %v738_v45 = vclz %v7545_v27 }
 0x143   :  { %vm806_vm11 = vcmp.lt.s32.totalorder %v786_v8, 2  ;;  %v815_v44 = vsel %vm807_vm10, %v798_v53, %v814_v47  ;;  %v817_v37 = vsel %vm805_vm8, %v795_v16, %v798_v53  ;;  %vm7543_vm12 = vcmp.lt.s32.totalorder %v7542_v18, 0 }
 0x144   :  { %v809_v36 = vsel %vm805_vm8, %v789_v60, %v792_v38  ;;  %v816_v3 = vsel %vm806_vm11, %v813_v10, %v815_v44  ;;  %v818_v7 = vsel %vm808_vm9, %v804_v58, 1326507024  ;;  %v811_v4 = vsel %vm807_vm10, %v795_v16, %v810_v12 }
 0x145   :  { %v819_v2 = vsel %vm807_vm10, %v801_v48, %v818_v7  ;;  %v8561_v11 = vmul.u32.u64.low %v821_v32, %v816_v3  ;;  %v8562_v25 = vmul.u32.u64.high %v821_v32, %v816_v3, %v8561_v11  ;;  %v445_v42 = vxor.u32 2147483648, %v8539_v6  ;;  %v7970_v3 = vld [vmem:[%s11684_s3 + $0x4] ss:$8 sps:$4 sm:$0xff]  }
 0x146   :  { %v537_v54 = vshll.u32 %v8420_v28, %v8501_v63  ;;  %v820_v15 = vsel %vm806_vm11, %v817_v37, %v819_v2  ;;  %vm887_vm13 = vcmp.gt.s32.totalorder %v886_v23, 0  ;;  %v8569_v53 = vsel %vm7543_vm12, 0, %v7542_v18  ;;  %7316 = vmatprep.subr.bf16.mxu0 %v7970_v3 }
 0x147   :  { %v7546_v60 = vadd.s32 4294967294, %v738_v45  ;;  %v8571_v38 = vmul.u32.u64.low %v821_v32, %v820_v15  ;;  %v8572_v27 = vmul.u32.u64.high %v821_v32, %v820_v15, %v8571_v38  ;;  %8016 = vcosq.f32 %v8537_v20  ;;  %v7968_v15 = vld [vmem:[%s11684_s3] ss:$8 sps:$4 sm:$0xff]  }
 0x148   :  { %v8575_v58 = vor.u32 %v538_v57, %v537_v54  ;;  %v8577_v16 = vor.u32 4788187, %v542_v14  ;;  %v812_v48 = vsel %vm806_vm11, %v809_v36, %v811_v4  ;;  %v8583_v28 = vsel %vm466_vm7, %v550_v21, %v8405_v34  ;;  %7317 = vmatpush1.bf16.xpose.msra.mxu0 %v7968_v15 }
 0x149   :  { %v831_v63 = vadd.s32 1, %v8562_v25  ;;  %v883_v18 = vand.u32 8388607, %v11696_v61  ;;  %v888_v12 = vsel %vm887_vm13, %v886_v23, 0  ;;  %8018 = vsinq.f32 %v8537_v20 }
 0x14a   :  { %v8592_v57 = vsel %vm363_vm6, %v445_v42, %v8539_v6  ;;  %v643_v14 = vsub.s32 4294967266, %v8569_v53  ;;  %v890_v8 = vand.u32 31, %v888_v12  ;;  %v623_v34 = vadd.s32 %v8434_v46, %v8429_v52 }
 0x14b   :  { %vm7547_vm14 = vcmp.lt.s32.totalorder %v7546_v60, 0  ;;  %v828_v21 = vmul.u32 %v821_v32, %v812_v48  ;;  %vm830_vm15 = vc.u32 %v8572_v27, %v8561_v11  ;;  %v544_v23 = vand.u32 2147483647, %v8577_v16  ;;  %v8620_v48 = vpop.f32.mrb[13].mxu0 }
 0x14c   :  { %v546_v20 = vcvt.s32.f32 %v8575_v58  ;;  %v832_v10 = vsel %vm830_vm15, %v831_v63, %v8562_v25  ;;  %v891_v47 = vsub.s32 32, %v890_v8  ;;  %v639_v6 = vsub.s32 32, %v8569_v53  ;;  %11857 = vst [vmem:[#allocation20_spill] sm:$0xff] %v8620_v48 }
 0x14d   :  { %v833_v45 = vadd.s32 %v832_v10, %v828_v21  ;;  %v884_v44 = vor.u32 8388608, %v883_v18  ;;  %v982_v37 = vand.u32 2139095040, %v8275_v55  ;;  %v644_v36 = vadd.s32 127, %v643_v14 }
 0x14e   :  { %v8604_v52 = vsel %vm7547_vm14, 0, %v7546_v60  ;;  %v893_v32 = vshll.u32 %v11699_v51, %v890_v8  ;;  %v894_v46 = vshrl.u32 %v11697_v56, %v891_v47  ;;  %v896_v4 = vshll.u32 %v11697_v56, %v890_v8 }
 0x14f   :  { %v834_v7 = vadd.s32 536870912, %v833_v45  ;;  %v11855_v2 = vmov 2131351028   ;;  %v11856_v42 = vmov 2102212464   ;;  %v889_v60 = vshrl.u32 %v888_v12, 5 }
 0x150   :  { %v897_v25 = vshrl.u32 %v11855_v2, %v891_v47  ;;  %v900_v54 = vshrl.u32 %v11856_v42, %v891_v47  ;;  %v899_v38 = vshll.u32 %v11855_v2, %v890_v8  ;;  %v902_v58 = vshll.u32 %v11856_v42, %v890_v8 }
 0x151   :  { %v903_v16 = vshrl.u32 %v11701_v62, %v891_v47  ;;  %v8622_v63 = vshrl.u32 %v834_v7, 30  ;;  %v895_v18 = vor.u32 %v894_v46, %v893_v32  ;;  %v906_v21 = vshrl.u32 %v11706_v5, %v891_v47  ;;  %v8625_v10 = vpop.eup %8016 }
 0x152   :  { %v898_v14 = vor.u32 %v897_v25, %v896_v4  ;;  %11858 = vst [vmem:[#allocation21_spill] sm:$0xff] %v8625_v10  ;;  %v901_v61 = vor.u32 %v900_v54, %v899_v38  ;;  %v983_v51 = vshrl.u32 %v982_v37, 23  ;;  %v645_v59 = vshll.u32 %v644_v36, 23 }
 0x153   :  { %v904_v12 = vor.u32 %v903_v16, %v902_v58  ;;  %v746_v62 = vsub.s32 4294967266, %v8604_v52  ;;  %v11859_v3 = vmov 920167782   ;;  %v8630_v0 = vshll.u32 %v884_v44, 8  ;;  %v8632_v7 = vpop.eup %8018 }
 0x154   :  { %v905_v19 = vshll.u32 %v11859_v3, %v890_v8  ;;  %11860 = vst [vmem:[#allocation22_spill] sm:$0xff] %v8632_v7  ;;  %v641_v32 = vshrl.u32 %v623_v34, %v639_v6  ;;  %v836_v46 = vshll.u32 %v8622_v63, 30  ;;  %vm908_vm0 = vcmp.lt.s32.totalorder %v889_v60, 1 }
 0x155   :  { %vm911_vm1 = vcmp.lt.s32.totalorder %v889_v60, 4  ;;  %v11861_v4 = vand.u32 2147483647, %v8247_v22  ;;  %v11862_v25 = vmov 0  ;;  %v11865_v37 = vand.u32 2147483647, %v8255_v29 }
 0x156   :  { %v907_v8 = vor.u32 %v906_v21, %v905_v19  ;;  %vm910_vm4 = vcmp.lt.s32.totalorder %v889_v60, 3  ;;  %v916_v34 = vsel %vm908_vm0, %v895_v18, %v898_v14  ;;  %v917_v6 = vsel %vm911_vm1, %v904_v12, 920167782 }
 0x157   :  { %vm8637_vm2 = vcmp.le.f32.partialorder %v11861_v4, 0.7853982  ;;  %vm8643_vm3 = vcmp.le.f32.partialorder %v11865_v37, 0.7853982  ;;  %v640_v44 = vshll.u32 %v8494_v24, %v8569_v53  ;;  %v913_v54 = vsel %vm911_vm1, %v901_v61, 2102212464 }
 0x158   :  { %v11863_v25 = vsel %vm8637_vm2, 4294967295, %v11862_v25  ;;  %v918_v15 = vsel %vm910_vm4, %v901_v61, %v917_v6  ;;  %v7556_v38 = vadd.s32 4294967169, %v983_v51  ;;  %v547_v58 = vmul.f32 %v546_v20, %v544_v23 }
 0x159   :  { %11864 = vst [vmem:[#allocation23_spill] sm:$0xff] %v11863_v25  ;;  %v646_v16 = vor.u32 4788187, %v645_v59  ;;  %v11868_v4 = vmov 683565275   ;;  %vm909_vm5 = vcmp.lt.s32.totalorder %v889_v60, 2  ;;  %v642_v5 = vor.u32 %v641_v32, %v640_v44 }
 0x15a   :  { %v892_v37 = vshrl.u32 %v11868_v4, %v891_v47  ;;  %v8654_v19 = vsub.s32 %v833_v45, %v836_v46  ;;  %v919_v21 = vsel %vm909_vm5, %v916_v34, %v918_v15  ;;  %v920_v56 = vsel %vm908_vm0, %v898_v14, %v901_v61 }
 0x15b   :  { %v747_v10 = vadd.s32 127, %v746_v62  ;;  %v914_v53 = vsel %vm910_vm4, %v898_v14, %v913_v54  ;;  %v921_v6 = vsel %vm911_vm1, %v907_v8, 1326507024  ;;  %v989_v20 = vadd.s32 1, %v7556_v38 }
 0x15c   :  { %v912_v24 = vsel %vm908_vm0, %v892_v37, %v895_v18  ;;  %v922_v51 = vsel %vm910_vm4, %v904_v12, %v921_v6  ;;  %v8663_v59 = vmul.u32.u64.low %v8630_v0, %v919_v21  ;;  %v8664_v23 = vmul.u32.u64.high %v8630_v0, %v919_v21, %v8663_v59  ;;  %v7973_v37 = vld [vmem:[%s11684_s3 + $0x80] ss:$8 sps:$4 sm:$0xff]  }
 0x15d   :  { %v647_v47 = vand.u32 2147483647, %v646_v16  ;;  %v726_v45 = vadd.s32 %v8478_v1, %v8492_v43  ;;  %v742_v62 = vsub.s32 32, %v8604_v52  ;;  %v923_v61 = vsel %vm909_vm5, %v920_v56, %v922_v51 }
 0x15e   :  { %v839_v18 = vsub.s32 0, %v8654_v19  ;;  %v8673_v14 = vmul.u32.u64.low %v8630_v0, %v923_v61  ;;  %v8674_v32 = vmul.u32.u64.high %v8630_v0, %v923_v61, %v8673_v14  ;;  %vm990_vm6 = vcmp.gt.s32.totalorder %v989_v20, 0  ;;  %v8713_v61 = vpop.f32.mrb[14].mxu0 }
 0x15f   :  { %v649_v12 = vcvt.s32.f32 %v642_v5  ;;  %v748_v46 = vshll.u32 %v747_v10, 23  ;;  %v915_v8 = vsel %vm909_vm5, %v912_v24, %v914_v53  ;;  %v991_v34 = vsel %vm990_vm6, %v989_v20, 0  ;;  %11872 = vst [vmem:[#allocation26_spill] sm:$0xff] %v8713_v61 }
 0x160   :  { %v449_v1 = vsel %vm8637_vm2, %v8247_v22, %v8592_v57  ;;  %v553_v56 = vsel %vm8643_vm3, 0, %v8583_v28  ;;  %v934_v43 = vadd.s32 1, %v8664_v23  ;;  %v993_v44 = vand.u32 31, %v991_v34  ;;  %v7971_v28 = vld [vmem:[%s11684_s3 + $0x84] ss:$8 sps:$4 sm:$0xff]  }
 0x161   :  { %v548_v54 = vxor.u32 2147483648, %v547_v58  ;;  %v650_v15 = vmul.f32 %v649_v12, %v647_v47  ;;  %v744_v38 = vshrl.u32 %v726_v45, %v742_v62  ;;  %v11869_v5 = vand.u32 2147483647, %v8275_v55  ;;  %7139 = vmatprep.subr.bf16.mxu1 %v7971_v28 }
 0x162   :  { %v7549_v10 = vmin.u32 %v839_v18, %v8654_v19  ;;  %v931_v16 = vmul.u32 %v8630_v0, %v915_v8  ;;  %vm933_vm8 = vc.u32 %v8674_v32, %v8663_v59  ;;  %v8691_v57 = vsub.s32 32, %v993_v44  ;;  %7140 = vmatpush1.bf16.xpose.msra.mxu1 %v7973_v37 }
 0x163   :  { %v986_v60 = vand.u32 8388607, %v11869_v5  ;;  %8020 = vcosq.f32 %v449_v1  ;;  %v8699_v21 = vand.u32 3, %v553_v56  ;;  %vm569_vm9 = vcmp.lt.s32.totalorder %v8257_v31, 0 }
 0x164   :  { %vm672_vm10 = vcmp.lt.s32.totalorder %v8260_v39, 0  ;;  %v749_v0 = vor.u32 4788187, %v748_v46  ;;  %v935_v24 = vsel %vm933_vm8, %v934_v43, %v8664_v23  ;;  %8022 = vsinq.f32 %v449_v1 }
 0x165   :  { %11870 = vst [vmem:[#allocation24_spill] sm:$0xff] %v8699_v21  ;;  %v8704_v53 = vadd.s32 3, %v553_v56  ;;  %v743_v6 = vshll.u32 %v8546_v35, %v8604_v52  ;;  %v8708_v51 = vadd.s32 %v935_v24, %v931_v16  ;;  %v549_v20 = vsel %vm466_vm7, %v548_v54, %v547_v58 }
 0x166   :  { %v651_v47 = vxor.u32 2147483648, %v650_v15  ;;  %v756_v45 = vsub.s32 4, %v8532_v30  ;;  %v987_v62 = vor.u32 8388608, %v986_v60  ;;  %v841_v18 = vclz %v7549_v10 }
 0x167   :  { %11871 = vst [vmem:[#allocation25_spill] sm:$0xff] %v8704_v53  ;;  %v745_v23 = vor.u32 %v744_v38, %v743_v6  ;;  %v11873_v14 = vmov 2475754826   ;;  %v1000_v35 = vshrl.u32 %v11855_v2, %v8691_v57  ;;  %v750_v52 = vand.u32 2147483647, %v749_v0 }
 0x168   :  { %v997_v12 = vshrl.u32 %v11873_v14, %v8691_v57  ;;  %v8719_v46 = vshrl.u32 %v991_v34, 5  ;;  %v1003_v58 = vshrl.u32 %v11856_v42, %v8691_v57  ;;  %v1085_v8 = vand.u32 2139095040, %v8287_v13 }
 0x169   :  { %v937_v1 = vadd.s32 536870912, %v8708_v51  ;;  %v996_v56 = vshll.u32 %v11868_v4, %v993_v44  ;;  %v999_v43 = vshll.u32 %v11873_v14, %v993_v44  ;;  %v1006_v54 = vshrl.u32 %v11859_v3, %v8691_v57 }
 0x16a   :  { %v1002_v38 = vshll.u32 %v11855_v2, %v993_v44  ;;  %v1005_v5 = vshll.u32 %v11856_v42, %v993_v44  ;;  %v1008_v34 = vshll.u32 %v11859_v3, %v993_v44  ;;  %v11874_v60 = vmov 1326507024  }
 0x16b   :  { %v1009_v10 = vshrl.u32 %v11874_v60, %v8691_v57  ;;  %v752_v16 = vcvt.s32.f32 %v745_v23  ;;  %v7550_v28 = vadd.s32 4294967294, %v841_v18  ;;  %v998_v37 = vor.u32 %v997_v12, %v996_v56 }
 0x16c   :  { %v1001_v0 = vor.u32 %v1000_v35, %v999_v43  ;;  %v653_v24 = vsub.s32 4, %v8469_v33  ;;  %v1004_v6 = vor.u32 %v1003_v58, %v1002_v38  ;;  %v1007_v53 = vor.u32 %v1006_v54, %v1005_v5 }
 0x16d   :  { %v1010_v21 = vor.u32 %v1009_v10, %v1008_v34  ;;  %v552_v7 = vsel %vm8643_vm3, %v8255_v29, %v549_v20  ;;  %v11875_v22 = vand.u32 2147483647, %v8257_v31  ;;  %v11876_v44 = vmov 0  ;;  %v8757_v20 = vpop.eup %8020 }
 0x16e   :  { %v652_v23 = vsel %vm569_vm9, %v651_v47, %v650_v15  ;;  %v11879_v18 = vand.u32 2147483647, %v8260_v39  ;;  %v8752_v35 = vmul.f32 %v752_v16, %v750_v52  ;;  %v757_v36 = vsel %vm672_vm10, %v756_v45, %v8532_v30  ;;  %11882 = vst [vmem:[#allocation28_spill] sm:$0xff] %v8757_v20  ;;  %v8762_v47 = vpop.eup %8022 }
 0x16f   :  { %vm8740_vm7 = vcmp.le.f32.partialorder %v11875_v22, 0.7853982  ;;  %v8759_v22 = vshrl.u32 %v937_v1, 30  ;;  %vm1011_vm12 = vcmp.lt.s32.totalorder %v8719_v46, 1  ;;  %v1027_v58 = vshll.u32 %v987_v62, 8  ;;  %11883 = vst [vmem:[#allocation29_spill] sm:$0xff] %v8762_v47 }
 0x170   :  { %v11877_v44 = vsel %vm8740_vm7, 4294967295, %v11876_v44  ;;  %vm8748_vm11 = vcmp.le.f32.partialorder %v11879_v18, 0.7853982  ;;  %v1086_v15 = vshrl.u32 %v1085_v8, 23  ;;  %vm7551_vm13 = vcmp.lt.s32.totalorder %v7550_v28, 0 }
 0x171   :  { %11878 = vst [vmem:[#allocation27_spill] sm:$0xff] %v11877_v44  ;;  %vm1013_vm14 = vcmp.lt.s32.totalorder %v8719_v46, 3  ;;  %vm1014_vm15 = vcmp.lt.s32.totalorder %v8719_v46, 4  ;;  %v1019_v52 = vsel %vm1011_vm12, %v998_v37, %v1001_v0  ;;  %v1023_v45 = vsel %vm1011_vm12, %v1001_v0, %v1004_v6 }
 0x172   :  { %v1016_v56 = vsel %vm1014_vm15, %v1004_v6, 2102212464  ;;  %v1020_v30 = vsel %vm1014_vm15, %v1007_v53, 920167782  ;;  %v1024_v1 = vsel %vm1014_vm15, %v1010_v21, 1326507024  ;;  %v995_v62 = vshrl.u32 %v11868_v4, %v8691_v57 }
 0x173   :  { %vm1012_vm0 = vcmp.lt.s32.totalorder %v8719_v46, 2  ;;  %v1021_v8 = vsel %vm1013_vm14, %v1004_v6, %v1020_v30  ;;  %v1025_v43 = vsel %vm1013_vm14, %v1007_v53, %v1024_v1  ;;  %v939_v54 = vshll.u32 %v8759_v22, 30 }
 0x174   :  { %v1022_v38 = vsel %vm1012_vm0, %v1019_v52, %v1021_v8  ;;  %v1026_v5 = vsel %vm1012_vm0, %v1023_v45, %v1025_v43  ;;  %v7560_v21 = vadd.s32 4294967169, %v1086_v15  ;;  %v1015_v57 = vsel %vm1011_vm12, %v995_v62, %v998_v37 }
 0x175   :  { %v1017_v34 = vsel %vm1013_vm14, %v1001_v0, %v1016_v56  ;;  %v8786_v10 = vmul.u32.u64.low %v1027_v58, %v1026_v5  ;;  %v8787_v16 = vmul.u32.u64.high %v1027_v58, %v1026_v5, %v8786_v10  ;;  %8024 = vcosq.f32 %v552_v7 }
 0x176   :  { %vm775_vm1 = vcmp.lt.s32.totalorder %v8262_v40, 0  ;;  %v8790_v53 = vmul.u32.u64.low %v1027_v58, %v1022_v38  ;;  %v8791_v6 = vmul.u32.u64.high %v1027_v58, %v1022_v38, %v8790_v53  ;;  %8026 = vsinq.f32 %v552_v7 }
 0x177   :  { %v8797_v18 = vsel %vm569_vm9, %v653_v24, %v8469_v33  ;;  %v844_v37 = vsel %vm7551_vm13, 0, %v7550_v28  ;;  %v1092_v15 = vadd.s32 1, %v7560_v21  ;;  %v655_v0 = vsel %vm8740_vm7, %v8257_v31, %v652_v23 }
 0x178   :  { %11884 = vst [vmem:[#allocation30_spill] sm:$0xff] %v8797_v18  ;;  %v759_v52 = vsel %vm8748_vm11, 0, %v757_v36  ;;  %v8806_v56 = vsub.s32 %v8708_v51, %v939_v54  ;;  %v1018_v7 = vsel %vm1012_vm0, %v1015_v57, %v1017_v34  ;;  %v754_v30 = vxor.u32 2147483648, %v8752_v35  ;;  %v8833_v57 = vpop.f32.mrb[15].mxu0 }
 0x179   :  { %v859_v33 = vsub.s32 4, %v8622_v63  ;;  %vm1036_vm3 = vc.u32 %v8787_v16, %v8790_v53  ;;  %vm1093_vm4 = vcmp.gt.s32.totalorder %v1092_v15, 0  ;;  %v849_v28 = vsub.s32 4294967266, %v844_v37  ;;  %11890 = vst [vmem:[#allocation33_spill] sm:$0xff] %v8833_v57 }
 0x17a   :  { %v1037_v24 = vadd.s32 1, %v8791_v6  ;;  %v11713_v23 = vand.u32 2147483647, %v8287_v13  ;;  %v1094_v36 = vsel %vm1093_vm4, %v1092_v15, 0  ;;  %v8816_v45 = vand.u32 3, %v759_v52 }
 0x17b   :  { %v8818_v51 = vadd.s32 3, %v759_v52  ;;  %v845_v46 = vsub.s32 32, %v844_v37  ;;  %v1034_v1 = vmul.u32 %v1027_v58, %v1018_v7  ;;  %8028 = vcosq.f32 %v655_v0 }
 0x17c   :  { %11885 = vst [vmem:[#allocation31_spill] sm:$0xff] %v8816_v45  ;;  %v11887_v62 = vand.u32 2147483647, %v8262_v40  ;;  %v942_v43 = vsub.s32 0, %v8806_v56  ;;  %v1038_v54 = vsel %vm1036_vm3, %v1037_v24, %v8791_v6  ;;  %v1096_v38 = vand.u32 31, %v1094_v36 }
 0x17d   :  { %11886 = vst [vmem:[#allocation32_spill] sm:$0xff] %v8818_v51  ;;  %8030 = vsinq.f32 %v655_v0  ;;  %v829_v5 = vadd.s32 %v8561_v11, %v8572_v27  ;;  %v860_v58 = vsel %vm775_vm1, %v859_v33, %v8622_v63  ;;  %v1039_v21 = vadd.s32 %v1038_v54, %v1034_v1 }
 0x17e   :  { %vm8822_vm5 = vcmp.le.f32.partialorder %v11887_v62, 0.7853982  ;;  %v8838_v34 = vsel %vm672_vm10, %v754_v30, %v8752_v35  ;;  %v850_v10 = vadd.s32 127, %v849_v28  ;;  %v1089_v6 = vand.u32 8388607, %v11713_v23 }
 0x17f   :  { %v1097_v15 = vsub.s32 32, %v1096_v38  ;;  %v846_v0 = vshll.u32 %v8654_v19, %v844_v37  ;;  %v847_v11 = vshrl.u32 %v829_v5, %v845_v46  ;;  %v1040_v27 = vadd.s32 536870912, %v1039_v21  ;;  %v8844_v63 = vpop.eup %8024 }
 0x180   :  { %v1188_v52 = vand.u32 2139095040, %v8356_v50  ;;  %11891 = vst [vmem:[#allocation34_spill] sm:$0xff] %v8844_v63  ;;  %v7553_v7 = vmin.u32 %v942_v43, %v8806_v56  ;;  %v8850_v28 = vpop.eup %8026  ;;  %v1099_v19 = vshll.u32 %v11868_v4, %v1096_v38  ;;  %v1102_v37 = vshll.u32 %v11873_v14, %v1096_v38 }
 0x181   :  { %v1100_v33 = vshrl.u32 %v11873_v14, %v1097_v15  ;;  %v1103_v35 = vshrl.u32 %v11855_v2, %v1097_v15  ;;  %v1106_v30 = vshrl.u32 %v11856_v42, %v1097_v15  ;;  %11892 = vst [vmem:[#allocation35_spill] sm:$0xff] %v8850_v28  ;;  %v8852_v24 = vshrl.u32 %v1040_v27, 30 }
 0x182   :  { %v1109_v46 = vshrl.u32 %v11859_v3, %v1097_v15  ;;  %v851_v1 = vshll.u32 %v850_v10, 23  ;;  %v1095_v62 = vshrl.u32 %v1094_v36, 5  ;;  %v1105_v43 = vshll.u32 %v11855_v2, %v1096_v38 }
 0x183   :  { %v1108_v54 = vshll.u32 %v11856_v42, %v1096_v38  ;;  %v1042_v5 = vshll.u32 %v8852_v24, 30  ;;  %v1101_v23 = vor.u32 %v1100_v33, %v1099_v19  ;;  %v1104_v45 = vor.u32 %v1103_v35, %v1102_v37 }
 0x184   :  { %v1189_v51 = vshrl.u32 %v1188_v52, 23  ;;  %v1107_v63 = vor.u32 %v1106_v30, %v1105_v43  ;;  %v1111_v28 = vshll.u32 %v11859_v3, %v1096_v38  ;;  %v1112_v29 = vshrl.u32 %v11874_v60, %v1097_v15 }
 0x185   :  { %v1110_v27 = vor.u32 %v1109_v46, %v1108_v54  ;;  %v848_v31 = vor.u32 %v847_v11, %v846_v0  ;;  %v862_v10 = vsel %vm8822_vm5, 0, %v860_v58  ;;  %v944_v36 = vclz %v7553_v7  ;;  %v8866_v18 = vpop.eup %8028 }
 0x186   :  { %v8864_v44 = vsub.s32 %v1039_v21, %v1042_v5  ;;  %11893 = vst [vmem:[#allocation36_spill] sm:$0xff] %v8866_v18  ;;  %v852_v20 = vor.u32 4788187, %v851_v1  ;;  %vm878_vm6 = vcmp.lt.s32.totalorder %v8270_v49, 0  ;;  %v1090_v33 = vor.u32 8388608, %v1089_v6 }
 0x187   :  { %v1113_v52 = vor.u32 %v1112_v29, %v1111_v28  ;;  %vm1114_vm8 = vcmp.lt.s32.totalorder %v1095_v62, 1  ;;  %v8869_v35 = vpop.eup %8030  ;;  %vm1117_vm9 = vcmp.lt.s32.totalorder %v1095_v62, 4  ;;  %v7564_v11 = vadd.s32 4294967169, %v1189_v51 }
 0x188   :  { %11894 = vst [vmem:[#allocation37_spill] sm:$0xff] %v8869_v35  ;;  %v1045_v38 = vsub.s32 0, %v8864_v44  ;;  %v1122_v0 = vsel %vm1114_vm8, %v1101_v23, %v1104_v45  ;;  %vm1116_vm10 = vcmp.lt.s32.totalorder %v1095_v62, 3  ;;  %v1123_v58 = vsel %vm1117_vm9, %v1110_v27, 920167782 }
 0x189   :  { %v1126_v21 = vsel %vm1114_vm8, %v1104_v45, %v1107_v63  ;;  %v1127_v7 = vsel %vm1117_vm9, %v1113_v52, 1326507024  ;;  %v11895_v30 = vand.u32 2147483647, %v8270_v49  ;;  %v7554_v29 = vadd.s32 4294967294, %v944_v36 }
 0x18a   :  { %vm1115_vm13 = vcmp.lt.s32.totalorder %v1095_v62, 2  ;;  %v1119_v6 = vsel %vm1117_vm9, %v1107_v63, 2102212464  ;;  %v1124_v28 = vsel %vm1116_vm10, %v1107_v63, %v1123_v58  ;;  %v1098_v37 = vshrl.u32 %v11868_v4, %v1097_v15 }
 0x18b   :  { %vm8876_vm12 = vcmp.le.f32.partialorder %v11895_v30, 0.7853982  ;;  %v1125_v51 = vsel %vm1115_vm13, %v1122_v0, %v1124_v28  ;;  %v1128_v46 = vsel %vm1116_vm10, %v1110_v27, %v1127_v7  ;;  %v1130_v1 = vshll.u32 %v1090_v33, 8 }
 0x18c   :  { %v962_v43 = vsub.s32 4, %v8759_v22  ;;  %v7557_v54 = vmin.u32 %v1045_v38, %v8864_v44  ;;  %v1129_v5 = vsel %vm1115_vm13, %v1126_v21, %v1128_v46  ;;  %v1195_v52 = vadd.s32 1, %v7564_v11  ;;  %v8927_v46 = vpop.f32.mrb[16].mxu0 }
 0x18d   :  { %v1118_v36 = vsel %vm1114_vm8, %v1098_v37, %v1101_v23  ;;  %v1120_v30 = vsel %vm1116_vm10, %v1104_v45, %v1119_v6  ;;  %v8889_v18 = vmul.u32.u64.low %v1130_v1, %v1129_v5  ;;  %v8890_v63 = vmul.u32.u64.high %v1130_v1, %v1129_v5, %v8889_v18  ;;  %11900 = vst [vmem:[#allocation40_spill] sm:$0xff] %v8927_v46 }
 0x18e   :  { %vm7555_vm14 = vcmp.lt.s32.totalorder %v7554_v29, 0  ;;  %v8892_v15 = vmul.u32.u64.low %v1130_v1, %v1125_v51  ;;  %v8893_v0 = vmul.u32.u64.high %v1130_v1, %v1125_v51, %v8892_v15  ;;  %vm1196_vm15 = vcmp.gt.s32.totalorder %v1195_v52, 0 }
 0x18f   :  { %v8900_v27 = vsel %vm8748_vm11, %v8260_v39, %v8838_v34  ;;  %v853_v33 = vand.u32 2147483647, %v852_v20  ;;  %v11724_v23 = vand.u32 2147483647, %v8356_v50  ;;  %v1197_v38 = vsel %vm1196_vm15, %v1195_v52, 0 }
 0x190   :  { %v963_v18 = vsel %vm878_vm6, %v962_v43, %v8759_v22  ;;  %v1047_v45 = vclz %v7557_v54  ;;  %v1121_v11 = vsel %vm1115_vm13, %v1118_v36, %v1120_v30  ;;  %v1199_v58 = vand.u32 31, %v1197_v38 }
 0x191   :  { %v855_v21 = vcvt.s32.f32 %v848_v31  ;;  %v8907_v7 = vand.u32 3, %v862_v10  ;;  %v8909_v6 = vsel %vm7555_vm14, 0, %v7554_v29  ;;  %vm1139_vm11 = vc.u32 %v8890_v63, %v8892_v15 }
 0x192   :  { %8032 = vcosq.f32 %v8900_v27  ;;  %v8914_v12 = vadd.s32 3, %v862_v10  ;;  %v932_v20 = vadd.s32 %v8663_v59, %v8674_v32  ;;  %v1140_v22 = vadd.s32 1, %v8893_v0 }
 0x193   :  { %11898 = vst [vmem:[#allocation38_spill] sm:$0xff] %v8907_v7  ;;  %v856_v34 = vmul.f32 %v855_v21, %v853_v33  ;;  %v8921_v31 = vsel %vm8876_vm12, 0, %v963_v18  ;;  %v1137_v62 = vmul.u32 %v1130_v1, %v1121_v11  ;;  %v1200_v29 = vsub.s32 32, %v1199_v58 }
 0x194   :  { %11899 = vst [vmem:[#allocation39_spill] sm:$0xff] %v8914_v12  ;;  %v952_v28 = vsub.s32 4294967266, %v8909_v6  ;;  %v7558_v37 = vadd.s32 4294967294, %v1047_v45  ;;  %v1141_v51 = vsel %vm1139_vm11, %v1140_v22, %v8893_v0  ;;  %v1192_v10 = vand.u32 8388607, %v11724_v23 }
 0x195   :  { %v1142_v59 = vadd.s32 %v1141_v51, %v1137_v62  ;;  %v1202_v32 = vshll.u32 %v11868_v4, %v1199_v58  ;;  %v1203_v43 = vshrl.u32 %v11873_v14, %v1200_v29  ;;  %v1206_v54 = vshrl.u32 %v11855_v2, %v1200_v29 }
 0x196   :  { %v1205_v1 = vshll.u32 %v11873_v14, %v1199_v58  ;;  %v1209_v5 = vshrl.u32 %v11856_v42, %v1200_v29  ;;  %v1211_v52 = vshll.u32 %v11856_v42, %v1199_v58  ;;  %v1212_v36 = vshrl.u32 %v11859_v3, %v1200_v29 }
 0x197   :  { %v857_v30 = vxor.u32 2147483648, %v856_v34  ;;  %v1143_v0 = vadd.s32 536870912, %v1142_v59  ;;  %v1198_v33 = vshrl.u32 %v1197_v38, 5  ;;  %v1208_v18 = vshll.u32 %v11855_v2, %v1199_v58 }
 0x198   :  { %v948_v45 = vsub.s32 32, %v8909_v6  ;;  %v1204_v11 = vor.u32 %v1203_v43, %v1202_v32  ;;  %v1207_v21 = vor.u32 %v1206_v54, %v1205_v1  ;;  %v1213_v22 = vor.u32 %v1212_v36, %v1211_v52 }
 0x199   :  { %v8938_v62 = vshrl.u32 %v1143_v0, 30  ;;  %v1210_v51 = vor.u32 %v1209_v5, %v1208_v18  ;;  %v1214_v23 = vshll.u32 %v11859_v3, %v1199_v58  ;;  %v1215_v39 = vshrl.u32 %v11874_v60, %v1200_v29 }
 0x19a   :  { %v953_v7 = vadd.s32 127, %v952_v28  ;;  %vm7559_vm0 = vcmp.lt.s32.totalorder %v7558_v37, 0  ;;  %v1193_v12 = vor.u32 8388608, %v1192_v10  ;;  %v1291_v35 = vand.u32 2139095040, %v8396_v9 }
 0x19b   :  { %v1145_v38 = vshll.u32 %v8938_v62, 30  ;;  %v1216_v47 = vor.u32 %v1215_v39, %v1214_v23  ;;  %vm1217_vm3 = vcmp.lt.s32.totalorder %v1198_v33, 1  ;;  %vm1220_vm4 = vcmp.lt.s32.totalorder %v1198_v33, 4 }
 0x19c   :  { %v8944_v32 = vpop.eup %8032  ;;  %v1201_v43 = vshrl.u32 %v11868_v4, %v1200_v29  ;;  %vm1219_vm8 = vcmp.lt.s32.totalorder %v1198_v33, 3  ;;  %v1225_v54 = vsel %vm1217_vm3, %v1204_v11, %v1207_v21  ;;  %v1226_v58 = vsel %vm1220_vm4, %v1213_v22, 920167782 }
 0x19d   :  { %11901 = vst [vmem:[#allocation41_spill] sm:$0xff] %v8944_v32  ;;  %v8949_v1 = vsub.s32 %v1142_v59, %v1145_v38  ;;  %vm1218_vm9 = vcmp.lt.s32.totalorder %v1198_v33, 2  ;;  %v1222_v28 = vsel %vm1220_vm4, %v1210_v51, 2102212464  ;;  %v1227_v10 = vsel %vm1219_vm8, %v1210_v51, %v1226_v58 }
 0x19e   :  { %v1228_v39 = vsel %vm1218_vm9, %v1225_v54, %v1227_v10  ;;  %v1229_v23 = vsel %vm1217_vm3, %v1207_v21, %v1210_v51  ;;  %v1233_v5 = vshll.u32 %v1193_v12, 8  ;;  %v1292_v52 = vshrl.u32 %v1291_v35, 23 }
 0x19f   :  { %v8956_v29 = vsel %vm7559_vm0, 0, %v7558_v37  ;;  %v1148_v36 = vsub.s32 0, %v8949_v1  ;;  %v1221_v0 = vsel %vm1217_vm3, %v1201_v43, %v1204_v11  ;;  %v1230_v59 = vsel %vm1220_vm4, %v1216_v47, 1326507024 }
 0x1a0   :  { %v1223_v18 = vsel %vm1219_vm8, %v1207_v21, %v1222_v28  ;;  %v1231_v38 = vsel %vm1219_vm8, %v1213_v22, %v1230_v59  ;;  %v8963_v58 = vmul.u32.u64.low %v1233_v5, %v1228_v39  ;;  %v8964_v32 = vmul.u32.u64.high %v1233_v5, %v1228_v39, %v8963_v58 }
 0x1a1   :  { %v950_v51 = vshrl.u32 %v932_v20, %v948_v45  ;;  %v954_v12 = vshll.u32 %v953_v7, 23  ;;  %v7561_v35 = vmin.u32 %v1148_v36, %v8949_v1  ;;  %v1232_v37 = vsel %vm1218_vm9, %v1229_v23, %v1231_v38 }
 0x1a2   :  { %v858_v54 = vsel %vm775_vm1, %v857_v30, %v856_v34  ;;  %v8971_v11 = vmul.u32.u64.low %v1233_v5, %v1232_v37  ;;  %v8972_v43 = vmul.u32.u64.high %v1233_v5, %v1232_v37, %v8971_v11  ;;  %v7568_v47 = vadd.s32 4294967169, %v1292_v52 }
 0x1a3   :  { %v949_v21 = vshll.u32 %v8806_v56, %v8909_v6  ;;  %v1055_v22 = vsub.s32 4294967266, %v8956_v29  ;;  %v1150_v28 = vclz %v7561_v35  ;;  %v1224_v20 = vsel %vm1218_vm9, %v1221_v0, %v1223_v18 }
 0x1a4   :  { %8034 = vsinq.f32 %v8900_v27  ;;  %v8980_v7 = vand.u32 3, %v8921_v31  ;;  %v1243_v45 = vadd.s32 1, %v8964_v32  ;;  %v1298_v34 = vadd.s32 1, %v7568_v47  ;;  %v7976_v47 = vld [vmem:[%s11684_s3 + $0x14] ss:$8 sps:$4 sm:$0xff]  }
 0x1a5   :  { %v8986_v30 = vsel %vm8822_vm5, %v8262_v40, %v858_v54  ;;  %v951_v10 = vor.u32 %v950_v51, %v949_v21  ;;  %v955_v56 = vor.u32 4788187, %v954_v12  ;;  %v11731_v6 = vand.u32 2147483647, %v8396_v9  ;;  %v7974_v21 = vld [vmem:[%s11684_s3 + $0x10] ss:$8 sps:$4 sm:$0xff]   ;;  %7318 = vmatprep.subr.bf16.mxu0 %v7976_v47 }
 0x1a6   :  { %11902 = vst [vmem:[#allocation42_spill] sm:$0xff] %v8980_v7  ;;  %v1051_v33 = vsub.s32 32, %v8956_v29  ;;  %v1240_v39 = vmul.u32 %v1233_v5, %v1224_v20  ;;  %vm1242_vm1 = vc.u32 %v8972_v43, %v8963_v58  ;;  %vm1299_vm10 = vcmp.gt.s32.totalorder %v1298_v34, 0  ;;  %7319 = vmatpush1.bf16.xpose.msra.mxu0 %v7974_v21 }
 0x1a7   :  { %v1056_v27 = vadd.s32 127, %v1055_v22  ;;  %v7562_v23 = vadd.s32 4294967294, %v1150_v28  ;;  %v1244_v52 = vsel %vm1242_vm1, %v1243_v45, %v8964_v32  ;;  %v1300_v36 = vsel %vm1299_vm10, %v1298_v34, 0  ;;  %v9020_v34 = vpop.f32.mrb[17].mxu0 }
 0x1a8   :  { %8036 = vcosq.f32 %v8986_v30  ;;  %v8995_v8 = vadd.s32 3, %v8921_v31  ;;  %v1245_v0 = vadd.s32 %v1244_v52, %v1240_v39  ;;  %v1302_v59 = vand.u32 31, %v1300_v36 }
 0x1a9   :  { %v956_v18 = vand.u32 2147483647, %v955_v56  ;;  %v958_v38 = vcvt.s32.f32 %v951_v10  ;;  %v1035_v5 = vadd.s32 %v8790_v53, %v8787_v16  ;;  %v1052_v12 = vshll.u32 %v8864_v44, %v8956_v29 }
 0x1aa   :  { %11903 = vst [vmem:[#allocation43_spill] sm:$0xff] %v8995_v8  ;;  %v1246_v35 = vadd.s32 536870912, %v1245_v0  ;;  %v1295_v32 = vand.u32 8388607, %v11731_v6  ;;  %v1303_v37 = vsub.s32 32, %v1302_v59  ;;  %v1057_v31 = vshll.u32 %v1056_v27, 23 }
 0x1ab   :  { %v1053_v54 = vshrl.u32 %v1035_v5, %v1051_v33  ;;  %vm7563_vm5 = vcmp.lt.s32.totalorder %v7562_v23, 0  ;;  %v1394_v11 = vand.u32 2139095040, %v8450_v26  ;;  %v1305_v53 = vshll.u32 %v11868_v4, %v1302_v59 }
 0x1ac   :  { %v9008_v16 = vshrl.u32 %v1246_v35, 30  ;;  %v1306_v44 = vshrl.u32 %v11873_v14, %v1303_v37  ;;  %v1309_v29 = vshrl.u32 %v11855_v2, %v1303_v37  ;;  %v1308_v22 = vshll.u32 %v11873_v14, %v1302_v59 }
 0x1ad   :  { %v1311_v28 = vshll.u32 %v11855_v2, %v1302_v59  ;;  %v1312_v20 = vshrl.u32 %v11856_v42, %v1303_v37  ;;  %v1315_v45 = vshrl.u32 %v11859_v3, %v1303_v37  ;;  %v9024_v56 = vsel %vm7563_vm5, 0, %v7562_v23 }
 0x1ae   :  { %v9022_v10 = vpop.eup %8034  ;;  %v1248_v33 = vshll.u32 %v9008_v16, 30  ;;  %v1296_v39 = vor.u32 8388608, %v1295_v32  ;;  %v1314_v27 = vshll.u32 %v11856_v42, %v1302_v59  ;;  %v1301_v52 = vshrl.u32 %v1300_v36, 5 }
 0x1af   :  { %11904 = vst [vmem:[#allocation44_spill] sm:$0xff] %v9022_v10  ;;  %v1307_v5 = vor.u32 %v1306_v44, %v1305_v53  ;;  %v1310_v35 = vor.u32 %v1309_v29, %v1308_v22  ;;  %v1313_v6 = vor.u32 %v1312_v20, %v1311_v28  ;;  %v1317_v47 = vshll.u32 %v11859_v3, %v1302_v59 }
 0x1b0   :  { %v9028_v51 = vsub.s32 %v1245_v0, %v1248_v33  ;;  %v1316_v7 = vor.u32 %v1315_v45, %v1314_v27  ;;  %v1318_v8 = vshrl.u32 %v11874_v60, %v1303_v37  ;;  %v9032_v10 = vmul.f32 %v958_v38, %v956_v18 }
 0x1b1   :  { %vm981_vm13 = vcmp.lt.s32.totalorder %v8275_v55, 0  ;;  %v1054_v23 = vor.u32 %v1053_v54, %v1052_v12  ;;  %v1058_v32 = vor.u32 4788187, %v1057_v31  ;;  %v1395_v40 = vshrl.u32 %v1394_v11, 23 }
 0x1b2   :  { %v9035_v25 = vpop.eup %8036  ;;  %v1158_v36 = vsub.s32 4294967266, %v9024_v56  ;;  %v1251_v53 = vsub.s32 0, %v9028_v51  ;;  %v1319_v0 = vor.u32 %v1318_v8, %v1317_v47  ;;  %v1336_v44 = vshll.u32 %v1296_v39, 8 }
 0x1b3   :  { %v1304_v29 = vshrl.u32 %v11868_v4, %v1303_v37  ;;  %vm1320_vm14 = vcmp.lt.s32.totalorder %v1301_v52, 1  ;;  %vm1322_vm15 = vcmp.lt.s32.totalorder %v1301_v52, 3  ;;  %vm1323_vm11 = vcmp.lt.s32.totalorder %v1301_v52, 4 }
 0x1b4   :  { %v7565_v59 = vmin.u32 %v1251_v53, %v9028_v51  ;;  %v1325_v18 = vsel %vm1323_vm11, %v1313_v6, 2102212464  ;;  %v1328_v38 = vsel %vm1320_vm14, %v1307_v5, %v1310_v35  ;;  %v1329_v12 = vsel %vm1323_vm11, %v1316_v7, 920167782 }
 0x1b5   :  { %v11905_v54 = vand.u32 2147483647, %v8275_v55  ;;  %vm1321_vm3 = vcmp.lt.s32.totalorder %v1301_v52, 2  ;;  %v1330_v8 = vsel %vm1322_vm15, %v1313_v6, %v1329_v12  ;;  %v1332_v11 = vsel %vm1320_vm14, %v1310_v35, %v1313_v6 }
 0x1b6   :  { %v7572_v21 = vadd.s32 4294967169, %v1395_v40  ;;  %v1253_v37 = vclz %v7565_v59  ;;  %v1324_v22 = vsel %vm1320_vm14, %v1304_v29, %v1307_v5  ;;  %v1331_v28 = vsel %vm1321_vm3, %v1328_v38, %v1330_v8 }
 0x1b7   :  { %vm9043_vm0 = vcmp.le.f32.partialorder %v11905_v54, 0.7853982  ;;  %v1333_v20 = vsel %vm1323_vm11, %v1319_v0, 1326507024  ;;  %v1326_v45 = vsel %vm1322_vm15, %v1310_v35, %v1325_v18  ;;  %v1059_v47 = vand.u32 2147483647, %v1058_v32 }
 0x1b8   :  { %v1334_v33 = vsel %vm1322_vm15, %v1316_v7, %v1333_v20  ;;  %v9051_v39 = vmul.u32.u64.low %v1336_v44, %v1331_v28  ;;  %v9052_v27 = vmul.u32.u64.high %v1336_v44, %v1331_v28, %v9051_v39  ;;  %v7566_v53 = vadd.s32 4294967294, %v1253_v37 }
 0x1b9   :  { %v1335_v54 = vsel %vm1321_vm3, %v1332_v11, %v1334_v33  ;;  %v11737_v6 = vand.u32 2147483647, %v8450_v26  ;;  %v1154_v40 = vsub.s32 32, %v9024_v56  ;;  %v1401_v0 = vadd.s32 1, %v7572_v21 }
 0x1ba   :  { %v9058_v5 = vmul.u32.u64.low %v1336_v44, %v1335_v54  ;;  %v9059_v29 = vmul.u32.u64.high %v1336_v44, %v1335_v54, %v9058_v5  ;;  %v1061_v59 = vcvt.s32.f32 %v1054_v23  ;;  %v11908_v7 = vsub.s32 4, %v8852_v24 }
 0x1bb   :  { %v1159_v18 = vadd.s32 127, %v1158_v36  ;;  %v1327_v32 = vsel %vm1321_vm3, %v1324_v22, %v1326_v45  ;;  %v960_v38 = vxor.u32 2147483648, %v9032_v10  ;;  %v1138_v12 = vadd.s32 %v8892_v15, %v8890_v63  ;;  %v7979_v15 = vld [vmem:[%s11684_s3 + $0x90] ss:$8 sps:$4 sm:$0xff]  }
 0x1bc   :  { %v1066_v35 = vsel %vm981_vm13, %v11908_v7, %v8852_v24  ;;  %v1346_v8 = vadd.s32 1, %v9052_v27  ;;  %vm1402_vm4 = vcmp.gt.s32.totalorder %v1401_v0, 0  ;;  %v1062_v11 = vmul.f32 %v1061_v59, %v1059_v47  ;;  %v7977_v24 = vld [vmem:[%s11684_s3 + $0x94] ss:$8 sps:$4 sm:$0xff]  }
 0x1bd   :  { %vm7567_vm8 = vcmp.lt.s32.totalorder %v7566_v53, 0  ;;  %v1398_v23 = vand.u32 8388607, %v11737_v6  ;;  %v1403_v21 = vsel %vm1402_vm4, %v1401_v0, 0  ;;  %vm1084_vm9 = vcmp.lt.s32.totalorder %v8287_v13, 0  ;;  %7141 = vmatprep.subr.bf16.mxu1 %v7977_v24 }
 0x1be   :  { %v1156_v52 = vshrl.u32 %v1138_v12, %v1154_v40  ;;  %v1343_v36 = vmul.u32 %v1336_v44, %v1327_v32  ;;  %vm1345_vm1 = vc.u32 %v9059_v29, %v9051_v39  ;;  %v1405_v63 = vand.u32 31, %v1403_v21  ;;  %7142 = vmatpush1.bf16.xpose.msra.mxu1 %v7979_v15 }
 0x1bf   :  { %8038 = vsinq.f32 %v8986_v30  ;;  %v9085_v37 = vsel %vm9043_vm0, 0, %v1066_v35  ;;  %v1160_v22 = vshll.u32 %v1159_v18, 23  ;;  %v1347_v28 = vsel %vm1345_vm1, %v1346_v8, %v9052_v27 }
 0x1c0   :  { %v1155_v44 = vshll.u32 %v8949_v1, %v9024_v56  ;;  %v9091_v20 = vsel %vm7567_vm8, 0, %v7566_v53  ;;  %v1348_v45 = vadd.s32 %v1347_v28, %v1343_v36  ;;  %v1406_v33 = vsub.s32 32, %v1405_v63  ;;  %v9099_v56 = vpop.f32.mrb[18].mxu0 }
 0x1c1   :  { %v961_v30 = vsel %vm878_vm6, %v960_v38, %v9032_v10  ;;  %v1063_v47 = vxor.u32 2147483648, %v1062_v11  ;;  %v1168_v54 = vsub.s32 4, %v8938_v62  ;;  %v1399_v40 = vor.u32 8388608, %v1398_v23  ;;  %11909 = vst [vmem:[#allocation45_spill] sm:$0xff] %v9099_v56 }
 0x1c2   :  { %v1157_v5 = vor.u32 %v1156_v52, %v1155_v44  ;;  %v1349_v27 = vadd.s32 536870912, %v1348_v45  ;;  %v1409_v0 = vshrl.u32 %v11873_v14, %v1406_v33  ;;  %v1412_v1 = vshrl.u32 %v11855_v2, %v1406_v33 }
 0x1c3   :  { %v1161_v53 = vor.u32 4788187, %v1160_v22  ;;  %v1261_v59 = vsub.s32 4294967266, %v9091_v20  ;;  %v1415_v7 = vshrl.u32 %v11856_v42, %v1406_v33  ;;  %v1418_v35 = vshrl.u32 %v11859_v3, %v1406_v33 }
 0x1c4   :  { %v9104_v10 = vshrl.u32 %v1349_v27, 30  ;;  %v1404_v18 = vshrl.u32 %v1403_v21, 5  ;;  %v1408_v32 = vshll.u32 %v11868_v4, %v1405_v63  ;;  %v1411_v38 = vshll.u32 %v11873_v14, %v1405_v63 }
 0x1c5   :  { %v1414_v12 = vshll.u32 %v11855_v2, %v1405_v63  ;;  %v1417_v8 = vshll.u32 %v11856_v42, %v1405_v63  ;;  %v1420_v23 = vshll.u32 %v11859_v3, %v1405_v63  ;;  %v1421_v24 = vshrl.u32 %v11874_v60, %v1406_v33 }
 0x1c6   :  { %v9115_v52 = vsel %vm8876_vm12, %v8270_v49, %v961_v30  ;;  %v1351_v36 = vshll.u32 %v9104_v10, 30  ;;  %v1410_v21 = vor.u32 %v1409_v0, %v1408_v32  ;;  %v1413_v15 = vor.u32 %v1412_v1, %v1411_v38 }
 0x1c7   :  { %v1169_v22 = vsel %vm1084_vm9, %v1168_v54, %v8938_v62  ;;  %v1416_v28 = vor.u32 %v1415_v7, %v1414_v12  ;;  %v1419_v44 = vor.u32 %v1418_v35, %v1417_v8  ;;  %v1422_v27 = vor.u32 %v1421_v24, %v1420_v23 }
 0x1c8   :  { %v1064_v63 = vsel %vm981_vm13, %v1063_v47, %v1062_v11  ;;  %v11910_v6 = vand.u32 2147483647, %v8287_v13  ;;  %v1164_v30 = vcvt.s32.f32 %v1157_v5  ;;  %v1271_v0 = vsub.s32 4, %v9008_v16 }
 0x1c9   :  { %v9130_v1 = vsub.s32 %v1348_v45, %v1351_v36  ;;  %v9132_v32 = vpop.eup %8038  ;;  %v1162_v62 = vand.u32 2147483647, %v1161_v53  ;;  %vm1187_vm12 = vcmp.lt.s32.totalorder %v8356_v50, 0  ;;  %v1262_v54 = vadd.s32 127, %v1261_v59 }
 0x1ca   :  { %vm9125_vm6 = vcmp.le.f32.partialorder %v11910_v6, 0.7853982  ;;  %vm1423_vm10 = vcmp.lt.s32.totalorder %v1404_v18, 1  ;;  %v1439_v7 = vshll.u32 %v1399_v40, 8  ;;  %v1407_v11 = vshrl.u32 %v11868_v4, %v1406_v33 }
 0x1cb   :  { %vm1425_vm5 = vcmp.lt.s32.totalorder %v1404_v18, 3  ;;  %vm1426_vm13 = vcmp.lt.s32.totalorder %v1404_v18, 4  ;;  %v1431_v6 = vsel %vm1423_vm10, %v1410_v21, %v1413_v15  ;;  %v1435_v35 = vsel %vm1423_vm10, %v1413_v15, %v1416_v28 }
 0x1cc   :  { %v1428_v47 = vsel %vm1426_vm13, %v1416_v28, 2102212464  ;;  %v1432_v5 = vsel %vm1426_vm13, %v1419_v44, 920167782  ;;  %v1436_v45 = vsel %vm1426_vm13, %v1422_v27, 1326507024  ;;  %v1165_v12 = vmul.f32 %v1164_v30, %v1162_v62 }
 0x1cd   :  { %v1354_v38 = vsub.s32 0, %v9130_v1  ;;  %vm1424_vm14 = vcmp.lt.s32.totalorder %v1404_v18, 2  ;;  %v1433_v53 = vsel %vm1425_vm5, %v1416_v28, %v1432_v5  ;;  %v1437_v59 = vsel %vm1425_vm5, %v1419_v44, %v1436_v45 }
 0x1ce   :  { %v11913_v40 = vand.u32 2147483647, %v8356_v50  ;;  %v1257_v8 = vsub.s32 32, %v9091_v20  ;;  %v1434_v23 = vsel %vm1424_vm14, %v1431_v6, %v1433_v53  ;;  %v1438_v24 = vsel %vm1424_vm14, %v1435_v35, %v1437_v59 }
 0x1cf   :  { %v1427_v36 = vsel %vm1423_vm10, %v1407_v11, %v1410_v21  ;;  %v1429_v27 = vsel %vm1425_vm5, %v1413_v15, %v1428_v47  ;;  %v9152_v28 = vmul.u32.u64.low %v1439_v7, %v1438_v24  ;;  %v9153_v5 = vmul.u32.u64.high %v1439_v7, %v1438_v24, %v9152_v28 }
 0x1d0   :  { %vm9143_vm15 = vcmp.le.f32.partialorder %v11913_v40, 0.7853982  ;;  %v1263_v44 = vshll.u32 %v1262_v54, 23  ;;  %v9155_v30 = vmul.u32.u64.low %v1439_v7, %v1434_v23  ;;  %v9156_v62 = vmul.u32.u64.high %v1439_v7, %v1434_v23, %v9155_v30 }
 0x1d1   :  { %v1497_v45 = vand.u32 2139095040, %v8518_v17  ;;  %v9161_v40 = vand.u32 3, %v9085_v37  ;;  %v9164_v6 = vadd.s32 3, %v9085_v37  ;;  %v1241_v21 = vadd.s32 %v8963_v58, %v8972_v43 }
 0x1d2   :  { %v7569_v15 = vmin.u32 %v1354_v38, %v9130_v1  ;;  %8040 = vcosq.f32 %v9115_v52  ;;  %v1171_v54 = vsel %vm9125_vm6, 0, %v1169_v22  ;;  %v1430_v11 = vsel %vm1424_vm14, %v1427_v36, %v1429_v27  ;;  %v9191_v27 = vpop.f32.mrb[19].mxu0 }
 0x1d3   :  { %11916 = vst [vmem:[#allocation46_spill] sm:$0xff] %v9161_v40  ;;  %11917 = vst [vmem:[#allocation47_spill] sm:$0xff] %v9164_v6  ;;  %v1498_v47 = vshrl.u32 %v1497_v45, 23  ;;  %v1067_v35 = vsel %vm9043_vm0, %v8275_v55, %v1064_v63  ;;  %v1259_v53 = vshrl.u32 %v1241_v21, %v1257_v8  ;;  %v1272_v37 = vsel %vm1187_vm12, %v1271_v0, %v9008_v16 }
 0x1d4   :  { %vm1448_vm11 = vc.u32 %v9153_v5, %v9155_v30  ;;  %v1166_v58 = vxor.u32 2147483648, %v1165_v12  ;;  %v1264_v43 = vor.u32 4788187, %v1263_v44  ;;  %v1449_v38 = vadd.s32 1, %v9156_v62  ;;  %11919 = vst [vmem:[#allocation49_spill] sm:$0xff] %v9191_v27 }
 0x1d5   :  { %v7576_v22 = vadd.s32 4294967169, %v1498_v47  ;;  %v1258_v18 = vshll.u32 %v9028_v51, %v9091_v20  ;;  %v1356_v59 = vclz %v7569_v15  ;;  %v1446_v23 = vmul.u32 %v1439_v7, %v1430_v11 }
 0x1d6   :  { %v11738_v31 = vand.u32 2147483647, %v8518_v17  ;;  %8042 = vsinq.f32 %v9115_v52  ;;  %v9186_v63 = vand.u32 3, %v1171_v54  ;;  %v1450_v16 = vsel %vm1448_vm11, %v1449_v38, %v9156_v62 }
 0x1d7   :  { %v1504_v0 = vadd.s32 1, %v7576_v22  ;;  %8044 = vcosq.f32 %v1067_v35  ;;  %v1260_v8 = vor.u32 %v1259_v53, %v1258_v18  ;;  %v1274_v24 = vsel %vm9143_vm15, 0, %v1272_v37 }
 0x1d8   :  { %11918 = vst [vmem:[#allocation48_spill] sm:$0xff] %v9186_v63  ;;  %v1451_v36 = vadd.s32 %v1450_v16, %v1446_v23  ;;  %v1167_v51 = vsel %vm1084_vm9, %v1166_v58, %v1165_v12  ;;  %v1265_v20 = vand.u32 2147483647, %v1264_v43  ;;  %v1600_v52 = vand.u32 2139095040, %v8620_v48 }
 0x1d9   :  { %vm1505_vm0 = vcmp.gt.s32.totalorder %v1504_v0, 0  ;;  %v7570_v7 = vadd.s32 4294967294, %v1356_v59  ;;  %v1501_v44 = vand.u32 8388607, %v11738_v31  ;;  %8046 = vsinq.f32 %v1067_v35 }
 0x1da   :  { %v1452_v28 = vadd.s32 536870912, %v1451_v36  ;;  %v1506_v62 = vsel %vm1505_vm0, %v1504_v0, 0  ;;  %v9198_v45 = vadd.s32 3, %v1171_v54  ;;  %v9200_v21 = vand.u32 3, %v1274_v24 }
 0x1db   :  { %v1508_v15 = vand.u32 31, %v1506_v62  ;;  %v9205_v12 = vsel %vm9125_vm6, %v8287_v13, %v1167_v51  ;;  %v1267_v11 = vcvt.s32.f32 %v1260_v8  ;;  %v9207_v47 = vadd.s32 3, %v1274_v24 }
 0x1dc   :  { %11920 = vst [vmem:[#allocation50_spill] sm:$0xff] %v9198_v45  ;;  %11921 = vst [vmem:[#allocation51_spill] sm:$0xff] %v9200_v21  ;;  %v9209_v53 = vshrl.u32 %v1452_v28, 30  ;;  %v9211_v37 = vpop.eup %8040  ;;  %v9215_v35 = vadd.s32 %v9051_v39, %v9059_v29  ;;  %v1601_v43 = vshrl.u32 %v1600_v52, 23  ;;  %vm7571_vm3 = vcmp.lt.s32.totalorder %v7570_v7, 0 }
 0x1dd   :  { %11922 = vst [vmem:[#allocation52_spill] sm:$0xff] %v9207_v47  ;;  %11923 = vst [vmem:[#allocation53_spill] sm:$0xff] %v9211_v37  ;;  %v1509_v58 = vsub.s32 32, %v1508_v15  ;;  %v9218_v38 = vmul.f32 %v1267_v11, %v1265_v20  ;;  %v1502_v22 = vor.u32 8388608, %v1501_v44  ;;  %v1511_v18 = vshll.u32 %v11868_v4, %v1508_v15 }
 0x1de   :  { %v1454_v19 = vshll.u32 %v9209_v53, 30  ;;  %v1514_v29 = vshll.u32 %v11873_v14, %v1508_v15  ;;  %v1517_v0 = vshll.u32 %v11855_v2, %v1508_v15  ;;  %v9232_v51 = vsel %vm7571_vm3, 0, %v7570_v7 }
 0x1df   :  { %v1512_v59 = vshrl.u32 %v11873_v14, %v1509_v58  ;;  %v1515_v23 = vshrl.u32 %v11855_v2, %v1509_v58  ;;  %v1518_v16 = vshrl.u32 %v11856_v42, %v1509_v58  ;;  %v1521_v8 = vshrl.u32 %v11859_v3, %v1509_v58 }
 0x1e0   :  { %v9225_v39 = vsub.s32 %v1451_v36, %v1454_v19  ;;  %v9230_v24 = vpop.eup %8042  ;;  %v1507_v20 = vshrl.u32 %v1506_v62, 5  ;;  %v1520_v52 = vshll.u32 %v11856_v42, %v1508_v15  ;;  %v7580_v28 = vadd.s32 4294967169, %v1601_v43 }
 0x1e1   :  { %11924 = vst [vmem:[#allocation54_spill] sm:$0xff] %v9230_v24  ;;  %v9235_v44 = vpop.eup %8044  ;;  %v1513_v36 = vor.u32 %v1512_v59, %v1511_v18  ;;  %v1516_v19 = vor.u32 %v1515_v23, %v1514_v29  ;;  %v1519_v31 = vor.u32 %v1518_v16, %v1517_v0  ;;  %v1269_v54 = vxor.u32 2147483648, %v9218_v38 }
 0x1e2   :  { %11925 = vst [vmem:[#allocation55_spill] sm:$0xff] %v9235_v44  ;;  %v1457_v11 = vsub.s32 0, %v9225_v39  ;;  %v1522_v63 = vor.u32 %v1521_v8, %v1520_v52  ;;  %v1523_v45 = vshll.u32 %v11859_v3, %v1508_v15  ;;  %v1524_v13 = vshrl.u32 %v11874_v60, %v1509_v58 }
 0x1e3   :  { %vm1290_vm4 = vcmp.lt.s32.totalorder %v8396_v9, 0  ;;  %v1360_v7 = vsub.s32 32, %v9232_v51  ;;  %v1542_v43 = vshll.u32 %v1502_v22, 8  ;;  %v9245_v47 = vpop.eup %8046  ;;  %vm1526_vm8 = vcmp.lt.s32.totalorder %v1507_v20, 1 }
 0x1e4   :  { %v7573_v62 = vmin.u32 %v1457_v11, %v9225_v39  ;;  %11926 = vst [vmem:[#allocation56_spill] sm:$0xff] %v9245_v47  ;;  %v1525_v18 = vor.u32 %v1524_v13, %v1523_v45  ;;  %vm1529_vm9 = vcmp.lt.s32.totalorder %v1507_v20, 4  ;;  %v1607_v59 = vadd.s32 1, %v7580_v28 }
 0x1e5   :  { %v1364_v23 = vsub.s32 4294967266, %v9232_v51  ;;  %v1510_v15 = vshrl.u32 %v11868_v4, %v1509_v58  ;;  %v1531_v16 = vsel %vm1529_vm9, %v1519_v31, 2102212464  ;;  %v1534_v29 = vsel %vm1526_vm8, %v1513_v36, %v1516_v19 }
 0x1e6   :  { %vm1527_vm1 = vcmp.lt.s32.totalorder %v1507_v20, 2  ;;  %vm1528_vm6 = vcmp.lt.s32.totalorder %v1507_v20, 3  ;;  %v1535_v0 = vsel %vm1529_vm9, %v1522_v63, 920167782  ;;  %v1538_v8 = vsel %vm1526_vm8, %v1516_v19, %v1519_v31 }
 0x1e7   :  { %v1459_v52 = vclz %v7573_v62  ;;  %v1530_v22 = vsel %vm1526_vm8, %v1510_v15, %v1513_v36  ;;  %v1536_v11 = vsel %vm1528_vm6, %v1519_v31, %v1535_v0  ;;  %v1539_v21 = vsel %vm1529_vm9, %v1525_v18, 1326507024 }
 0x1e8   :  { %v1532_v37 = vsel %vm1528_vm6, %v1516_v19, %v1531_v16  ;;  %v1537_v13 = vsel %vm1527_vm1, %v1534_v29, %v1536_v11  ;;  %v1540_v45 = vsel %vm1528_vm6, %v1522_v63, %v1539_v21  ;;  %vm1608_vm10 = vcmp.gt.s32.totalorder %v1607_v59, 0 }
 0x1e9   :  { %v1541_v28 = vsel %vm1527_vm1, %v1538_v8, %v1540_v45  ;;  %v9251_v24 = vmul.u32.u64.low %v1542_v43, %v1537_v13  ;;  %v9252_v49 = vmul.u32.u64.high %v1542_v43, %v1537_v13, %v9251_v24  ;;  %v11927_v58 = vand.u32 2147483647, %v8620_v48  ;;  %v9298_v45 = vpop.f32.mrb[20].mxu0 }
 0x1ea   :  { %8048 = vcosq.f32 %v9205_v12  ;;  %v9258_v62 = vmul.u32.u64.low %v1542_v43, %v1541_v28  ;;  %v9259_v36 = vmul.u32.u64.high %v1542_v43, %v1541_v28, %v9258_v62  ;;  %v1609_v31 = vsel %vm1608_vm10, %v1607_v59, 0  ;;  %11929 = vst [vmem:[#allocation57_spill] sm:$0xff] %v9298_v45 }
 0x1eb   :  { %v1604_v40 = vand.u32 8388607, %v11927_v58  ;;  %8050 = vsinq.f32 %v9205_v12  ;;  %v1362_v63 = vshrl.u32 %v9215_v35, %v1360_v7  ;;  %v7574_v21 = vadd.s32 4294967294, %v1459_v52 }
 0x1ec   :  { %v1533_v19 = vsel %vm1527_vm1, %v1530_v22, %v1532_v37  ;;  %v9267_v18 = vsel %vm1187_vm12, %v1269_v54, %v9218_v38  ;;  %v1365_v15 = vadd.s32 127, %v1364_v23  ;;  %v11928_v16 = vsub.s32 4, %v9104_v10 }
 0x1ed   :  { %v1611_v59 = vand.u32 31, %v1609_v31  ;;  %v1361_v12 = vshll.u32 %v9130_v1, %v9232_v51  ;;  %v1552_v35 = vadd.s32 1, %v9252_v49  ;;  %v1605_v37 = vor.u32 8388608, %v1604_v40 }
 0x1ee   :  { %v9274_v29 = vsel %vm1290_vm4, %v11928_v16, %v9104_v10  ;;  %v9282_v54 = vadd.s32 %v9155_v30, %v9153_v5  ;;  %v1549_v38 = vmul.u32 %v1542_v43, %v1533_v19  ;;  %vm1551_vm12 = vc.u32 %v9259_v36, %v9251_v24 }
 0x1ef   :  { %v1612_v7 = vsub.s32 32, %v1611_v59  ;;  %v1363_v10 = vor.u32 %v1362_v63, %v1361_v12  ;;  %vm7575_vm5 = vcmp.lt.s32.totalorder %v7574_v21, 0  ;;  %v1553_v23 = vsel %vm1551_vm12, %v1552_v35, %v9252_v49 }
 0x1f0   :  { %v1703_v1 = vand.u32 2139095040, %v8713_v61  ;;  %v1366_v51 = vshll.u32 %v1365_v15, 23  ;;  %v1554_v0 = vadd.s32 %v1553_v23, %v1549_v38  ;;  %v1614_v5 = vshll.u32 %v11868_v4, %v1611_v59 }
 0x1f1   :  { %v1615_v40 = vshrl.u32 %v11873_v14, %v1612_v7  ;;  %v1618_v8 = vshrl.u32 %v11855_v2, %v1612_v7  ;;  %v1617_v30 = vshll.u32 %v11873_v14, %v1611_v59  ;;  %v1621_v43 = vshrl.u32 %v11856_v42, %v1612_v7 }
 0x1f2   :  { %v9293_v52 = vshll.u32 %v1605_v37, 8  ;;  %v9295_v22 = vsel %vm7575_vm5, 0, %v7574_v21  ;;  %v1555_v11 = vadd.s32 536870912, %v1554_v0  ;;  %v1610_v49 = vshrl.u32 %v1609_v31, 5 }
 0x1f3   :  { %v1620_v13 = vshll.u32 %v11855_v2, %v1611_v59  ;;  %v1616_v28 = vor.u32 %v1615_v40, %v1614_v5  ;;  %v1619_v58 = vor.u32 %v1618_v8, %v1617_v30  ;;  %v1623_v62 = vshll.u32 %v11856_v42, %v1611_v59 }
 0x1f4   :  { %v1624_v63 = vshrl.u32 %v11859_v3, %v1612_v7  ;;  %v9302_v19 = vpop.eup %8048  ;;  %v1367_v15 = vor.u32 4788187, %v1366_v51  ;;  %v9304_v16 = vshrl.u32 %v1555_v11, 30  ;;  %v1627_v21 = vshrl.u32 %v11874_v60, %v1612_v7 }
 0x1f5   :  { %11930 = vst [vmem:[#allocation58_spill] sm:$0xff] %v9302_v19  ;;  %v1622_v12 = vor.u32 %v1621_v43, %v1620_v13  ;;  %v9307_v35 = vpop.eup %8050  ;;  %v1370_v31 = vcvt.s32.f32 %v1363_v10  ;;  %v1626_v38 = vshll.u32 %v11859_v3, %v1611_v59  ;;  %v1704_v23 = vshrl.u32 %v1703_v1, 23 }
 0x1f6   :  { %11931 = vst [vmem:[#allocation59_spill] sm:$0xff] %v9307_v35  ;;  %v1625_v37 = vor.u32 %v1624_v63, %v1623_v62  ;;  %v1467_v40 = vsub.s32 4294967266, %v9295_v22  ;;  %v1557_v8 = vshll.u32 %v9304_v16, 30  ;;  %vm1629_vm13 = vcmp.lt.s32.totalorder %v1610_v49, 1 }
 0x1f7   :  { %vm1632_vm14 = vcmp.lt.s32.totalorder %v1610_v49, 4  ;;  %v11932_v51 = vand.u32 2147483647, %v8396_v9  ;;  %v1628_v30 = vor.u32 %v1627_v21, %v1626_v38  ;;  %vm1631_vm0 = vcmp.lt.s32.totalorder %v1610_v49, 3 }
 0x1f8   :  { %v1637_v10 = vsel %vm1629_vm13, %v1616_v28, %v1619_v58  ;;  %v1638_v43 = vsel %vm1632_vm14, %v1625_v37, 920167782  ;;  %v1368_v59 = vand.u32 2147483647, %v1367_v15  ;;  %v9320_v1 = vsub.s32 %v1554_v0, %v1557_v8 }
 0x1f9   :  { %vm9314_vm11 = vcmp.le.f32.partialorder %v11932_v51, 0.7853982  ;;  %vm1630_vm3 = vcmp.lt.s32.totalorder %v1610_v49, 2  ;;  %v1639_v11 = vsel %vm1631_vm0, %v1622_v12, %v1638_v43  ;;  %vm1393_vm8 = vcmp.lt.s32.totalorder %v8450_v26, 0 }
 0x1fa   :  { %v1463_v13 = vsub.s32 32, %v9295_v22  ;;  %v1634_v62 = vsel %vm1632_vm14, %v1622_v12, 2102212464  ;;  %v1640_v63 = vsel %vm1630_vm3, %v1637_v10, %v1639_v11  ;;  %v7584_v21 = vadd.s32 4294967169, %v1704_v23 }
 0x1fb   :  { %v1468_v38 = vadd.s32 127, %v1467_v40  ;;  %v1560_v51 = vsub.s32 0, %v9320_v1  ;;  %v1613_v20 = vshrl.u32 %v11868_v4, %v1612_v7  ;;  %v1641_v0 = vsel %vm1629_vm13, %v1619_v58, %v1622_v12 }
 0x1fc   :  { %v1477_v15 = vsub.s32 4, %v9209_v53  ;;  %v1642_v8 = vsel %vm1632_vm14, %v1628_v30, 1326507024  ;;  %v9333_v43 = vmul.u32.u64.low %v9293_v52, %v1640_v63  ;;  %v9334_v19 = vmul.u32.u64.high %v9293_v52, %v1640_v63, %v9333_v43 }
 0x1fd   :  { %v11935_v35 = vand.u32 2147483647, %v8450_v26  ;;  %v7577_v40 = vmin.u32 %v1560_v51, %v9320_v1  ;;  %v1633_v7 = vsel %vm1629_vm13, %v1613_v20, %v1616_v28  ;;  %v1635_v12 = vsel %vm1631_vm0, %v1619_v58, %v1634_v62 }
 0x1fe   :  { %v1643_v10 = vsel %vm1631_vm0, %v1625_v37, %v1642_v8  ;;  %v1371_v30 = vmul.f32 %v1370_v31, %v1368_v59  ;;  %v1465_v11 = vshrl.u32 %v9282_v54, %v1463_v13  ;;  %v1710_v6 = vadd.s32 1, %v7584_v21 }
 0x1ff   :  { %vm9339_vm9 = vcmp.le.f32.partialorder %v11935_v35, 0.7853982  ;;  %v1644_v63 = vsel %vm1630_vm3, %v1641_v0, %v1643_v10  ;;  %v1469_v44 = vshll.u32 %v1468_v38, 23  ;;  %v1562_v47 = vclz %v7577_v40  ;;  %v9393_v10 = vpop.f32.mrb[21].mxu0 }
 0x200   :  { %v9350_v35 = vmul.u32.u64.low %v9293_v52, %v1644_v63  ;;  %v9351_v55 = vmul.u32.u64.high %v9293_v52, %v1644_v63, %v9350_v35  ;;  %v1464_v51 = vshll.u32 %v9225_v39, %v9295_v22  ;;  %v1636_v20 = vsel %vm1630_vm3, %v1633_v7, %v1635_v12 }
 0x201   :  { %v1655_v28 = vadd.s32 1, %v9334_v19  ;;  %vm1711_vm1 = vcmp.gt.s32.totalorder %v1710_v6, 0  ;;  %v1273_v54 = vsel %vm9143_vm15, %v8356_v50, %v9267_v18  ;;  %v1377_v58 = vsel %vm9314_vm11, 0, %v9274_v29 }
 0x202   :  { %v7578_v31 = vadd.s32 4294967294, %v1562_v47  ;;  %v1712_v37 = vsel %vm1711_vm1, %v1710_v6, 0  ;;  %v1372_v59 = vxor.u32 2147483648, %v1371_v30  ;;  %v1466_v13 = vor.u32 %v1465_v11, %v1464_v51 }
 0x203   :  { %v11938_v39 = vand.u32 2147483647, %v8713_v61  ;;  %v1714_v49 = vand.u32 31, %v1712_v37  ;;  %v1470_v62 = vor.u32 4788187, %v1469_v44  ;;  %v1478_v21 = vsel %vm1393_vm8, %v1477_v15, %v9209_v53 }
 0x204   :  { %v1652_v33 = vmul.u32 %v9293_v52, %v1636_v20  ;;  %vm1654_vm15 = vc.u32 %v9351_v55, %v9333_v43  ;;  %8052 = vcosq.f32 %v1273_v54  ;;  %v9372_v18 = vand.u32 3, %v1377_v58  ;;  %v7982_v53 = vld [vmem:[%s11684_s3 + $0x24] ss:$8 sps:$4 sm:$0xff]   ;;  %v7980_v15 = vld [vmem:[%s11684_s3 + $0x20] ss:$8 sps:$4 sm:$0xff]  }
 0x205   :  { %v1707_v22 = vand.u32 8388607, %v11938_v39  ;;  %v1656_v6 = vsel %vm1654_vm15, %v1655_v28, %v9334_v19  ;;  %v1715_v47 = vsub.s32 32, %v1714_v49  ;;  %8054 = vsinq.f32 %v1273_v54  ;;  %7320 = vmatprep.subr.bf16.mxu0 %v7982_v53 }
 0x206   :  { %11939 = vst [vmem:[#allocation60_spill] sm:$0xff] %v9372_v18  ;;  %v9375_v29 = vadd.s32 3, %v1377_v58  ;;  %vm7579_vm6 = vcmp.lt.s32.totalorder %v7578_v31, 0  ;;  %v1657_v44 = vadd.s32 %v1656_v6, %v1652_v33  ;;  %v9382_v52 = vsel %vm1290_vm4, %v1372_v59, %v1371_v30  ;;  %7321 = vmatpush1.bf16.xpose.msra.mxu0 %v7980_v15 }
 0x207   :  { %v1473_v38 = vcvt.s32.f32 %v1466_v13  ;;  %v9386_v0 = vsel %vm9339_vm9, 0, %v1478_v21  ;;  %v1708_v19 = vor.u32 8388608, %v1707_v22  ;;  %v1471_v8 = vand.u32 2147483647, %v1470_v62 }
 0x208   :  { %11940 = vst [vmem:[#allocation61_spill] sm:$0xff] %v9375_v29  ;;  %v1658_v40 = vadd.s32 536870912, %v1657_v44  ;;  %v1718_v7 = vshrl.u32 %v11873_v14, %v1715_v47  ;;  %v1721_v12 = vshrl.u32 %v11855_v2, %v1715_v47  ;;  %v9395_v30 = vsel %vm7579_vm6, 0, %v7578_v31 }
 0x209   :  { %v9397_v11 = vshrl.u32 %v1712_v37, 5  ;;  %v1724_v63 = vshrl.u32 %v11856_v42, %v1715_v47  ;;  %v1806_v35 = vand.u32 2139095040, %v8833_v57  ;;  %v1717_v20 = vshll.u32 %v11868_v4, %v1714_v49 }
 0x20a   :  { %v9401_v51 = vshrl.u32 %v1658_v40, 30  ;;  %v1720_v28 = vshll.u32 %v11873_v14, %v1714_v49  ;;  %v1727_v54 = vshrl.u32 %v11859_v3, %v1715_v47  ;;  %v1723_v58 = vshll.u32 %v11855_v2, %v1714_v49 }
 0x20b   :  { %v1726_v31 = vshll.u32 %v11856_v42, %v1714_v49  ;;  %v1729_v37 = vshll.u32 %v11859_v3, %v1714_v49  ;;  %v1730_v59 = vshrl.u32 %v11874_v60, %v1715_v47  ;;  %v1570_v13 = vsub.s32 4294967266, %v9395_v30 }
 0x20c   :  { %v1660_v39 = vshll.u32 %v9401_v51, 30  ;;  %v1719_v22 = vor.u32 %v1718_v7, %v1717_v20  ;;  %v1722_v62 = vor.u32 %v1721_v12, %v1720_v28  ;;  %v1725_v21 = vor.u32 %v1724_v63, %v1723_v58 }
 0x20d   :  { %v1728_v33 = vor.u32 %v1727_v54, %v1726_v31  ;;  %v1731_v6 = vor.u32 %v1730_v59, %v1729_v37  ;;  %v11757_v53 = vand.u32 2147483647, %v8833_v57  ;;  %v9413_v15 = vmul.f32 %v1473_v38, %v1471_v8 }
 0x20e   :  { %v1550_v40 = vadd.s32 %v9251_v24, %v9259_v36  ;;  %v9417_v18 = vsub.s32 %v1657_v44, %v1660_v39  ;;  %v9419_v49 = vshll.u32 %v1708_v19, 8  ;;  %v9421_v29 = vpop.eup %8052  ;;  %v1566_v50 = vsub.s32 32, %v9395_v30 }
 0x20f   :  { %11941 = vst [vmem:[#allocation62_spill] sm:$0xff] %v9421_v29  ;;  %v1716_v7 = vshrl.u32 %v11868_v4, %v1715_v47  ;;  %vm1732_vm4 = vcmp.lt.s32.totalorder %v9397_v11, 1  ;;  %v1807_v12 = vshrl.u32 %v1806_v35, 23  ;;  %v9426_v63 = vpop.eup %8054  ;;  %v1571_v38 = vadd.s32 127, %v1570_v13 }
 0x210   :  { %v1663_v8 = vsub.s32 0, %v9417_v18  ;;  %vm1735_vm10 = vcmp.lt.s32.totalorder %v9397_v11, 4  ;;  %v1740_v24 = vsel %vm1732_vm4, %v1719_v22, %v1722_v62  ;;  %vm1734_vm12 = vcmp.lt.s32.totalorder %v9397_v11, 3 }
 0x211   :  { %v1741_v36 = vsel %vm1735_vm10, %v1728_v33, 920167782  ;;  %v1744_v44 = vsel %vm1732_vm4, %v1722_v62, %v1725_v21  ;;  %v1745_v47 = vsel %vm1735_vm10, %v1731_v6, 1326507024  ;;  %vm1496_vm5 = vcmp.lt.s32.totalorder %v8518_v17, 0 }
 0x212   :  { %v7581_v19 = vmin.u32 %v1663_v8, %v9417_v18  ;;  %vm1733_vm13 = vcmp.lt.s32.totalorder %v9397_v11, 2  ;;  %v1737_v35 = vsel %vm1735_vm10, %v1725_v21, 2102212464  ;;  %v1742_v20 = vsel %vm1734_vm12, %v1725_v21, %v1741_v36 }
 0x213   :  { %v1568_v28 = vshrl.u32 %v1550_v40, %v1566_v50  ;;  %v1743_v54 = vsel %vm1733_vm13, %v1740_v24, %v1742_v20  ;;  %v1746_v58 = vsel %vm1734_vm12, %v1728_v33, %v1745_v47  ;;  %v7588_v31 = vadd.s32 4294967169, %v1807_v12  ;;  %v7985_v20 = vld [vmem:[%s11684_s3 + $0xa0] ss:$8 sps:$4 sm:$0xff]  }
 0x214   :  { %v1572_v37 = vshll.u32 %v1571_v38, 23  ;;  %v1665_v59 = vclz %v7581_v19  ;;  %v1736_v13 = vsel %vm1732_vm4, %v1716_v7, %v1719_v22  ;;  %v1747_v39 = vsel %vm1733_vm13, %v1744_v44, %v1746_v58 }
 0x215   :  { %v1738_v6 = vsel %vm1734_vm12, %v1722_v62, %v1737_v35  ;;  %v9451_v50 = vmul.u32.u64.low %v9419_v49, %v1747_v39  ;;  %v9452_v21 = vmul.u32.u64.high %v9419_v49, %v1747_v39, %v9451_v50  ;;  %v1813_v40 = vadd.s32 1, %v7588_v31 }
 0x216   :  { %v9458_v33 = vsel %vm9314_vm11, %v8396_v9, %v9382_v52  ;;  %v7582_v12 = vadd.s32 4294967294, %v1665_v59  ;;  %v9461_v22 = vmul.u32.u64.low %v9419_v49, %v1743_v54  ;;  %v9462_v7 = vmul.u32.u64.high %v9419_v49, %v1743_v54, %v9461_v22 }
 0x217   :  { %v1475_v38 = vxor.u32 2147483648, %v9413_v15  ;;  %v1567_v62 = vshll.u32 %v9320_v1, %v9395_v30  ;;  %v1580_v8 = vsub.s32 4, %v9304_v16  ;;  %vm1814_vm14 = vcmp.gt.s32.totalorder %v1813_v40, 0  ;;  %v7983_v1 = vld [vmem:[%s11684_s3 + $0xa4] ss:$8 sps:$4 sm:$0xff]  }
 0x218   :  { %vm7583_vm0 = vcmp.lt.s32.totalorder %v7582_v12, 0  ;;  %v1739_v5 = vsel %vm1733_vm13, %v1736_v13, %v1738_v6  ;;  %v1810_v52 = vand.u32 8388607, %v11757_v53  ;;  %v1815_v24 = vsel %vm1814_vm14, %v1813_v40, 0  ;;  %7143 = vmatprep.subr.bf16.mxu1 %v7983_v1 }
 0x219   :  { %v9474_v36 = vand.u32 3, %v9386_v0  ;;  %v1569_v44 = vor.u32 %v1568_v28, %v1567_v62  ;;  %v1573_v47 = vor.u32 4788187, %v1572_v37  ;;  %vm1757_vm11 = vc.u32 %v9452_v21, %v9461_v22  ;;  %7144 = vmatpush1.bf16.xpose.msra.mxu1 %v7985_v20 }
 0x21a   :  { %v9482_v30 = vadd.s32 3, %v9386_v0  ;;  %v9484_v11 = vsel %vm7583_vm0, 0, %v7582_v12  ;;  %v1758_v19 = vadd.s32 1, %v9462_v7  ;;  %v9487_v35 = vshrl.u32 %v1815_v24, 5 }
 0x21b   :  { %11942 = vst [vmem:[#allocation63_spill] sm:$0xff] %v9474_v36  ;;  %8056 = vcosq.f32 %v9458_v33  ;;  %v9496_v28 = vsel %vm1496_vm5, %v1580_v8, %v9304_v16  ;;  %v1755_v0 = vmul.u32 %v9419_v49, %v1739_v5  ;;  %v1817_v54 = vand.u32 31, %v1815_v24 }
 0x21c   :  { %11943 = vst [vmem:[#allocation64_spill] sm:$0xff] %v9482_v30  ;;  %v9502_v58 = vsel %vm1393_vm8, %v1475_v38, %v9413_v15  ;;  %v1653_v31 = vadd.s32 %v9333_v43, %v9351_v55  ;;  %v1759_v37 = vsel %vm1757_vm11, %v1758_v19, %v9462_v7  ;;  %v1811_v59 = vor.u32 8388608, %v1810_v52  ;;  %v9511_v15 = vpop.f32.mrb[22].mxu0 }
 0x21d   :  { %v1576_v13 = vcvt.s32.f32 %v1569_v44  ;;  %v1673_v16 = vsub.s32 4294967266, %v9484_v11  ;;  %v1760_v39 = vadd.s32 %v1759_v37, %v1755_v0  ;;  %v1818_v6 = vsub.s32 32, %v1817_v54  ;;  %11944 = vst [vmem:[#allocation65_spill] sm:$0xff] %v9511_v15 }
 0x21e   :  { %v1574_v49 = vand.u32 2147483647, %v1573_v47  ;;  %v1820_v40 = vshll.u32 %v11868_v4, %v1817_v54  ;;  %vm1835_vm3 = vcmp.lt.s32.totalorder %v9487_v35, 1  ;;  %v1823_v43 = vshll.u32 %v11873_v14, %v1817_v54 }
 0x21f   :  { %v1761_v12 = vadd.s32 536870912, %v1760_v39  ;;  %v1821_v55 = vshrl.u32 %v11873_v14, %v1818_v6  ;;  %v1824_v7 = vshrl.u32 %v11855_v2, %v1818_v6  ;;  %v1826_v38 = vshll.u32 %v11855_v2, %v1817_v54 }
 0x220   :  { %v1827_v62 = vshrl.u32 %v11856_v42, %v1818_v6  ;;  %v1829_v8 = vshll.u32 %v11856_v42, %v1817_v54  ;;  %v1830_v5 = vshrl.u32 %v11859_v3, %v1818_v6  ;;  %v1674_v52 = vadd.s32 127, %v1673_v16 }
 0x221   :  { %v9520_v24 = vshrl.u32 %v1761_v12, 30  ;;  %v1822_v44 = vor.u32 %v1821_v55, %v1820_v40  ;;  %v1825_v47 = vor.u32 %v1824_v7, %v1823_v43  ;;  %v1832_v20 = vshll.u32 %v11859_v3, %v1817_v54 }
 0x222   :  { %v1828_v1 = vor.u32 %v1827_v62, %v1826_v38  ;;  %v1831_v19 = vor.u32 %v1830_v5, %v1829_v8  ;;  %v1833_v0 = vshrl.u32 %v11874_v60, %v1818_v6  ;;  %v1669_v37 = vsub.s32 32, %v9484_v11 }
 0x223   :  { %v1763_v53 = vshll.u32 %v9520_v24, 30  ;;  %vm1838_vm8 = vcmp.lt.s32.totalorder %v9487_v35, 4  ;;  %v1843_v50 = vsel %vm1835_vm3, %v1822_v44, %v1825_v47  ;;  %v11945_v16 = vand.u32 2147483647, %v8518_v17 }
 0x224   :  { %v1577_v12 = vmul.f32 %v1576_v13, %v1574_v49  ;;  %v1834_v55 = vor.u32 %v1833_v0, %v1832_v20  ;;  %vm1837_vm15 = vcmp.lt.s32.totalorder %v9487_v35, 3  ;;  %v1844_v54 = vsel %vm1838_vm8, %v1831_v19, 920167782 }
 0x225   :  { %vm9531_vm1 = vcmp.le.f32.partialorder %v11945_v16, 0.7853982  ;;  %v9538_v43 = vpop.eup %8056  ;;  %vm1599_vm6 = vcmp.lt.s32.totalorder %v8620_v48, 0  ;;  %v9541_v7 = vsub.s32 %v1760_v39, %v1763_v53  ;;  %vm1836_vm4 = vcmp.lt.s32.totalorder %v9487_v35, 2 }
 0x226   :  { %11948 = vst [vmem:[#allocation66_spill] sm:$0xff] %v9538_v43  ;;  %v1845_v38 = vsel %vm1837_vm15, %v1828_v1, %v1844_v54  ;;  %v1851_v62 = vshll.u32 %v1811_v59, 8  ;;  %v1675_v8 = vshll.u32 %v1674_v52, 23  ;;  %v1840_v13 = vsel %vm1838_vm8, %v1828_v1, 2102212464 }
 0x227   :  { %v1846_v49 = vsel %vm1836_vm4, %v1843_v50, %v1845_v38  ;;  %v1909_v5 = vand.u32 2139095040, %v8927_v46  ;;  %v1671_v20 = vshrl.u32 %v1653_v31, %v1669_v37  ;;  %v1766_v0 = vsub.s32 0, %v9541_v7 }
 0x228   :  { %v1819_v53 = vshrl.u32 %v11868_v4, %v1818_v6  ;;  %v1847_v39 = vsel %vm1835_vm3, %v1825_v47, %v1828_v1  ;;  %v1670_v59 = vshll.u32 %v9417_v18, %v9484_v11  ;;  %v1848_v52 = vsel %vm1838_vm8, %v1834_v55, 1326507024 }
 0x229   :  { %v9559_v16 = vmul.u32.u64.low %v1851_v62, %v1846_v49  ;;  %v9560_v54 = vmul.u32.u64.high %v1851_v62, %v1846_v49, %v9559_v16  ;;  %v11949_v50 = vand.u32 2147483647, %v8620_v48  ;;  %v7585_v6 = vmin.u32 %v1766_v0, %v9541_v7 }
 0x22a   :  { %v1839_v1 = vsel %vm1835_vm3, %v1819_v53, %v1822_v44  ;;  %v1841_v18 = vsel %vm1837_vm15, %v1825_v47, %v1840_v13  ;;  %v1849_v11 = vsel %vm1837_vm15, %v1831_v19, %v1848_v52  ;;  %v1578_v37 = vxor.u32 2147483648, %v1577_v12 }
 0x22b   :  { %vm9565_vm10 = vcmp.le.f32.partialorder %v11949_v50, 0.7853982  ;;  %v1676_v55 = vor.u32 4788187, %v1675_v8  ;;  %v1850_v38 = vsel %vm1836_vm4, %v1847_v39, %v1849_v11  ;;  %v1910_v49 = vshrl.u32 %v1909_v5, 23 }
 0x22c   :  { %v1672_v50 = vor.u32 %v1671_v20, %v1670_v59  ;;  %vm1702_vm12 = vcmp.lt.s32.totalorder %v8713_v61, 0  ;;  %v1768_v43 = vclz %v7585_v6  ;;  %8058 = vsinq.f32 %v9458_v33 }
 0x22d   :  { %v9579_v0 = vmul.u32.u64.low %v1851_v62, %v1850_v38  ;;  %v9580_v9 = vmul.u32.u64.high %v1851_v62, %v1850_v38, %v9579_v0  ;;  %v1842_v44 = vsel %vm1836_vm4, %v1839_v1, %v1841_v18  ;;  %v1861_v47 = vadd.s32 1, %v9560_v54 }
 0x22e   :  { %v7592_v19 = vadd.s32 4294967169, %v1910_v49  ;;  %v1479_v8 = vsel %vm9339_vm9, %v8450_v26, %v9502_v58  ;;  %v1583_v13 = vsel %vm9531_vm1, 0, %v9496_v28  ;;  %v7586_v5 = vadd.s32 4294967294, %v1768_v43 }
 0x22f   :  { %v11761_v20 = vand.u32 2147483647, %v8927_v46  ;;  %v1579_v33 = vsel %vm1496_vm5, %v1578_v37, %v1577_v12  ;;  %v1677_v35 = vand.u32 2147483647, %v1676_v55  ;;  %v11952_v53 = vsub.s32 4, %v9401_v51 }
 0x230   :  { %v11953_v23 = vand.u32 2147483647, %v8713_v61  ;;  %v1916_v28 = vadd.s32 1, %v7592_v19  ;;  %v1679_v43 = vcvt.s32.f32 %v1672_v50  ;;  %v1786_v59 = vsub.s32 4, %v9520_v24 }
 0x231   :  { %v1684_v39 = vsel %vm1599_vm6, %v11952_v53, %v9401_v51  ;;  %v1858_v52 = vmul.u32 %v1851_v62, %v1842_v44  ;;  %vm1860_vm5 = vc.u32 %v9580_v9, %v9559_v16  ;;  %vm7587_vm13 = vcmp.lt.s32.totalorder %v7586_v5, 0 }
 0x232   :  { %vm9603_vm9 = vcmp.le.f32.partialorder %v11953_v23, 0.7853982  ;;  %v1862_v12 = vsel %vm1860_vm5, %v1861_v47, %v9560_v54  ;;  %vm1917_vm14 = vcmp.gt.s32.totalorder %v1916_v28, 0  ;;  %v2012_v51 = vand.u32 2139095040, %v9020_v34  ;;  %v9621_v54 = vpop.f32.mrb[23].mxu0 }
 0x233   :  { %8060 = vcosq.f32 %v1479_v8  ;;  %v1582_v6 = vsel %vm9531_vm1, %v8518_v17, %v1579_v33  ;;  %v9615_v1 = vand.u32 3, %v1583_v13  ;;  %v1863_v18 = vadd.s32 %v1862_v12, %v1858_v52 }
 0x234   :  { %v1680_v11 = vmul.f32 %v1679_v43, %v1677_v35  ;;  %v1686_v62 = vsel %vm9565_vm10, 0, %v1684_v39  ;;  %v1913_v37 = vand.u32 8388607, %v11761_v20  ;;  %v1918_v55 = vsel %vm1917_vm14, %v1916_v28, 0 }
 0x235   :  { %11956 = vst [vmem:[#allocation67_spill] sm:$0xff] %v9615_v1  ;;  %8062 = vsinq.f32 %v1479_v8  ;;  %v9623_v38 = vadd.s32 3, %v1583_v13  ;;  %v9625_v49 = vsel %vm7587_vm13, 0, %v7586_v5  ;;  %v1864_v40 = vadd.s32 536870912, %v1863_v18 }
 0x236   :  { %8064 = vcosq.f32 %v1582_v6  ;;  %v1787_v50 = vsel %vm1702_vm12, %v1786_v59, %v9520_v24  ;;  %v1920_v0 = vand.u32 31, %v1918_v55  ;;  %v2013_v44 = vshrl.u32 %v2012_v51, 23  ;;  %v9636_v8 = vpop.eup %8058 }
 0x237   :  { %11957 = vst [vmem:[#allocation68_spill] sm:$0xff] %v9623_v38  ;;  %8066 = vsinq.f32 %v1582_v6  ;;  %v9630_v47 = vand.u32 3, %v1686_v62  ;;  %v9632_v19 = vadd.s32 3, %v1686_v62  ;;  %v9634_v33 = vshrl.u32 %v1864_v40, 30  ;;  %11960 = vst [vmem:[#allocation71_spill] sm:$0xff] %v9636_v8 }
 0x238   :  { %v1681_v13 = vxor.u32 2147483648, %v1680_v11  ;;  %v1776_v5 = vsub.s32 4294967266, %v9625_v49  ;;  %v1914_v35 = vor.u32 8388608, %v1913_v37  ;;  %v1921_v53 = vsub.s32 32, %v1920_v0 }
 0x239   :  { %11958 = vst [vmem:[#allocation69_spill] sm:$0xff] %v9630_v47  ;;  %11959 = vst [vmem:[#allocation70_spill] sm:$0xff] %v9632_v19  ;;  %v1756_v39 = vadd.s32 %v9461_v22, %v9452_v21  ;;  %v9643_v24 = vsel %vm9603_vm9, 0, %v1787_v50  ;;  %v1866_v23 = vshll.u32 %v9634_v33, 30  ;;  %v7596_v12 = vadd.s32 4294967169, %v2013_v44 }
 0x23a   :  { %v1924_v43 = vshrl.u32 %v11873_v14, %v1921_v53  ;;  %v1927_v59 = vshrl.u32 %v11855_v2, %v1921_v53  ;;  %v1930_v52 = vshrl.u32 %v11856_v42, %v1921_v53  ;;  %v1923_v6 = vshll.u32 %v11868_v4, %v1920_v0 }
 0x23b   :  { %v9650_v51 = vsub.s32 %v1863_v18, %v1866_v23  ;;  %v1926_v21 = vshll.u32 %v11873_v14, %v1920_v0  ;;  %v1929_v22 = vshll.u32 %v11855_v2, %v1920_v0  ;;  %v1682_v62 = vsel %vm1599_vm6, %v1681_v13, %v1680_v11 }
 0x23c   :  { %v1777_v37 = vadd.s32 127, %v1776_v5  ;;  %v1919_v40 = vshrl.u32 %v1918_v55, 5  ;;  %v9657_v50 = vshll.u32 %v1914_v35, 8  ;;  %v1925_v44 = vor.u32 %v1924_v43, %v1923_v6 }
 0x23d   :  { %v9659_v20 = vpop.eup %8060  ;;  %v1869_v28 = vsub.s32 0, %v9650_v51  ;;  %v1928_v18 = vor.u32 %v1927_v59, %v1926_v21  ;;  %v1931_v23 = vor.u32 %v1930_v52, %v1929_v22  ;;  %v1932_v1 = vshll.u32 %v11856_v42, %v1920_v0 }
 0x23e   :  { %11961 = vst [vmem:[#allocation72_spill] sm:$0xff] %v9659_v20  ;;  %v1933_v38 = vshrl.u32 %v11859_v3, %v1921_v53  ;;  %v1935_v17 = vshll.u32 %v11859_v3, %v1920_v0  ;;  %v1936_v47 = vshrl.u32 %v11874_v60, %v1921_v53  ;;  %v1772_v55 = vsub.s32 32, %v9625_v49 }
 0x23f   :  { %v9666_v11 = vpop.eup %8062  ;;  %v7589_v13 = vmin.u32 %v1869_v28, %v9650_v51  ;;  %v11963_v5 = vand.u32 2147483647, %v9020_v34  ;;  %v2019_v43 = vadd.s32 1, %v7596_v12  ;;  %vm1938_vm0 = vcmp.lt.s32.totalorder %v1919_v40, 1 }
 0x240   :  { %11962 = vst [vmem:[#allocation73_spill] sm:$0xff] %v9666_v11  ;;  %v9672_v59 = vpop.eup %8064  ;;  %v1934_v52 = vor.u32 %v1933_v38, %v1932_v1  ;;  %v1937_v6 = vor.u32 %v1936_v47, %v1935_v17  ;;  %vm1941_vm11 = vcmp.lt.s32.totalorder %v1919_v40, 4  ;;  %v1778_v0 = vshll.u32 %v1777_v37, 23 }
 0x241   :  { %v2016_v35 = vand.u32 8388607, %v11963_v5  ;;  %11964 = vst [vmem:[#allocation74_spill] sm:$0xff] %v9672_v59  ;;  %v9674_v21 = vpop.eup %8066  ;;  %v1871_v22 = vclz %v7589_v13  ;;  %v1943_v19 = vsel %vm1941_vm11, %v1931_v23, 2102212464  ;;  %v1946_v8 = vsel %vm1938_vm0, %v1925_v44, %v1928_v18 }
 0x242   :  { %11965 = vst [vmem:[#allocation75_spill] sm:$0xff] %v9674_v21  ;;  %v1922_v36 = vshrl.u32 %v11868_v4, %v1921_v53  ;;  %vm1940_vm3 = vcmp.lt.s32.totalorder %v1919_v40, 3  ;;  %v1947_v28 = vsel %vm1941_vm11, %v1934_v52, 920167782  ;;  %v1950_v26 = vsel %vm1938_vm0, %v1928_v18, %v1931_v23 }
 0x243   :  { %v7590_v30 = vadd.s32 4294967294, %v1871_v22  ;;  %vm1939_vm8 = vcmp.lt.s32.totalorder %v1919_v40, 2  ;;  %v1948_v12 = vsel %vm1940_vm3, %v1931_v23, %v1947_v28  ;;  %v1951_v5 = vsel %vm1941_vm11, %v1937_v6, 1326507024 }
 0x244   :  { %v1942_v59 = vsel %vm1938_vm0, %v1922_v36, %v1925_v44  ;;  %v1944_v1 = vsel %vm1940_vm3, %v1928_v18, %v1943_v19  ;;  %v1949_v17 = vsel %vm1939_vm8, %v1946_v8, %v1948_v12  ;;  %v1952_v38 = vsel %vm1940_vm3, %v1934_v52, %v1951_v5  ;;  %v9719_v5 = vpop.f32.mrb[24].mxu0 }
 0x245   :  { %v1774_v47 = vshrl.u32 %v1756_v39, %v1772_v55  ;;  %v1953_v20 = vsel %vm1939_vm8, %v1950_v26, %v1952_v38  ;;  %v9678_v37 = vmul.u32.u64.low %v9657_v50, %v1949_v17  ;;  %v9679_v13 = vmul.u32.u64.high %v9657_v50, %v1949_v17, %v9678_v37  ;;  %11968 = vst [vmem:[#allocation78_spill] sm:$0xff] %v9719_v5 }
 0x246   :  { %v9683_v53 = vmul.u32.u64.low %v9657_v50, %v1953_v20  ;;  %v9684_v21 = vmul.u32.u64.high %v9657_v50, %v1953_v20, %v9683_v53  ;;  %v2017_v11 = vor.u32 8388608, %v2016_v35  ;;  %vm2020_vm1 = vcmp.gt.s32.totalorder %v2019_v43, 0 }
 0x247   :  { %v1773_v40 = vshll.u32 %v9541_v7, %v9625_v49  ;;  %vm7591_vm15 = vcmp.lt.s32.totalorder %v7590_v30, 0  ;;  %v1945_v36 = vsel %vm1939_vm8, %v1942_v59, %v1944_v1  ;;  %v2021_v19 = vsel %vm2020_vm1, %v2019_v43, 0 }
 0x248   :  { %v1779_v8 = vor.u32 4788187, %v1778_v0  ;;  %v9689_v26 = vand.u32 3, %v9643_v24  ;;  %v9692_v39 = vadd.s32 3, %v9643_v24  ;;  %v2023_v44 = vand.u32 31, %v2021_v19 }
 0x249   :  { %v9697_v20 = vsel %vm9565_vm10, %v8620_v48, %v1682_v62  ;;  %v1775_v18 = vor.u32 %v1774_v47, %v1773_v40  ;;  %v1964_v23 = vadd.s32 1, %v9679_v13  ;;  %v9701_v49 = vsel %vm7591_vm15, 0, %v7590_v30 }
 0x24a   :  { %11966 = vst [vmem:[#allocation76_spill] sm:$0xff] %v9689_v26  ;;  %11967 = vst [vmem:[#allocation77_spill] sm:$0xff] %v9692_v39  ;;  %v1961_v55 = vmul.u32 %v9657_v50, %v1945_v36  ;;  %vm1963_vm6 = vc.u32 %v9684_v21, %v9678_v37  ;;  %v2024_v24 = vsub.s32 32, %v2023_v44  ;;  %v1859_v35 = vadd.s32 %v9559_v16, %v9580_v9 }
 0x24b   :  { %v1965_v31 = vsel %vm1963_vm6, %v1964_v23, %v9679_v13  ;;  %v9709_v62 = vshll.u32 %v2017_v11, 8  ;;  %v2115_v43 = vand.u32 2139095040, %v9099_v56  ;;  %v1780_v59 = vand.u32 2147483647, %v1779_v8 }
 0x24c   :  { %v1966_v52 = vadd.s32 %v1965_v31, %v1961_v55  ;;  %v2027_v30 = vshrl.u32 %v11873_v14, %v2024_v24  ;;  %v2030_v6 = vshrl.u32 %v11855_v2, %v2024_v24  ;;  %v1879_v50 = vsub.s32 4294967266, %v9701_v49 }
 0x24d   :  { %v2026_v0 = vshll.u32 %v11868_v4, %v2023_v44  ;;  %v2029_v22 = vshll.u32 %v11873_v14, %v2023_v44  ;;  %v2033_v9 = vshrl.u32 %v11856_v42, %v2024_v24  ;;  %v1782_v16 = vcvt.s32.f32 %v1775_v18 }
 0x24e   :  { %v1967_v28 = vadd.s32 536870912, %v1966_v52  ;;  %v2022_v11 = vshrl.u32 %v2021_v19, 5  ;;  %v2032_v12 = vshll.u32 %v11855_v2, %v2023_v44  ;;  %v2035_v38 = vshll.u32 %v11856_v42, %v2023_v44 }
 0x24f   :  { %v2028_v1 = vor.u32 %v2027_v30, %v2026_v0  ;;  %v2031_v17 = vor.u32 %v2030_v6, %v2029_v22  ;;  %v2036_v47 = vshrl.u32 %v11859_v3, %v2024_v24  ;;  %v2039_v40 = vshrl.u32 %v11874_v60, %v2024_v24 }
 0x250   :  { %v9723_v13 = vshrl.u32 %v1967_v28, 30  ;;  %v2034_v53 = vor.u32 %v2033_v9, %v2032_v12  ;;  %v2116_v36 = vshrl.u32 %v2115_v43, 23  ;;  %v1783_v8 = vmul.f32 %v1782_v16, %v1780_v59 }
 0x251   :  { %v1880_v18 = vadd.s32 127, %v1879_v50  ;;  %v2037_v23 = vor.u32 %v2036_v47, %v2035_v38  ;;  %v2038_v19 = vshll.u32 %v11859_v3, %v2023_v44  ;;  %v1875_v55 = vsub.s32 32, %v9701_v49 }
 0x252   :  { %v1969_v31 = vshll.u32 %v9723_v13, 30  ;;  %vm2041_vm4 = vcmp.lt.s32.totalorder %v2022_v11, 1  ;;  %vm2044_vm10 = vcmp.lt.s32.totalorder %v2022_v11, 4  ;;  %vm1805_vm5 = vcmp.lt.s32.totalorder %v8833_v57, 0 }
 0x253   :  { %v2040_v30 = vor.u32 %v2039_v40, %v2038_v19  ;;  %vm2043_vm13 = vcmp.lt.s32.totalorder %v2022_v11, 3  ;;  %v2049_v6 = vsel %vm2041_vm4, %v2028_v1, %v2031_v17  ;;  %v2050_v0 = vsel %vm2044_vm10, %v2037_v23, 920167782 }
 0x254   :  { %v1889_v43 = vsub.s32 4, %v9634_v33  ;;  %v9733_v59 = vsub.s32 %v1966_v52, %v1969_v31  ;;  %v2051_v44 = vsel %vm2043_vm13, %v2034_v53, %v2050_v0  ;;  %v7600_v50 = vadd.s32 4294967169, %v2116_v36 }
 0x255   :  { %v1881_v22 = vshll.u32 %v1880_v18, 23  ;;  %v2025_v9 = vshrl.u32 %v11868_v4, %v2024_v24  ;;  %vm2042_vm14 = vcmp.lt.s32.totalorder %v2022_v11, 2  ;;  %v2046_v16 = vsel %vm2044_vm10, %v2034_v53, 2102212464 }
 0x256   :  { %v1784_v28 = vxor.u32 2147483648, %v1783_v8  ;;  %v11969_v12 = vand.u32 2147483647, %v8833_v57  ;;  %v1876_v52 = vshll.u32 %v9650_v51, %v9701_v49  ;;  %v1972_v47 = vsub.s32 0, %v9733_v59 }
 0x257   :  { %v2052_v40 = vsel %vm2042_vm14, %v2049_v6, %v2051_v44  ;;  %v1877_v36 = vshrl.u32 %v1859_v35, %v1875_v55  ;;  %v2045_v24 = vsel %vm2041_vm4, %v2025_v9, %v2028_v1  ;;  %v2053_v18 = vsel %vm2041_vm4, %v2031_v17, %v2034_v53 }
 0x258   :  { %vm9740_vm0 = vcmp.le.f32.partialorder %v11969_v12, 0.7853982  ;;  %v2054_v19 = vsel %vm2044_vm10, %v2040_v30, 1326507024  ;;  %v7593_v31 = vmin.u32 %v1972_v47, %v9733_v59  ;;  %v2047_v0 = vsel %vm2043_vm13, %v2031_v17, %v2046_v16 }
 0x259   :  { %v2055_v12 = vsel %vm2043_vm13, %v2037_v23, %v2054_v19  ;;  %v2122_v7 = vadd.s32 1, %v7600_v50  ;;  %v1882_v26 = vor.u32 4788187, %v1881_v22  ;;  %v1878_v55 = vor.u32 %v1877_v36, %v1876_v52  ;;  %v9784_v36 = vpop.f32.mrb[25].mxu0 }
 0x25a   :  { %v2056_v51 = vsel %vm2042_vm14, %v2053_v18, %v2055_v12  ;;  %v9756_v49 = vmul.u32.u64.low %v9709_v62, %v2052_v40  ;;  %v9757_v6 = vmul.u32.u64.high %v9709_v62, %v2052_v40, %v9756_v49  ;;  %v1974_v35 = vclz %v7593_v31  ;;  %v7988_v40 = vld [vmem:[%s11684_s3 + $0x34] ss:$8 sps:$4 sm:$0xff]  }
 0x25b   :  { %v9761_v1 = vmul.u32.u64.low %v9709_v62, %v2056_v51  ;;  %v9762_v53 = vmul.u32.u64.high %v9709_v62, %v2056_v51, %v9761_v1  ;;  %vm2123_vm11 = vcmp.gt.s32.totalorder %v2122_v7, 0  ;;  %v2048_v17 = vsel %vm2042_vm14, %v2045_v24, %v2047_v0  ;;  %7322 = vmatprep.subr.bf16.mxu0 %v7988_v40 }
 0x25c   :  { %v2124_v30 = vsel %vm2123_vm11, %v2122_v7, 0  ;;  %v1890_v44 = vsel %vm1805_vm5, %v1889_v43, %v9634_v33  ;;  %v7594_v50 = vadd.s32 4294967294, %v1974_v35  ;;  %v11972_v22 = vand.u32 2147483647, %v9099_v56  ;;  %v7986_v7 = vld [vmem:[%s11684_s3 + $0x30] ss:$8 sps:$4 sm:$0xff]  }
 0x25d   :  { %v2126_v16 = vand.u32 31, %v2124_v30  ;;  %8068 = vcosq.f32 %v9697_v20  ;;  %v1785_v47 = vsel %vm1702_vm12, %v1784_v28, %v1783_v8  ;;  %v1883_v52 = vand.u32 2147483647, %v1882_v26  ;;  %7323 = vmatpush1.bf16.xpose.msra.mxu0 %v7986_v7 }
 0x25e   :  { %v2119_v9 = vand.u32 8388607, %v11972_v22  ;;  %v2067_v11 = vadd.s32 1, %v9757_v6  ;;  %vm7595_vm3 = vcmp.lt.s32.totalorder %v7594_v50, 0  ;;  %v2064_v33 = vmul.u32 %v9709_v62, %v2048_v17 }
 0x25f   :  { %vm2066_vm8 = vc.u32 %v9762_v53, %v9756_v49  ;;  %v2127_v43 = vsub.s32 32, %v2126_v16  ;;  %v1885_v26 = vcvt.s32.f32 %v1878_v55  ;;  %v9788_v8 = vsel %vm9740_vm0, 0, %v1890_v44 }
 0x260   :  { %v9790_v28 = vsel %vm7595_vm3, 0, %v7594_v50  ;;  %v2068_v24 = vsel %vm2066_vm8, %v2067_v11, %v9757_v6  ;;  %v9796_v62 = vsel %vm9603_vm9, %v8713_v61, %v1785_v47  ;;  %v2120_v31 = vor.u32 8388608, %v2119_v9 }
 0x261   :  { %v1982_v18 = vsub.s32 4294967266, %v9790_v28  ;;  %v2069_v19 = vadd.s32 %v2068_v24, %v2064_v33  ;;  %v1886_v0 = vmul.f32 %v1885_v26, %v1883_v52  ;;  %v1962_v12 = vadd.s32 %v9678_v37, %v9684_v21 }
 0x262   :  { %v2130_v51 = vshrl.u32 %v11873_v14, %v2127_v43  ;;  %v2133_v35 = vshrl.u32 %v11855_v2, %v2127_v43  ;;  %v2129_v1 = vshll.u32 %v11868_v4, %v2126_v16  ;;  %v2136_v58 = vshrl.u32 %v11856_v42, %v2127_v43 }
 0x263   :  { %v2070_v6 = vadd.s32 536870912, %v2069_v19  ;;  %v2218_v55 = vand.u32 2139095040, %v9191_v27  ;;  %v2125_v17 = vshrl.u32 %v2124_v30, 5  ;;  %v2132_v44 = vshll.u32 %v11873_v14, %v2126_v16 }
 0x264   :  { %v2138_v50 = vshll.u32 %v11856_v42, %v2126_v16  ;;  %v2139_v22 = vshrl.u32 %v11859_v3, %v2127_v43  ;;  %v1983_v21 = vadd.s32 127, %v1982_v18  ;;  %v2131_v9 = vor.u32 %v2130_v51, %v2129_v1 }
 0x265   :  { %v9809_v37 = vshrl.u32 %v2070_v6, 30  ;;  %v2135_v47 = vshll.u32 %v11855_v2, %v2126_v16  ;;  %v2134_v52 = vor.u32 %v2133_v35, %v2132_v44  ;;  %v2141_v7 = vshll.u32 %v11859_v3, %v2126_v16 }
 0x266   :  { %v2140_v11 = vor.u32 %v2139_v22, %v2138_v50  ;;  %v2142_v33 = vshrl.u32 %v11874_v60, %v2127_v43  ;;  %vm1908_vm12 = vcmp.lt.s32.totalorder %v8927_v46, 0  ;;  %v1978_v30 = vsub.s32 32, %v9790_v28 }
 0x267   :  { %v1992_v40 = vsub.s32 4, %v9723_v13  ;;  %v2072_v26 = vshll.u32 %v9809_v37, 30  ;;  %v2137_v24 = vor.u32 %v2136_v58, %v2135_v47  ;;  %v9818_v18 = vpop.eup %8068  ;;  %v1887_v51 = vxor.u32 2147483648, %v1886_v0 }
 0x268   :  { %11973 = vst [vmem:[#allocation79_spill] sm:$0xff] %v9818_v18  ;;  %v2143_v6 = vor.u32 %v2142_v33, %v2141_v7  ;;  %v2160_v1 = vshll.u32 %v2120_v31, 8  ;;  %v2219_v35 = vshrl.u32 %v2218_v55, 23  ;;  %v1984_v44 = vshll.u32 %v1983_v21, 23 }
 0x269   :  { %v9820_v50 = vsub.s32 %v2069_v19, %v2072_v26  ;;  %vm2144_vm9 = vcmp.lt.s32.totalorder %v2125_v17, 1  ;;  %vm2147_vm1 = vcmp.lt.s32.totalorder %v2125_v17, 4  ;;  %v11974_v16 = vand.u32 2147483647, %v8927_v46 }
 0x26a   :  { %v1979_v58 = vshll.u32 %v9733_v59, %v9790_v28  ;;  %v2128_v47 = vshrl.u32 %v11868_v4, %v2127_v43  ;;  %v2152_v7 = vsel %vm2144_vm9, %v2131_v9, %v2134_v52  ;;  %v2153_v31 = vsel %vm2147_vm1, %v2140_v11, 920167782 }
 0x26b   :  { %vm9824_vm15 = vcmp.le.f32.partialorder %v11974_v16, 0.7853982  ;;  %v1980_v55 = vshrl.u32 %v1962_v12, %v1978_v30  ;;  %v2075_v19 = vsub.s32 0, %v9820_v50  ;;  %vm2146_vm6 = vcmp.lt.s32.totalorder %v2125_v17, 3 }
 0x26c   :  { %v2149_v21 = vsel %vm2147_vm1, %v2137_v24, 2102212464  ;;  %vm2145_vm4 = vcmp.lt.s32.totalorder %v2125_v17, 2  ;;  %v2154_v33 = vsel %vm2146_vm6, %v2137_v24, %v2153_v31  ;;  %v2156_v26 = vsel %vm2144_vm9, %v2134_v52, %v2137_v24 }
 0x26d   :  { %v2157_v16 = vsel %vm2147_vm1, %v2143_v6, 1326507024  ;;  %v1985_v23 = vor.u32 4788187, %v1984_v44  ;;  %v7597_v39 = vmin.u32 %v2075_v19, %v9820_v50  ;;  %v2148_v59 = vsel %vm2144_vm9, %v2128_v47, %v2131_v9 }
 0x26e   :  { %v2155_v43 = vsel %vm2145_vm4, %v2152_v7, %v2154_v33  ;;  %v2150_v28 = vsel %vm2146_vm6, %v2134_v52, %v2149_v21  ;;  %v2158_v61 = vsel %vm2146_vm6, %v2140_v11, %v2157_v16  ;;  %v1981_v30 = vor.u32 %v1980_v55, %v1979_v58 }
 0x26f   :  { %v9837_v18 = vmul.u32.u64.low %v2160_v1, %v2155_v43  ;;  %v9838_v12 = vmul.u32.u64.high %v2160_v1, %v2155_v43, %v9837_v18  ;;  %v2077_v48 = vclz %v7597_v39  ;;  %v2159_v31 = vsel %vm2145_vm4, %v2156_v26, %v2158_v61 }
 0x270   :  { %v7604_v29 = vadd.s32 4294967169, %v2219_v35  ;;  %v1888_v24 = vsel %vm1805_vm5, %v1887_v51, %v1886_v0  ;;  %v1993_v9 = vsel %vm1908_vm12, %v1992_v40, %v9723_v13  ;;  %vm2011_vm10 = vcmp.lt.s32.totalorder %v9020_v34, 0 }
 0x271   :  { %v9848_v52 = vmul.u32.u64.low %v2160_v1, %v2159_v31  ;;  %v9849_v11 = vmul.u32.u64.high %v2160_v1, %v2159_v31, %v9848_v52  ;;  %8070 = vsinq.f32 %v9697_v20  ;;  %v1986_v6 = vand.u32 2147483647, %v1985_v23 }
 0x272   :  { %v2151_v39 = vsel %vm2145_vm4, %v2148_v59, %v2150_v28  ;;  %v2225_v44 = vadd.s32 1, %v7604_v29  ;;  %8072 = vcosq.f32 %v9796_v62  ;;  %v9855_v61 = vand.u32 3, %v9788_v8 }
 0x273   :  { %v7598_v0 = vadd.s32 4294967294, %v2077_v48  ;;  %v2170_v51 = vadd.s32 1, %v9838_v12  ;;  %v1891_v13 = vsel %vm9740_vm0, %v8833_v57, %v1888_v24  ;;  %v1988_v40 = vcvt.s32.f32 %v1981_v30  ;;  %v7989_v48 = vld [vmem:[%s11684_s3 + $0xb4] ss:$8 sps:$4 sm:$0xff]   ;;  %v9897_v24 = vpop.f32.mrb[26].mxu0 }
 0x274   :  { %11977 = vst [vmem:[#allocation80_spill] sm:$0xff] %v9855_v61  ;;  %v1995_v20 = vsel %vm9824_vm15, 0, %v1993_v9  ;;  %vm2226_vm5 = vcmp.gt.s32.totalorder %v2225_v44, 0  ;;  %v2167_v23 = vmul.u32 %v2160_v1, %v2151_v39  ;;  %vm2169_vm13 = vc.u32 %v9849_v11, %v9837_v18  ;;  %v7991_v1 = vld [vmem:[%s11684_s3 + $0xb0] ss:$8 sps:$4 sm:$0xff]   ;;  %7145 = vmatprep.subr.bf16.mxu1 %v7989_v48  ;;  %11985 = vst [vmem:[#allocation84_spill] sm:$0xff] %v9897_v24 }
 0x275   :  { %v11978_v29 = vand.u32 2147483647, %v9191_v27  ;;  %v2227_v35 = vsel %vm2226_vm5, %v2225_v44, 0  ;;  %8074 = vsinq.f32 %v9796_v62  ;;  %v1989_v38 = vmul.f32 %v1988_v40, %v1986_v6  ;;  %7146 = vmatpush1.bf16.xpose.msra.mxu1 %v7991_v1 }
 0x276   :  { %v2095_v58 = vsub.s32 4, %v9809_v37  ;;  %v2171_v47 = vsel %vm2169_vm13, %v2170_v51, %v9838_v12  ;;  %8076 = vcosq.f32 %v1891_v13  ;;  %v11979_v7 = vand.u32 2147483647, %v9020_v34 }
 0x277   :  { %v2222_v17 = vand.u32 8388607, %v11978_v29  ;;  %vm7599_vm0 = vcmp.lt.s32.totalorder %v7598_v0, 0  ;;  %v2172_v19 = vadd.s32 %v2171_v47, %v2167_v23  ;;  %v2229_v21 = vand.u32 31, %v2227_v35 }
 0x278   :  { %vm9878_vm14 = vcmp.le.f32.partialorder %v11979_v7, 0.7853982  ;;  %8078 = vsinq.f32 %v1891_v13  ;;  %v9883_v62 = vadd.s32 3, %v9788_v8  ;;  %v9885_v33 = vand.u32 3, %v1995_v20 }
 0x279   :  { %v9887_v26 = vadd.s32 3, %v1995_v20  ;;  %v2173_v16 = vadd.s32 536870912, %v2172_v19  ;;  %v2223_v59 = vor.u32 8388608, %v2222_v17  ;;  %v2230_v43 = vsub.s32 32, %v2229_v21 }
 0x27a   :  { %11982 = vst [vmem:[#allocation81_spill] sm:$0xff] %v9883_v62  ;;  %11983 = vst [vmem:[#allocation82_spill] sm:$0xff] %v9885_v33  ;;  %v1990_v12 = vxor.u32 2147483648, %v1989_v38  ;;  %v2065_v30 = vadd.s32 %v9756_v49, %v9762_v53  ;;  %v9892_v31 = vsel %vm7599_vm0, 0, %v7598_v0  ;;  %v2096_v8 = vsel %vm2011_vm10, %v2095_v58, %v9809_v37 }
 0x27b   :  { %11984 = vst [vmem:[#allocation83_spill] sm:$0xff] %v9887_v26  ;;  %v9899_v9 = vshrl.u32 %v2173_v16, 30  ;;  %v2232_v52 = vshll.u32 %v11868_v4, %v2229_v21  ;;  %v2233_v6 = vshrl.u32 %v11873_v14, %v2230_v43  ;;  %v2236_v39 = vshrl.u32 %v11855_v2, %v2230_v43  ;;  %v9904_v44 = vpop.eup %8070 }
 0x27c   :  { %v2235_v49 = vshll.u32 %v11873_v14, %v2229_v21  ;;  %v2238_v53 = vshll.u32 %v11855_v2, %v2229_v21  ;;  %v2239_v0 = vshrl.u32 %v11856_v42, %v2230_v43  ;;  %v2242_v37 = vshrl.u32 %v11859_v3, %v2230_v43  ;;  %v9910_v51 = vpop.eup %8072 }
 0x27d   :  { %11986 = vst [vmem:[#allocation85_spill] sm:$0xff] %v9910_v51  ;;  %v2085_v13 = vsub.s32 4294967266, %v9892_v31  ;;  %v2175_v40 = vshll.u32 %v9899_v9, 30  ;;  %v2228_v20 = vshrl.u32 %v2227_v35, 5  ;;  %v2241_v23 = vshll.u32 %v11856_v42, %v2229_v21 }
 0x27e   :  { %v2234_v29 = vor.u32 %v2233_v6, %v2232_v52  ;;  %v2237_v17 = vor.u32 %v2236_v39, %v2235_v49  ;;  %v2240_v48 = vor.u32 %v2239_v0, %v2238_v53  ;;  %v2321_v58 = vand.u32 2139095040, %v9298_v45 }
 0x27f   :  { %v9916_v47 = vsub.s32 %v2172_v19, %v2175_v40  ;;  %v2243_v1 = vor.u32 %v2242_v37, %v2241_v23  ;;  %v2244_v7 = vshll.u32 %v11859_v3, %v2229_v21  ;;  %v2245_v16 = vshrl.u32 %v11874_v60, %v2230_v43  ;;  %v9920_v28 = vpop.eup %8074 }
 0x280   :  { %11987 = vst [vmem:[#allocation86_spill] sm:$0xff] %v9920_v28  ;;  %v1991_v33 = vsel %vm1908_vm12, %v1990_v12, %v1989_v38  ;;  %v2081_v35 = vsub.s32 32, %v9892_v31  ;;  %v9927_v52 = vsel %vm9878_vm14, 0, %v2096_v8  ;;  %v2263_v6 = vshll.u32 %v2223_v59, 8  ;;  %v9929_v39 = vpop.eup %8076 }
 0x281   :  { %11988 = vst [vmem:[#allocation87_spill] sm:$0xff] %v9929_v39  ;;  %v2086_v19 = vadd.s32 127, %v2085_v13  ;;  %v2178_v49 = vsub.s32 0, %v9916_v47  ;;  %v2246_v21 = vor.u32 %v2245_v16, %v2244_v7  ;;  %vm2247_vm11 = vcmp.lt.s32.totalorder %v2228_v20, 1 }
 0x282   :  { %v9932_v53 = vpop.eup %8078  ;;  %vm2114_vm3 = vcmp.lt.s32.totalorder %v9099_v56, 0  ;;  %v2231_v38 = vshrl.u32 %v11868_v4, %v2230_v43  ;;  %vm2250_vm8 = vcmp.lt.s32.totalorder %v2228_v20, 4  ;;  %v2255_v12 = vsel %vm2247_vm11, %v2234_v29, %v2237_v17 }
 0x283   :  { %v2322_v0 = vshrl.u32 %v2321_v58, 23  ;;  %v7601_v8 = vmin.u32 %v2178_v49, %v9916_v47  ;;  %vm2249_vm12 = vcmp.lt.s32.totalorder %v2228_v20, 3  ;;  %v2252_v59 = vsel %vm2250_vm8, %v2240_v48, 2102212464 }
 0x284   :  { %v2256_v37 = vsel %vm2250_vm8, %v2243_v1, 920167782  ;;  %vm2248_vm9 = vcmp.lt.s32.totalorder %v2228_v20, 2  ;;  %v2259_v40 = vsel %vm2247_vm11, %v2237_v17, %v2240_v48  ;;  %v2260_v23 = vsel %vm2250_vm8, %v2246_v21, 1326507024 }
 0x285   :  { %v2257_v13 = vsel %vm2249_vm12, %v2240_v48, %v2256_v37  ;;  %v2087_v7 = vshll.u32 %v2086_v19, 23  ;;  %v11989_v16 = vand.u32 2147483647, %v9099_v56  ;;  %v2180_v43 = vclz %v7601_v8 }
 0x286   :  { %v2251_v58 = vsel %vm2247_vm11, %v2231_v38, %v2234_v29  ;;  %v2258_v49 = vsel %vm2248_vm9, %v2255_v12, %v2257_v13  ;;  %v2253_v51 = vsel %vm2249_vm12, %v2237_v17, %v2252_v59  ;;  %v2261_v28 = vsel %vm2249_vm12, %v2243_v1, %v2260_v23 }
 0x287   :  { %vm9941_vm1 = vcmp.le.f32.partialorder %v11989_v16, 0.7853982  ;;  %v9947_v61 = vmul.u32.u64.low %v2263_v6, %v2258_v49  ;;  %v9948_v57 = vmul.u32.u64.high %v2263_v6, %v2258_v49, %v9947_v61  ;;  %v2083_v48 = vshrl.u32 %v2065_v30, %v2081_v35 }
 0x288   :  { %v7602_v21 = vadd.s32 4294967294, %v2180_v43  ;;  %v2198_v19 = vsub.s32 4, %v9899_v9  ;;  %v2262_v37 = vsel %vm2248_vm9, %v2259_v40, %v2261_v28  ;;  %v1994_v8 = vsel %vm9824_vm15, %v8927_v46, %v1991_v33 }
 0x289   :  { %v9956_v16 = vmul.u32.u64.low %v2263_v6, %v2262_v37  ;;  %v9957_v29 = vmul.u32.u64.high %v2263_v6, %v2262_v37, %v9956_v16  ;;  %v7608_v38 = vadd.s32 4294967169, %v2322_v0  ;;  %v2082_v17 = vshll.u32 %v9820_v50, %v9892_v31 }
 0x28a   :  { %v2088_v1 = vor.u32 4788187, %v2087_v7  ;;  %vm7603_vm6 = vcmp.lt.s32.totalorder %v7602_v21, 0  ;;  %v2254_v30 = vsel %vm2248_vm9, %v2251_v58, %v2253_v51  ;;  %v9963_v35 = vand.u32 3, %v9927_v52  ;;  %v9988_v16 = vpop.f32.mrb[27].mxu0 }
 0x28b   :  { %v9965_v12 = vsel %vm7603_vm6, 0, %v7602_v21  ;;  %v2273_v28 = vadd.s32 1, %v9948_v57  ;;  %v2328_v22 = vadd.s32 1, %v7608_v38  ;;  %8080 = vcosq.f32 %v1994_v8  ;;  %11995 = vst [vmem:[#allocation90_spill] sm:$0xff] %v9988_v16 }
 0x28c   :  { %11992 = vst [vmem:[#allocation88_spill] sm:$0xff] %v9963_v35  ;;  %v2084_v33 = vor.u32 %v2083_v48, %v2082_v17  ;;  %v2188_v59 = vsub.s32 4294967266, %v9965_v12  ;;  %v2199_v50 = vsel %vm2114_vm3, %v2198_v19, %v9899_v9  ;;  %v2270_v31 = vmul.u32 %v2263_v6, %v2254_v30 }
 0x28d   :  { %vm2272_vm15 = vc.u32 %v9957_v29, %v9947_v61  ;;  %v11993_v51 = vand.u32 2147483647, %v9298_v45  ;;  %vm2329_vm4 = vcmp.gt.s32.totalorder %v2328_v22, 0  ;;  %v2089_v0 = vand.u32 2147483647, %v2088_v1 }
 0x28e   :  { %v2274_v13 = vsel %vm2272_vm15, %v2273_v28, %v9948_v57  ;;  %v2330_v40 = vsel %vm2329_vm4, %v2328_v22, 0  ;;  %v2424_v23 = vand.u32 2139095040, %v9393_v10  ;;  %v2189_v7 = vadd.s32 127, %v2188_v59 }
 0x28f   :  { %v2325_v20 = vand.u32 8388607, %v11993_v51  ;;  %v9980_v43 = vsel %vm9941_vm1, 0, %v2199_v50  ;;  %v2275_v9 = vadd.s32 %v2274_v13, %v2270_v31  ;;  %v2332_v6 = vand.u32 31, %v2330_v40 }
 0x290   :  { %8082 = vsinq.f32 %v1994_v8  ;;  %v2091_v58 = vcvt.s32.f32 %v2084_v33  ;;  %v9983_v49 = vadd.s32 3, %v9927_v52  ;;  %v2168_v57 = vadd.s32 %v9837_v18, %v9849_v11 }
 0x291   :  { %v2276_v21 = vadd.s32 536870912, %v2275_v9  ;;  %v2326_v19 = vor.u32 8388608, %v2325_v20  ;;  %v2333_v37 = vsub.s32 32, %v2332_v6  ;;  %v2184_v17 = vsub.s32 32, %v9965_v12 }
 0x292   :  { %11994 = vst [vmem:[#allocation89_spill] sm:$0xff] %v9983_v49  ;;  %v2092_v38 = vmul.f32 %v2091_v58, %v2089_v0  ;;  %v9992_v1 = vand.u32 3, %v9980_v43  ;;  %v2425_v8 = vshrl.u32 %v2424_v23, 23  ;;  %v2190_v30 = vshll.u32 %v2189_v7, 23 }
 0x293   :  { %v9994_v52 = vshrl.u32 %v2276_v21, 30  ;;  %v2336_v28 = vshrl.u32 %v11873_v14, %v2333_v37  ;;  %v2339_v22 = vshrl.u32 %v11855_v2, %v2333_v37  ;;  %v2335_v18 = vshll.u32 %v11868_v4, %v2332_v6 }
 0x294   :  { %11996 = vst [vmem:[#allocation91_spill] sm:$0xff] %v9992_v1  ;;  %v2338_v11 = vshll.u32 %v11873_v14, %v2332_v6  ;;  %v2342_v33 = vshrl.u32 %v11856_v42, %v2333_v37  ;;  %v2345_v59 = vshrl.u32 %v11859_v3, %v2333_v37  ;;  %v2331_v31 = vshrl.u32 %v2330_v40, 5 }
 0x295   :  { %v2278_v50 = vshll.u32 %v9994_v52, 30  ;;  %v2341_v51 = vshll.u32 %v11855_v2, %v2332_v6  ;;  %v2344_v20 = vshll.u32 %v11856_v42, %v2332_v6  ;;  %v10005_v0 = vpop.eup %8080  ;;  %v2186_v13 = vshrl.u32 %v2168_v57, %v2184_v17 }
 0x296   :  { %11997 = vst [vmem:[#allocation92_spill] sm:$0xff] %v10005_v0  ;;  %v2337_v23 = vor.u32 %v2336_v28, %v2335_v18  ;;  %v2340_v7 = vor.u32 %v2339_v22, %v2338_v11  ;;  %v2348_v58 = vshrl.u32 %v11874_v60, %v2333_v37  ;;  %v2347_v46 = vshll.u32 %v11859_v3, %v2332_v6 }
 0x297   :  { %v10008_v21 = vsub.s32 %v2275_v9, %v2278_v50  ;;  %v2343_v48 = vor.u32 %v2342_v33, %v2341_v51  ;;  %v2346_v1 = vor.u32 %v2345_v59, %v2344_v20  ;;  %v2093_v35 = vxor.u32 2147483648, %v2092_v38 }
 0x298   :  { %v2185_v40 = vshll.u32 %v9916_v47, %v9965_v12  ;;  %v2191_v49 = vor.u32 4788187, %v2190_v30  ;;  %v2366_v62 = vshll.u32 %v2326_v19, 8  ;;  %v2349_v0 = vor.u32 %v2348_v58, %v2347_v46 }
 0x299   :  { %v2281_v39 = vsub.s32 0, %v10008_v21  ;;  %vm2350_vm5 = vcmp.lt.s32.totalorder %v2331_v31, 1  ;;  %v7612_v57 = vadd.s32 4294967169, %v2425_v8  ;;  %v2334_v9 = vshrl.u32 %v11868_v4, %v2333_v37 }
 0x29a   :  { %v10014_v17 = vpop.eup %8082  ;;  %v2187_v28 = vor.u32 %v2186_v13, %v2185_v40  ;;  %vm2353_vm13 = vcmp.lt.s32.totalorder %v2331_v31, 4  ;;  %v2358_v22 = vsel %vm2350_vm5, %v2337_v23, %v2340_v7  ;;  %vm2352_vm0 = vcmp.lt.s32.totalorder %v2331_v31, 3 }
 0x29b   :  { %11998 = vst [vmem:[#allocation93_spill] sm:$0xff] %v10014_v17  ;;  %v7605_v6 = vmin.u32 %v2281_v39, %v10008_v21  ;;  %v2355_v18 = vsel %vm2353_vm13, %v2343_v48, 2102212464  ;;  %v2359_v47 = vsel %vm2353_vm13, %v2346_v1, 920167782  ;;  %vm2217_vm11 = vcmp.lt.s32.totalorder %v9191_v27, 0 }
 0x29c   :  { %v2192_v12 = vand.u32 2147483647, %v2191_v49  ;;  %vm2351_vm8 = vcmp.lt.s32.totalorder %v2331_v31, 2  ;;  %v2360_v46 = vsel %vm2352_vm0, %v2343_v48, %v2359_v47  ;;  %v2362_v19 = vsel %vm2350_vm5, %v2340_v7, %v2343_v48 }
 0x29d   :  { %v2283_v8 = vclz %v7605_v6  ;;  %v2354_v30 = vsel %vm2350_vm5, %v2334_v9, %v2337_v23  ;;  %v2361_v37 = vsel %vm2351_vm8, %v2358_v22, %v2360_v46  ;;  %v2363_v11 = vsel %vm2353_vm13, %v2349_v0, 1326507024 }
 0x29e   :  { %v2356_v33 = vsel %vm2352_vm0, %v2340_v7, %v2355_v18  ;;  %v2364_v59 = vsel %vm2352_vm0, %v2346_v1, %v2363_v11  ;;  %v10023_v50 = vmul.u32.u64.low %v2366_v62, %v2361_v37  ;;  %v10024_v39 = vmul.u32.u64.high %v2366_v62, %v2361_v37, %v10023_v50  ;;  %v10062_v37 = vpop.f32.mrb[28].mxu0 }
 0x29f   :  { %v2094_v49 = vsel %vm2011_vm10, %v2093_v35, %v2092_v38  ;;  %v7606_v51 = vadd.s32 4294967294, %v2283_v8  ;;  %v2365_v20 = vsel %vm2351_vm8, %v2362_v19, %v2364_v59  ;;  %v2431_v13 = vadd.s32 1, %v7612_v57  ;;  %12004 = vst [vmem:[#allocation95_spill] sm:$0xff] %v10062_v37 }
 0x2a0   :  { %v2194_v48 = vcvt.s32.f32 %v2187_v28  ;;  %v10030_v58 = vmul.u32.u64.low %v2366_v62, %v2365_v20  ;;  %v10031_v40 = vmul.u32.u64.high %v2366_v62, %v2365_v20, %v10030_v58  ;;  %v11999_v23 = vand.u32 2147483647, %v9393_v10 }
 0x2a1   :  { %vm7607_vm12 = vcmp.lt.s32.totalorder %v7606_v51, 0  ;;  %v2301_v1 = vsub.s32 4, %v9994_v52  ;;  %v2357_v7 = vsel %vm2351_vm8, %v2354_v30, %v2356_v33  ;;  %vm2432_vm9 = vcmp.gt.s32.totalorder %v2431_v13, 0 }
 0x2a2   :  { %v2428_v0 = vand.u32 8388607, %v11999_v23  ;;  %v2195_v9 = vmul.f32 %v2194_v48, %v2192_v12  ;;  %v2286_v22 = vsel %vm7607_vm12, 0, %v7606_v51  ;;  %v2376_v35 = vadd.s32 1, %v10024_v39 }
 0x2a3   :  { %v2433_v38 = vsel %vm2432_vm9, %v2431_v13, 0  ;;  %v10041_v57 = vsel %vm9878_vm14, %v9020_v34, %v2094_v49  ;;  %v10044_v28 = vadd.s32 3, %v9980_v43  ;;  %v12001_v6 = vand.u32 2147483647, %v9191_v27 }
 0x2a4   :  { %v2291_v31 = vsub.s32 4294967266, %v2286_v22  ;;  %v2527_v47 = vand.u32 2139095040, %v9511_v15  ;;  %v2373_v12 = vmul.u32 %v2366_v62, %v2357_v7  ;;  %vm2375_vm6 = vc.u32 %v10031_v40, %v10023_v50 }
 0x2a5   :  { %12000 = vst [vmem:[#allocation94_spill] sm:$0xff] %v10044_v28  ;;  %vm10048_vm10 = vcmp.le.f32.partialorder %v12001_v6, 0.7853982  ;;  %v2435_v46 = vand.u32 31, %v2433_v38  ;;  %v2271_v43 = vadd.s32 %v9947_v61, %v9957_v29  ;;  %v2302_v19 = vsel %vm2217_vm11, %v2301_v1, %v9994_v52 }
 0x2a6   :  { %v2377_v8 = vsel %vm2375_vm6, %v2376_v35, %v10024_v39  ;;  %v2429_v30 = vor.u32 8388608, %v2428_v0  ;;  %v2196_v11 = vxor.u32 2147483648, %v2195_v9  ;;  %v2292_v62 = vadd.s32 127, %v2291_v31 }
 0x2a7   :  { %v2378_v33 = vadd.s32 %v2377_v8, %v2373_v12  ;;  %v2436_v59 = vsub.s32 32, %v2435_v46  ;;  %v2287_v49 = vsub.s32 32, %v2286_v22  ;;  %v2434_v51 = vshrl.u32 %v2433_v38, 5 }
 0x2a8   :  { %v2438_v20 = vshll.u32 %v11868_v4, %v2435_v46  ;;  %v2528_v13 = vshrl.u32 %v2527_v47, 23  ;;  %v2441_v29 = vshll.u32 %v11873_v14, %v2435_v46  ;;  %v2444_v39 = vshll.u32 %v11855_v2, %v2435_v46 }
 0x2a9   :  { %v2379_v48 = vadd.s32 536870912, %v2378_v33  ;;  %v2439_v61 = vshrl.u32 %v11873_v14, %v2436_v59  ;;  %v2442_v52 = vshrl.u32 %v11855_v2, %v2436_v59  ;;  %v2445_v58 = vshrl.u32 %v11856_v42, %v2436_v59 }
 0x2aa   :  { %v2447_v23 = vshll.u32 %v11856_v42, %v2435_v46  ;;  %v2448_v0 = vshrl.u32 %v11859_v3, %v2436_v59  ;;  %v2293_v1 = vshll.u32 %v2292_v62, 23  ;;  %v2450_v47 = vshll.u32 %v11859_v3, %v2435_v46 }
 0x2ab   :  { %v10072_v7 = vshrl.u32 %v2379_v48, 30  ;;  %v2440_v35 = vor.u32 %v2439_v61, %v2438_v20  ;;  %v2443_v38 = vor.u32 %v2442_v52, %v2441_v29  ;;  %v2446_v6 = vor.u32 %v2445_v58, %v2444_v39 }
 0x2ac   :  { %v2449_v31 = vor.u32 %v2448_v0, %v2447_v23  ;;  %v2451_v12 = vshrl.u32 %v11874_v60, %v2436_v59  ;;  %v2289_v8 = vshrl.u32 %v2271_v43, %v2287_v49  ;;  %v2304_v55 = vsel %vm10048_vm10, 0, %v2302_v19 }
 0x2ad   :  { %v2381_v28 = vshll.u32 %v10072_v7, 30  ;;  %v2469_v17 = vshll.u32 %v2429_v30, 8  ;;  %v2197_v62 = vsel %vm2114_vm3, %v2196_v11, %v2195_v9  ;;  %v2288_v48 = vshll.u32 %v10008_v21, %v2286_v22 }
 0x2ae   :  { %v2452_v20 = vor.u32 %v2451_v12, %v2450_v47  ;;  %v7616_v61 = vadd.s32 4294967169, %v2528_v13  ;;  %v2437_v46 = vshrl.u32 %v11868_v4, %v2436_v59  ;;  %vm2453_vm14 = vcmp.lt.s32.totalorder %v2434_v51, 1 }
 0x2af   :  { %v10082_v29 = vsub.s32 %v2378_v33, %v2381_v28  ;;  %vm2456_vm15 = vcmp.lt.s32.totalorder %v2434_v51, 4  ;;  %v2294_v43 = vor.u32 4788187, %v2293_v1  ;;  %v2461_v52 = vsel %vm2453_vm14, %v2440_v35, %v2443_v38 }
 0x2b0   :  { %v2458_v49 = vsel %vm2456_vm15, %v2446_v6, 2102212464  ;;  %v2462_v19 = vsel %vm2456_vm15, %v2449_v31, 920167782  ;;  %v2290_v39 = vor.u32 %v2289_v8, %v2288_v48  ;;  %vm2454_vm4 = vcmp.lt.s32.totalorder %v2434_v51, 2 }
 0x2b1   :  { %v2384_v30 = vsub.s32 0, %v10082_v29  ;;  %vm2455_vm5 = vcmp.lt.s32.totalorder %v2434_v51, 3  ;;  %v2457_v9 = vsel %vm2453_vm14, %v2437_v46, %v2440_v35  ;;  %v2465_v21 = vsel %vm2453_vm14, %v2443_v38, %v2446_v6 }
 0x2b2   :  { %v2463_v11 = vsel %vm2455_vm5, %v2446_v6, %v2462_v19  ;;  %v2466_v22 = vsel %vm2456_vm15, %v2452_v20, 1326507024  ;;  %vm2320_vm3 = vcmp.lt.s32.totalorder %v9298_v45, 0  ;;  %v2459_v33 = vsel %vm2455_vm5, %v2443_v38, %v2458_v49 }
 0x2b3   :  { %v7609_v28 = vmin.u32 %v2384_v30, %v10082_v29  ;;  %v2464_v59 = vsel %vm2454_vm4, %v2461_v52, %v2463_v11  ;;  %v2467_v13 = vsel %vm2455_vm5, %v2449_v31, %v2466_v22  ;;  %v2295_v58 = vand.u32 2147483647, %v2294_v43  ;;  %v7994_v30 = vld [vmem:[%s11684_s3 + $0x44] ss:$8 sps:$4 sm:$0xff]   ;;  %v7992_v22 = vld [vmem:[%s11684_s3 + $0x40] ss:$8 sps:$4 sm:$0xff]  }
 0x2b4   :  { %v2468_v23 = vsel %vm2454_vm4, %v2465_v21, %v2467_v13  ;;  %v10090_v0 = vmul.u32.u64.low %v2469_v17, %v2464_v59  ;;  %v10091_v1 = vmul.u32.u64.high %v2469_v17, %v2464_v59, %v10090_v0  ;;  %8084 = vcosq.f32 %v10041_v57  ;;  %7324 = vmatprep.subr.bf16.mxu0 %v7994_v30  ;;  %v10133_v59 = vpop.f32.mrb[29].mxu0 }
 0x2b5   :  { %v2386_v35 = vclz %v7609_v28  ;;  %v10095_v6 = vmul.u32.u64.low %v2469_v17, %v2468_v23  ;;  %v10096_v47 = vmul.u32.u64.high %v2469_v17, %v2468_v23, %v10095_v6  ;;  %8086 = vsinq.f32 %v10041_v57  ;;  %7325 = vmatpush1.bf16.xpose.msra.mxu0 %v7992_v22 }
 0x2b6   :  { %v2297_v12 = vcvt.s32.f32 %v2290_v39  ;;  %v2460_v38 = vsel %vm2454_vm4, %v2457_v9, %v2459_v33  ;;  %v2534_v8 = vadd.s32 1, %v7616_v61  ;;  %v10103_v31 = vsel %vm9941_vm1, %v9099_v56, %v2197_v62 }
 0x2b7   :  { %v10105_v48 = vand.u32 3, %v2304_v55  ;;  %v7610_v20 = vadd.s32 4294967294, %v2386_v35  ;;  %v12006_v46 = vand.u32 2147483647, %v9511_v15  ;;  %v2404_v52 = vsub.s32 4, %v10072_v7 }
 0x2b8   :  { %v2298_v49 = vmul.f32 %v2297_v12, %v2295_v58  ;;  %v2479_v57 = vadd.s32 1, %v10091_v1  ;;  %vm2535_vm13 = vcmp.gt.s32.totalorder %v2534_v8, 0  ;;  %v2476_v51 = vmul.u32 %v2469_v17, %v2460_v38 }
 0x2b9   :  { %12005 = vst [vmem:[#allocation96_spill] sm:$0xff] %v10105_v48  ;;  %v10109_v43 = vand.u32 8388607, %v12006_v46  ;;  %vm7611_vm0 = vcmp.lt.s32.totalorder %v7610_v20, 0  ;;  %vm2478_vm8 = vc.u32 %v10096_v47, %v10090_v0  ;;  %v2536_v26 = vsel %vm2535_vm13, %v2534_v8, 0 }
 0x2ba   :  { %v10115_v62 = vadd.s32 3, %v2304_v55  ;;  %v2389_v61 = vsel %vm7611_vm0, 0, %v7610_v20  ;;  %v2480_v19 = vsel %vm2478_vm8, %v2479_v57, %v10091_v1  ;;  %v2538_v39 = vand.u32 31, %v2536_v26 }
 0x2bb   :  { %v2374_v9 = vadd.s32 %v10023_v50, %v10031_v40  ;;  %v2390_v11 = vsub.s32 32, %v2389_v61  ;;  %v2394_v21 = vsub.s32 4294967266, %v2389_v61  ;;  %v2481_v17 = vadd.s32 %v2480_v19, %v2476_v51 }
 0x2bc   :  { %12007 = vst [vmem:[#allocation97_spill] sm:$0xff] %v10115_v62  ;;  %8088 = vcosq.f32 %v10103_v31  ;;  %v10130_v55 = vsel %vm2320_vm3, %v2404_v52, %v10072_v7  ;;  %v2532_v28 = vor.u32 8388608, %v10109_v43  ;;  %v2539_v33 = vsub.s32 32, %v2538_v39 }
 0x2bd   :  { %v2299_v50 = vxor.u32 2147483648, %v2298_v49  ;;  %v2392_v40 = vshrl.u32 %v2374_v9, %v2390_v11  ;;  %v2395_v13 = vadd.s32 127, %v2394_v21  ;;  %v2482_v58 = vadd.s32 536870912, %v2481_v17 }
 0x2be   :  { %v2391_v23 = vshll.u32 %v10082_v29, %v2389_v61  ;;  %v2541_v1 = vshll.u32 %v11868_v4, %v2538_v39  ;;  %v2542_v35 = vshrl.u32 %v11873_v14, %v2539_v33  ;;  %v2545_v7 = vshrl.u32 %v11855_v2, %v2539_v33  ;;  %v10139_v6 = vpop.eup %8084 }
 0x2bf   :  { %v2396_v12 = vshll.u32 %v2395_v13, 23  ;;  %v10141_v38 = vshrl.u32 %v2482_v58, 30  ;;  %v2548_v8 = vshrl.u32 %v11856_v42, %v2539_v33  ;;  %v2551_v20 = vshrl.u32 %v11859_v3, %v2539_v33  ;;  %v10145_v46 = vpop.eup %8086 }
 0x2c0   :  { %v2393_v43 = vor.u32 %v2392_v40, %v2391_v23  ;;  %v2537_v52 = vshrl.u32 %v2536_v26, 5  ;;  %v2544_v29 = vshll.u32 %v11873_v14, %v2538_v39  ;;  %v2550_v57 = vshll.u32 %v11856_v42, %v2538_v39 }
 0x2c1   :  { %v2397_v51 = vor.u32 4788187, %v2396_v12  ;;  %v2484_v61 = vshll.u32 %v10141_v38, 30  ;;  %v2543_v19 = vor.u32 %v2542_v35, %v2541_v1  ;;  %v2547_v30 = vshll.u32 %v11855_v2, %v2538_v39 }
 0x2c2   :  { %v2546_v9 = vor.u32 %v2545_v7, %v2544_v29  ;;  %v2552_v11 = vor.u32 %v2551_v20, %v2550_v57  ;;  %v2553_v21 = vshll.u32 %v11859_v3, %v2538_v39  ;;  %v2554_v22 = vshrl.u32 %v11874_v60, %v2539_v33 }
 0x2c3   :  { %v2300_v40 = vsel %vm2217_vm11, %v2299_v50, %v2298_v49  ;;  %v12008_v26 = vand.u32 2147483647, %v9298_v45  ;;  %v2398_v58 = vand.u32 2147483647, %v2397_v51  ;;  %v10161_v23 = vsub.s32 %v2481_v17, %v2484_v61 }
 0x2c4   :  { %v2549_v1 = vor.u32 %v2548_v8, %v2547_v30  ;;  %v2400_v35 = vcvt.s32.f32 %v2393_v43  ;;  %v2540_v7 = vshrl.u32 %v11868_v4, %v2539_v33  ;;  %v2555_v12 = vor.u32 %v2554_v22, %v2553_v21 }
 0x2c5   :  { %vm10157_vm1 = vcmp.le.f32.partialorder %v12008_v26, 0.7853982  ;;  %v2630_v39 = vand.u32 2139095040, %v9621_v54  ;;  %vm2423_vm12 = vcmp.lt.s32.totalorder %v9393_v10, 0  ;;  %v2487_v49 = vsub.s32 0, %v10161_v23 }
 0x2c6   :  { %vm2556_vm11 = vcmp.lt.s32.totalorder %v2537_v52, 1  ;;  %vm2557_vm9 = vcmp.lt.s32.totalorder %v2537_v52, 2  ;;  %vm2559_vm6 = vcmp.lt.s32.totalorder %v2537_v52, 4  ;;  %v10167_v50 = vpop.eup %8088  ;;  %v2401_v20 = vmul.f32 %v2400_v35, %v2398_v58 }
 0x2c7   :  { %12011 = vst [vmem:[#allocation98_spill] sm:$0xff] %v10167_v50  ;;  %vm2558_vm14 = vcmp.lt.s32.totalorder %v2537_v52, 3  ;;  %v2564_v17 = vsel %vm2556_vm11, %v2543_v19, %v2546_v9  ;;  %v2565_v8 = vsel %vm2559_vm6, %v2552_v11, 920167782  ;;  %v7613_v43 = vmin.u32 %v2487_v49, %v10161_v23 }
 0x2c8   :  { %v2561_v33 = vsel %vm2559_vm6, %v2549_v1, 2102212464  ;;  %v2566_v29 = vsel %vm2558_vm14, %v2549_v1, %v2565_v8  ;;  %v2568_v57 = vsel %vm2556_vm11, %v2546_v9, %v2549_v1  ;;  %v12012_v51 = vand.u32 2147483647, %v9393_v10 }
 0x2c9   :  { %v2567_v30 = vsel %vm2557_vm9, %v2564_v17, %v2566_v29  ;;  %v2569_v21 = vsel %vm2559_vm6, %v2555_v12, 1326507024  ;;  %v2572_v22 = vshll.u32 %v2532_v28, 8  ;;  %v2631_v26 = vshrl.u32 %v2630_v39, 23 }
 0x2ca   :  { %vm10175_vm15 = vcmp.le.f32.partialorder %v12012_v51, 0.7853982  ;;  %v2489_v58 = vclz %v7613_v43  ;;  %v2507_v35 = vsub.s32 4, %v10141_v38  ;;  %v2560_v49 = vsel %vm2556_vm11, %v2540_v7, %v2543_v19 }
 0x2cb   :  { %v2570_v8 = vsel %vm2558_vm14, %v2552_v11, %v2569_v21  ;;  %v2562_v1 = vsel %vm2558_vm14, %v2546_v9, %v2561_v33  ;;  %v10185_v51 = vmul.u32.u64.low %v2572_v22, %v2567_v30  ;;  %v10186_v56 = vmul.u32.u64.high %v2572_v22, %v2567_v30, %v10185_v51 }
 0x2cc   :  { %v2571_v50 = vsel %vm2557_vm9, %v2568_v57, %v2570_v8  ;;  %v2402_v48 = vxor.u32 2147483648, %v2401_v20  ;;  %v7614_v17 = vadd.s32 4294967294, %v2489_v58  ;;  %v2303_v39 = vsel %vm10048_vm10, %v9191_v27, %v2300_v40 }
 0x2cd   :  { %v10189_v12 = vmul.u32.u64.low %v2572_v22, %v2571_v50  ;;  %v10190_v28 = vmul.u32.u64.high %v2572_v22, %v2571_v50, %v10189_v12  ;;  %v2407_v19 = vsel %vm10157_vm1, 0, %v10130_v55  ;;  %v11798_v9 = vand.u32 2147483647, %v9621_v54 }
 0x2ce   :  { %v7620_v11 = vadd.s32 4294967169, %v2631_v26  ;;  %8090 = vsinq.f32 %v10103_v31  ;;  %vm7615_vm4 = vcmp.lt.s32.totalorder %v7614_v17, 0  ;;  %v2563_v7 = vsel %vm2557_vm9, %v2560_v49, %v2562_v1  ;;  %v7997_v49 = vld [vmem:[%s11684_s3 + $0xc0] ss:$8 sps:$4 sm:$0xff]  }
 0x2cf   :  { %v2733_v43 = vand.u32 2139095040, %v9719_v5  ;;  %v10202_v50 = vsel %vm7615_vm4, 0, %v7614_v17  ;;  %v2508_v18 = vsel %vm2423_vm12, %v2507_v35, %v10141_v38  ;;  %v2582_v40 = vadd.s32 1, %v10186_v56 }
 0x2d0   :  { %v2637_v33 = vadd.s32 1, %v7620_v11  ;;  %8092 = vcosq.f32 %v2303_v39  ;;  %v2403_v55 = vsel %vm2320_vm3, %v2402_v48, %v2401_v20  ;;  %v10210_v29 = vand.u32 3, %v2407_v19  ;;  %v7995_v48 = vld [vmem:[%s11684_s3 + $0xc4] ss:$8 sps:$4 sm:$0xff]  }
 0x2d1   :  { %v2497_v31 = vsub.s32 4294967266, %v10202_v50  ;;  %v2579_v52 = vmul.u32 %v2572_v22, %v2563_v7  ;;  %vm2581_vm10 = vc.u32 %v10190_v28, %v10185_v51  ;;  %v2634_v57 = vand.u32 8388607, %v11798_v9  ;;  %7147 = vmatprep.subr.bf16.mxu1 %v7995_v48 }
 0x2d2   :  { %12015 = vst [vmem:[#allocation99_spill] sm:$0xff] %v10210_v29  ;;  %vm2638_vm5 = vcmp.gt.s32.totalorder %v2637_v33, 0  ;;  %v2510_v38 = vsel %vm10175_vm15, 0, %v2508_v18  ;;  %v2583_v30 = vsel %vm2581_vm10, %v2582_v40, %v10186_v56  ;;  %v2734_v26 = vshrl.u32 %v2733_v43, 23  ;;  %7148 = vmatpush1.bf16.xpose.msra.mxu1 %v7997_v49  ;;  %v10246_v40 = vpop.f32.mrb[30].mxu0 }
 0x2d3   :  { %v2639_v21 = vsel %vm2638_vm5, %v2637_v33, 0  ;;  %v10226_v20 = vsel %vm10157_vm1, %v9298_v45, %v2403_v55  ;;  %v2498_v22 = vadd.s32 127, %v2497_v31  ;;  %v2584_v58 = vadd.s32 %v2583_v30, %v2579_v52 }
 0x2d4   :  { %v2641_v35 = vand.u32 31, %v2639_v21  ;;  %8094 = vsinq.f32 %v2303_v39  ;;  %v10231_v56 = vadd.s32 3, %v2407_v19  ;;  %v2477_v8 = vadd.s32 %v10090_v0, %v10096_v47 }
 0x2d5   :  { %v10236_v17 = vand.u32 3, %v2510_v38  ;;  %v10238_v13 = vadd.s32 3, %v2510_v38  ;;  %v2585_v12 = vadd.s32 536870912, %v2584_v58  ;;  %8096 = vcosq.f32 %v10226_v20 }
 0x2d6   :  { %12016 = vst [vmem:[#allocation100_spill] sm:$0xff] %v10231_v56  ;;  %v2642_v11 = vsub.s32 32, %v2641_v35  ;;  %v2493_v7 = vsub.s32 32, %v10202_v50  ;;  %v2635_v39 = vor.u32 8388608, %v2634_v57  ;;  %v7624_v19 = vadd.s32 4294967169, %v2734_v26 }
 0x2d7   :  { %12017 = vst [vmem:[#allocation101_spill] sm:$0xff] %v10236_v17  ;;  %12018 = vst [vmem:[#allocation102_spill] sm:$0xff] %v10238_v13  ;;  %v2499_v43 = vshll.u32 %v2498_v22, 23  ;;  %v10242_v18 = vshrl.u32 %v2585_v12, 30  ;;  %v2644_v55 = vshll.u32 %v11868_v4, %v2641_v35  ;;  %v2647_v31 = vshll.u32 %v11873_v14, %v2641_v35 }
 0x2d8   :  { %v2645_v0 = vshrl.u32 %v11873_v14, %v2642_v11  ;;  %v2648_v47 = vshrl.u32 %v11855_v2, %v2642_v11  ;;  %v10248_v33 = vpop.eup %8090  ;;  %v2651_v52 = vshrl.u32 %v11856_v42, %v2642_v11  ;;  %v2654_v57 = vshrl.u32 %v11859_v3, %v2642_v11 }
 0x2d9   :  { %12019 = vst [vmem:[#allocation103_spill] sm:$0xff] %v10248_v33  ;;  %v2587_v38 = vshll.u32 %v10242_v18, 30  ;;  %v2640_v30 = vshrl.u32 %v2639_v21, 5  ;;  %v2650_v26 = vshll.u32 %v11855_v2, %v2641_v35  ;;  %v2653_v48 = vshll.u32 %v11856_v42, %v2641_v35 }
 0x2da   :  { %v10257_v22 = vpop.eup %8092  ;;  %v2495_v49 = vshrl.u32 %v2477_v8, %v2493_v7  ;;  %v2646_v12 = vor.u32 %v2645_v0, %v2644_v55  ;;  %v2649_v9 = vor.u32 %v2648_v47, %v2647_v31  ;;  %v2657_v1 = vshrl.u32 %v11874_v60, %v2642_v11 }
 0x2db   :  { %v10260_v29 = vsub.s32 %v2584_v58, %v2587_v38  ;;  %v2652_v56 = vor.u32 %v2651_v52, %v2650_v26  ;;  %v2655_v45 = vor.u32 %v2654_v57, %v2653_v48  ;;  %v2656_v17 = vshll.u32 %v11859_v3, %v2641_v35 }
 0x2dc   :  { %v2494_v21 = vshll.u32 %v10161_v23, %v10202_v50  ;;  %v2500_v13 = vor.u32 4788187, %v2499_v43  ;;  %v2675_v33 = vshll.u32 %v2635_v39, 8  ;;  %v12020_v27 = vand.u32 2147483647, %v9719_v5 }
 0x2dd   :  { %v2590_v8 = vsub.s32 0, %v10260_v29  ;;  %v2658_v7 = vor.u32 %v2657_v1, %v2656_v17  ;;  %vm2659_vm3 = vcmp.lt.s32.totalorder %v2640_v30, 1  ;;  %v2740_v0 = vadd.s32 1, %v7624_v19 }
 0x2de   :  { %v2737_v62 = vand.u32 8388607, %v12020_v27  ;;  %v10268_v47 = vpop.eup %8094  ;;  %v2496_v58 = vor.u32 %v2495_v49, %v2494_v21  ;;  %v2643_v55 = vshrl.u32 %v11868_v4, %v2642_v11  ;;  %vm2662_vm13 = vcmp.lt.s32.totalorder %v2640_v30, 4 }
 0x2df   :  { %v2667_v35 = vsel %vm2659_vm3, %v2646_v12, %v2649_v9  ;;  %v7617_v23 = vmin.u32 %v2590_v8, %v10260_v29  ;;  %vm2661_vm0 = vcmp.lt.s32.totalorder %v2640_v30, 3  ;;  %v2664_v50 = vsel %vm2662_vm13, %v2652_v56, 2102212464  ;;  %v10273_v43 = vpop.eup %8096 }
 0x2e0   :  { %v2668_v39 = vsel %vm2662_vm13, %v2655_v45, 920167782  ;;  %12021 = vst [vmem:[#allocation104_spill] sm:$0xff] %v10273_v43  ;;  %v2501_v27 = vand.u32 2147483647, %v2500_v13  ;;  %vm2660_vm8 = vcmp.lt.s32.totalorder %v2640_v30, 2  ;;  %v2671_v17 = vsel %vm2659_vm3, %v2649_v9, %v2652_v56 }
 0x2e1   :  { %v2669_v1 = vsel %vm2661_vm0, %v2652_v56, %v2668_v39  ;;  %v2592_v19 = vclz %v7617_v23  ;;  %v2663_v31 = vsel %vm2659_vm3, %v2643_v55, %v2646_v12  ;;  %v2672_v52 = vsel %vm2662_vm13, %v2658_v7, 1326507024 }
 0x2e2   :  { %v2670_v11 = vsel %vm2660_vm8, %v2667_v35, %v2669_v1  ;;  %v2665_v57 = vsel %vm2661_vm0, %v2649_v9, %v2664_v50  ;;  %v2673_v38 = vsel %vm2661_vm0, %v2655_v45, %v2672_v52  ;;  %v2503_v49 = vcvt.s32.f32 %v2496_v58 }
 0x2e3   :  { %v10278_v26 = vmul.u32.u64.low %v2675_v33, %v2670_v11  ;;  %v10279_v48 = vmul.u32.u64.high %v2675_v33, %v2670_v11, %v10278_v26  ;;  %v7618_v21 = vadd.s32 4294967294, %v2592_v19  ;;  %v2674_v13 = vsel %vm2660_vm8, %v2671_v17, %v2673_v38 }
 0x2e4   :  { %vm2741_vm1 = vcmp.gt.s32.totalorder %v2740_v0, 0  ;;  %vm2526_vm11 = vcmp.lt.s32.totalorder %v9511_v15, 0  ;;  %v10284_v56 = vmul.u32.u64.low %v2675_v33, %v2674_v13  ;;  %v10285_v8 = vmul.u32.u64.high %v2675_v33, %v2674_v13, %v10284_v56 }
 0x2e5   :  { %v2738_v12 = vor.u32 8388608, %v2737_v62  ;;  %v2742_v55 = vsel %vm2741_vm1, %v2740_v0, 0  ;;  %v2504_v35 = vmul.f32 %v2503_v49, %v2501_v27  ;;  %vm7619_vm9 = vcmp.lt.s32.totalorder %v7618_v21, 0  ;;  %v10293_v62 = vpop.f32.mrb[31].mxu0 }
 0x2e6   :  { %v2666_v45 = vsel %vm2660_vm8, %v2663_v31, %v2665_v57  ;;  %v2744_v9 = vand.u32 31, %v2742_v55  ;;  %8098 = vsinq.f32 %v10226_v20  ;;  %v2595_v7 = vsel %vm7619_vm9, 0, %v7618_v21 }
 0x2e7   :  { %v2685_v58 = vadd.s32 1, %v10279_v48  ;;  %v2580_v50 = vadd.s32 %v10185_v51, %v10190_v28  ;;  %v2596_v39 = vsub.s32 32, %v2595_v7  ;;  %v2600_v1 = vsub.s32 4294967266, %v2595_v7 }
 0x2e8   :  { %v2745_v17 = vsub.s32 32, %v2744_v9  ;;  %v2610_v0 = vsub.s32 4, %v10242_v18  ;;  %v2682_v30 = vmul.u32 %v2675_v33, %v2666_v45  ;;  %vm2684_vm6 = vc.u32 %v10285_v8, %v10278_v26 }
 0x2e9   :  { %v10298_v20 = vshll.u32 %v2738_v12, 8  ;;  %v2505_v27 = vxor.u32 2147483648, %v2504_v35  ;;  %v2601_v19 = vadd.s32 127, %v2600_v1  ;;  %v2686_v31 = vsel %vm2684_vm6, %v2685_v58, %v10279_v48 }
 0x2ea   :  { %v10301_v11 = vshrl.u32 %v2742_v55, 5  ;;  %v2687_v51 = vadd.s32 %v2686_v31, %v2682_v30  ;;  %v2747_v28 = vshll.u32 %v11868_v4, %v2744_v9  ;;  %v2748_v52 = vshrl.u32 %v11873_v14, %v2745_v17 }
 0x2eb   :  { %v2751_v57 = vshrl.u32 %v11855_v2, %v2745_v17  ;;  %v2598_v38 = vshrl.u32 %v2580_v50, %v2596_v39  ;;  %v2602_v33 = vshll.u32 %v2601_v19, 23  ;;  %v2750_v49 = vshll.u32 %v11873_v14, %v2744_v9 }
 0x2ec   :  { %v2754_v21 = vshrl.u32 %v11856_v42, %v2745_v17  ;;  %v2688_v13 = vadd.s32 536870912, %v2687_v51  ;;  %v2753_v56 = vshll.u32 %v11855_v2, %v2744_v9  ;;  %v2756_v48 = vshll.u32 %v11856_v42, %v2744_v9 }
 0x2ed   :  { %v2757_v12 = vshrl.u32 %v11859_v3, %v2745_v17  ;;  %v2597_v55 = vshll.u32 %v10260_v29, %v2595_v7  ;;  %v2611_v45 = vsel %vm2526_vm11, %v2610_v0, %v10242_v18  ;;  %v2749_v58 = vor.u32 %v2748_v52, %v2747_v28 }
 0x2ee   :  { %v2752_v50 = vor.u32 %v2751_v57, %v2750_v49  ;;  %v12022_v39 = vand.u32 2147483647, %v9511_v15  ;;  %v2689_v30 = vshrl.u32 %v2688_v13, 30  ;;  %v2755_v19 = vor.u32 %v2754_v21, %v2753_v56 }
 0x2ef   :  { %v2758_v31 = vor.u32 %v2757_v12, %v2756_v48  ;;  %v2760_v23 = vshrl.u32 %v11874_v60, %v2745_v17  ;;  %v2506_v29 = vsel %vm2423_vm12, %v2505_v27, %v2504_v35  ;;  %v2603_v7 = vor.u32 4788187, %v2602_v33 }
 0x2f0   :  { %vm10317_vm14 = vcmp.le.f32.partialorder %v12022_v39, 0.7853982  ;;  %vm2629_vm4 = vcmp.lt.s32.totalorder %v9621_v54, 0  ;;  %v2759_v18 = vshll.u32 %v11859_v3, %v2744_v9  ;;  %v2836_v0 = vand.u32 2139095040, %v9784_v36  ;;  %v10327_v28 = vpop.eup %8098 }
 0x2f1   :  { %12025 = vst [vmem:[#allocation105_spill] sm:$0xff] %v10327_v28  ;;  %v2599_v52 = vor.u32 %v2598_v38, %v2597_v55  ;;  %v2690_v57 = vshll.u32 %v2689_v30, 30  ;;  %vm2762_vm10 = vcmp.lt.s32.totalorder %v10301_v11, 1  ;;  %vm2765_vm5 = vcmp.lt.s32.totalorder %v10301_v11, 4 }
 0x2f2   :  { %v2761_v49 = vor.u32 %v2760_v23, %v2759_v18  ;;  %vm2764_vm3 = vcmp.lt.s32.totalorder %v10301_v11, 3  ;;  %v2770_v35 = vsel %vm2762_vm10, %v2749_v58, %v2752_v50  ;;  %v2771_v27 = vsel %vm2765_vm5, %v2758_v31, 920167782 }
 0x2f3   :  { %v2509_v9 = vsel %vm10175_vm15, %v9393_v10, %v2506_v29  ;;  %v12026_v38 = vand.u32 2147483647, %v9621_v54  ;;  %v10345_v21 = vsub.s32 %v2687_v51, %v2690_v57  ;;  %vm2763_vm13 = vcmp.lt.s32.totalorder %v10301_v11, 2 }
 0x2f4   :  { %v2772_v23 = vsel %vm2764_vm3, %v2755_v19, %v2771_v27  ;;  %v2604_v13 = vand.u32 2147483647, %v2603_v7  ;;  %v2767_v56 = vsel %vm2765_vm5, %v2755_v19, 2102212464  ;;  %v2837_v48 = vshrl.u32 %v2836_v0, 23 }
 0x2f5   :  { %vm10341_vm12 = vcmp.le.f32.partialorder %v12026_v38, 0.7853982  ;;  %v2773_v61 = vsel %vm2763_vm13, %v2770_v35, %v2772_v23  ;;  %v2693_v12 = vsub.s32 0, %v10345_v21  ;;  %v2713_v55 = vsub.s32 4, %v2689_v30 }
 0x2f6   :  { %v2746_v39 = vshrl.u32 %v11868_v4, %v2745_v17  ;;  %v2774_v51 = vsel %vm2762_vm10, %v2752_v50, %v2755_v19  ;;  %v2606_v29 = vcvt.s32.f32 %v2599_v52  ;;  %v2775_v18 = vsel %vm2765_vm5, %v2761_v49, 1326507024 }
 0x2f7   :  { %v10361_v7 = vmul.u32.u64.low %v10298_v20, %v2773_v61  ;;  %v10362_v57 = vmul.u32.u64.high %v10298_v20, %v2773_v61, %v10361_v7  ;;  %v7621_v35 = vmin.u32 %v2693_v12, %v10345_v21  ;;  %v2768_v17 = vsel %vm2764_vm3, %v2752_v50, %v2767_v56 }
 0x2f8   :  { %v2766_v0 = vsel %vm2762_vm10, %v2746_v39, %v2749_v58  ;;  %v2776_v19 = vsel %vm2764_vm3, %v2758_v31, %v2775_v18  ;;  %v2607_v52 = vmul.f32 %v2606_v29, %v2604_v13  ;;  %v2613_v49 = vsel %vm10317_vm14, 0, %v2611_v45 }
 0x2f9   :  { %v2777_v27 = vsel %vm2763_vm13, %v2774_v51, %v2776_v19  ;;  %v7628_v38 = vadd.s32 4294967169, %v2837_v48  ;;  %v2695_v23 = vclz %v7621_v35  ;;  %v2714_v61 = vsel %vm2629_vm4, %v2713_v55, %v2689_v30 }
 0x2fa   :  { %v10379_v58 = vmul.u32.u64.low %v10298_v20, %v2777_v27  ;;  %v10380_v12 = vmul.u32.u64.high %v10298_v20, %v2777_v27, %v10379_v58  ;;  %8100 = vcosq.f32 %v2509_v9  ;;  %v2769_v50 = vsel %vm2763_vm13, %v2766_v0, %v2768_v17 }
 0x2fb   :  { %v2788_v31 = vadd.s32 1, %v10362_v57  ;;  %v2843_v13 = vadd.s32 1, %v7628_v38  ;;  %8102 = vsinq.f32 %v2509_v9  ;;  %v10385_v45 = vand.u32 3, %v2613_v49 }
 0x2fc   :  { %v10387_v56 = vadd.s32 3, %v2613_v49  ;;  %v7622_v48 = vadd.s32 4294967294, %v2695_v23  ;;  %v2608_v39 = vxor.u32 2147483648, %v2607_v52  ;;  %v2716_v30 = vsel %vm10341_vm12, 0, %v2714_v61 }
 0x2fd   :  { %12029 = vst [vmem:[#allocation106_spill] sm:$0xff] %v10385_v45  ;;  %v12031_v55 = vand.u32 2147483647, %v9784_v36  ;;  %vm2844_vm15 = vcmp.gt.s32.totalorder %v2843_v13, 0  ;;  %v2785_v11 = vmul.u32 %v10298_v20, %v2769_v50  ;;  %vm2787_vm8 = vc.u32 %v10380_v12, %v10361_v7 }
 0x2fe   :  { %12030 = vst [vmem:[#allocation107_spill] sm:$0xff] %v10387_v56  ;;  %vm7623_vm0 = vcmp.lt.s32.totalorder %v7622_v48, 0  ;;  %v2845_v9 = vsel %vm2844_vm15, %v2843_v13, 0  ;;  %v2789_v18 = vsel %vm2787_vm8, %v2788_v31, %v10362_v57  ;;  %v2683_v17 = vadd.s32 %v10278_v26, %v10285_v8  ;;  %v8000_v26 = vld [vmem:[%s11684_s3 + $0x54] ss:$8 sps:$4 sm:$0xff]  }
 0x2ff   :  { %v10393_v51 = vand.u32 8388607, %v12031_v55  ;;  %v2698_v29 = vsel %vm7623_vm0, 0, %v7622_v48  ;;  %v2847_v35 = vand.u32 31, %v2845_v9  ;;  %v2790_v27 = vadd.s32 %v2789_v18, %v2785_v11  ;;  %v8001_v8 = vld [vmem:[%s11684_s3 + $0xd4] ss:$8 sps:$4 sm:$0xff]   ;;  %7326 = vmatprep.subr.bf16.mxu0 %v8000_v26 }
 0x300   :  { %v2699_v19 = vsub.s32 32, %v2698_v29  ;;  %v2703_v49 = vsub.s32 4294967266, %v2698_v29  ;;  %v10404_v38 = vsel %vm2526_vm11, %v2608_v39, %v2607_v52  ;;  %v10406_v20 = vand.u32 3, %v2716_v30  ;;  %7149 = vmatprep.subr.bf16.mxu1 %v8001_v8 }
 0x301   :  { %v10408_v23 = vadd.s32 3, %v2716_v30  ;;  %v2848_v61 = vsub.s32 32, %v2847_v35  ;;  %v2700_v57 = vshll.u32 %v10345_v21, %v2698_v29  ;;  %v2791_v31 = vadd.s32 536870912, %v2790_v27  ;;  %v7998_v21 = vld [vmem:[%s11684_s3 + $0x50] ss:$8 sps:$4 sm:$0xff]  }
 0x302   :  { %12032 = vst [vmem:[#allocation108_spill] sm:$0xff] %v10406_v20  ;;  %v2701_v58 = vshrl.u32 %v2683_v17, %v2699_v19  ;;  %v2704_v50 = vadd.s32 127, %v2703_v49  ;;  %v2850_v52 = vshll.u32 %v11868_v4, %v2847_v35  ;;  %v8003_v30 = vld [vmem:[%s11684_s3 + $0xd0] ss:$8 sps:$4 sm:$0xff]   ;;  %v2841_v19 = vor.u32 8388608, %v10393_v51  ;;  %7327 = vmatpush1.bf16.xpose.msra.mxu0 %v7998_v21 }
 0x303   :  { %12033 = vst [vmem:[#allocation109_spill] sm:$0xff] %v10408_v23  ;;  %v2851_v13 = vshrl.u32 %v11873_v14, %v2848_v61  ;;  %v2854_v48 = vshrl.u32 %v11855_v2, %v2848_v61  ;;  %v2857_v39 = vshrl.u32 %v11856_v42, %v2848_v61  ;;  %v10427_v29 = vshrl.u32 %v2791_v31, 30  ;;  %7150 = vmatpush1.bf16.xpose.msra.mxu1 %v8003_v30 }
 0x304   :  { %v2702_v55 = vor.u32 %v2701_v58, %v2700_v57  ;;  %v2705_v11 = vshll.u32 %v2704_v50, 23  ;;  %v2860_v18 = vshrl.u32 %v11859_v3, %v2848_v61  ;;  %v10430_v17 = vpop.eup %8100  ;;  %v10433_v49 = vshrl.u32 %v2845_v9, 5 }
 0x305   :  { %12034 = vst [vmem:[#allocation110_spill] sm:$0xff] %v10430_v17  ;;  %v2853_v0 = vshll.u32 %v11873_v14, %v2847_v35  ;;  %v2859_v45 = vshll.u32 %v11856_v42, %v2847_v35  ;;  %v10437_v56 = vpop.eup %8102  ;;  %v2793_v58 = vshll.u32 %v10427_v29, 30  ;;  %v2852_v50 = vor.u32 %v2851_v13, %v2850_v52 }
 0x306   :  { %12035 = vst [vmem:[#allocation111_spill] sm:$0xff] %v10437_v56  ;;  %v2706_v57 = vor.u32 4788187, %v2705_v11  ;;  %v2856_v31 = vshll.u32 %v11855_v2, %v2847_v35  ;;  %vm2732_vm1 = vcmp.lt.s32.totalorder %v9719_v5, 0  ;;  %v2862_v9 = vshll.u32 %v11859_v3, %v2847_v35 }
 0x307   :  { %v2855_v26 = vor.u32 %v2854_v48, %v2853_v0  ;;  %v2861_v51 = vor.u32 %v2860_v18, %v2859_v45  ;;  %v2863_v8 = vshrl.u32 %v11874_v60, %v2848_v61  ;;  %v2709_v28 = vcvt.s32.f32 %v2702_v55 }
 0x308   :  { %v2707_v43 = vand.u32 2147483647, %v2706_v57  ;;  %v10444_v21 = vsub.s32 %v2790_v27, %v2793_v58  ;;  %v2858_v20 = vor.u32 %v2857_v39, %v2856_v31  ;;  %v2816_v11 = vsub.s32 4, %v10427_v29  ;;  %v8006_v27 = vld [vmem:[%s11684_s3 + $0x64] ss:$8 sps:$4 sm:$0xff]  }
 0x309   :  { %v2849_v52 = vshrl.u32 %v11868_v4, %v2848_v61  ;;  %v2864_v13 = vor.u32 %v2863_v8, %v2862_v9  ;;  %v2939_v30 = vand.u32 2139095040, %v9897_v24  ;;  %v12036_v0 = vand.u32 2147483647, %v9719_v5  ;;  %v8004_v61 = vld [vmem:[%s11684_s3 + $0x60] ss:$8 sps:$4 sm:$0xff]   ;;  %7328 = vmatprep.subr.bf16.mxu0 %v8006_v27 }
 0x30a   :  { %v2710_v23 = vmul.f32 %v2709_v28, %v2707_v43  ;;  %v2796_v35 = vsub.s32 0, %v10444_v21  ;;  %vm2865_vm9 = vcmp.lt.s32.totalorder %v10433_v49, 1  ;;  %vm2868_vm6 = vcmp.lt.s32.totalorder %v10433_v49, 4  ;;  %v8007_v57 = vld [vmem:[%s11684_s3 + $0xe4] ss:$8 sps:$4 sm:$0xff]   ;;  %7329 = vmatpush1.bf16.xpose.msra.mxu0 %v8004_v61 }
 0x30b   :  { %vm10451_vm11 = vcmp.le.f32.partialorder %v12036_v0, 0.7853982  ;;  %vm2866_vm10 = vcmp.lt.s32.totalorder %v10433_v49, 2  ;;  %vm2867_vm5 = vcmp.lt.s32.totalorder %v10433_v49, 3  ;;  %v2873_v43 = vsel %vm2865_vm9, %v2852_v50, %v2855_v26  ;;  %v8009_v58 = vld [vmem:[%s11684_s3 + $0xe0] ss:$8 sps:$4 sm:$0xff]   ;;  %7151 = vmatprep.subr.bf16.mxu1 %v8007_v57 }
 0x30c   :  { %v2874_v28 = vsel %vm2868_vm6, %v2861_v51, 920167782  ;;  %v7625_v48 = vmin.u32 %v2796_v35, %v10444_v21  ;;  %v2870_v39 = vsel %vm2868_vm6, %v2858_v20, 2102212464  ;;  %v2877_v18 = vsel %vm2865_vm9, %v2855_v26, %v2858_v20  ;;  %7152 = vmatpush1.bf16.xpose.msra.mxu1 %v8009_v58  ;;  %v8010_v57 = vld [vmem:[%s11684_s3 + $0x70] ss:$8 sps:$4 sm:$0xff]  }
 0x30d   :  { %v2875_v55 = vsel %vm2867_vm5, %v2858_v20, %v2874_v28  ;;  %v2878_v9 = vsel %vm2868_vm6, %v2864_v13, 1326507024  ;;  %v2881_v8 = vshll.u32 %v2841_v19, 8  ;;  %v2940_v0 = vshrl.u32 %v2939_v30, 23 }
 0x30e   :  { %v2876_v31 = vsel %vm2866_vm10, %v2873_v43, %v2875_v55  ;;  %v2711_v35 = vxor.u32 2147483648, %v2710_v23  ;;  %v2798_v28 = vclz %v7625_v48  ;;  %v2869_v20 = vsel %vm2865_vm9, %v2849_v52, %v2852_v50 }
 0x30f   :  { %v2879_v27 = vsel %vm2867_vm5, %v2861_v51, %v2878_v9  ;;  %v2871_v17 = vsel %vm2867_vm5, %v2855_v26, %v2870_v39  ;;  %v10489_v43 = vmul.u32.u64.low %v2881_v8, %v2876_v31  ;;  %v10490_v13 = vmul.u32.u64.high %v2881_v8, %v2876_v31, %v10489_v43  ;;  %v8013_v31 = vld [vmem:[%s11684_s3 + $0xf4] ss:$8 sps:$4 sm:$0xff]  }
 0x310   :  { %v2880_v56 = vsel %vm2866_vm10, %v2877_v18, %v2879_v27  ;;  %v7626_v19 = vadd.s32 4294967294, %v2798_v28  ;;  %v2817_v50 = vsel %vm2732_vm1, %v2816_v11, %v10427_v29  ;;  %v2612_v26 = vsel %vm10317_vm14, %v9511_v15, %v10404_v38  ;;  %7153 = vmatprep.subr.bf16.mxu1 %v8013_v31 }
 0x311   :  { %v10496_v52 = vmul.u32.u64.low %v2881_v8, %v2880_v56  ;;  %v10497_v30 = vmul.u32.u64.high %v2881_v8, %v2880_v56, %v10496_v52  ;;  %v7632_v51 = vadd.s32 4294967169, %v2940_v0  ;;  %v12039_v61 = vand.u32 2147483647, %v9897_v24 }
 0x312   :  { %v11812_v39 = vand.u32 2147483647, %v9988_v16  ;;  %v2712_v55 = vsel %vm2629_vm4, %v2711_v35, %v2710_v23  ;;  %vm7627_vm3 = vcmp.lt.s32.totalorder %v7626_v19, 0  ;;  %v2872_v56 = vsel %vm2866_vm10, %v2869_v20, %v2871_v17  ;;  %v8012_v17 = vld [vmem:[%s11684_s3 + $0x74] ss:$8 sps:$4 sm:$0xff]  }
 0x313   :  { %v10505_v48 = vand.u32 8388607, %v12039_v61  ;;  %v3042_v29 = vand.u32 2139095040, %v9988_v16  ;;  %v2801_v11 = vsel %vm7627_vm3, 0, %v7626_v19  ;;  %v2819_v1 = vsel %vm10451_vm11, 0, %v2817_v50  ;;  %7330 = vmatprep.subr.bf16.mxu0 %v8012_v17 }
 0x314   :  { %v2891_v38 = vadd.s32 1, %v10490_v13  ;;  %v2946_v18 = vadd.s32 1, %v7632_v51  ;;  %8104 = vcosq.f32 %v2612_v26  ;;  %v2786_v23 = vadd.s32 %v10361_v7, %v10380_v12  ;;  %v8015_v7 = vld [vmem:[%s11684_s3 + $0xf0] ss:$8 sps:$4 sm:$0xff]   ;;  %7331 = vmatpush1.bf16.xpose.msra.mxu0 %v8010_v57 }
 0x315   :  { %v2802_v58 = vsub.s32 32, %v2801_v11  ;;  %v2806_v49 = vsub.s32 4294967266, %v2801_v11  ;;  %v2715_v9 = vsel %vm10341_vm12, %v9621_v54, %v2712_v55  ;;  %v2888_v0 = vmul.u32 %v2881_v8, %v2872_v56  ;;  %7154 = vmatpush1.bf16.xpose.msra.mxu1 %v8015_v7 }
 0x316   :  { %vm2890_vm14 = vc.u32 %v10497_v30, %v10489_v43  ;;  %vm2947_vm4 = vcmp.gt.s32.totalorder %v2946_v18, 0  ;;  %v3043_v20 = vshrl.u32 %v3042_v29, 23  ;;  %8106 = vsinq.f32 %v2612_v26 }
 0x317   :  { %v2807_v12 = vadd.s32 127, %v2806_v49  ;;  %v2892_v35 = vsel %vm2890_vm14, %v2891_v38, %v10490_v13  ;;  %v2948_v28 = vsel %vm2947_vm4, %v2946_v18, 0  ;;  %v2804_v27 = vshrl.u32 %v2786_v23, %v2802_v58 }
 0x318   :  { %v2893_v33 = vadd.s32 %v2892_v35, %v2888_v0  ;;  %v2950_v19 = vand.u32 31, %v2948_v28  ;;  %8108 = vcosq.f32 %v2715_v9  ;;  %v10536_v50 = vand.u32 3, %v2819_v1 }
 0x319   :  { %v2808_v8 = vshll.u32 %v2807_v12, 23  ;;  %v10538_v52 = vadd.s32 3, %v2819_v1  ;;  %8110 = vsinq.f32 %v2715_v9  ;;  %v2803_v51 = vshll.u32 %v10444_v21, %v2801_v11 }
 0x31a   :  { %12040 = vst [vmem:[#allocation112_spill] sm:$0xff] %v10536_v50  ;;  %v2894_v13 = vadd.s32 536870912, %v2893_v33  ;;  %v2951_v61 = vsub.s32 32, %v2950_v19  ;;  %v2944_v56 = vor.u32 8388608, %v10505_v48  ;;  %v7636_v26 = vadd.s32 4294967169, %v3043_v20 }
 0x31b   :  { %12041 = vst [vmem:[#allocation113_spill] sm:$0xff] %v10538_v52  ;;  %v2809_v55 = vor.u32 4788187, %v2808_v8  ;;  %v10544_v29 = vand.u32 8388607, %v11812_v39  ;;  %v2805_v38 = vor.u32 %v2804_v27, %v2803_v51  ;;  %vm2835_vm12 = vcmp.lt.s32.totalorder %v9784_v36, 0 }
 0x31c   :  { %v2895_v18 = vshrl.u32 %v2894_v13, 30  ;;  %v2954_v1 = vshrl.u32 %v11873_v14, %v2951_v61  ;;  %v2957_v57 = vshrl.u32 %v11855_v2, %v2951_v61  ;;  %v2953_v21 = vshll.u32 %v11868_v4, %v2950_v19 }
 0x31d   :  { %v2956_v11 = vshll.u32 %v11873_v14, %v2950_v19  ;;  %v2960_v23 = vshrl.u32 %v11856_v42, %v2951_v61  ;;  %v2963_v48 = vshrl.u32 %v11859_v3, %v2951_v61  ;;  %v2949_v49 = vshrl.u32 %v2948_v28, 5 }
 0x31e   :  { %v2896_v58 = vshll.u32 %v2895_v18, 30  ;;  %v2959_v17 = vshll.u32 %v11855_v2, %v2950_v19  ;;  %v2962_v31 = vshll.u32 %v11856_v42, %v2950_v19  ;;  %v10555_v9 = vpop.eup %8104  ;;  %v2810_v0 = vand.u32 2147483647, %v2809_v55 }
 0x31f   :  { %12042 = vst [vmem:[#allocation114_spill] sm:$0xff] %v10555_v9  ;;  %v2955_v7 = vor.u32 %v2954_v1, %v2953_v21  ;;  %v2958_v12 = vor.u32 %v2957_v57, %v2956_v11  ;;  %v2966_v35 = vshrl.u32 %v11874_v60, %v2951_v61  ;;  %v12043_v20 = vand.u32 2147483647, %v9784_v36 }
 0x320   :  { %v10564_v8 = vsub.s32 %v2893_v33, %v2896_v58  ;;  %v2961_v28 = vor.u32 %v2960_v23, %v2959_v17  ;;  %v2964_v51 = vor.u32 %v2963_v48, %v2962_v31  ;;  %v2965_v13 = vshll.u32 %v11859_v3, %v2950_v19  ;;  %v10568_v1 = vpop.eup %8106 }
 0x321   :  { %vm10560_vm13 = vcmp.le.f32.partialorder %v12043_v20, 0.7853982  ;;  %v2812_v39 = vcvt.s32.f32 %v2805_v38  ;;  %v2919_v50 = vsub.s32 4, %v2895_v18  ;;  %v2984_v52 = vshll.u32 %v2944_v56, 8  ;;  %12046 = vst [vmem:[#allocation115_spill] sm:$0xff] %v10568_v1 }
 0x322   :  { %v3047_v55 = vor.u32 8388608, %v10544_v29  ;;  %v2899_v57 = vsub.s32 0, %v10564_v8  ;;  %v2967_v21 = vor.u32 %v2966_v35, %v2965_v13  ;;  %vm2968_vm15 = vcmp.lt.s32.totalorder %v2949_v49, 1  ;;  %v10571_v20 = vpop.eup %8108 }
 0x323   :  { %v3049_v11 = vadd.s32 1, %v7636_v26  ;;  %v10573_v33 = vmul.f32 %v2812_v39, %v2810_v0  ;;  %v2952_v23 = vshrl.u32 %v11868_v4, %v2951_v61  ;;  %vm2971_vm0 = vcmp.lt.s32.totalorder %v2949_v49, 4  ;;  %v10577_v38 = vpop.eup %8110 }
 0x324   :  { %v2976_v19 = vsel %vm2968_vm15, %v2955_v7, %v2958_v12  ;;  %v7629_v56 = vmin.u32 %v2899_v57, %v10564_v8  ;;  %vm2970_vm8 = vcmp.lt.s32.totalorder %v2949_v49, 3  ;;  %v2973_v29 = vsel %vm2971_vm0, %v2961_v28, 2102212464 }
 0x325   :  { %v2977_v48 = vsel %vm2971_vm0, %v2964_v51, 920167782  ;;  %v2920_v58 = vsel %vm2835_vm12, %v2919_v50, %v2895_v18  ;;  %vm2969_vm9 = vcmp.lt.s32.totalorder %v2949_v49, 2  ;;  %v2980_v39 = vsel %vm2968_vm15, %v2958_v12, %v2961_v28 }
 0x326   :  { %v2978_v26 = vsel %vm2970_vm8, %v2961_v28, %v2977_v48  ;;  %v2901_v17 = vclz %v7629_v56  ;;  %v2972_v61 = vsel %vm2968_vm15, %v2952_v23, %v2955_v7  ;;  %v2981_v0 = vsel %vm2971_vm0, %v2967_v21, 1326507024 }
 0x327   :  { %v2979_v31 = vsel %vm2969_vm9, %v2976_v19, %v2978_v26  ;;  %v2974_v35 = vsel %vm2970_vm8, %v2958_v12, %v2973_v29  ;;  %v2982_v13 = vsel %vm2970_vm8, %v2964_v51, %v2981_v0  ;;  %vm3050_vm6 = vcmp.gt.s32.totalorder %v3049_v11, 0 }
 0x328   :  { %v10585_v9 = vmul.u32.u64.low %v2984_v52, %v2979_v31  ;;  %v10586_v57 = vmul.u32.u64.high %v2984_v52, %v2979_v31, %v10585_v9  ;;  %v7630_v1 = vadd.s32 4294967294, %v2901_v17  ;;  %v2983_v15 = vsel %vm2969_vm9, %v2980_v39, %v2982_v13 }
 0x329   :  { %v2922_v18 = vsel %vm10560_vm13, 0, %v2920_v58  ;;  %v10593_v28 = vmul.u32.u64.low %v2984_v52, %v2983_v15  ;;  %v10594_v7 = vmul.u32.u64.high %v2984_v52, %v2983_v15, %v10593_v28  ;;  %v3051_v23 = vsel %vm3050_vm6, %v3049_v11, 0 }
 0x32a   :  { %v2889_v12 = vadd.s32 %v10489_v43, %v10497_v30  ;;  %vm7631_vm10 = vcmp.lt.s32.totalorder %v7630_v1, 0  ;;  %v2975_v51 = vsel %vm2969_vm9, %v2972_v61, %v2974_v35  ;;  %v3053_v21 = vand.u32 31, %v3051_v23 }
 0x32b   :  { %v2814_v19 = vxor.u32 2147483648, %v10573_v33  ;;  %v2904_v56 = vsel %vm7631_vm10, 0, %v7630_v1  ;;  %v2994_v29 = vadd.s32 1, %v10586_v57  ;;  %v10601_v48 = vshll.u32 %v3047_v55, 8 }
 0x32c   :  { %v2905_v26 = vsub.s32 32, %v2904_v56  ;;  %v2909_v58 = vsub.s32 4294967266, %v2904_v56  ;;  %v10603_v39 = vand.u32 3, %v2922_v18  ;;  %v3054_v15 = vsub.s32 32, %v3053_v21 }
 0x32d   :  { %v10605_v11 = vadd.s32 3, %v2922_v18  ;;  %v2991_v17 = vmul.u32 %v2984_v52, %v2975_v51  ;;  %vm2993_vm5 = vc.u32 %v10594_v7, %v10585_v9  ;;  %v10609_v43 = vshrl.u32 %v3051_v23, 5 }
 0x32e   :  { %12047 = vst [vmem:[#allocation116_spill] sm:$0xff] %v10603_v39  ;;  %v2906_v30 = vshll.u32 %v10564_v8, %v2904_v56  ;;  %v2907_v49 = vshrl.u32 %v2889_v12, %v2905_v26  ;;  %v2910_v1 = vadd.s32 127, %v2909_v58  ;;  %v2995_v55 = vsel %vm2993_vm5, %v2994_v29, %v10586_v57 }
 0x32f   :  { %12048 = vst [vmem:[#allocation117_spill] sm:$0xff] %v10605_v11  ;;  %v2996_v61 = vadd.s32 %v2995_v55, %v2991_v17  ;;  %v3056_v31 = vshll.u32 %v11868_v4, %v3053_v21  ;;  %v3057_v0 = vshrl.u32 %v11873_v14, %v3054_v15  ;;  %v3060_v35 = vshrl.u32 %v11855_v2, %v3054_v15 }
 0x330   :  { %v2908_v13 = vor.u32 %v2907_v49, %v2906_v30  ;;  %v2911_v52 = vshll.u32 %v2910_v1, 23  ;;  %vm2938_vm3 = vcmp.lt.s32.totalorder %v9897_v24, 0  ;;  %v3059_v18 = vshll.u32 %v11873_v14, %v3053_v21 }
 0x331   :  { %v3063_v28 = vshrl.u32 %v11856_v42, %v3054_v15  ;;  %v2997_v8 = vadd.s32 536870912, %v2996_v61  ;;  %v3062_v23 = vshll.u32 %v11855_v2, %v3053_v21  ;;  %v3065_v57 = vshll.u32 %v11856_v42, %v3053_v21 }
 0x332   :  { %v3066_v12 = vshrl.u32 %v11859_v3, %v3054_v15  ;;  %v2912_v51 = vor.u32 4788187, %v2911_v52  ;;  %v3058_v56 = vor.u32 %v3057_v0, %v3056_v31  ;;  %v3061_v29 = vor.u32 %v3060_v35, %v3059_v18 }
 0x333   :  { %v3145_v26 = vand.u32 2139095040, %v10062_v37  ;;  %v12049_v58 = vand.u32 2147483647, %v9897_v24  ;;  %v2998_v30 = vshrl.u32 %v2997_v8, 30  ;;  %v3064_v49 = vor.u32 %v3063_v28, %v3062_v23 }
 0x334   :  { %v3067_v1 = vor.u32 %v3066_v12, %v3065_v57  ;;  %v3069_v55 = vshrl.u32 %v11874_v60, %v3054_v15  ;;  %v2913_v50 = vand.u32 2147483647, %v2912_v51  ;;  %v2915_v39 = vcvt.s32.f32 %v2908_v13 }
 0x335   :  { %vm10625_vm14 = vcmp.le.f32.partialorder %v12049_v58, 0.7853982  ;;  %v3068_v11 = vshll.u32 %v11859_v3, %v3053_v21  ;;  %vm3071_vm4 = vcmp.lt.s32.totalorder %v10609_v43, 1  ;;  %v2999_v31 = vshll.u32 %v2998_v30, 30 }
 0x336   :  { %v3022_v0 = vsub.s32 4, %v2998_v30  ;;  %vm3073_vm15 = vcmp.lt.s32.totalorder %v10609_v43, 3  ;;  %vm3074_vm0 = vcmp.lt.s32.totalorder %v10609_v43, 4  ;;  %v2916_v35 = vmul.f32 %v2915_v39, %v2913_v50 }
 0x337   :  { %v3070_v52 = vor.u32 %v3069_v55, %v3068_v11  ;;  %v3079_v18 = vsel %vm3071_vm4, %v3058_v56, %v3061_v29  ;;  %v3080_v28 = vsel %vm3074_vm0, %v3067_v1, 920167782  ;;  %v2815_v21 = vsel %vm2732_vm1, %v2814_v19, %v10573_v33 }
 0x338   :  { %v10641_v13 = vsub.s32 %v2996_v61, %v2999_v31  ;;  %vm3072_vm8 = vcmp.lt.s32.totalorder %v10609_v43, 2  ;;  %v3081_v8 = vsel %vm3073_vm15, %v3064_v49, %v3080_v28  ;;  %v3055_v50 = vshrl.u32 %v11868_v4, %v3054_v15 }
 0x339   :  { %v3076_v39 = vsel %vm3074_vm0, %v3064_v49, 2102212464  ;;  %v3082_v11 = vsel %vm3072_vm8, %v3079_v18, %v3081_v8  ;;  %v3146_v23 = vshrl.u32 %v3145_v26, 23  ;;  %v2917_v57 = vxor.u32 2147483648, %v2916_v35 }
 0x33a   :  { %v3002_v12 = vsub.s32 0, %v10641_v13  ;;  %v3023_v33 = vsel %vm2938_vm3, %v3022_v0, %v2998_v30  ;;  %v3083_v19 = vsel %vm3071_vm4, %v3061_v29, %v3064_v49  ;;  %v2818_v15 = vsel %vm10451_vm11, %v9719_v5, %v2815_v21 }
 0x33b   :  { %v3084_v61 = vsel %vm3074_vm0, %v3070_v52, 1326507024  ;;  %v10662_v51 = vmul.u32.u64.low %v10601_v48, %v3082_v11  ;;  %v10663_v58 = vmul.u32.u64.high %v10601_v48, %v3082_v11, %v10662_v51  ;;  %v3075_v30 = vsel %vm3071_vm4, %v3055_v50, %v3058_v56 }
 0x33c   :  { %v7633_v26 = vmin.u32 %v3002_v12, %v10641_v13  ;;  %v3077_v49 = vsel %vm3073_vm15, %v3061_v29, %v3076_v39  ;;  %v3085_v45 = vsel %vm3073_vm15, %v3067_v1, %v3084_v61  ;;  %v3025_v55 = vsel %vm10625_vm14, 0, %v3023_v33 }
 0x33d   :  { %v3086_v31 = vsel %vm3072_vm8, %v3083_v19, %v3085_v45  ;;  %v7640_v0 = vadd.s32 4294967169, %v3146_v23  ;;  %v12052_v52 = vand.u32 2147483647, %v10062_v37  ;;  %v2918_v28 = vsel %vm2835_vm12, %v2917_v57, %v2916_v35 }
 0x33e   :  { %v3004_v56 = vclz %v7633_v26  ;;  %v10682_v21 = vmul.u32.u64.low %v10601_v48, %v3086_v31  ;;  %v10683_v29 = vmul.u32.u64.high %v10601_v48, %v3086_v31, %v10682_v21  ;;  %8112 = vcosq.f32 %v2818_v15 }
 0x33f   :  { %v3149_v18 = vand.u32 8388607, %v12052_v52  ;;  %v3078_v1 = vsel %vm3072_vm8, %v3075_v30, %v3077_v49  ;;  %v3097_v8 = vadd.s32 1, %v10663_v58  ;;  %v3152_v50 = vadd.s32 1, %v7640_v0 }
 0x340   :  { %8114 = vsinq.f32 %v2818_v15  ;;  %v2992_v39 = vadd.s32 %v10585_v9, %v10594_v7  ;;  %v7634_v11 = vadd.s32 4294967294, %v3004_v56  ;;  %v10694_v35 = vsel %vm10560_vm13, %v9784_v36, %v2918_v28 }
 0x341   :  { %v10696_v57 = vand.u32 3, %v3025_v55  ;;  %v3150_v12 = vor.u32 8388608, %v3149_v18  ;;  %vm3153_vm1 = vcmp.gt.s32.totalorder %v3152_v50, 0  ;;  %v3094_v43 = vmul.u32 %v10601_v48, %v3078_v1 }
 0x342   :  { %vm7635_vm11 = vcmp.lt.s32.totalorder %v7634_v11, 0  ;;  %vm3096_vm12 = vc.u32 %v10683_v29, %v10662_v51  ;;  %v3154_v33 = vsel %vm3153_vm1, %v3152_v50, 0  ;;  %v10701_v7 = vadd.s32 3, %v3025_v55 }
 0x343   :  { %12053 = vst [vmem:[#allocation118_spill] sm:$0xff] %v10696_v57  ;;  %v3007_v9 = vsel %vm7635_vm11, 0, %v7634_v11  ;;  %v3098_v19 = vsel %vm3096_vm12, %v3097_v8, %v10663_v58  ;;  %v3156_v15 = vand.u32 31, %v3154_v33  ;;  %8116 = vcosq.f32 %v10694_v35 }
 0x344   :  { %12054 = vst [vmem:[#allocation119_spill] sm:$0xff] %v10701_v7  ;;  %v3008_v27 = vsub.s32 32, %v3007_v9  ;;  %v3012_v61 = vsub.s32 4294967266, %v3007_v9  ;;  %vm3041_vm13 = vcmp.lt.s32.totalorder %v9988_v16, 0  ;;  %v3099_v26 = vadd.s32 %v3098_v19, %v3094_v43 }
 0x345   :  { %v3009_v30 = vshll.u32 %v10641_v13, %v3007_v9  ;;  %v3157_v48 = vsub.s32 32, %v3156_v15  ;;  %v10707_v49 = vshll.u32 %v3150_v12, 8  ;;  %v3248_v45 = vand.u32 2139095040, %v10133_v59 }
 0x346   :  { %v3010_v31 = vshrl.u32 %v2992_v39, %v3008_v27  ;;  %v3013_v55 = vadd.s32 127, %v3012_v61  ;;  %v3100_v0 = vadd.s32 536870912, %v3099_v26  ;;  %v3159_v58 = vshll.u32 %v11868_v4, %v3156_v15 }
 0x347   :  { %v3160_v52 = vshrl.u32 %v11873_v14, %v3157_v48  ;;  %v3162_v18 = vshll.u32 %v11873_v14, %v3156_v15  ;;  %v3163_v28 = vshrl.u32 %v11855_v2, %v3157_v48  ;;  %v3166_v56 = vshrl.u32 %v11856_v42, %v3157_v48 }
 0x348   :  { %v3011_v21 = vor.u32 %v3010_v31, %v3009_v30  ;;  %v3014_v13 = vshll.u32 %v3013_v55, 23  ;;  %v3101_v1 = vshrl.u32 %v3100_v0, 30  ;;  %v3169_v8 = vshrl.u32 %v11859_v3, %v3157_v48  ;;  %v10716_v50 = vpop.eup %8112 }
 0x349   :  { %12055 = vst [vmem:[#allocation120_spill] sm:$0xff] %v10716_v50  ;;  %v3155_v39 = vshrl.u32 %v3154_v33, 5  ;;  %v3161_v11 = vor.u32 %v3160_v52, %v3159_v58  ;;  %v3165_v12 = vshll.u32 %v11855_v2, %v3156_v15  ;;  %v3168_v43 = vshll.u32 %v11856_v42, %v3156_v15 }
 0x34a   :  { %v10720_v9 = vpop.eup %8114  ;;  %v3015_v19 = vor.u32 4788187, %v3014_v13  ;;  %v12057_v27 = vand.u32 2147483647, %v9988_v16  ;;  %v3102_v30 = vshll.u32 %v3101_v1, 30  ;;  %v3125_v31 = vsub.s32 4, %v3101_v1 }
 0x34b   :  { %12056 = vst [vmem:[#allocation121_spill] sm:$0xff] %v10720_v9  ;;  %v3164_v55 = vor.u32 %v3163_v28, %v3162_v18  ;;  %v3167_v0 = vor.u32 %v3166_v56, %v3165_v12  ;;  %v3170_v23 = vor.u32 %v3169_v8, %v3168_v43  ;;  %v3171_v33 = vshll.u32 %v11859_v3, %v3156_v15 }
 0x34c   :  { %vm10724_vm9 = vcmp.le.f32.partialorder %v12057_v27, 0.7853982  ;;  %v3172_v58 = vshrl.u32 %v11874_v60, %v3157_v48  ;;  %v3016_v52 = vand.u32 2147483647, %v3015_v19  ;;  %v3018_v57 = vcvt.s32.f32 %v3011_v21 }
 0x34d   :  { %v10730_v7 = vsub.s32 %v3099_v26, %v3102_v30  ;;  %v3158_v13 = vshrl.u32 %v11868_v4, %v3157_v48  ;;  %v3126_v27 = vsel %vm3041_vm13, %v3125_v31, %v3101_v1  ;;  %vm3174_vm6 = vcmp.lt.s32.totalorder %v3155_v39, 1  ;;  %v10735_v9 = vpop.eup %8116 }
 0x34e   :  { %v3173_v50 = vor.u32 %v3172_v58, %v3171_v33  ;;  %vm3175_vm10 = vcmp.lt.s32.totalorder %v3155_v39, 2  ;;  %12060 = vst [vmem:[#allocation122_spill] sm:$0xff] %v10735_v9  ;;  %v3019_v18 = vmul.f32 %v3018_v57, %v3016_v52  ;;  %vm3176_vm5 = vcmp.lt.s32.totalorder %v3155_v39, 3 }
 0x34f   :  { %v3105_v28 = vsub.s32 0, %v10730_v7  ;;  %vm3177_vm4 = vcmp.lt.s32.totalorder %v3155_v39, 4  ;;  %v3178_v15 = vsel %vm3174_vm6, %v3158_v13, %v3161_v11  ;;  %v3182_v21 = vsel %vm3174_vm6, %v3161_v11, %v3164_v55 }
 0x350   :  { %v3179_v56 = vsel %vm3177_vm4, %v3167_v0, 2102212464  ;;  %v3183_v26 = vsel %vm3177_vm4, %v3170_v23, 920167782  ;;  %v3020_v8 = vxor.u32 2147483648, %v3019_v18  ;;  %v3186_v1 = vsel %vm3174_vm6, %v3164_v55, %v3167_v0 }
 0x351   :  { %v7637_v48 = vmin.u32 %v3105_v28, %v10730_v7  ;;  %v3184_v12 = vsel %vm3176_vm5, %v3167_v0, %v3183_v26  ;;  %v3180_v43 = vsel %vm3176_vm5, %v3164_v55, %v3179_v56  ;;  %v3187_v30 = vsel %vm3177_vm4, %v3173_v50, 1326507024 }
 0x352   :  { %v3185_v19 = vsel %vm3175_vm10, %v3182_v21, %v3184_v12  ;;  %v3249_v57 = vshrl.u32 %v3248_v45, 23  ;;  %v3021_v31 = vsel %vm2938_vm3, %v3020_v8, %v3019_v18  ;;  %v3188_v58 = vsel %vm3176_vm5, %v3170_v23, %v3187_v30 }
 0x353   :  { %v3107_v33 = vclz %v7637_v48  ;;  %v12061_v11 = vand.u32 2147483647, %v10133_v59  ;;  %v3128_v13 = vsel %vm10724_vm9, 0, %v3126_v27  ;;  %v3189_v0 = vsel %vm3175_vm10, %v3186_v1, %v3188_v58 }
 0x354   :  { %v10751_v55 = vmul.u32.u64.low %v10707_v49, %v3185_v19  ;;  %v10752_v28 = vmul.u32.u64.high %v10707_v49, %v3185_v19, %v10751_v55  ;;  %v3181_v50 = vsel %vm3175_vm10, %v3178_v15, %v3180_v43  ;;  %8118 = vsinq.f32 %v10694_v35 }
 0x355   :  { %v3252_v52 = vand.u32 8388607, %v12061_v11  ;;  %v7638_v45 = vadd.s32 4294967294, %v3107_v33  ;;  %v10757_v18 = vmul.u32.u64.low %v10707_v49, %v3189_v0  ;;  %v10758_v56 = vmul.u32.u64.high %v10707_v49, %v3189_v0, %v10757_v18 }
 0x356   :  { %v3024_v23 = vsel %vm10625_vm14, %v9897_v24, %v3021_v31  ;;  %v7644_v27 = vadd.s32 4294967169, %v3249_v57  ;;  %v3351_v21 = vand.u32 2139095040, %v10246_v40  ;;  %v3095_v26 = vadd.s32 %v10662_v51, %v10683_v29 }
 0x357   :  { %vm7639_vm3 = vcmp.lt.s32.totalorder %v7638_v45, 0  ;;  %v10767_v8 = vand.u32 3, %v3128_v13  ;;  %v11822_v39 = vand.u32 2147483647, %v10246_v40  ;;  %v3197_v48 = vmul.u32 %v10707_v49, %v3181_v50 }
 0x358   :  { %v3110_v15 = vsel %vm7639_vm3, 0, %v7638_v45  ;;  %v3200_v35 = vadd.s32 1, %v10752_v28  ;;  %v3255_v12 = vadd.s32 1, %v7644_v27  ;;  %8120 = vcosq.f32 %v3024_v23 }
 0x359   :  { %12062 = vst [vmem:[#allocation123_spill] sm:$0xff] %v10767_v8  ;;  %v3111_v17 = vsub.s32 32, %v3110_v15  ;;  %v3115_v1 = vsub.s32 4294967266, %v3110_v15  ;;  %v3253_v43 = vor.u32 8388608, %v3252_v52  ;;  %v3112_v19 = vshll.u32 %v10730_v7, %v3110_v15 }
 0x35a   :  { %vm3199_vm14 = vc.u32 %v10758_v56, %v10751_v55  ;;  %vm3256_vm15 = vcmp.gt.s32.totalorder %v3255_v12, 0  ;;  %v3352_v51 = vshrl.u32 %v3351_v21, 23  ;;  %8122 = vsinq.f32 %v3024_v23 }
 0x35b   :  { %v3113_v29 = vshrl.u32 %v3095_v26, %v3111_v17  ;;  %v3116_v30 = vadd.s32 127, %v3115_v1  ;;  %v3201_v57 = vsel %vm3199_vm14, %v3200_v35, %v10752_v28  ;;  %v3257_v31 = vsel %vm3256_vm15, %v3255_v12, 0 }
 0x35c   :  { %v10776_v49 = vadd.s32 3, %v3128_v13  ;;  %v3202_v33 = vadd.s32 %v3201_v57, %v3197_v48  ;;  %v3259_v58 = vand.u32 31, %v3257_v31  ;;  %v10780_v7 = vand.u32 8388607, %v11822_v39 }
 0x35d   :  { %v3114_v11 = vor.u32 %v3113_v29, %v3112_v19  ;;  %v3117_v0 = vshll.u32 %v3116_v30, 23  ;;  %vm3144_vm0 = vcmp.lt.s32.totalorder %v10062_v37, 0  ;;  %v10784_v18 = vshll.u32 %v3253_v43, 8 }
 0x35e   :  { %12063 = vst [vmem:[#allocation124_spill] sm:$0xff] %v10776_v49  ;;  %v3203_v45 = vadd.s32 536870912, %v3202_v33  ;;  %v3260_v50 = vsub.s32 32, %v3259_v58  ;;  %v7648_v28 = vadd.s32 4294967169, %v3352_v51  ;;  %v3258_v13 = vshrl.u32 %v3257_v31, 5  ;;  %v10788_v26 = vpop.eup %8118 }
 0x35f   :  { %v3118_v23 = vor.u32 4788187, %v3117_v0  ;;  %v3262_v27 = vshll.u32 %v11868_v4, %v3259_v58  ;;  %v3265_v21 = vshll.u32 %v11873_v14, %v3259_v58  ;;  %12064 = vst [vmem:[#allocation125_spill] sm:$0xff] %v10788_v26  ;;  %v3121_v15 = vcvt.s32.f32 %v3114_v11 }
 0x360   :  { %v3204_v48 = vshrl.u32 %v3203_v45, 30  ;;  %v3263_v35 = vshrl.u32 %v11873_v14, %v3260_v50  ;;  %v3266_v12 = vshrl.u32 %v11855_v2, %v3260_v50  ;;  %v12065_v1 = vand.u32 2147483647, %v10062_v37 }
 0x361   :  { %v3119_v17 = vand.u32 2147483647, %v3118_v23  ;;  %v3268_v19 = vshll.u32 %v11855_v2, %v3259_v58  ;;  %v3269_v51 = vshrl.u32 %v11856_v42, %v3260_v50  ;;  %v3272_v29 = vshrl.u32 %v11859_v3, %v3260_v50 }
 0x362   :  { %vm10794_vm8 = vcmp.le.f32.partialorder %v12065_v1, 0.7853982  ;;  %v3205_v30 = vshll.u32 %v3204_v48, 30  ;;  %v3228_v57 = vsub.s32 4, %v3204_v48  ;;  %v3264_v31 = vor.u32 %v3263_v35, %v3262_v27  ;;  %v10802_v0 = vpop.eup %8120 }
 0x363   :  { %v3271_v11 = vshll.u32 %v11856_v42, %v3259_v58  ;;  %12068 = vst [vmem:[#allocation126_spill] sm:$0xff] %v10802_v0  ;;  %v3122_v45 = vmul.f32 %v3121_v15, %v3119_v17  ;;  %v3267_v23 = vor.u32 %v3266_v12, %v3265_v21  ;;  %v3270_v39 = vor.u32 %v3269_v51, %v3268_v19 }
 0x364   :  { %v3275_v1 = vshrl.u32 %v11874_v60, %v3260_v50  ;;  %v3198_v52 = vadd.s32 %v10751_v55, %v10758_v56  ;;  %v10807_v24 = vsub.s32 %v3202_v33, %v3205_v30  ;;  %v3274_v8 = vshll.u32 %v11859_v3, %v3259_v58  ;;  %v10812_v0 = vpop.eup %8122 }
 0x365   :  { %v3273_v5 = vor.u32 %v3272_v29, %v3271_v11  ;;  %v3123_v49 = vxor.u32 2147483648, %v3122_v45  ;;  %v3261_v27 = vshrl.u32 %v11868_v4, %v3260_v50  ;;  %v3356_v35 = vor.u32 8388608, %v10780_v7  ;;  %12069 = vst [vmem:[#allocation127_spill] sm:$0xff] %v10812_v0 }
 0x366   :  { %v3358_v9 = vadd.s32 1, %v7648_v28  ;;  %v3208_v21 = vsub.s32 0, %v10807_v24  ;;  %v3276_v15 = vor.u32 %v3275_v1, %v3274_v8  ;;  %vm3277_vm1 = vcmp.lt.s32.totalorder %v3258_v13, 1 }
 0x367   :  { %vm3280_vm11 = vcmp.lt.s32.totalorder %v3258_v13, 4  ;;  %v3229_v55 = vsel %vm3144_vm0, %v3228_v57, %v3204_v48  ;;  %vm3278_vm12 = vcmp.lt.s32.totalorder %v3258_v13, 2  ;;  %v3285_v33 = vsel %vm3277_vm1, %v3264_v31, %v3267_v23 }
 0x368   :  { %v3282_v56 = vsel %vm3280_vm11, %v3270_v39, 2102212464  ;;  %v3124_v58 = vsel %vm3041_vm13, %v3123_v49, %v3122_v45  ;;  %v7641_v7 = vmin.u32 %v3208_v21, %v10807_v24  ;;  %vm3279_vm6 = vcmp.lt.s32.totalorder %v3258_v13, 3 }
 0x369   :  { %v3286_v50 = vsel %vm3280_vm11, %v3273_v5, 920167782  ;;  %v3281_v28 = vsel %vm3277_vm1, %v3261_v27, %v3264_v31  ;;  %v3283_v12 = vsel %vm3279_vm6, %v3267_v23, %v3282_v56  ;;  %v3289_v17 = vsel %vm3277_vm1, %v3267_v23, %v3270_v39 }
 0x36a   :  { %v3287_v8 = vsel %vm3279_vm6, %v3270_v39, %v3286_v50  ;;  %v3210_v19 = vclz %v7641_v7  ;;  %v10824_v48 = vsel %vm10794_vm8, 0, %v3229_v55  ;;  %v3290_v29 = vsel %vm3280_vm11, %v3276_v15, 1326507024 }
 0x36b   :  { %v3288_v51 = vsel %vm3278_vm12, %v3285_v33, %v3287_v8  ;;  %v10831_v49 = vsel %vm10724_vm9, %v9988_v16, %v3124_v58  ;;  %v3291_v30 = vsel %vm3279_vm6, %v3273_v5, %v3290_v29  ;;  %v3284_v11 = vsel %vm3278_vm12, %v3281_v28, %v3283_v12 }
 0x36c   :  { %v10834_v57 = vmul.u32.u64.low %v10784_v18, %v3288_v51  ;;  %v10835_v31 = vmul.u32.u64.high %v10784_v18, %v3288_v51, %v10834_v57  ;;  %v7642_v39 = vadd.s32 4294967294, %v3210_v19  ;;  %v3292_v45 = vsel %vm3278_vm12, %v3289_v17, %v3291_v30 }
 0x36d   :  { %vm3359_vm13 = vcmp.gt.s32.totalorder %v3358_v9, 0  ;;  %v10841_v23 = vmul.u32.u64.low %v10784_v18, %v3292_v45  ;;  %v10842_v1 = vmul.u32.u64.high %v10784_v18, %v3292_v45, %v10841_v23  ;;  %v3454_v61 = vand.u32 2139095040, %v10293_v62 }
 0x36e   :  { %v3360_v27 = vsel %vm3359_vm13, %v3358_v9, 0  ;;  %vm7643_vm9 = vcmp.lt.s32.totalorder %v7642_v39, 0  ;;  %v10846_v5 = vand.u32 3, %v10824_v48  ;;  %v10848_v15 = vshll.u32 %v3356_v35, 8 }
 0x36f   :  { %v3362_v21 = vand.u32 31, %v3360_v27  ;;  %8124 = vcosq.f32 %v10831_v49  ;;  %v3213_v55 = vsel %vm7643_vm9, 0, %v7642_v39  ;;  %v3300_v13 = vmul.u32 %v10784_v18, %v3284_v11 }
 0x370   :  { %12070 = vst [vmem:[#allocation128_spill] sm:$0xff] %v10846_v5  ;;  %v3303_v56 = vadd.s32 1, %v10835_v31  ;;  %v3214_v33 = vsub.s32 32, %v3213_v55  ;;  %v3218_v58 = vsub.s32 4294967266, %v3213_v55  ;;  %v10853_v7 = vshrl.u32 %v3360_v27, 5 }
 0x371   :  { %v3363_v9 = vsub.s32 32, %v3362_v21  ;;  %v3215_v50 = vshll.u32 %v10807_v24, %v3213_v55  ;;  %vm3302_vm10 = vc.u32 %v10842_v1, %v10834_v57  ;;  %v10858_v28 = vshrl.u32 %v3454_v61, 23 }
 0x372   :  { %v12071_v35 = vand.u32 2147483647, %v10293_v62  ;;  %v3216_v8 = vshrl.u32 %v3198_v52, %v3214_v33  ;;  %v3219_v18 = vadd.s32 127, %v3218_v58  ;;  %v3304_v17 = vsel %vm3302_vm10, %v3303_v56, %v10835_v31 }
 0x373   :  { %v3365_v19 = vshll.u32 %v11868_v4, %v3362_v21  ;;  %vm3247_vm5 = vcmp.lt.s32.totalorder %v10133_v59, 0  ;;  %v3305_v51 = vadd.s32 %v3304_v17, %v3300_v13  ;;  %v3366_v24 = vshrl.u32 %v11873_v14, %v3363_v9 }
 0x374   :  { %v10862_v12 = vand.u32 8388607, %v12071_v35  ;;  %v3368_v29 = vshll.u32 %v11873_v14, %v3362_v21  ;;  %v3369_v30 = vshrl.u32 %v11855_v2, %v3363_v9  ;;  %v3217_v39 = vor.u32 %v3216_v8, %v3215_v50 }
 0x375   :  { %v3220_v11 = vshll.u32 %v3219_v18, 23  ;;  %v3371_v45 = vshll.u32 %v11855_v2, %v3362_v21  ;;  %v3372_v52 = vshrl.u32 %v11856_v42, %v3363_v9  ;;  %v3306_v23 = vadd.s32 536870912, %v3305_v51 }
 0x376   :  { %v3364_v31 = vshrl.u32 %v11868_v4, %v3363_v9  ;;  %v3374_v27 = vshll.u32 %v11856_v42, %v3362_v21  ;;  %v3375_v61 = vshrl.u32 %v11859_v3, %v3363_v9  ;;  %v12072_v13 = vand.u32 2147483647, %v10133_v59 }
 0x377   :  { %v3221_v55 = vor.u32 4788187, %v3220_v11  ;;  %v3367_v33 = vor.u32 %v3366_v24, %v3365_v19  ;;  %v3370_v58 = vor.u32 %v3369_v30, %v3368_v29  ;;  %v3373_v50 = vor.u32 %v3372_v52, %v3371_v45 }
 0x378   :  { %vm10877_vm4 = vcmp.le.f32.partialorder %v12072_v13, 0.7853982  ;;  %v3307_v35 = vshrl.u32 %v3306_v23, 30  ;;  %v3376_v8 = vor.u32 %v3375_v61, %v3374_v27  ;;  %v3377_v18 = vshll.u32 %v11859_v3, %v3362_v21 }
 0x379   :  { %v3378_v17 = vshrl.u32 %v11874_v60, %v3363_v9  ;;  %v3222_v5 = vand.u32 2147483647, %v3221_v55  ;;  %v3224_v0 = vcvt.s32.f32 %v3217_v39  ;;  %vm3380_vm3 = vcmp.lt.s32.totalorder %v10853_v7, 1  ;;  %v10885_v11 = vpop.eup %8124 }
 0x37a   :  { %vm3382_vm14 = vcmp.lt.s32.totalorder %v10853_v7, 3  ;;  %v3308_v13 = vshll.u32 %v3307_v35, 30  ;;  %v3331_v16 = vsub.s32 4, %v3307_v35  ;;  %vm3383_vm15 = vcmp.lt.s32.totalorder %v10853_v7, 4 }
 0x37b   :  { %v3379_v26 = vor.u32 %v3378_v17, %v3377_v18  ;;  %v3225_v19 = vmul.f32 %v3224_v0, %v3222_v5  ;;  %v3385_v24 = vsel %vm3383_vm15, %v3373_v50, 2102212464  ;;  %v3388_v21 = vsel %vm3380_vm3, %v3367_v33, %v3370_v58 }
 0x37c   :  { %v3389_v9 = vsel %vm3383_vm15, %v3376_v8, 920167782  ;;  %v10894_v29 = vsub.s32 %v3305_v51, %v3308_v13  ;;  %vm3381_vm1 = vcmp.lt.s32.totalorder %v10853_v7, 2  ;;  %v3384_v30 = vsel %vm3380_vm3, %v3364_v31, %v3367_v33 }
 0x37d   :  { %v3390_v39 = vsel %vm3382_vm14, %v3373_v50, %v3389_v9  ;;  %v3226_v0 = vxor.u32 2147483648, %v3225_v19  ;;  %v3332_v5 = vsel %vm3247_vm5, %v3331_v16, %v3307_v35  ;;  %v3386_v45 = vsel %vm3382_vm14, %v3370_v58, %v3385_v24 }
 0x37e   :  { %v3391_v52 = vsel %vm3381_vm1, %v3388_v21, %v3390_v39  ;;  %8126 = vsinq.f32 %v10831_v49  ;;  %v10909_v51 = vadd.s32 3, %v10824_v48  ;;  %v3311_v23 = vsub.s32 0, %v10894_v29 }
 0x37f   :  { %v3392_v31 = vsel %vm3380_vm3, %v3370_v58, %v3373_v50  ;;  %v3227_v27 = vsel %vm3144_vm0, %v3226_v0, %v3225_v19  ;;  %v3393_v16 = vsel %vm3383_vm15, %v3379_v26, 1326507024  ;;  %v3334_v48 = vsel %vm10877_vm4, 0, %v3332_v5 }
 0x380   :  { %12075 = vst [vmem:[#allocation129_spill] sm:$0xff] %v10909_v51  ;;  %v10919_v61 = vmul.u32.u64.low %v10848_v15, %v3391_v52  ;;  %v10920_v55 = vmul.u32.u64.high %v10848_v15, %v3391_v52, %v10919_v61  ;;  %v7645_v49 = vmin.u32 %v3311_v23, %v10894_v29  ;;  %v3387_v33 = vsel %vm3381_vm1, %v3384_v30, %v3386_v45  ;;  %v12079_v52 = vld [vmem:[#allocation28_spill] sm:$0xff] }
 0x381   :  { %v3394_v58 = vsel %vm3382_vm14, %v3376_v8, %v3393_v16  ;;  %v3230_v26 = vsel %vm10794_vm8, %v10062_v37, %v3227_v27  ;;  %v7652_v35 = vadd.s32 4294967169, %v10858_v28  ;;  %v3459_v18 = vor.u32 8388608, %v10862_v12 }
 0x382   :  { %v3395_v50 = vsel %vm3381_vm1, %v3392_v31, %v3394_v58  ;;  %v3313_v17 = vclz %v7645_v49  ;;  %v10944_v8 = vsel %vm8637_vm2, 0, %v8528_v41  ;;  %v3301_v43 = vadd.s32 %v10834_v57, %v10842_v1  ;;  %v12078_v1 = vld [vmem:[#allocation29_spill] sm:$0xff]  ;;  %v12083_v58 = vld [vmem:[#allocation30_spill] sm:$0xff] }
 0x383   :  { %v10938_v13 = vmul.u32.u64.low %v10848_v15, %v3395_v50  ;;  %v10939_v19 = vmul.u32.u64.high %v10848_v15, %v3395_v50, %v10938_v13  ;;  %v10948_v21 = vand.u32 3, %v3334_v48  ;;  %v3406_v7 = vadd.s32 1, %v10920_v55 }
 0x384   :  { %v3461_v28 = vadd.s32 1, %v7652_v35  ;;  %8128 = vcosq.f32 %v3230_v26  ;;  %v7646_v12 = vadd.s32 4294967294, %v3313_v17  ;;  %v10951_v9 = vadd.s32 3, %v3334_v48 }
 0x385   :  { %12077 = vst [vmem:[#allocation23_spill] sm:$0xff] %v10948_v21  ;;  %v3403_v30 = vmul.u32 %v10848_v15, %v3387_v33  ;;  %8130 = vsinq.f32 %v3230_v26  ;;  %v10954_v39 = vshll.u32 %v3459_v18, 8  ;;  %v10957_v41 = vand.u32 3, %v10944_v8 }
 0x386   :  { %vm3462_vm0 = vcmp.gt.s32.totalorder %v3461_v28, 0  ;;  %vm7647_vm2 = vcmp.lt.s32.totalorder %v7646_v12, 0  ;;  %vm3405_vm8 = vc.u32 %v10939_v19, %v10919_v61  ;;  %vm3350_vm11 = vcmp.lt.s32.totalorder %v10246_v40, 0 }
 0x387   :  { %v3463_v57 = vsel %vm3462_vm0, %v3461_v28, 0  ;;  %v3316_v5 = vsel %vm7647_vm2, 0, %v7646_v12  ;;  %v3407_v45 = vsel %vm3405_vm8, %v3406_v7, %v10920_v55  ;;  %v12080_v49 = vand.u32 2147483647, %v10246_v40 }
 0x388   :  { %v3465_v15 = vand.u32 31, %v3463_v57  ;;  %v10965_v31 = vpop.eup %8126  ;;  %v3317_v27 = vsub.s32 32, %v3316_v5  ;;  %v3321_v16 = vsub.s32 4294967266, %v3316_v5  ;;  %v3408_v33 = vadd.s32 %v3407_v45, %v3403_v30 }
 0x389   :  { %vm10969_vm12 = vcmp.le.f32.partialorder %v12080_v49, 0.7853982  ;;  %v10976_v50 = vsel %vm8740_vm7, 0, %v12083_v58  ;;  %v3318_v55 = vshll.u32 %v10894_v29, %v3316_v5  ;;  %v3464_v35 = vshrl.u32 %v3463_v57, 5 }
 0x38a   :  { %v3466_v18 = vsub.s32 32, %v3465_v15  ;;  %v3468_v17 = vshll.u32 %v11868_v4, %v3465_v15  ;;  %v3319_v13 = vshrl.u32 %v3301_v43, %v3317_v27  ;;  %v3322_v24 = vadd.s32 127, %v3321_v16 }
 0x38b   :  { %v3409_v7 = vadd.s32 536870912, %v3408_v33  ;;  %v3471_v28 = vshll.u32 %v11873_v14, %v3465_v15  ;;  %v3474_v45 = vshll.u32 %v11855_v2, %v3465_v15  ;;  %v3477_v16 = vshll.u32 %v11856_v42, %v3465_v15 }
 0x38c   :  { %v3469_v12 = vshrl.u32 %v11873_v14, %v3466_v18  ;;  %v3472_v30 = vshrl.u32 %v11855_v2, %v3466_v18  ;;  %v3475_v49 = vshrl.u32 %v11856_v42, %v3466_v18  ;;  %v3320_v58 = vor.u32 %v3319_v13, %v3318_v55 }
 0x38d   :  { %v3323_v26 = vshll.u32 %v3322_v24, 23  ;;  %v3410_v29 = vshrl.u32 %v3409_v7, 30  ;;  %v3478_v57 = vshrl.u32 %v11859_v3, %v3466_v18  ;;  %v3467_v5 = vshrl.u32 %v11868_v4, %v3466_v18 }
 0x38e   :  { %v3470_v43 = vor.u32 %v3469_v12, %v3468_v17  ;;  %v3473_v27 = vor.u32 %v3472_v30, %v3471_v28  ;;  %v10988_v23 = vpop.eup %8128  ;;  %v3476_v37 = vor.u32 %v3475_v49, %v3474_v45  ;;  %v3327_v21 = vcvt.s32.f32 %v3320_v58 }
 0x38f   :  { %v3324_v14 = vor.u32 4788187, %v3323_v26  ;;  %v3411_v0 = vshll.u32 %v3410_v29, 30  ;;  %v3434_v51 = vsub.s32 4, %v3410_v29  ;;  %v10990_v2 = vpop.eup %8130  ;;  %v3479_v55 = vor.u32 %v3478_v57, %v3477_v16 }
 0x390   :  { %v3480_v13 = vshll.u32 %v11859_v3, %v3465_v15  ;;  %v3481_v24 = vshrl.u32 %v11874_v60, %v3466_v18  ;;  %vm3483_vm7 = vcmp.lt.s32.totalorder %v3464_v35, 1  ;;  %vm3484_vm6 = vcmp.lt.s32.totalorder %v3464_v35, 2 }
 0x391   :  { %v3325_v7 = vand.u32 2147483647, %v3324_v14  ;;  %v10994_v4 = vsub.s32 %v3408_v33, %v3411_v0  ;;  %v3435_v42 = vsel %vm3350_vm11, %v3434_v51, %v3410_v29  ;;  %vm3485_vm13 = vcmp.lt.s32.totalorder %v3464_v35, 3  ;;  %v12085_v29 = vld [vmem:[#allocation37_spill] sm:$0xff] }
 0x392   :  { %v11000_v17 = vsel %vm10969_vm12, 0, %v3435_v42  ;;  %v3482_v28 = vor.u32 %v3481_v24, %v3480_v13  ;;  %vm3486_vm9 = vcmp.lt.s32.totalorder %v3464_v35, 4  ;;  %v3487_v3 = vsel %vm3483_vm7, %v3467_v5, %v3470_v43  ;;  %v12086_v13 = vld [vmem:[#allocation6_spill] sm:$0xff] }
 0x393   :  { %v3328_v12 = vmul.f32 %v3327_v21, %v3325_v7  ;;  %v3414_v30 = vsub.s32 0, %v10994_v4  ;;  %v3488_v60 = vsel %vm3486_vm9, %v3476_v37, 2102212464  ;;  %v3491_v15 = vsel %vm3483_vm7, %v3470_v43, %v3473_v27 }
 0x394   :  { %v3492_v0 = vsel %vm3486_vm9, %v3479_v55, 920167782  ;;  %v3495_v33 = vsel %vm3483_vm7, %v3473_v27, %v3476_v37  ;;  %v3489_v45 = vsel %vm3485_vm13, %v3473_v27, %v3488_v60  ;;  %v3404_v58 = vadd.s32 %v10919_v61, %v10939_v19 }
 0x395   :  { %v3329_v18 = vxor.u32 2147483648, %v3328_v12  ;;  %v7649_v51 = vmin.u32 %v3414_v30, %v10994_v4  ;;  %v3493_v49 = vsel %vm3485_vm13, %v3476_v37, %v3492_v0  ;;  %v3496_v26 = vsel %vm3486_vm9, %v3482_v28, 1326507024 }
 0x396   :  { %v3494_v21 = vsel %vm3484_vm6, %v3491_v15, %v3493_v49  ;;  %v663_v57 = vxor.u32 2147483648, %v12085_v29  ;;  %v11013_v16 = vand.u32 3, %v11000_v17  ;;  %v3497_v14 = vsel %vm3485_vm13, %v3479_v55, %v3496_v26  ;;  %v12087_v55 = vld [vmem:[#allocation8_spill] sm:$0xff] }
 0x397   :  { %v3330_v5 = vsel %vm3247_vm5, %v3329_v18, %v3328_v12  ;;  %v3416_v43 = vclz %v7649_v51  ;;  %v3490_v27 = vsel %vm3484_vm6, %v3487_v3, %v3489_v45  ;;  %v3498_v37 = vsel %vm3484_vm6, %v3495_v33, %v3497_v14  ;;  %v12090_v33 = vld [vmem:[#allocation36_spill] sm:$0xff] }
 0x398   :  { %v11019_v61 = vmul.u32.u64.low %v10954_v39, %v3494_v21  ;;  %v11020_v19 = vmul.u32.u64.high %v10954_v39, %v3494_v21, %v11019_v61  ;;  %vm453_vm10 = vweird.f32 %v12086_v13  ;;  %v3333_v24 = vsel %vm10877_vm4, %v10133_v59, %v3330_v5 }
 0x399   :  { %v7650_v7 = vadd.s32 4294967294, %v3416_v43  ;;  %v11027_v42 = vmul.u32.u64.low %v10954_v39, %v3498_v37  ;;  %v11028_v28 = vmul.u32.u64.high %v10954_v39, %v3498_v37, %v11027_v42  ;;  %vm659_vm5 = vweird.f32 %v12087_v55  ;;  %v12099_v55 = vld [vmem:[#allocation21_spill] sm:$0xff] }
 0x39a   :  { %vm455_vm3 = vcmp.lt.s32.totalorder %v10957_v41, 2  ;;  %vm456_vm14 = vcmp.eq.s32.totalorder %v10957_v41, 0  ;;  %vm459_vm15 = vcmp.eq.s32.totalorder %v10957_v41, 2  ;;  %v660_v35 = vand.u32 3, %v10976_v50 }
 0x39b   :  { %vm7651_vm1 = vcmp.lt.s32.totalorder %v7650_v7, 0  ;;  %v3506_v12 = vmul.u32 %v10954_v39, %v3490_v27  ;;  %v12088_v56 = vxor.u32 2147483648, %v12078_v1  ;;  %v12089_v3 = vxor.u32 2147483648, %v12079_v52 }
 0x39c   :  { %8132 = vcosq.f32 %v3333_v24  ;;  %v3419_v15 = vsel %vm7651_vm1, 0, %v7650_v7  ;;  %v3509_v0 = vadd.s32 1, %v11020_v19  ;;  %v666_v18 = vxor.u32 2147483648, %v12090_v33 }
 0x39d   :  { %v458_v30 = vsel %vm456_vm14, %v12079_v52, %v12088_v56  ;;  %v461_v60 = vsel %vm459_vm15, %v12089_v3, %v12078_v1  ;;  %v3420_v41 = vsub.s32 32, %v3419_v15  ;;  %v3424_v51 = vsub.s32 4294967266, %v3419_v15 }
 0x39e   :  { %v462_v45 = vsel %vm455_vm3, %v458_v30, %v461_v60  ;;  %vm661_vm4 = vcmp.lt.s32.totalorder %v660_v35, 2  ;;  %v3421_v39 = vshll.u32 %v10994_v4, %v3419_v15  ;;  %vm3508_vm0 = vc.u32 %v11028_v28, %v11019_v61 }
 0x39f   :  { %vm662_vm2 = vcmp.eq.s32.totalorder %v660_v35, 0  ;;  %vm665_vm8 = vcmp.eq.s32.totalorder %v660_v35, 2  ;;  %v3422_v49 = vshrl.u32 %v3404_v58, %v3420_v41  ;;  %v3425_v21 = vadd.s32 127, %v3424_v51 }
 0x3a0   :  { %vm3453_vm7 = vcmp.lt.s32.totalorder %v10293_v62, 0  ;;  %v3510_v26 = vsel %vm3508_vm0, %v3509_v0, %v11020_v19  ;;  %v664_v5 = vsel %vm662_vm2, %v12090_v33, %v663_v57  ;;  %v12091_v43 = vand.u32 2147483647, %v10293_v62 }
 0x3a1   :  { %v3511_v4 = vadd.s32 %v3510_v26, %v3506_v12  ;;  %v667_v27 = vsel %vm665_vm8, %v666_v18, %v12085_v29  ;;  %v3787_v58 = vadd.s32 3, %v10944_v8  ;;  %v3995_v37 = vadd.s32 3, %v10976_v50 }
 0x3a2   :  { %vm11053_vm6 = vcmp.le.f32.partialorder %v12091_v43, 0.7853982  ;;  %v3423_v7 = vor.u32 %v3422_v49, %v3421_v39  ;;  %v3426_v42 = vshll.u32 %v3425_v21, 23  ;;  %v463_v19 = vsel %vm453_vm10, nan, %v462_v45  ;;  %v12096_v43 = vld [vmem:[#allocation17_spill] sm:$0xff] }
 0x3a3   :  { %v668_v56 = vsel %vm661_vm4, %v664_v5, %v667_v27  ;;  %v3512_v30 = vadd.s32 536870912, %v3511_v4  ;;  %v3788_v60 = vand.u32 3, %v3787_v58  ;;  %v3996_v15 = vand.u32 3, %v3995_v37 }
 0x3a4   :  { %v669_v3 = vsel %vm659_vm5, nan, %v668_v56  ;;  %8134 = vsinq.f32 %v3333_v24  ;;  %v3427_v12 = vor.u32 4788187, %v3426_v42  ;;  %v11066_v0 = vadd.s32 3, %v11000_v17  ;;  %v12097_v42 = vld [vmem:[#allocation22_spill] sm:$0xff]  ;;  %v12098_v56 = vld [vmem:[#allocation5_spill] sm:$0xff] }
 0x3a5   :  { %v3555_v8 = vpack.c.bf16 %v669_v3, %v463_v19  ;;  %v11069_v50 = vadd.s32 %v11019_v61, %v11028_v28  ;;  %v3513_v41 = vshrl.u32 %v3512_v30, 30  ;;  %vm3790_vm13 = vcmp.eq.s32.totalorder %v3788_v60, 0 }
 0x3a6   :  { %vm3793_vm9 = vcmp.eq.s32.totalorder %v3788_v60, 2  ;;  %v3428_v35 = vand.u32 2147483647, %v3427_v12  ;;  %v3430_v51 = vcvt.s32.f32 %v3423_v7  ;;  %v12094_v45 = vxor.u32 2147483648, %v12078_v1  ;;  %v11077_v17 = vpop.eup %8132 }
 0x3a7   :  { %v12095_v24 = vxor.u32 2147483648, %v12079_v52  ;;  %7348 = vmatprep.mubr.bf16.mxu0 %v3555_v8  ;;  %v3514_v21 = vshll.u32 %v3513_v41, 30  ;;  %v3537_v26 = vsub.s32 4, %v3513_v41  ;;  %vm3789_vm3 = vcmp.lt.s32.totalorder %v3788_v60, 2 }
 0x3a8   :  { %v3792_v39 = vsel %vm3790_vm13, %v12079_v52, %v12094_v45  ;;  %vm3998_vm14 = vcmp.eq.s32.totalorder %v3996_v15, 0  ;;  %v3431_v61 = vmul.f32 %v3430_v51, %v3428_v35  ;;  %vm4001_vm15 = vcmp.eq.s32.totalorder %v3996_v15, 2  ;;  %v12101_v35 = vld [vmem:[#allocation35_spill] sm:$0xff] }
 0x3a9   :  { %v3795_v49 = vsel %vm3793_vm9, %v12095_v24, %v12078_v1  ;;  %v4000_v5 = vsel %vm3998_vm14, %v12090_v33, %v663_v57  ;;  %vm352_vm1 = vcmp.lt.s32.totalorder %v12096_v43, 2  ;;  %v11083_v27 = vsub.s32 %v3511_v4, %v3514_v21  ;;  %v12103_v24 = vld [vmem:[#allocation34_spill] sm:$0xff] }
 0x3aa   :  { %v3796_v28 = vsel %vm3789_vm3, %v3792_v39, %v3795_v49  ;;  %v3538_v1 = vsel %vm3453_vm7, %v3537_v26, %v3513_v41  ;;  %vm3997_vm4 = vcmp.lt.s32.totalorder %v3996_v15, 2  ;;  %v4003_v52 = vsel %vm4001_vm15, %v666_v18, %v12085_v29  ;;  %v12100_v41 = vld [vmem:[#allocation7_spill] sm:$0xff]  ;;  %v12102_v39 = vld [vmem:[#allocation24_spill] sm:$0xff] }
 0x3ab   :  { %v3432_v58 = vxor.u32 2147483648, %v3431_v61  ;;  %v3540_v37 = vsel %vm11053_vm6, 0, %v3538_v1  ;;  %v4004_v7 = vsel %vm3997_vm4, %v4000_v5, %v4003_v52  ;;  %v354_v19 = vxor.u32 2147483648, %v12097_v42  ;;  %v12104_v26 = vld [vmem:[#allocation19_spill] sm:$0xff]  ;;  %v12105_v1 = vld [vmem:[#allocation25_spill] sm:$0xff] }
 0x3ac   :  { %v3517_v57 = vsub.s32 0, %v11083_v27  ;;  %v3797_v33 = vsel %vm453_vm10, nan, %v3796_v28  ;;  %v4005_v4 = vsel %vm659_vm5, nan, %v4004_v7  ;;  %vm350_vm0 = vweird.f32 %v12098_v56 }
 0x3ad   :  { %vm353_vm2 = vcmp.eq.s32.totalorder %v12096_v43, 0  ;;  %v3433_v29 = vsel %vm3350_vm11, %v3432_v58, %v3431_v61  ;;  %v11100_v18 = vand.u32 3, %v3540_v37  ;;  %v11102_v30 = vadd.s32 3, %v3540_v37 }
 0x3ae   :  { %v6919_v3 = vpack.c.bf16 %v4005_v4, %v3797_v33  ;;  %v3436_v13 = vsel %vm10969_vm12, %v10246_v40, %v3433_v29  ;;  %v7653_v60 = vmin.u32 %v3517_v57, %v11083_v27  ;;  %v355_v15 = vsel %vm353_vm2, %v12099_v55, %v354_v19  ;;  %v11110_v8 = vpop.eup %8134 }
 0x3af   :  { %v357_v12 = vxor.u32 2147483648, %v12099_v55  ;;  %8136 = vcosq.f32 %v3436_v13  ;;  %vm356_vm11 = vcmp.eq.s32.totalorder %v12096_v43, 2  ;;  %vm556_vm10 = vweird.f32 %v12100_v41 }
 0x3b0   :  { %7171 = vmatprep.mubr.bf16.mxu1 %v6919_v3  ;;  %v560_v51 = vxor.u32 2147483648, %v12101_v35  ;;  %v3519_v45 = vclz %v7653_v60  ;;  %vm558_vm12 = vcmp.lt.s32.totalorder %v12102_v39, 2  ;;  %vm559_vm5 = vcmp.eq.s32.totalorder %v12102_v39, 0 }
 0x3b1   :  { %v358_v48 = vsel %vm356_vm11, %v357_v12, %v12097_v42  ;;  %8138 = vsinq.f32 %v3436_v13  ;;  %v563_v21 = vxor.u32 2147483648, %v12103_v24  ;;  %v3684_v61 = vand.u32 3, %v12104_v26  ;;  %v12107_v26 = vld [vmem:[#allocation12_spill] sm:$0xff] }
 0x3b2   :  { %v561_v49 = vsel %vm559_vm5, %v12103_v24, %v560_v51  ;;  %v7654_v28 = vadd.s32 4294967294, %v3519_v45  ;;  %v359_v5 = vsel %vm352_vm1, %v355_v15, %v358_v48  ;;  %vm562_vm8 = vcmp.eq.s32.totalorder %v12102_v39, 2  ;;  %v12106_v48 = vld [vmem:[#allocation10_spill] sm:$0xff] }
 0x3b3   :  { %v3892_v52 = vand.u32 3, %v12105_v1  ;;  %v564_v58 = vsel %vm562_vm8, %v563_v21, %v12101_v35  ;;  %vm3685_vm13 = vcmp.lt.s32.totalorder %v3684_v61, 2  ;;  %vm3686_vm9 = vcmp.eq.s32.totalorder %v3684_v61, 0 }
 0x3b4   :  { %vm3689_vm3 = vcmp.eq.s32.totalorder %v3684_v61, 2  ;;  %vm7655_vm14 = vcmp.lt.s32.totalorder %v7654_v28, 0  ;;  %v565_v37 = vsel %vm558_vm12, %v561_v49, %v564_v58  ;;  %v3688_v7 = vsel %vm3686_vm9, %v12099_v55, %v354_v19 }
 0x3b5   :  { %v3691_v57 = vsel %vm3689_vm3, %v357_v12, %v12097_v42  ;;  %v3522_v33 = vsel %vm7655_vm14, 0, %v7654_v28  ;;  %v360_v43 = vsel %vm350_vm0, nan, %v359_v5  ;;  %v566_v4 = vsel %vm556_vm10, nan, %v565_v37  ;;  %v12109_v5 = vld [vmem:[#allocation55_spill] sm:$0xff] }
 0x3b6   :  { %v3692_v29 = vsel %vm3685_vm13, %v3688_v7, %v3691_v57  ;;  %v3523_v3 = vsub.s32 32, %v3522_v33  ;;  %v3527_v13 = vsub.s32 4294967266, %v3522_v33  ;;  %v3554_v60 = vpack.c.bf16 %v566_v4, %v360_v43  ;;  %v12111_v37 = vld [vmem:[#allocation47_spill] sm:$0xff]  ;;  %v12112_v43 = vld [vmem:[#allocation38_spill] sm:$0xff] }
 0x3b7   :  { %vm3893_vm15 = vcmp.lt.s32.totalorder %v3892_v52, 2  ;;  %v3524_v15 = vshll.u32 %v11083_v27, %v3522_v33  ;;  %v3693_v45 = vsel %vm350_vm0, nan, %v3692_v29  ;;  %vm3894_vm1 = vcmp.eq.s32.totalorder %v3892_v52, 0 }
 0x3b8   :  { %vm3897_vm4 = vcmp.eq.s32.totalorder %v3892_v52, 2  ;;  %v3525_v42 = vshrl.u32 %v11069_v50, %v3523_v3  ;;  %v3528_v19 = vadd.s32 127, %v3527_v13  ;;  %v3896_v55 = vsel %vm3894_vm1, %v12103_v24, %v560_v51  ;;  %7349 = vmatmul.mubr.bf16.vlgmr.msra.gmra.mrb[32].mxu0 %v3554_v60  ;;  %v12108_v51 = vld [vmem:[#allocation56_spill] sm:$0xff]  ;;  %v12110_v52 = vld [vmem:[#allocation39_spill] sm:$0xff] }
 0x3b9   :  { %v3899_v12 = vsel %vm3897_vm4, %v563_v21, %v12101_v35  ;;  %vm865_vm2 = vweird.f32 %v12106_v48  ;;  %v11139_v39 = vpop.eup %8136  ;;  %v869_v27 = vxor.u32 2147483648, %v9132_v32  ;;  %v872_v56 = vxor.u32 2147483648, %v9035_v25 }
 0x3ba   :  { %v3900_v49 = vsel %vm3893_vm15, %v3896_v55, %v3899_v12  ;;  %vm1071_vm0 = vweird.f32 %v12107_v26  ;;  %v3526_v61 = vor.u32 %v3525_v42, %v3524_v15  ;;  %v3529_v28 = vshll.u32 %v3528_v19, 23 }
 0x3bb   :  { %v3901_v50 = vsel %vm556_vm10, nan, %v3900_v49  ;;  %v1075_v24 = vxor.u32 2147483648, %v12108_v51  ;;  %v11147_v35 = vpop.eup %8138  ;;  %v1078_v1 = vxor.u32 2147483648, %v12109_v5  ;;  %v4204_v58 = vand.u32 3, %v12110_v52  ;;  %v12113_v49 = vld [vmem:[#allocation46_spill] sm:$0xff]  ;;  %v12115_v52 = vld [vmem:[#allocation44_spill] sm:$0xff] }
 0x3bc   :  { %v6918_v21 = vpack.c.bf16 %v3901_v50, %v3693_v45  ;;  %v4412_v7 = vand.u32 3, %v12111_v37  ;;  %v3530_v57 = vor.u32 4788187, %v3529_v28  ;;  %v3533_v33 = vcvt.s32.f32 %v3526_v61  ;;  %v12116_v37 = vld [vmem:[#allocation41_spill] sm:$0xff] }
 0x3bd   :  { %vm867_vm11 = vcmp.lt.s32.totalorder %v12112_v43, 2  ;;  %vm868_vm12 = vcmp.eq.s32.totalorder %v12112_v43, 0  ;;  %vm4205_vm5 = vcmp.lt.s32.totalorder %v4204_v58, 2  ;;  %vm4206_vm10 = vcmp.eq.s32.totalorder %v4204_v58, 0 }
 0x3be   :  { %7172 = vmatmul.mubr.bf16.vlgmr.msra.gmra.mrb[0].mxu1 %v6918_v21  ;;  %vm4209_vm8 = vcmp.eq.s32.totalorder %v4204_v58, 2  ;;  %vm871_vm13 = vcmp.eq.s32.totalorder %v12112_v43, 2  ;;  %v3531_v41 = vand.u32 2147483647, %v3530_v57  ;;  %v4208_v4 = vsel %vm4206_vm10, %v9035_v25, %v869_v27  ;;  %v12118_v57 = vld [vmem:[#allocation54_spill] sm:$0xff] }
 0x3bf   :  { %v4211_v29 = vsel %vm4209_vm8, %v872_v56, %v9132_v32  ;;  %vm4414_vm9 = vcmp.eq.s32.totalorder %v4412_v7, 0  ;;  %vm4417_vm3 = vcmp.eq.s32.totalorder %v4412_v7, 2  ;;  %v870_v60 = vsel %vm868_vm12, %v9035_v25, %v869_v27 }
 0x3c0   :  { %v4212_v3 = vsel %vm4205_vm5, %v4208_v4, %v4211_v29  ;;  %v4416_v13 = vsel %vm4414_vm9, %v12109_v5, %v1075_v24  ;;  %v3534_v15 = vmul.f32 %v3533_v33, %v3531_v41  ;;  %vm4413_vm14 = vcmp.lt.s32.totalorder %v4412_v7, 2  ;;  %v12119_v41 = vld [vmem:[#allocation53_spill] sm:$0xff]  ;;  %v12121_v29 = vld [vmem:[#allocation43_spill] sm:$0xff] }
 0x3c1   :  { %v4419_v45 = vsel %vm4417_vm3, %v1078_v1, %v12108_v51  ;;  %v873_v42 = vsel %vm871_vm13, %v872_v56, %v9132_v32  ;;  %v4213_v19 = vsel %vm865_vm2, nan, %v4212_v3  ;;  %vm1074_vm15 = vcmp.eq.s32.totalorder %v12113_v49, 0  ;;  %v12114_v56 = vld [vmem:[#allocation9_spill] sm:$0xff] }
 0x3c2   :  { %v4420_v55 = vsel %vm4413_vm14, %v4416_v13, %v4419_v45  ;;  %v874_v12 = vsel %vm867_vm11, %v870_v60, %v873_v42  ;;  %v3535_v61 = vxor.u32 2147483648, %v3534_v15  ;;  %vm1073_vm1 = vcmp.lt.s32.totalorder %v12113_v49, 2  ;;  %v12122_v60 = vld [vmem:[#allocation31_spill] sm:$0xff] }
 0x3c3   :  { %v4421_v28 = vsel %vm1071_vm0, nan, %v4420_v55  ;;  %v1076_v25 = vsel %vm1074_vm15, %v12109_v5, %v1075_v24  ;;  %v875_v32 = vsel %vm865_vm2, nan, %v874_v12  ;;  %vm1077_vm4 = vcmp.eq.s32.totalorder %v12113_v49, 2  ;;  %v12117_v5 = vld [vmem:[#allocation11_spill] sm:$0xff]  ;;  %v12123_v49 = vld [vmem:[#allocation42_spill] sm:$0xff] }
 0x3c4   :  { %v6921_v27 = vpack.c.bf16 %v4421_v28, %v4213_v19  ;;  %vm762_vm12 = vweird.f32 %v12114_v56  ;;  %v3536_v50 = vsel %vm3453_vm7, %v3535_v61, %v3534_v15  ;;  %v1079_v21 = vsel %vm1077_vm4, %v1078_v1, %v12108_v51  ;;  %v12120_v51 = vld [vmem:[#allocation32_spill] sm:$0xff] }
 0x3c5   :  { %v766_v58 = vxor.u32 2147483648, %v12115_v52  ;;  %v769_v7 = vxor.u32 2147483648, %v12116_v37  ;;  %v3539_v24 = vsel %vm11053_vm6, %v10293_v62, %v3536_v50  ;;  %v1080_v48 = vsel %vm1073_vm1, %v1076_v25, %v1079_v21  ;;  %v12129_v56 = vld [vmem:[#allocation64_spill] sm:$0xff] }
 0x3c6   :  { %7179 = vmatprep.mubr.bf16.mxu1 %v6921_v27  ;;  %vm968_vm2 = vweird.f32 %v12117_v5  ;;  %v972_v33 = vxor.u32 2147483648, %v12118_v57  ;;  %v1081_v43 = vsel %vm1071_vm0, nan, %v1080_v48  ;;  %v975_v4 = vxor.u32 2147483648, %v12119_v41  ;;  %v12125_v48 = vld [vmem:[#allocation62_spill] sm:$0xff] }
 0x3c7   :  { %v4100_v1 = vand.u32 3, %v12120_v51  ;;  %v4308_v3 = vand.u32 3, %v12121_v29  ;;  %8140 = vcosq.f32 %v3539_v24  ;;  %v3557_v13 = vpack.c.bf16 %v1081_v43, %v875_v32  ;;  %v12126_v51 = vld [vmem:[#allocation73_spill] sm:$0xff] }
 0x3c8   :  { %vm764_vm7 = vcmp.lt.s32.totalorder %v12122_v60, 2  ;;  %vm765_vm6 = vcmp.eq.s32.totalorder %v12122_v60, 0  ;;  %vm768_vm9 = vcmp.eq.s32.totalorder %v12122_v60, 2  ;;  %vm970_vm3 = vcmp.lt.s32.totalorder %v12123_v49, 2  ;;  %v12131_v60 = vld [vmem:[#allocation51_spill] sm:$0xff] }
 0x3c9   :  { %vm4101_vm11 = vcmp.lt.s32.totalorder %v4100_v1, 2  ;;  %vm4102_vm5 = vcmp.eq.s32.totalorder %v4100_v1, 0  ;;  %vm4105_vm10 = vcmp.eq.s32.totalorder %v4100_v1, 2  ;;  %vm4309_vm8 = vcmp.lt.s32.totalorder %v4308_v3, 2  ;;  %7356 = vmatprep.mubr.bf16.mxu0 %v3557_v13  ;;  %v12130_v13 = vld [vmem:[#allocation16_spill] sm:$0xff] }
 0x3ca   :  { %v4104_v14 = vsel %vm4102_vm5, %v12116_v37, %v766_v58  ;;  %v4107_v26 = vsel %vm4105_vm10, %v769_v7, %v12115_v52  ;;  %vm4310_vm0 = vcmp.eq.s32.totalorder %v4308_v3, 0  ;;  %vm4313_vm13 = vcmp.eq.s32.totalorder %v4308_v3, 2 }
 0x3cb   :  { %v4108_v15 = vsel %vm4101_vm11, %v4104_v14, %v4107_v26  ;;  %v4312_v45 = vsel %vm4310_vm0, %v12119_v41, %v972_v33  ;;  %v4315_v42 = vsel %vm4313_vm13, %v975_v4, %v12118_v57  ;;  %v767_v19 = vsel %vm765_vm6, %v12116_v37, %v766_v58  ;;  %v12124_v37 = vld [vmem:[#allocation14_spill] sm:$0xff] }
 0x3cc   :  { %v4109_v55 = vsel %vm762_vm12, nan, %v4108_v15  ;;  %v4316_v12 = vsel %vm4309_vm8, %v4312_v45, %v4315_v42  ;;  %v770_v28 = vsel %vm768_vm9, %v769_v7, %v12115_v52  ;;  %vm971_vm14 = vcmp.eq.s32.totalorder %v12123_v49, 0 }
 0x3cd   :  { %v4317_v61 = vsel %vm968_vm2, nan, %v4316_v12  ;;  %vm974_vm15 = vcmp.eq.s32.totalorder %v12123_v49, 2  ;;  %v771_v27 = vsel %vm764_vm7, %v767_v19, %v770_v28  ;;  %v973_v32 = vsel %vm971_vm14, %v12119_v41, %v972_v33  ;;  %v12127_v41 = vld [vmem:[#allocation72_spill] sm:$0xff]  ;;  %v12132_v49 = vld [vmem:[#allocation63_spill] sm:$0xff] }
 0x3ce   :  { %v6920_v25 = vpack.c.bf16 %v4317_v61, %v4109_v55  ;;  %v976_v50 = vsel %vm974_vm15, %v975_v4, %v12118_v57  ;;  %8142 = vsinq.f32 %v3539_v24  ;;  %v772_v21 = vsel %vm762_vm12, nan, %v771_v27  ;;  %v12128_v24 = vld [vmem:[#allocation52_spill] sm:$0xff] }
 0x3cf   :  { %v977_v58 = vsel %vm970_vm3, %v973_v32, %v976_v50  ;;  %vm1277_vm1 = vweird.f32 %v12124_v37  ;;  %v1281_v7 = vxor.u32 2147483648, %v9426_v63  ;;  %v1284_v43 = vxor.u32 2147483648, %v12125_v48  ;;  %v12137_v37 = vld [vmem:[#allocation71_spill] sm:$0xff] }
 0x3d0   :  { %7180 = vmatmul.mubr.bf16.gmra.mrb[4].mxu1 %v6920_v25  ;;  %v978_v52 = vsel %vm968_vm2, nan, %v977_v58  ;;  %v1487_v1 = vxor.u32 2147483648, %v12126_v51  ;;  %v1490_v57 = vxor.u32 2147483648, %v12127_v41  ;;  %v4620_v4 = vand.u32 3, %v12128_v24  ;;  %v12133_v58 = vld [vmem:[#allocation13_spill] sm:$0xff]  ;;  %v12138_v24 = vld [vmem:[#allocation50_spill] sm:$0xff] }
 0x3d1   :  { %v3556_v33 = vpack.c.bf16 %v978_v52, %v772_v21  ;;  %v4828_v29 = vand.u32 3, %v12129_v56  ;;  %v11220_v3 = vpop.eup %8140  ;;  %vm1483_vm4 = vweird.f32 %v12130_v13  ;;  %vm1279_vm12 = vcmp.lt.s32.totalorder %v12131_v60, 2  ;;  %v12134_v52 = vld [vmem:[#allocation59_spill] sm:$0xff] }
 0x3d2   :  { %vm1280_vm2 = vcmp.eq.s32.totalorder %v12131_v60, 0  ;;  %vm1283_vm7 = vcmp.eq.s32.totalorder %v12131_v60, 2  ;;  %vm4621_vm6 = vcmp.lt.s32.totalorder %v4620_v4, 2  ;;  %vm4622_vm11 = vcmp.eq.s32.totalorder %v4620_v4, 0 }
 0x3d3   :  { %7357 = vmatmul.mubr.bf16.gmra.mrb[36].mxu0 %v3556_v33  ;;  %vm4625_vm5 = vcmp.eq.s32.totalorder %v4620_v4, 2  ;;  %vm4829_vm10 = vcmp.lt.s32.totalorder %v4828_v29, 2  ;;  %v4624_v5 = vsel %vm4622_vm11, %v12125_v48, %v1281_v7  ;;  %vm4830_vm8 = vcmp.eq.s32.totalorder %v4828_v29, 0  ;;  %v12136_v33 = vld [vmem:[#allocation15_spill] sm:$0xff] }
 0x3d4   :  { %v4627_v14 = vsel %vm4625_vm5, %v1284_v43, %v9426_v63  ;;  %vm4833_vm0 = vcmp.eq.s32.totalorder %v4828_v29, 2  ;;  %v4832_v15 = vsel %vm4830_vm8, %v12127_v41, %v1487_v1  ;;  %v1282_v42 = vsel %vm1280_vm2, %v12125_v48, %v1281_v7  ;;  %v12135_v48 = vld [vmem:[#allocation58_spill] sm:$0xff]  ;;  %v12140_v29 = vld [vmem:[#allocation61_spill] sm:$0xff] }
 0x3d5   :  { %v4628_v26 = vsel %vm4621_vm6, %v4624_v5, %v4627_v14  ;;  %v4835_v45 = vsel %vm4833_vm0, %v1490_v57, %v12126_v51  ;;  %v1285_v12 = vsel %vm1283_vm7, %v1284_v43, %v9426_v63  ;;  %vm1486_vm13 = vcmp.eq.s32.totalorder %v12132_v49, 0  ;;  %v12141_v5 = vld [vmem:[#allocation48_spill] sm:$0xff] }
 0x3d6   :  { %v4629_v19 = vsel %vm1277_vm1, nan, %v4628_v26  ;;  %v4836_v55 = vsel %vm4829_vm10, %v4832_v15, %v4835_v45  ;;  %v1286_v28 = vsel %vm1279_vm12, %v1282_v42, %v1285_v12  ;;  %v1488_v25 = vsel %vm1486_vm13, %v12127_v41, %v1487_v1 }
 0x3d7   :  { %v4837_v61 = vsel %vm1483_vm4, nan, %v4836_v55  ;;  %vm1489_vm9 = vcmp.eq.s32.totalorder %v12132_v49, 2  ;;  %v1287_v32 = vsel %vm1277_vm1, nan, %v1286_v28  ;;  %vm1485_vm3 = vcmp.lt.s32.totalorder %v12132_v49, 2 }
 0x3d8   :  { %v6923_v27 = vpack.c.bf16 %v4837_v61, %v4629_v19  ;;  %v1491_v63 = vsel %vm1489_vm9, %v1490_v57, %v12126_v51  ;;  %v11247_v50 = vpop.eup %8142  ;;  %vm1174_vm14 = vweird.f32 %v12133_v58  ;;  %v1178_v7 = vxor.u32 2147483648, %v12134_v52  ;;  %v12139_v57 = vld [vmem:[#allocation66_spill] sm:$0xff]  ;;  %v12142_v61 = vld [vmem:[#allocation60_spill] sm:$0xff]  ;;  %v12147_v58 = vld [vmem:[#allocation81_spill] sm:$0xff] }
 0x3d9   :  { %v1492_v21 = vsel %vm1485_vm3, %v1488_v25, %v1491_v63  ;;  %v1181_v43 = vxor.u32 2147483648, %v12135_v48  ;;  %vm1380_vm15 = vweird.f32 %v12136_v33  ;;  %v1384_v41 = vxor.u32 2147483648, %v12137_v37 }
 0x3da   :  { %7187 = vmatprep.mubr.bf16.mxu1 %v6923_v27  ;;  %v1493_v1 = vsel %vm1483_vm4, nan, %v1492_v21  ;;  %v4516_v4 = vand.u32 3, %v12138_v24  ;;  %v1387_v56 = vxor.u32 2147483648, %v12139_v57  ;;  %v4724_v60 = vand.u32 3, %v12140_v29  ;;  %v12148_v29 = vld [vmem:[#allocation33_spill] sm:$0xff] }
 0x3db   :  { %v3559_v51 = vpack.c.bf16 %v1493_v1, %v1287_v32  ;;  %vm1176_vm1 = vcmp.lt.s32.totalorder %v12141_v5, 2  ;;  %vm1177_vm6 = vcmp.eq.s32.totalorder %v12141_v5, 0  ;;  %vm1180_vm5 = vcmp.eq.s32.totalorder %v12141_v5, 2 }
 0x3dc   :  { %vm4517_vm12 = vcmp.lt.s32.totalorder %v4516_v4, 2  ;;  %vm4518_vm2 = vcmp.eq.s32.totalorder %v4516_v4, 0  ;;  %vm4521_vm7 = vcmp.eq.s32.totalorder %v4516_v4, 2  ;;  %vm4726_vm4 = vcmp.eq.s32.totalorder %v4724_v60, 0  ;;  %v12145_v4 = vld [vmem:[#allocation87_spill] sm:$0xff] }
 0x3dd   :  { %7364 = vmatprep.mubr.bf16.mxu0 %v3559_v51  ;;  %v4520_v13 = vsel %vm4518_vm2, %v12135_v48, %v1178_v7  ;;  %v4523_v14 = vsel %vm4521_vm7, %v1181_v43, %v12134_v52  ;;  %v1179_v26 = vsel %vm1177_vm6, %v12135_v48, %v1178_v7  ;;  %v4728_v45 = vsel %vm4726_vm4, %v12139_v57, %v1384_v41  ;;  %v12146_v51 = vld [vmem:[#allocation70_spill] sm:$0xff] }
 0x3de   :  { %v4524_v15 = vsel %vm4517_vm12, %v4520_v13, %v4523_v14  ;;  %vm4729_vm11 = vcmp.eq.s32.totalorder %v4724_v60, 2  ;;  %vm4725_vm10 = vcmp.lt.s32.totalorder %v4724_v60, 2  ;;  %v1182_v55 = vsel %vm1180_vm5, %v1181_v43, %v12134_v52  ;;  %v12143_v52 = vld [vmem:[#allocation20_spill] sm:$0xff]  ;;  %v12144_v43 = vld [vmem:[#allocation79_spill] sm:$0xff]  ;;  %v12149_v60 = vld [vmem:[#allocation69_spill] sm:$0xff] }
 0x3df   :  { %v4525_v42 = vsel %vm1174_vm14, nan, %v4524_v15  ;;  %v4731_v19 = vsel %vm4729_vm11, %v1387_v56, %v12137_v37  ;;  %v1183_v49 = vsel %vm1176_vm1, %v1179_v26, %v1182_v55  ;;  %vm1383_vm8 = vcmp.eq.s32.totalorder %v12142_v61, 0  ;;  %v12150_v55 = vld [vmem:[#allocation80_spill] sm:$0xff] }
 0x3e0   :  { %v4732_v12 = vsel %vm4725_vm10, %v4728_v45, %v4731_v19  ;;  %vm1386_vm0 = vcmp.eq.s32.totalorder %v12142_v61, 2  ;;  %vm1382_vm13 = vcmp.lt.s32.totalorder %v12142_v61, 2  ;;  %v1385_v25 = vsel %vm1383_vm8, %v12139_v57, %v1384_v41 }
 0x3e1   :  { %v4733_v28 = vsel %vm1380_vm15, nan, %v4732_v12  ;;  %v1388_v27 = vsel %vm1386_vm0, %v1387_v56, %v12137_v37  ;;  %v1184_v63 = vsel %vm1174_vm14, nan, %v1183_v49  ;;  %vm1689_vm9 = vweird.f32 %v12143_v52 }
 0x3e2   :  { %v6922_v32 = vpack.c.bf16 %v4733_v28, %v4525_v42  ;;  %v1389_v21 = vsel %vm1382_vm13, %v1385_v25, %v1388_v27  ;;  %v1693_v48 = vxor.u32 2147483648, %v9904_v44  ;;  %v1696_v1 = vxor.u32 2147483648, %v12144_v43 }
 0x3e3   :  { %v1390_v7 = vsel %vm1380_vm15, nan, %v1389_v21  ;;  %v1899_v24 = vxor.u32 2147483648, %v9932_v53  ;;  %v1902_v37 = vxor.u32 2147483648, %v12145_v4  ;;  %v5036_v57 = vand.u32 3, %v12146_v51 }
 0x3e4   :  { %7188 = vmatmul.mubr.bf16.gmra.mrb[8].mxu1 %v6922_v32  ;;  %v3558_v41 = vpack.c.bf16 %v1390_v7, %v1184_v63  ;;  %v5244_v56 = vand.u32 3, %v12147_v58  ;;  %vm1895_vm3 = vweird.f32 %v12148_v29  ;;  %vm1691_vm14 = vcmp.lt.s32.totalorder %v12149_v60, 2  ;;  %v12151_v32 = vld [vmem:[#allocation18_spill] sm:$0xff]  ;;  %v12152_v63 = vld [vmem:[#allocation75_spill] sm:$0xff] }
 0x3e5   :  { %vm1692_vm15 = vcmp.eq.s32.totalorder %v12149_v60, 0  ;;  %vm1695_vm1 = vcmp.eq.s32.totalorder %v12149_v60, 2  ;;  %vm5037_vm12 = vcmp.lt.s32.totalorder %v5036_v57, 2  ;;  %vm5038_vm2 = vcmp.eq.s32.totalorder %v5036_v57, 0  ;;  %v12153_v7 = vld [vmem:[#allocation74_spill] sm:$0xff] }
 0x3e6   :  { %7365 = vmatmul.mubr.bf16.gmra.mrb[40].mxu0 %v3558_v41  ;;  %vm5041_vm7 = vcmp.eq.s32.totalorder %v5036_v57, 2  ;;  %vm5245_vm6 = vcmp.lt.s32.totalorder %v5244_v56, 2  ;;  %v5040_v33 = vsel %vm5038_vm2, %v12144_v43, %v1693_v48  ;;  %vm5246_vm4 = vcmp.eq.s32.totalorder %v5244_v56, 0  ;;  %v12156_v41 = vld [vmem:[#allocation68_spill] sm:$0xff]  ;;  %v12157_v57 = vld [vmem:[#allocation85_spill] sm:$0xff] }
 0x3e7   :  { %v5043_v5 = vsel %vm5041_vm7, %v1696_v1, %v9904_v44  ;;  %vm5249_vm11 = vcmp.eq.s32.totalorder %v5244_v56, 2  ;;  %v5248_v14 = vsel %vm5246_vm4, %v12145_v4, %v1899_v24  ;;  %v1694_v15 = vsel %vm1692_vm15, %v12144_v43, %v1693_v48  ;;  %v12159_v56 = vld [vmem:[#allocation67_spill] sm:$0xff] }
 0x3e8   :  { %v5044_v13 = vsel %vm5037_vm12, %v5040_v33, %v5043_v5  ;;  %v5251_v26 = vsel %vm5249_vm11, %v1902_v37, %v9932_v53  ;;  %v1697_v19 = vsel %vm1695_vm1, %v1696_v1, %v9904_v44  ;;  %vm1898_vm5 = vcmp.eq.s32.totalorder %v12150_v55, 0  ;;  %v12154_v1 = vld [vmem:[#allocation26_spill] sm:$0xff] }
 0x3e9   :  { %v5045_v45 = vsel %vm1689_vm9, nan, %v5044_v13  ;;  %v5252_v42 = vsel %vm5245_vm6, %v5248_v14, %v5251_v26  ;;  %v1698_v49 = vsel %vm1691_vm14, %v1694_v15, %v1697_v19  ;;  %v1900_v61 = vsel %vm1898_vm5, %v12145_v4, %v1899_v24  ;;  %v12155_v24 = vld [vmem:[#allocation86_spill] sm:$0xff]  ;;  %v12160_v19 = vld [vmem:[#allocation76_spill] sm:$0xff] }
 0x3ea   :  { %v5253_v12 = vsel %vm1895_vm3, nan, %v5252_v42  ;;  %vm1901_vm10 = vcmp.eq.s32.totalorder %v12150_v55, 2  ;;  %v1699_v25 = vsel %vm1689_vm9, nan, %v1698_v49  ;;  %vm1897_vm8 = vcmp.lt.s32.totalorder %v12150_v55, 2 }
 0x3eb   :  { %v6925_v28 = vpack.c.bf16 %v5253_v12, %v5045_v45  ;;  %v1903_v44 = vsel %vm1901_vm10, %v1902_v37, %v9932_v53  ;;  %vm1586_vm0 = vweird.f32 %v12151_v32  ;;  %v1590_v21 = vxor.u32 2147483648, %v12152_v63  ;;  %v12158_v37 = vld [vmem:[#allocation77_spill] sm:$0xff] }
 0x3ec   :  { %v1904_v27 = vsel %vm1897_vm8, %v1900_v61, %v1903_v44  ;;  %v1593_v48 = vxor.u32 2147483648, %v12153_v7  ;;  %vm1792_vm13 = vweird.f32 %v12154_v1  ;;  %v1796_v52 = vxor.u32 2147483648, %v12155_v24  ;;  %v12162_v32 = vld [vmem:[#allocation97_spill] sm:$0xff] }
 0x3ed   :  { %7195 = vmatprep.mubr.bf16.mxu1 %v6925_v28  ;;  %v1905_v43 = vsel %vm1895_vm3, nan, %v1904_v27  ;;  %v4932_v4 = vand.u32 3, %v12156_v41  ;;  %v1799_v53 = vxor.u32 2147483648, %v12157_v57  ;;  %v5140_v58 = vand.u32 3, %v12158_v37  ;;  %v12163_v41 = vld [vmem:[#allocation49_spill] sm:$0xff] }
 0x3ee   :  { %v3561_v51 = vpack.c.bf16 %v1905_v43, %v1699_v25  ;;  %vm1588_vm9 = vcmp.lt.s32.totalorder %v12159_v56, 2  ;;  %vm1589_vm12 = vcmp.eq.s32.totalorder %v12159_v56, 0  ;;  %vm1592_vm7 = vcmp.eq.s32.totalorder %v12159_v56, 2  ;;  %v12161_v43 = vld [vmem:[#allocation89_spill] sm:$0xff] }
 0x3ef   :  { %vm4933_vm14 = vcmp.lt.s32.totalorder %v4932_v4, 2  ;;  %vm4934_vm15 = vcmp.eq.s32.totalorder %v4932_v4, 0  ;;  %vm4937_vm1 = vcmp.eq.s32.totalorder %v4932_v4, 2  ;;  %vm5142_vm3 = vcmp.eq.s32.totalorder %v5140_v58, 0  ;;  %v12164_v4 = vld [vmem:[#allocation88_spill] sm:$0xff] }
 0x3f0   :  { %7372 = vmatprep.mubr.bf16.mxu0 %v3561_v51  ;;  %v4936_v29 = vsel %vm4934_vm15, %v12153_v7, %v1590_v21  ;;  %v4939_v60 = vsel %vm4937_vm1, %v1593_v48, %v12152_v63  ;;  %v1591_v33 = vsel %vm1589_vm12, %v12153_v7, %v1590_v21  ;;  %v5144_v13 = vsel %vm5142_vm3, %v12157_v57, %v1796_v52 }
 0x3f1   :  { %v4940_v5 = vsel %vm4933_vm14, %v4936_v29, %v4939_v60  ;;  %vm5145_vm2 = vcmp.eq.s32.totalorder %v5140_v58, 2  ;;  %vm5141_vm6 = vcmp.lt.s32.totalorder %v5140_v58, 2  ;;  %v1594_v15 = vsel %vm1592_vm7, %v1593_v48, %v12152_v63 }
 0x3f2   :  { %v4941_v14 = vsel %vm1586_vm0, nan, %v4940_v5  ;;  %v5147_v26 = vsel %vm5145_vm2, %v1799_v53, %v12155_v24  ;;  %v1595_v42 = vsel %vm1588_vm9, %v1591_v33, %v1594_v15  ;;  %vm1795_vm4 = vcmp.eq.s32.totalorder %v12160_v19, 0  ;;  %v12165_v33 = vld [vmem:[#allocation96_spill] sm:$0xff] }
 0x3f3   :  { %v5148_v45 = vsel %vm5141_vm6, %v5144_v13, %v5147_v26  ;;  %vm1798_vm11 = vcmp.eq.s32.totalorder %v12160_v19, 2  ;;  %vm1794_vm5 = vcmp.lt.s32.totalorder %v12160_v19, 2  ;;  %v1797_v12 = vsel %vm1795_vm4, %v12157_v57, %v1796_v52 }
 0x3f4   :  { %v5149_v55 = vsel %vm1792_vm13, nan, %v5148_v45  ;;  %v1800_v49 = vsel %vm1798_vm11, %v1799_v53, %v12155_v24  ;;  %v1596_v28 = vsel %vm1586_vm0, nan, %v1595_v42  ;;  %vm2101_vm10 = vweird.f32 %v9020_v34  ;;  %v12166_v45 = vld [vmem:[#allocation40_spill] sm:$0xff]  ;;  %v12167_v42 = vld [vmem:[#allocation93_spill] sm:$0xff] }
 0x3f5   :  { %v6924_v61 = vpack.c.bf16 %v5149_v55, %v4941_v14  ;;  %v1801_v25 = vsel %vm1794_vm5, %v1797_v12, %v1800_v49  ;;  %v2105_v27 = vxor.u32 2147483648, %v10145_v46  ;;  %v2108_v63 = vxor.u32 2147483648, %v10139_v6  ;;  %v12168_v55 = vld [vmem:[#allocation92_spill] sm:$0xff]  ;;  %v12169_v49 = vld [vmem:[#allocation45_spill] sm:$0xff] }
 0x3f6   :  { %v1802_v44 = vsel %vm1792_vm13, nan, %v1801_v25  ;;  %v2311_v21 = vxor.u32 2147483648, %v10268_v47  ;;  %v2314_v48 = vxor.u32 2147483648, %v10257_v22  ;;  %v5452_v24 = vand.u32 3, %v12161_v43 }
 0x3f7   :  { %7196 = vmatmul.mubr.bf16.gmra.mrb[12].mxu1 %v6924_v61  ;;  %v3560_v7 = vpack.c.bf16 %v1802_v44, %v1596_v28  ;;  %v5660_v52 = vand.u32 3, %v12162_v32  ;;  %vm2307_vm8 = vweird.f32 %v12163_v41  ;;  %vm2103_vm0 = vcmp.lt.s32.totalorder %v12164_v4, 2  ;;  %v12170_v61 = vld [vmem:[#allocation103_spill] sm:$0xff] }
 0x3f8   :  { %vm2104_vm13 = vcmp.eq.s32.totalorder %v12164_v4, 0  ;;  %vm2107_vm9 = vcmp.eq.s32.totalorder %v12164_v4, 2  ;;  %vm5453_vm14 = vcmp.lt.s32.totalorder %v5452_v24, 2  ;;  %vm5454_vm15 = vcmp.eq.s32.totalorder %v5452_v24, 0  ;;  %v12171_v28 = vld [vmem:[#allocation83_spill] sm:$0xff] }
 0x3f9   :  { %7373 = vmatmul.mubr.bf16.gmra.mrb[44].mxu0 %v3560_v7  ;;  %vm5457_vm1 = vcmp.eq.s32.totalorder %v5452_v24, 2  ;;  %vm5661_vm12 = vcmp.lt.s32.totalorder %v5660_v52, 2  ;;  %v5456_v1 = vsel %vm5454_vm15, %v10139_v6, %v2105_v27  ;;  %vm5662_vm3 = vcmp.eq.s32.totalorder %v5660_v52, 0  ;;  %v12174_v7 = vld [vmem:[#allocation82_spill] sm:$0xff] }
 0x3fa   :  { %v5459_v51 = vsel %vm5457_vm1, %v2108_v63, %v10145_v46  ;;  %vm5665_vm2 = vcmp.eq.s32.totalorder %v5660_v52, 2  ;;  %v5664_v53 = vsel %vm5662_vm3, %v10257_v22, %v2311_v21  ;;  %v2106_v58 = vsel %vm2104_vm13, %v10139_v6, %v2105_v27  ;;  %v12172_v27 = vld [vmem:[#allocation98_spill] sm:$0xff] }
 0x3fb   :  { %v5460_v57 = vsel %vm5453_vm14, %v5456_v1, %v5459_v51  ;;  %v5667_v37 = vsel %vm5665_vm2, %v2314_v48, %v10268_v47  ;;  %v2109_v60 = vsel %vm2107_vm9, %v2108_v63, %v10145_v46  ;;  %vm2310_vm7 = vcmp.eq.s32.totalorder %v12165_v33, 0  ;;  %v12173_v63 = vld [vmem:[#allocation94_spill] sm:$0xff] }
 0x3fc   :  { %v5461_v56 = vsel %vm2101_vm10, nan, %v5460_v57  ;;  %v5668_v29 = vsel %vm5661_vm12, %v5664_v53, %v5667_v37  ;;  %v2110_v13 = vsel %vm2103_vm0, %v2106_v58, %v2109_v60  ;;  %v2312_v14 = vsel %vm2310_vm7, %v10257_v22, %v2311_v21  ;;  %v12175_v53 = vld [vmem:[#allocation91_spill] sm:$0xff] }
 0x3fd   :  { %v5669_v5 = vsel %vm2307_vm8, nan, %v5668_v29  ;;  %vm2313_vm6 = vcmp.eq.s32.totalorder %v12165_v33, 2  ;;  %v2111_v26 = vsel %vm2101_vm10, nan, %v2110_v13  ;;  %vm2309_vm4 = vcmp.lt.s32.totalorder %v12165_v33, 2  ;;  %v12176_v13 = vld [vmem:[#allocation111_spill] sm:$0xff] }
 0x3fe   :  { %v6927_v6 = vpack.c.bf16 %v5669_v5, %v5461_v56  ;;  %v2315_v46 = vsel %vm2313_vm6, %v2314_v48, %v10268_v47  ;;  %vm1998_vm11 = vweird.f32 %v12166_v45  ;;  %v2002_v19 = vxor.u32 2147483648, %v12167_v42  ;;  %v12179_v45 = vld [vmem:[#allocation109_spill] sm:$0xff] }
 0x3ff   :  { %v2316_v15 = vsel %vm2309_vm4, %v2312_v14, %v2315_v46  ;;  %v2005_v12 = vxor.u32 2147483648, %v12168_v55  ;;  %vm2204_vm5 = vweird.f32 %v12169_v49  ;;  %v2208_v34 = vxor.u32 2147483648, %v12170_v61 }
 0x400   :  { %7203 = vmatprep.mubr.bf16.mxu1 %v6927_v6  ;;  %v2317_v22 = vsel %vm2307_vm8, nan, %v2316_v15  ;;  %v5348_v25 = vand.u32 3, %v12171_v28  ;;  %v2211_v47 = vxor.u32 2147483648, %v12172_v27  ;;  %v5556_v21 = vand.u32 3, %v12173_v63  ;;  %v12177_v6 = vld [vmem:[#allocation110_spill] sm:$0xff] }
 0x401   :  { %v3563_v44 = vpack.c.bf16 %v2317_v22, %v2111_v26  ;;  %vm2000_vm10 = vcmp.lt.s32.totalorder %v12174_v7, 2  ;;  %vm2001_vm14 = vcmp.eq.s32.totalorder %v12174_v7, 0  ;;  %vm2004_vm1 = vcmp.eq.s32.totalorder %v12174_v7, 2  ;;  %v12180_v22 = vld [vmem:[#allocation101_spill] sm:$0xff] }
 0x402   :  { %vm5349_vm0 = vcmp.lt.s32.totalorder %v5348_v25, 2  ;;  %vm5350_vm13 = vcmp.eq.s32.totalorder %v5348_v25, 0  ;;  %vm5353_vm9 = vcmp.eq.s32.totalorder %v5348_v25, 2  ;;  %vm5558_vm8 = vcmp.eq.s32.totalorder %v5556_v21, 0 }
 0x403   :  { %7380 = vmatprep.mubr.bf16.mxu0 %v3563_v44  ;;  %v5352_v48 = vsel %vm5350_vm13, %v12168_v55, %v2002_v19  ;;  %v5355_v43 = vsel %vm5353_vm9, %v2005_v12, %v12167_v42  ;;  %v2003_v24 = vsel %vm2001_vm14, %v12168_v55, %v2002_v19  ;;  %v5560_v52 = vsel %vm5558_vm8, %v12172_v27, %v2208_v34  ;;  %v12178_v19 = vld [vmem:[#allocation102_spill] sm:$0xff] }
 0x404   :  { %v5356_v32 = vsel %vm5349_vm0, %v5352_v48, %v5355_v43  ;;  %vm5561_vm15 = vcmp.eq.s32.totalorder %v5556_v21, 2  ;;  %vm5557_vm12 = vcmp.lt.s32.totalorder %v5556_v21, 2  ;;  %v2006_v1 = vsel %vm2004_vm1, %v2005_v12, %v12167_v42  ;;  %v12181_v21 = vld [vmem:[#allocation108_spill] sm:$0xff] }
 0x405   :  { %v5357_v41 = vsel %vm1998_vm11, nan, %v5356_v32  ;;  %v5563_v4 = vsel %vm5561_vm15, %v2211_v47, %v12170_v61  ;;  %v2007_v57 = vsel %vm2000_vm10, %v2003_v24, %v2006_v1  ;;  %vm2207_vm3 = vcmp.eq.s32.totalorder %v12175_v53, 0  ;;  %v12183_v1 = vld [vmem:[#allocation105_spill] sm:$0xff] }
 0x406   :  { %v5564_v51 = vsel %vm5557_vm12, %v5560_v52, %v5563_v4  ;;  %vm2210_vm2 = vcmp.eq.s32.totalorder %v12175_v53, 2  ;;  %vm2206_vm7 = vcmp.lt.s32.totalorder %v12175_v53, 2  ;;  %v2209_v58 = vsel %vm2207_vm3, %v12172_v27, %v2208_v34  ;;  %v12182_v4 = vld [vmem:[#allocation57_spill] sm:$0xff] }
 0x407   :  { %v5565_v37 = vsel %vm2204_vm5, nan, %v5564_v51  ;;  %v2212_v56 = vsel %vm2210_vm2, %v2211_v47, %v12170_v61  ;;  %v2008_v60 = vsel %vm1998_vm11, nan, %v2007_v57  ;;  %vm2513_vm6 = vweird.f32 %v9393_v10  ;;  %v12184_v57 = vld [vmem:[#allocation104_spill] sm:$0xff] }
 0x408   :  { %v6926_v29 = vpack.c.bf16 %v5565_v37, %v5357_v41  ;;  %v2213_v33 = vsel %vm2206_vm7, %v2209_v58, %v2212_v56  ;;  %v2517_v14 = vxor.u32 2147483648, %v12176_v13  ;;  %v2520_v26 = vxor.u32 2147483648, %v12177_v6  ;;  %v12185_v37 = vld [vmem:[#allocation65_spill] sm:$0xff]  ;;  %v12186_v58 = vld [vmem:[#allocation115_spill] sm:$0xff]  ;;  %v12187_v56 = vld [vmem:[#allocation100_spill] sm:$0xff] }
 0x409   :  { %v2214_v5 = vsel %vm2204_vm5, nan, %v2213_v33  ;;  %v2723_v46 = vxor.u32 2147483648, %v10577_v38  ;;  %v2726_v42 = vxor.u32 2147483648, %v10571_v20  ;;  %v5868_v55 = vand.u32 3, %v12178_v19  ;;  %v12188_v33 = vld [vmem:[#allocation114_spill] sm:$0xff] }
 0x40a   :  { %7204 = vmatmul.mubr.bf16.gmra.mrb[16].mxu1 %v6926_v29  ;;  %v3562_v15 = vpack.c.bf16 %v2214_v5, %v2008_v60  ;;  %v6076_v12 = vand.u32 3, %v12179_v45  ;;  %vm2719_vm4 = vweird.f32 %v9621_v54  ;;  %vm2515_vm11 = vcmp.lt.s32.totalorder %v12180_v22, 2  ;;  %v12189_v5 = vld [vmem:[#allocation107_spill] sm:$0xff] }
 0x40b   :  { %vm2516_vm5 = vcmp.eq.s32.totalorder %v12180_v22, 0  ;;  %vm2519_vm10 = vcmp.eq.s32.totalorder %v12180_v22, 2  ;;  %vm5869_vm0 = vcmp.lt.s32.totalorder %v5868_v55, 2  ;;  %vm5870_vm13 = vcmp.eq.s32.totalorder %v5868_v55, 0  ;;  %v12191_v22 = vld [vmem:[#allocation106_spill] sm:$0xff] }
 0x40c   :  { %7381 = vmatmul.mubr.bf16.gmra.mrb[48].mxu0 %v3562_v15  ;;  %vm5873_vm9 = vcmp.eq.s32.totalorder %v5868_v55, 2  ;;  %vm6077_vm14 = vcmp.lt.s32.totalorder %v6076_v12, 2  ;;  %v5872_v49 = vsel %vm5870_vm13, %v12177_v6, %v2517_v14  ;;  %vm6078_vm8 = vcmp.eq.s32.totalorder %v6076_v12, 0 }
 0x40d   :  { %v5875_v61 = vsel %vm5873_vm9, %v2520_v26, %v12176_v13  ;;  %vm6081_vm15 = vcmp.eq.s32.totalorder %v6076_v12, 2  ;;  %v6080_v28 = vsel %vm6078_vm8, %v10571_v20, %v2723_v46  ;;  %v2518_v44 = vsel %vm2516_vm5, %v12177_v6, %v2517_v14  ;;  %v12190_v14 = vld [vmem:[#allocation99_spill] sm:$0xff] }
 0x40e   :  { %v5876_v34 = vsel %vm5869_vm0, %v5872_v49, %v5875_v61  ;;  %v6083_v25 = vsel %vm6081_vm15, %v2726_v42, %v10577_v38  ;;  %v2521_v63 = vsel %vm2519_vm10, %v2520_v26, %v12176_v13  ;;  %vm2722_vm1 = vcmp.eq.s32.totalorder %v12181_v21, 0 }
 0x40f   :  { %v5877_v27 = vsel %vm2513_vm6, nan, %v5876_v34  ;;  %v6084_v47 = vsel %vm6077_vm14, %v6080_v28, %v6083_v25  ;;  %v2522_v48 = vsel %vm2515_vm11, %v2518_v44, %v2521_v63  ;;  %v2724_v43 = vsel %vm2722_vm1, %v10571_v20, %v2723_v46 }
 0x410   :  { %v6085_v7 = vsel %vm2719_vm4, nan, %v6084_v47  ;;  %vm2725_vm12 = vcmp.eq.s32.totalorder %v12181_v21, 2  ;;  %v2523_v32 = vsel %vm2513_vm6, nan, %v2522_v48  ;;  %vm2721_vm3 = vcmp.lt.s32.totalorder %v12181_v21, 2  ;;  %v12192_v47 = vld [vmem:[#allocation125_spill] sm:$0xff]  ;;  %v12193_v21 = vld [vmem:[#allocation122_spill] sm:$0xff] }
 0x411   :  { %v6929_v24 = vpack.c.bf16 %v6085_v7, %v5877_v27  ;;  %v2727_v52 = vsel %vm2725_vm12, %v2726_v42, %v10577_v38  ;;  %vm2410_vm2 = vweird.f32 %v12182_v4  ;;  %v2414_v51 = vxor.u32 2147483648, %v12183_v1 }
 0x412   :  { %v2728_v41 = vsel %vm2721_vm3, %v2724_v43, %v2727_v52  ;;  %v2417_v53 = vxor.u32 2147483648, %v12184_v57  ;;  %vm2616_vm7 = vweird.f32 %v12185_v37  ;;  %v2620_v10 = vxor.u32 2147483648, %v12186_v58 }
 0x413   :  { %7211 = vmatprep.mubr.bf16.mxu1 %v6929_v24  ;;  %v2729_v20 = vsel %vm2719_vm4, nan, %v2728_v41  ;;  %v5764_v29 = vand.u32 3, %v12187_v56  ;;  %v2623_v38 = vxor.u32 2147483648, %v12188_v33  ;;  %v5972_v13 = vand.u32 3, %v12189_v5  ;;  %v12195_v41 = vld [vmem:[#allocation124_spill] sm:$0xff] }
 0x414   :  { %v3565_v60 = vpack.c.bf16 %v2729_v20, %v2523_v32  ;;  %vm2412_vm6 = vcmp.lt.s32.totalorder %v12190_v14, 2  ;;  %vm2413_vm0 = vcmp.eq.s32.totalorder %v12190_v14, 0  ;;  %vm2416_vm9 = vcmp.eq.s32.totalorder %v12190_v14, 2  ;;  %v12194_v32 = vld [vmem:[#allocation117_spill] sm:$0xff] }
 0x415   :  { %vm5765_vm11 = vcmp.lt.s32.totalorder %v5764_v29, 2  ;;  %vm5766_vm5 = vcmp.eq.s32.totalorder %v5764_v29, 0  ;;  %vm5769_vm10 = vcmp.eq.s32.totalorder %v5764_v29, 2  ;;  %vm5974_vm4 = vcmp.eq.s32.totalorder %v5972_v13, 0 }
 0x416   :  { %7388 = vmatprep.mubr.bf16.mxu0 %v3565_v60  ;;  %v5768_v54 = vsel %vm5766_vm5, %v12184_v57, %v2414_v51  ;;  %v5771_v6 = vsel %vm5769_vm10, %v2417_v53, %v12183_v1  ;;  %v2415_v26 = vsel %vm2413_vm0, %v12184_v57, %v2414_v51  ;;  %v5976_v15 = vsel %vm5974_vm4, %v12188_v33, %v2620_v10  ;;  %v12197_v51 = vld [vmem:[#allocation116_spill] sm:$0xff] }
 0x417   :  { %v5772_v46 = vsel %vm5765_vm11, %v5768_v54, %v5771_v6  ;;  %vm5977_vm13 = vcmp.eq.s32.totalorder %v5972_v13, 2  ;;  %vm5973_vm14 = vcmp.lt.s32.totalorder %v5972_v13, 2  ;;  %v2418_v55 = vsel %vm2416_vm9, %v2417_v53, %v12183_v1  ;;  %v12196_v1 = vld [vmem:[#allocation90_spill] sm:$0xff] }
 0x418   :  { %v5773_v42 = vsel %vm2410_vm2, nan, %v5772_v46  ;;  %v5979_v19 = vsel %vm5977_vm13, %v2623_v38, %v12186_v58  ;;  %v2419_v12 = vsel %vm2412_vm6, %v2415_v26, %v2418_v55  ;;  %vm2619_vm8 = vcmp.eq.s32.totalorder %v12191_v22, 0  ;;  %v12199_v46 = vld [vmem:[#allocation78_spill] sm:$0xff] }
 0x419   :  { %v5980_v45 = vsel %vm5973_vm14, %v5976_v15, %v5979_v19  ;;  %vm2622_vm15 = vcmp.eq.s32.totalorder %v12191_v22, 2  ;;  %vm2618_vm1 = vcmp.lt.s32.totalorder %v12191_v22, 2  ;;  %v2621_v61 = vsel %vm2619_vm8, %v12188_v33, %v2620_v10  ;;  %v12198_v33 = vld [vmem:[#allocation123_spill] sm:$0xff]  ;;  %v12200_v15 = vld [vmem:[#allocation121_spill] sm:$0xff]  ;;  %v12201_v19 = vld [vmem:[#allocation120_spill] sm:$0xff] }
 0x41a   :  { %v5981_v49 = vsel %vm2616_vm7, nan, %v5980_v45  ;;  %v2624_v34 = vsel %vm2622_vm15, %v2623_v38, %v12186_v58  ;;  %v2420_v25 = vsel %vm2410_vm2, nan, %v2419_v12  ;;  %vm2925_vm12 = vweird.f32 %v9784_v36  ;;  %v12202_v45 = vld [vmem:[#allocation84_spill] sm:$0xff]  ;;  %v12203_v12 = vld [vmem:[#allocation127_spill] sm:$0xff]  ;;  %v12204_v22 = vld [vmem:[#allocation113_spill] sm:$0xff] }
 0x41b   :  { %v6928_v28 = vpack.c.bf16 %v5981_v49, %v5773_v42  ;;  %v2625_v44 = vsel %vm2618_vm1, %v2621_v61, %v2624_v34  ;;  %v2929_v63 = vxor.u32 2147483648, %v12192_v47  ;;  %v2932_v7 = vxor.u32 2147483648, %v12193_v21  ;;  %v12205_v34 = vld [vmem:[#allocation126_spill] sm:$0xff] }
 0x41c   :  { %v2626_v27 = vsel %vm2616_vm7, nan, %v2625_v44  ;;  %v3135_v48 = vxor.u32 2147483648, %v10965_v31  ;;  %v3138_v24 = vxor.u32 2147483648, %v10885_v11  ;;  %v6284_v52 = vand.u32 3, %v12194_v32  ;;  %v12207_v44 = vld [vmem:[#allocation112_spill] sm:$0xff] }
 0x41d   :  { %7212 = vmatmul.mubr.bf16.gmra.mrb[20].mxu1 %v6928_v28  ;;  %v3564_v43 = vpack.c.bf16 %v2626_v27, %v2420_v25  ;;  %v6492_v4 = vand.u32 3, %v12195_v41  ;;  %vm3131_vm3 = vweird.f32 %v12196_v1  ;;  %vm2927_vm2 = vcmp.lt.s32.totalorder %v12197_v51, 2  ;;  %v12206_v28 = vld [vmem:[#allocation119_spill] sm:$0xff]  ;;  %v12208_v41 = vld [vmem:[#allocation118_spill] sm:$0xff] }
 0x41e   :  { %vm2928_vm7 = vcmp.eq.s32.totalorder %v12197_v51, 0  ;;  %vm2931_vm6 = vcmp.eq.s32.totalorder %v12197_v51, 2  ;;  %vm6285_vm11 = vcmp.lt.s32.totalorder %v6284_v52, 2  ;;  %vm6286_vm5 = vcmp.eq.s32.totalorder %v6284_v52, 0 }
 0x41f   :  { %7389 = vmatmul.mubr.bf16.gmra.mrb[52].mxu0 %v3564_v43  ;;  %vm6289_vm10 = vcmp.eq.s32.totalorder %v6284_v52, 2  ;;  %vm6493_vm0 = vcmp.lt.s32.totalorder %v6492_v4, 2  ;;  %v6288_v57 = vsel %vm6286_vm5, %v12193_v21, %v2929_v63  ;;  %vm6494_vm4 = vcmp.eq.s32.totalorder %v6492_v4, 0 }
 0x420   :  { %v6291_v53 = vsel %vm6289_vm10, %v2932_v7, %v12192_v47  ;;  %vm6497_vm13 = vcmp.eq.s32.totalorder %v6492_v4, 2  ;;  %v6496_v37 = vsel %vm6494_vm4, %v10885_v11, %v3135_v48  ;;  %v2930_v10 = vsel %vm2928_vm7, %v12193_v21, %v2929_v63 }
 0x421   :  { %v6292_v20 = vsel %vm6285_vm11, %v6288_v57, %v6291_v53  ;;  %v6499_v58 = vsel %vm6497_vm13, %v3138_v24, %v10965_v31  ;;  %v2933_v60 = vsel %vm2931_vm6, %v2932_v7, %v12192_v47  ;;  %vm3134_vm9 = vcmp.eq.s32.totalorder %v12198_v33, 0 }
 0x422   :  { %v6293_v56 = vsel %vm2925_vm12, nan, %v6292_v20  ;;  %v6500_v29 = vsel %vm6493_vm0, %v6496_v37, %v6499_v58  ;;  %v2934_v5 = vsel %vm2927_vm2, %v2930_v10, %v2933_v60  ;;  %v3136_v13 = vsel %vm3134_vm9, %v10885_v11, %v3135_v48 }
 0x423   :  { %v6501_v38 = vsel %vm3131_vm3, nan, %v6500_v29  ;;  %vm3137_vm14 = vcmp.eq.s32.totalorder %v12198_v33, 2  ;;  %v2935_v54 = vsel %vm2925_vm12, nan, %v2934_v5  ;;  %vm3133_vm8 = vcmp.lt.s32.totalorder %v12198_v33, 2  ;;  %v12209_v5 = vld [vmem:[#allocation23_spill] sm:$0xff] }
 0x424   :  { %v6931_v14 = vpack.c.bf16 %v6501_v38, %v6293_v56  ;;  %v3139_v6 = vsel %vm3137_vm14, %v3138_v24, %v10965_v31  ;;  %vm2822_vm15 = vweird.f32 %v12199_v46  ;;  %v2826_v42 = vxor.u32 2147483648, %v12200_v15 }
 0x425   :  { %v3140_v26 = vsel %vm3133_vm8, %v3136_v13, %v3139_v6  ;;  %v2829_v55 = vxor.u32 2147483648, %v12201_v19  ;;  %vm3028_vm1 = vweird.f32 %v12202_v45  ;;  %v3032_v36 = vxor.u32 2147483648, %v12203_v12 }
 0x426   :  { %7219 = vmatprep.mubr.bf16.mxu1 %v6931_v14  ;;  %v3141_v11 = vsel %vm3131_vm3, nan, %v3140_v26  ;;  %v6180_v49 = vand.u32 3, %v12204_v22  ;;  %v3035_v31 = vxor.u32 2147483648, %v12205_v34  ;;  %v6388_v25 = vand.u32 3, %v12206_v28 }
 0x427   :  { %v3567_v61 = vpack.c.bf16 %v3141_v11, %v2935_v54  ;;  %vm2824_vm12 = vcmp.lt.s32.totalorder %v12207_v44, 2  ;;  %vm2825_vm11 = vcmp.eq.s32.totalorder %v12207_v44, 0  ;;  %vm2828_vm10 = vcmp.eq.s32.totalorder %v12207_v44, 2 }
 0x428   :  { %vm6181_vm2 = vcmp.lt.s32.totalorder %v6180_v49, 2  ;;  %vm6182_vm7 = vcmp.eq.s32.totalorder %v6180_v49, 0  ;;  %vm6185_vm6 = vcmp.eq.s32.totalorder %v6180_v49, 2  ;;  %vm6390_vm3 = vcmp.eq.s32.totalorder %v6388_v25, 0  ;;  %v12211_v49 = vld [vmem:[#allocation129_spill] sm:$0xff] }
 0x429   :  { %7396 = vmatprep.mubr.bf16.mxu0 %v3567_v61  ;;  %v6184_v27 = vsel %vm6182_vm7, %v12201_v19, %v2826_v42  ;;  %v6187_v47 = vsel %vm6185_vm6, %v2829_v55, %v12200_v15  ;;  %v2827_v63 = vsel %vm2825_vm11, %v12201_v19, %v2826_v42  ;;  %v6392_v7 = vsel %vm6390_vm3, %v12205_v34, %v3032_v36 }
 0x42a   :  { %v6188_v21 = vsel %vm6181_vm2, %v6184_v27, %v6187_v47  ;;  %vm6393_vm5 = vcmp.eq.s32.totalorder %v6388_v25, 2  ;;  %vm6389_vm0 = vcmp.lt.s32.totalorder %v6388_v25, 2  ;;  %v2830_v24 = vsel %vm2828_vm10, %v2829_v55, %v12200_v15 }
 0x42b   :  { %v6189_v48 = vsel %vm2822_vm15, nan, %v6188_v21  ;;  %v6395_v43 = vsel %vm6393_vm5, %v3035_v31, %v12203_v12  ;;  %v2831_v52 = vsel %vm2824_vm12, %v2827_v63, %v2830_v24  ;;  %vm3031_vm4 = vcmp.eq.s32.totalorder %v12208_v41, 0 }
 0x42c   :  { %v6396_v32 = vsel %vm6389_vm0, %v6392_v7, %v6395_v43  ;;  %vm3034_vm13 = vcmp.eq.s32.totalorder %v12208_v41, 2  ;;  %vm3030_vm9 = vcmp.lt.s32.totalorder %v12208_v41, 2  ;;  %v3033_v1 = vsel %vm3031_vm4, %v12205_v34, %v3032_v36 }
 0x42d   :  { %v6397_v4 = vsel %vm3028_vm1, nan, %v6396_v32  ;;  %v3036_v51 = vsel %vm3034_vm13, %v3035_v31, %v12203_v12  ;;  %v2832_v53 = vsel %vm2822_vm15, nan, %v2831_v52  ;;  %vm3337_vm14 = vweird.f32 %v10133_v59  ;;  %v12210_v12 = vld [vmem:[#allocation95_spill] sm:$0xff]  ;;  %v12212_v31 = vld [vmem:[#allocation128_spill] sm:$0xff] }
 0x42e   :  { %v6930_v57 = vpack.c.bf16 %v6397_v4, %v6189_v48  ;;  %v3037_v20 = vsel %vm3030_vm9, %v3033_v1, %v3036_v51  ;;  %v3341_v58 = vxor.u32 2147483648, %v11110_v8  ;;  %v3344_v10 = vxor.u32 2147483648, %v11077_v17 }
 0x42f   :  { %v3038_v37 = vsel %vm3028_vm1, nan, %v3037_v20  ;;  %v3547_v56 = vxor.u32 2147483648, %v11247_v50  ;;  %v3550_v60 = vxor.u32 2147483648, %v11220_v3  ;;  %v6700_v33 = vand.u32 3, %v10951_v9 }
 0x430   :  { %7220 = vmatmul.mubr.bf16.gmra.mrb[24].mxu1 %v6930_v57  ;;  %v3566_v29 = vpack.c.bf16 %v3038_v37, %v2832_v53  ;;  %v6908_v38 = vand.u32 3, %v11102_v30  ;;  %vm3543_vm8 = vweird.f32 %v10293_v62  ;;  %vm3339_vm15 = vcmp.lt.s32.totalorder %v12209_v5, 2 }
 0x431   :  { %vm3340_vm1 = vcmp.eq.s32.totalorder %v12209_v5, 0  ;;  %vm3343_vm12 = vcmp.eq.s32.totalorder %v12209_v5, 2  ;;  %vm6701_vm2 = vcmp.lt.s32.totalorder %v6700_v33, 2  ;;  %vm6702_vm7 = vcmp.eq.s32.totalorder %v6700_v33, 0 }
 0x432   :  { %7397 = vmatmul.mubr.bf16.gmra.mrb[56].mxu0 %v3566_v29  ;;  %vm6705_vm6 = vcmp.eq.s32.totalorder %v6700_v33, 2  ;;  %vm6909_vm11 = vcmp.lt.s32.totalorder %v6908_v38, 2  ;;  %v6704_v13 = vsel %vm6702_vm7, %v11077_v17, %v3341_v58  ;;  %vm6910_vm3 = vcmp.eq.s32.totalorder %v6908_v38, 0 }
 0x433   :  { %v6707_v14 = vsel %vm6705_vm6, %v3344_v10, %v11110_v8  ;;  %vm6913_vm5 = vcmp.eq.s32.totalorder %v6908_v38, 2  ;;  %v6912_v30 = vsel %vm6910_vm3, %v11220_v3, %v3547_v56  ;;  %v3342_v6 = vsel %vm3340_vm1, %v11077_v17, %v3341_v58 }
 0x434   :  { %v6708_v9 = vsel %vm6701_vm2, %v6704_v13, %v6707_v14  ;;  %v6915_v54 = vsel %vm6913_vm5, %v3550_v60, %v11247_v50  ;;  %v3345_v15 = vsel %vm3343_vm12, %v3344_v10, %v11110_v8  ;;  %vm3546_vm10 = vcmp.eq.s32.totalorder %v11100_v18, 0 }
 0x435   :  { %v6709_v26 = vsel %vm3337_vm14, nan, %v6708_v9  ;;  %v6916_v46 = vsel %vm6909_vm11, %v6912_v30, %v6915_v54  ;;  %v3346_v19 = vsel %vm3339_vm15, %v3342_v6, %v3345_v15  ;;  %v3548_v55 = vsel %vm3546_vm10, %v11220_v3, %v3547_v56 }
 0x436   :  { %v6917_v42 = vsel %vm3543_vm8, nan, %v6916_v46  ;;  %vm3549_vm0 = vcmp.eq.s32.totalorder %v11100_v18, 2  ;;  %v3347_v11 = vsel %vm3337_vm14, nan, %v3346_v19  ;;  %vm3545_vm4 = vcmp.lt.s32.totalorder %v11100_v18, 2 }
 0x437   :  { %v6933_v17 = vpack.c.bf16 %v6917_v42, %v6709_v26  ;;  %v3551_v8 = vsel %vm3549_vm0, %v3550_v60, %v11247_v50  ;;  %vm3234_vm13 = vweird.f32 %v12210_v12  ;;  %v3238_v36 = vxor.u32 2147483648, %v10990_v2 }
 0x438   :  { %v3552_v45 = vsel %vm3545_vm4, %v3548_v55, %v3551_v8  ;;  %v3241_v22 = vxor.u32 2147483648, %v10988_v23  ;;  %vm3440_vm9 = vweird.f32 %v10246_v40  ;;  %v3444_v59 = vxor.u32 2147483648, %v11147_v35 }
 0x439   :  { %7227 = vmatprep.mubr.bf16.mxu1 %v6933_v17  ;;  %v3553_v3 = vsel %vm3543_vm8, nan, %v3552_v45  ;;  %v6596_v61 = vand.u32 3, %v12211_v49  ;;  %v3447_v50 = vxor.u32 2147483648, %v11139_v39  ;;  %v6804_v34 = vand.u32 3, %v11066_v0 }
 0x43a   :  { %v3569_v18 = vpack.c.bf16 %v3553_v3, %v3347_v11  ;;  %vm3236_vm14 = vcmp.lt.s32.totalorder %v12212_v31, 2  ;;  %vm3237_vm2 = vcmp.eq.s32.totalorder %v12212_v31, 0  ;;  %vm3240_vm6 = vcmp.eq.s32.totalorder %v12212_v31, 2 }
 0x43b   :  { %vm6597_vm15 = vcmp.lt.s32.totalorder %v6596_v61, 2  ;;  %vm6598_vm1 = vcmp.eq.s32.totalorder %v6596_v61, 0  ;;  %vm6601_vm12 = vcmp.eq.s32.totalorder %v6596_v61, 2  ;;  %vm6806_vm8 = vcmp.eq.s32.totalorder %v6804_v34, 0 }
 0x43c   :  { %7404 = vmatprep.mubr.bf16.mxu0 %v3569_v18  ;;  %v6600_v62 = vsel %vm6598_vm1, %v10988_v23, %v3238_v36  ;;  %v6603_v28 = vsel %vm6601_vm12, %v3241_v22, %v10990_v2  ;;  %v3239_v25 = vsel %vm3237_vm2, %v10988_v23, %v3238_v36  ;;  %v6808_v27 = vsel %vm6806_vm8, %v11139_v39, %v3444_v59 }
 0x43d   :  { %v6604_v44 = vsel %vm6597_vm15, %v6600_v62, %v6603_v28  ;;  %vm6809_vm7 = vcmp.eq.s32.totalorder %v6804_v34, 2  ;;  %vm6805_vm11 = vcmp.lt.s32.totalorder %v6804_v34, 2  ;;  %v3242_v63 = vsel %vm3240_vm6, %v3241_v22, %v10990_v2 }
 0x43e   :  { %v6605_v0 = vsel %vm3234_vm13, nan, %v6604_v44  ;;  %v6811_v47 = vsel %vm6809_vm7, %v3447_v50, %v11147_v35  ;;  %v3243_v7 = vsel %vm3236_vm14, %v3239_v25, %v3242_v63  ;;  %vm3443_vm3 = vcmp.eq.s32.totalorder %v11013_v16, 0 }
 0x43f   :  { %v6812_v21 = vsel %vm6805_vm11, %v6808_v27, %v6811_v47  ;;  %vm3446_vm5 = vcmp.eq.s32.totalorder %v11013_v16, 2  ;;  %vm3442_vm10 = vcmp.lt.s32.totalorder %v11013_v16, 2  ;;  %v3445_v48 = vsel %vm3443_vm3, %v11139_v39, %v3444_v59 }
 0x440   :  { %v6813_v23 = vsel %vm3440_vm9, nan, %v6812_v21  ;;  %v3448_v43 = vsel %vm3446_vm5, %v3447_v50, %v11147_v35  ;;  %v3244_v2 = vsel %vm3234_vm13, nan, %v3243_v7  ;;  %v11616_v35 = vstv %s11685_s0 }
 0x441   :  { %v6932_v24 = vpack.c.bf16 %v6813_v23, %v6605_v0  ;;  %v3449_v32 = vsel %vm3442_vm10, %v3445_v48, %v3448_v43 }
 0x442   :  { %v3450_v52 = vsel %vm3440_vm9, nan, %v3449_v32 }
 0x443   :  { %7228 = vmatmul.mubr.bf16.gmra.mrb[28].mxu1 %v6932_v24  ;;  %v3568_v41 = vpack.c.bf16 %v3450_v52, %v3244_v2 }
 0x445   :  { %7405 = vmatmul.mubr.bf16.gmra.mrb[60].mxu0 %v3568_v41 }
 0x48b   :  { %v7350_v4 = vpop.f32.mrb[32].mxu0 }
 0x48c   :  { %v7352_v1 = vpop.f32.mrb[33].mxu0 }
 0x48d   :  { %v7353_v51 = vpop.f32.mrb[34].mxu0 }
 0x48e   :  { %v7355_v57 = vpop.f32.mrb[35].mxu0 }
 0x491   :  { %v7173_v16 = vpop.f32.mrb[0].mxu1 }
 0x492   :  { %v7351_v53 = vadd.f32 %v7350_v4, %v7173_v16  ;;  %v7175_v39 = vpop.f32.mrb[1].mxu1 }
 0x493   :  { %v7176_v20 = vpop.f32.mrb[2].mxu1 }
 0x494   :  { %v7354_v37 = vadd.f32 %v7353_v51, %v7176_v20  ;;  %v7178_v58 = vpop.f32.mrb[3].mxu1  ;;  %v7466_v40 = vmul.f32 %v11616_v35, %v7351_v53 }
 0x496   :  { %7482 = vst [vmem:[%s11686_s4] sm:$0xff] %v7466_v40  ;;  %v7467_v10 = vmul.f32 %v11616_v35, %v7354_v37 }
 0x498   :  { %7483 = vst [vmem:[%s11686_s4 + $0x8] sm:$0xff] %v7467_v10 }
 0x4a3   :  { %v7181_v56 = vpop.f32.mrb[4].mxu1 }
 0x4a4   :  { %v7183_v29 = vpop.f32.mrb[5].mxu1 }
 0x4a5   :  { %v7184_v60 = vpop.f32.mrb[6].mxu1 }
 0x4a6   :  { %v7358_v33 = vpop.f32.mrb[36].mxu0  ;;  %v7186_v38 = vpop.f32.mrb[7].mxu1 }
 0x4a7   :  { %v7359_v5 = vadd.f32 %v7358_v33, %v7181_v56  ;;  %v7360_v13 = vpop.f32.mrb[37].mxu0 }
 0x4a8   :  { %v7361_v14 = vpop.f32.mrb[38].mxu0 }
 0x4a9   :  { %v7362_v9 = vadd.f32 %v7361_v14, %v7184_v60  ;;  %v7363_v30 = vpop.f32.mrb[39].mxu0  ;;  %v7468_v54 = vmul.f32 %v11616_v35, %v7359_v5 }
 0x4ab   :  { %7484 = vst [vmem:[%s11686_s4 + $0x10] sm:$0xff] %v7468_v54  ;;  %v7469_v6 = vmul.f32 %v11616_v35, %v7362_v9 }
 0x4ad   :  { %7485 = vst [vmem:[%s11686_s4 + $0x18] sm:$0xff] %v7469_v6 }
 0x4b7   :  { %v7189_v26 = vpop.f32.mrb[8].mxu1 }
 0x4b8   :  { %v7191_v46 = vpop.f32.mrb[9].mxu1 }
 0x4b9   :  { %v7366_v15 = vpop.f32.mrb[40].mxu0  ;;  %v7192_v42 = vpop.f32.mrb[10].mxu1 }
 0x4ba   :  { %v7367_v19 = vadd.f32 %v7366_v15, %v7189_v26  ;;  %v7368_v55 = vpop.f32.mrb[41].mxu0  ;;  %v7194_v17 = vpop.f32.mrb[11].mxu1 }
 0x4bb   :  { %v7369_v11 = vpop.f32.mrb[42].mxu0 }
 0x4bc   :  { %v7370_v8 = vadd.f32 %v7369_v11, %v7192_v42  ;;  %v7371_v45 = vpop.f32.mrb[43].mxu0  ;;  %v7470_v12 = vmul.f32 %v11616_v35, %v7367_v19 }
 0x4be   :  { %7486 = vst [vmem:[%s11686_s4 + $0x20] sm:$0xff] %v7470_v12  ;;  %v7471_v36 = vmul.f32 %v11616_v35, %v7370_v8 }
 0x4c0   :  { %7487 = vst [vmem:[%s11686_s4 + $0x28] sm:$0xff] %v7471_v36 }
 0x4ca   :  { %v7197_v22 = vpop.f32.mrb[12].mxu1 }
 0x4cb   :  { %v7199_v3 = vpop.f32.mrb[13].mxu1 }
 0x4cc   :  { %v7374_v59 = vpop.f32.mrb[44].mxu0  ;;  %v7200_v49 = vpop.f32.mrb[14].mxu1 }
 0x4cd   :  { %v7375_v61 = vadd.f32 %v7374_v59, %v7197_v22  ;;  %v7376_v18 = vpop.f32.mrb[45].mxu0  ;;  %v7202_v50 = vpop.f32.mrb[15].mxu1 }
 0x4ce   :  { %v7377_v34 = vpop.f32.mrb[46].mxu0 }
 0x4cf   :  { %v7378_v31 = vadd.f32 %v7377_v34, %v7200_v49  ;;  %v7379_v62 = vpop.f32.mrb[47].mxu0  ;;  %v7472_v28 = vmul.f32 %v11616_v35, %v7375_v61 }
 0x4d1   :  { %7488 = vst [vmem:[%s11686_s4 + $0x30] sm:$0xff] %v7472_v28  ;;  %v7473_v25 = vmul.f32 %v11616_v35, %v7378_v31 }
 0x4d3   :  { %7489 = vst [vmem:[%s11686_s4 + $0x38] sm:$0xff] %v7473_v25 }
 0x4dd   :  { %v7205_v44 = vpop.f32.mrb[16].mxu1 }
 0x4de   :  { %v7207_v27 = vpop.f32.mrb[17].mxu1 }
 0x4df   :  { %v7382_v0 = vpop.f32.mrb[48].mxu0  ;;  %v7208_v47 = vpop.f32.mrb[18].mxu1 }
 0x4e0   :  { %v7383_v63 = vadd.f32 %v7382_v0, %v7205_v44  ;;  %v7384_v21 = vpop.f32.mrb[49].mxu0  ;;  %v7210_v7 = vpop.f32.mrb[19].mxu1 }
 0x4e1   :  { %v7385_v23 = vpop.f32.mrb[50].mxu0 }
 0x4e2   :  { %v7386_v48 = vadd.f32 %v7385_v23, %v7208_v47  ;;  %v7387_v43 = vpop.f32.mrb[51].mxu0  ;;  %v7474_v24 = vmul.f32 %v11616_v35, %v7383_v63 }
 0x4e4   :  { %7490 = vst [vmem:[%s11686_s4 + $0x40] sm:$0xff] %v7474_v24  ;;  %v7475_v32 = vmul.f32 %v11616_v35, %v7386_v48 }
 0x4e6   :  { %7491 = vst [vmem:[%s11686_s4 + $0x48] sm:$0xff] %v7475_v32 }
 0x4f0   :  { %v7213_v2 = vpop.f32.mrb[20].mxu1 }
 0x4f1   :  { %v7215_v52 = vpop.f32.mrb[21].mxu1 }
 0x4f2   :  { %v7390_v41 = vpop.f32.mrb[52].mxu0  ;;  %v7216_v4 = vpop.f32.mrb[22].mxu1 }
 0x4f3   :  { %v7391_v1 = vadd.f32 %v7390_v41, %v7213_v2  ;;  %v7392_v51 = vpop.f32.mrb[53].mxu0  ;;  %v7218_v57 = vpop.f32.mrb[23].mxu1 }
 0x4f4   :  { %v7393_v16 = vpop.f32.mrb[54].mxu0 }
 0x4f5   :  { %v7394_v53 = vadd.f32 %v7393_v16, %v7216_v4  ;;  %v7395_v39 = vpop.f32.mrb[55].mxu0  ;;  %v7476_v20 = vmul.f32 %v11616_v35, %v7391_v1 }
 0x4f7   :  { %7492 = vst [vmem:[%s11686_s4 + $0x50] sm:$0xff] %v7476_v20  ;;  %v7477_v37 = vmul.f32 %v11616_v35, %v7394_v53 }
 0x4f9   :  { %7493 = vst [vmem:[%s11686_s4 + $0x58] sm:$0xff] %v7477_v37 }
 0x503   :  { %v7221_v58 = vpop.f32.mrb[24].mxu1 }
 0x504   :  { %v7223_v40 = vpop.f32.mrb[25].mxu1 }
 0x505   :  { %v7398_v10 = vpop.f32.mrb[56].mxu0  ;;  %v7224_v56 = vpop.f32.mrb[26].mxu1 }
 0x506   :  { %v7399_v29 = vadd.f32 %v7398_v10, %v7221_v58  ;;  %v7400_v60 = vpop.f32.mrb[57].mxu0  ;;  %v7226_v33 = vpop.f32.mrb[27].mxu1 }
 0x507   :  { %v7401_v38 = vpop.f32.mrb[58].mxu0 }
 0x508   :  { %v7402_v5 = vadd.f32 %v7401_v38, %v7224_v56  ;;  %v7403_v13 = vpop.f32.mrb[59].mxu0  ;;  %v7478_v14 = vmul.f32 %v11616_v35, %v7399_v29 }
 0x50a   :  { %7494 = vst [vmem:[%s11686_s4 + $0x60] sm:$0xff] %v7478_v14  ;;  %v7479_v9 = vmul.f32 %v11616_v35, %v7402_v5 }
 0x50c   :  { %7495 = vst [vmem:[%s11686_s4 + $0x68] sm:$0xff] %v7479_v9 }
 0x516   :  { %v7229_v30 = vpop.f32.mrb[28].mxu1 }
 0x517   :  { %v7231_v54 = vpop.f32.mrb[29].mxu1 }
 0x518   :  { %v7406_v6 = vpop.f32.mrb[60].mxu0  ;;  %v7232_v26 = vpop.f32.mrb[30].mxu1 }
 0x519   :  { %v7407_v46 = vadd.f32 %v7406_v6, %v7229_v30  ;;  %v7408_v15 = vpop.f32.mrb[61].mxu0  ;;  %v7234_v42 = vpop.f32.mrb[31].mxu1 }
 0x51a   :  { %v7409_v19 = vpop.f32.mrb[62].mxu0 }
 0x51b   :  { %v7410_v55 = vadd.f32 %v7409_v19, %v7232_v26  ;;  %v7411_v17 = vpop.f32.mrb[63].mxu0  ;;  %v7480_v11 = vmul.f32 %v11616_v35, %v7407_v46 }
 0x51d   :  { %7496 = vst [vmem:[%s11686_s4 + $0x70] sm:$0xff] %v7480_v11  ;;  %v7481_v8 = vmul.f32 %v11616_v35, %v7410_v55 }
 0x51f   :  { %7497 = vst [vmem:[%s11686_s4 + $0x78] sm:$0xff] %v7481_v8 }

</bundles_post_ra>
